<compile_context>
chip_gen: v7x
topology: tpu7x:2x2x1
jax: 0.10.0
libtpu: 0.0.40
codegen_flags: <defaults>
</compile_context>

<pallas_src>
import jax
import jax.numpy as jnp
from jax.experimental import pallas as pl
from jax.experimental.pallas import tpu as pltpu

K = 5  # conv kernel size


def _round_up(x, m):
    return (x + m - 1) // m * m


# ---------------------------------------------------------------------------
# Fused conv1+pool -> conv2+pool -> conv3+pool kernel (one image per grid step)
# ---------------------------------------------------------------------------

def _zero_border(ref, pad):
    """Zero only the `pad`-wide halo of a (Hp, Wp, C) scratch (interior is
    overwritten right afterwards)."""
    hp, wp, c = ref.shape
    zr = jnp.zeros((pad, wp, c), ref.dtype)
    ref[0:pad, :, :] = zr
    ref[hp - pad:hp, :, :] = zr
    zc = jnp.zeros((hp - 2 * pad, pad, c), ref.dtype)
    ref[pad:hp - pad, 0:pad, :] = zc
    ref[pad:hp - pad, wp - pad:wp, :] = zc


def _pool2x2(acc, h, w, c, rmax_ref):
    """2x2 stride-2 max pool of acc (h*w, c) f32, rows laid out as i*w + j.
    Row pairs via a leading-dim split; column pairs via stride-2 ref loads."""
    a = acc.reshape(h // 2, 2, w, c)
    rmax_ref[...] = jnp.maximum(a[:, 0], a[:, 1])               # (h/2, w, c)
    return jnp.maximum(rmax_ref[:, pl.ds(0, w // 2, stride=2), :],
                       rmax_ref[:, pl.ds(1, w // 2, stride=2), :])


def _conv_taps(in_ref, w_ref, h, w, cin, cout):
    """5x5 'same' conv on a zero-padded (h+4, w+4, cin) f32 VMEM scratch as 25
    per-tap (h*w, cin)x(cin, cout) bf16 MXU matmuls, f32 accumulation."""
    acc = jnp.zeros((h * w, cout), jnp.float32)
    for t in range(K * K):
        di, dj = t // K, t % K
        xs = in_ref[di:di + h, dj:dj + w, :].reshape(h * w, cin)
        acc = acc + jnp.dot(xs.astype(jnp.bfloat16), w_ref[t],
                            preferred_element_type=jnp.float32)
    return acc


def _fused_cnn_kernel(x1_ref, w1_ref, w2_ref, w3_ref, b1_ref, b2_ref, b3_ref,
                      o_ref, a2_ref, a3_ref, rmax1, rmax2, rmax3):
    # ---- Layer 1: conv1 as ONE (1024,128)x(128,32) matmul on the pre-im2col'd
    #      input (K=75 zero-padded to 128), pool, then bias. ----
    c1 = jnp.dot(x1_ref[...], w1_ref[...], preferred_element_type=jnp.float32)
    p1 = _pool2x2(c1, 32, 32, 32, rmax1) + b1_ref[...]          # (16,16,32)
    _zero_border(a2_ref, 2)
    a2_ref[2:18, 2:18, :] = p1

    # ---- Layer 2 ----
    c2 = _conv_taps(a2_ref, w2_ref, 16, 16, 32, 32)
    p2 = _pool2x2(c2, 16, 16, 32, rmax2) + b2_ref[...]          # (8,8,32)
    _zero_border(a3_ref, 2)
    a3_ref[2:10, 2:10, :] = p2

    # ---- Layer 3 ----
    c3 = _conv_taps(a3_ref, w3_ref, 8, 8, 32, 64)
    p3 = _pool2x2(c3, 8, 8, 64, rmax3) + b3_ref[...]            # (4,4,64)
    o_ref[...] = p3.astype(o_ref.dtype)


def fused_cnn(x1, w1, w2, w3, b1, b2, b3):
    """x1: (N, 1024, 128) bf16 im2col'd conv1 input.  Returns (N,4,4,64) bf16."""
    N = x1.shape[0]
    return pl.pallas_call(
        _fused_cnn_kernel,
        out_shape=jax.ShapeDtypeStruct((N, 4, 4, 64), jnp.bfloat16),
        grid=(N,),
        in_specs=[
            pl.BlockSpec((None, 1024, 128), lambda n: (n, 0, 0)),
            pl.BlockSpec((128, 32), lambda n: (0, 0)),
            pl.BlockSpec((K * K, 32, 32), lambda n: (0, 0, 0)),
            pl.BlockSpec((K * K, 32, 64), lambda n: (0, 0, 0)),
            pl.BlockSpec((1, 1, 32), lambda n: (0, 0, 0)),
            pl.BlockSpec((1, 1, 32), lambda n: (0, 0, 0)),
            pl.BlockSpec((1, 1, 64), lambda n: (0, 0, 0)),
        ],
        out_specs=pl.BlockSpec((None, 4, 4, 64), lambda n: (n, 0, 0, 0)),
        scratch_shapes=[
            pltpu.VMEM((20, 20, 32), jnp.float32),   # conv2 input (+2 halo)
            pltpu.VMEM((12, 12, 32), jnp.float32),   # conv3 input (+2 halo)
            pltpu.VMEM((16, 32, 32), jnp.float32),   # pool row-max, layer 1
            pltpu.VMEM((8, 16, 32), jnp.float32),    # pool row-max, layer 2
            pltpu.VMEM((4, 8, 64), jnp.float32),     # pool row-max, layer 3
        ],
        compiler_params=pltpu.CompilerParams(
            dimension_semantics=("parallel",)),
    )(x1, w1, w2, w3, b1, b2, b3)


# ---------------------------------------------------------------------------
# Head: Flatten (perm folded into weights) + Linear(1024,64) + Linear(64,10)
# ---------------------------------------------------------------------------

def _head_kernel(x_ref, w1_ref, b1_ref, w2_ref, b2_ref, o_ref):
    h = jnp.dot(x_ref[...], w1_ref[...], preferred_element_type=jnp.float32)
    h = (h + b1_ref[...]).astype(jnp.bfloat16)
    y = jnp.dot(h, w2_ref[...], preferred_element_type=jnp.float32)
    o_ref[...] = y + b2_ref[...]


def head(xf, w1, b1, w2, b2):
    N, Kf = xf.shape
    tn = 128 if N >= 128 else _round_up(N, 8)      # row tile (128 for big batch)
    Np = _round_up(N, tn)
    if Np != N:
        xf = jnp.pad(xf, ((0, Np - N), (0, 0)))
    out = pl.pallas_call(
        _head_kernel,
        out_shape=jax.ShapeDtypeStruct((Np, w2.shape[1]), jnp.float32),
        grid=(Np // tn,),
        in_specs=[
            pl.BlockSpec((tn, Kf), lambda i: (i, 0)),
            pl.BlockSpec(w1.shape, lambda i: (0, 0)),
            pl.BlockSpec(b1.shape, lambda i: (0, 0)),
            pl.BlockSpec(w2.shape, lambda i: (0, 0)),
            pl.BlockSpec(b2.shape, lambda i: (0, 0)),
        ],
        out_specs=pl.BlockSpec((tn, w2.shape[1]), lambda i: (i, 0)),
        compiler_params=pltpu.CompilerParams(
            dimension_semantics=("parallel",)),
    )(xf, w1, b1, w2, b2)
    return out[:N]


# ---------------------------------------------------------------------------
# Parameter init (torch-style) and one-time layout prep
# ---------------------------------------------------------------------------

def init_params(key):
    keys = jax.random.split(key, 10)

    def u(k, shape, fan_in):
        bound = 1.0 / jnp.sqrt(jnp.float32(fan_in))
        return jax.random.uniform(k, shape, jnp.float32, -bound, bound)

    return {
        "c1_w": u(keys[0], (32, 3, 5, 5), 3 * 25),
        "c1_b": u(keys[1], (32,), 3 * 25),
        "c2_w": u(keys[2], (32, 32, 5, 5), 32 * 25),
        "c2_b": u(keys[3], (32,), 32 * 25),
        "c3_w": u(keys[4], (64, 32, 5, 5), 32 * 25),
        "c3_b": u(keys[5], (64,), 32 * 25),
        "l1_w": u(keys[6], (64, 1024), 1024),
        "l1_b": u(keys[7], (64,), 1024),
        "l2_w": u(keys[8], (10, 64), 64),
        "l2_b": u(keys[9], (10,), 64),
    }


def prepare_params(p):
    """Torch layouts -> kernel layouts (once, off the hot path).  Matmul
    operands in bf16 (single-pass MXU); biases stay f32 (added to f32 acc)."""
    bf16 = jnp.bfloat16

    def prep_tap_conv(w, b):
        cout, cin, k, _ = w.shape
        wt = jnp.transpose(w, (2, 3, 1, 0)).reshape(k * k, cin, cout)  # tap-major
        return wt.astype(bf16), b.reshape(1, 1, cout).astype(jnp.float32)

    # conv1 folded into one matmul over the im2col'd input: K = 5*5*3 = 75,
    # zero-padded to 128 so the input block / weight rows are lane-dense.
    w1 = jnp.transpose(p["c1_w"], (2, 3, 1, 0)).reshape(75, 32)
    w1 = jnp.pad(w1, ((0, 128 - 75), (0, 0))).astype(bf16)
    b1 = p["c1_b"].reshape(1, 1, 32).astype(jnp.float32)

    c2_w, c2_b = prep_tap_conv(p["c2_w"], p["c2_b"])
    c3_w, c3_b = prep_tap_conv(p["c3_w"], p["c3_b"])

    # Linear(1024,64): torch flatten is NCHW (f = c*16 + h*4 + w); the kernel
    # emits NHWC (g = h*256 + w*64 + c).  Fold the permutation into the weight.
    l1 = p["l1_w"].reshape(64, 64, 4, 4)                  # (o, c, h, w)
    l1 = jnp.transpose(l1, (2, 3, 1, 0)).reshape(4 * 4 * 64, 64).astype(bf16)
    l1_b = p["l1_b"].reshape(1, 64).astype(jnp.float32)

    # Linear(64,10): pad the 10 outputs to 128 lanes (zero cols/bias, sliced off).
    l2 = jnp.pad(p["l2_w"].T, ((0, 0), (0, 128 - 10))).astype(bf16)
    l2_b = jnp.pad(p["l2_b"], (0, 128 - 10)).reshape(1, 128).astype(jnp.float32)

    return {"c1_w": w1, "c1_b": b1, "c2_w": c2_w, "c2_b": c2_b,
            "c3_w": c3_w, "c3_b": c3_b, "l1_w": l1, "l1_b": l1_b,
            "l2_w": l2, "l2_b": l2_b}


# ---------------------------------------------------------------------------
# Forward pass
# ---------------------------------------------------------------------------

@jax.jit
def forward(prepped, x_nchw):
    N = x_nchw.shape[0]
    # NCHW -> NHWC, zero-pad by 2, and im2col ONLY the first conv (Cin=3, so
    # the 25x blow-up is ~256 KB/image and turns conv1 into one K=75 matmul).
    x = jnp.transpose(x_nchw, (0, 2, 3, 1)).astype(jnp.bfloat16)
    xp = jnp.pad(x, ((0, 0), (2, 2), (2, 2), (0, 0)))             # (N,36,36,3)
    cols = [xp[:, di:di + 32, dj:dj + 32, :]
            for di in range(K) for dj in range(K)]
    x1 = jnp.concatenate(cols, axis=-1)                           # (N,32,32,75)
    x1 = jnp.pad(x1, ((0, 0), (0, 0), (0, 0), (0, 128 - 75)))
    x1 = x1.reshape(N, 32 * 32, 128)                              # (N,1024,128)

    y3 = fused_cnn(x1, prepped["c1_w"], prepped["c2_w"], prepped["c3_w"],
                   prepped["c1_b"], prepped["c2_b"], prepped["c3_b"])  # (N,4,4,64)

    xf = y3.reshape(N, 4 * 4 * 64)                                # free reshape
    logits = head(xf, prepped["l1_w"], prepped["l1_b"],
                  prepped["l2_w"], prepped["l2_b"])               # (N,128)
    return logits[:, :10]


# Pure-JAX f32 reference (correctness check only).
@jax.jit
def reference_forward(p, x):
    def conv(x, w, b):
        y = jax.lax.conv_general_dilated(
            x, w, window_strides=(1, 1), padding=((2, 2), (2, 2)),
            dimension_numbers=("NCHW", "OIHW", "NCHW"))
        return y + b.reshape(1, -1, 1, 1)

    def pool(x):
        return jax.lax.reduce_window(x, -jnp.inf, jax.lax.max,
                                     (1, 1, 2, 2), (1, 1, 2, 2), "VALID")

    x = pool(conv(x, p["c1_w"], p["c1_b"]))
    x = pool(conv(x, p["c2_w"], p["c2_b"]))
    x = pool(conv(x, p["c3_w"], p["c3_b"]))
    x = x.reshape(x.shape[0], -1)
    x = x @ p["l1_w"].T + p["l1_b"]
    return x @ p["l2_w"].T + p["l2_b"]


if __name__ == "__main__":
    key = jax.random.PRNGKey(0)
    pkey, xkey = jax.random.split(key)
    params = init_params(pkey)
    prepped = prepare_params(params)

    # Input must be (N, 3, 32, 32) so that Flatten yields 1024 features.
    x = jax.random.normal(xkey, (2, 3, 32, 32), dtype=jnp.float32)

    out = jax.block_until_ready(forward(prepped, x))
    assert out.shape == (2, 10), out.shape
    assert out.dtype == jnp.float32

    ref = jax.block_until_ready(reference_forward(params, x))
    err = float(jnp.max(jnp.abs(out - ref)))
    assert err < 0.1, f"max |err| vs f32 reference = {err}"

    print("KERNEL_OK")
</pallas_src>

<mosaic_0001>
module attributes {stable_mosaic.version = 11 : i64} {
  func.func @_fused_cnn_kernel(%arg0: i32, %arg1: memref<1x1024x128xbf16, #tpu.memory_space<vmem>>, %arg2: memref<128x32xbf16, #tpu.memory_space<vmem>>, %arg3: memref<25x32x32xbf16, #tpu.memory_space<vmem>>, %arg4: memref<25x32x64xbf16, #tpu.memory_space<vmem>>, %arg5: memref<1x1x32xf32, #tpu.memory_space<vmem>>, %arg6: memref<1x1x32xf32, #tpu.memory_space<vmem>>, %arg7: memref<1x1x64xf32, #tpu.memory_space<vmem>>, %arg8: memref<1x4x4x64xbf16, #tpu.memory_space<vmem>>, %arg9: memref<20x20x32xf32, #tpu.memory_space<vmem>>, %arg10: memref<12x12x32xf32, #tpu.memory_space<vmem>>, %arg11: memref<16x32x32xf32, #tpu.memory_space<vmem>>, %arg12: memref<8x16x32xf32, #tpu.memory_space<vmem>>, %arg13: memref<4x8x64xf32, #tpu.memory_space<vmem>>) attributes {dimension_semantics = [#tpu.dimension_semantics<parallel>], iteration_bounds = array<i64: 2>, scalar_prefetch = 0 : i64, scratch_operands = 5 : i64, tpu.core_type = #tpu.core_type<tc>, window_params = [{transform_indices = @transform_0, window_bounds = array<i64: 1, 1024, 128>}, {pipeline_mode = #tpu.pipeline_mode<synchronous>, transform_indices = @transform_1, window_bounds = array<i64: 128, 32>}, {pipeline_mode = #tpu.pipeline_mode<synchronous>, transform_indices = @transform_2, window_bounds = array<i64: 25, 32, 32>}, {pipeline_mode = #tpu.pipeline_mode<synchronous>, transform_indices = @transform_3, window_bounds = array<i64: 25, 32, 64>}, {pipeline_mode = #tpu.pipeline_mode<synchronous>, transform_indices = @transform_4, window_bounds = array<i64: 1, 1, 32>}, {pipeline_mode = #tpu.pipeline_mode<synchronous>, transform_indices = @transform_5, window_bounds = array<i64: 1, 1, 32>}, {pipeline_mode = #tpu.pipeline_mode<synchronous>, transform_indices = @transform_6, window_bounds = array<i64: 1, 1, 64>}, {transform_indices = @transform_7, window_bounds = array<i64: 1, 4, 4, 64>}]} {
    %c0 = arith.constant 0 : index
    %c0_0 = arith.constant 0 : index
    %c0_1 = arith.constant 0 : index
    %0 = vector.load %arg1[%c0, %c0_0, %c0_1] : memref<1x1024x128xbf16, #tpu.memory_space<vmem>>, vector<1x1024x128xbf16>
    %1 = vector.shape_cast %0 : vector<1x1024x128xbf16> to vector<1024x128xbf16>
    %c0_2 = arith.constant 0 : index
    %c0_3 = arith.constant 0 : index
    %2 = vector.load %arg2[%c0_2, %c0_3] : memref<128x32xbf16, #tpu.memory_space<vmem>>, vector<128x32xbf16>
    %cst = arith.constant dense<0.000000e+00> : vector<1024x32xf32>
    %3 = tpu.matmul %1, %2, %cst {dimension_numbers = #tpu.dot_dimension_numbers<[1], [0], [0], [1], [0, 0, 1, 1], [], []>} : vector<1024x128xbf16>, vector<128x32xbf16>, vector<1024x32xf32> -> vector<1024x32xf32>
    %4 = vector.shape_cast %3 : vector<1024x32xf32> to vector<16x2x32x32xf32>
    %5 = vector.extract_strided_slice %4 {offsets = [0, 0, 0, 0], sizes = [16, 1, 32, 32], strides = [1, 1, 1, 1]} : vector<16x2x32x32xf32> to vector<16x1x32x32xf32>
    %6 = vector.shape_cast %5 : vector<16x1x32x32xf32> to vector<16x32x32xf32>
    %7 = vector.extract_strided_slice %4 {offsets = [0, 1, 0, 0], sizes = [16, 1, 32, 32], strides = [1, 1, 1, 1]} : vector<16x2x32x32xf32> to vector<16x1x32x32xf32>
    %8 = vector.shape_cast %7 : vector<16x1x32x32xf32> to vector<16x32x32xf32>
    %9 = arith.maximumf %6, %8 : vector<16x32x32xf32>
    %c0_4 = arith.constant 0 : index
    %c0_5 = arith.constant 0 : index
    %c0_6 = arith.constant 0 : index
    %10 = vector.load %arg11[%c0_4, %c0_5, %c0_6] : memref<16x32x32xf32, #tpu.memory_space<vmem>>, vector<16x32x32xf32>
    tpu.vector_store %arg11[%c0_4, %c0_5, %c0_6], %9 {strides = array<i32>} : memref<16x32x32xf32, #tpu.memory_space<vmem>>, vector<16x32x32xf32>,
    %c0_7 = arith.constant 0 : index
    %c0_8 = arith.constant 0 : index
    %c0_9 = arith.constant 0 : index
    %11 = tpu.strided_load %arg11[%c0_7, %c0_8, %c0_9] {strides = array<i32: 1, 2, 1>} : memref<16x32x32xf32, #tpu.memory_space<vmem>>, vector<16x16x32xf32>
    %c0_10 = arith.constant 0 : index
    %c1 = arith.constant 1 : index
    %c0_11 = arith.constant 0 : index
    %12 = tpu.strided_load %arg11[%c0_10, %c1, %c0_11] {strides = array<i32: 1, 2, 1>} : memref<16x32x32xf32, #tpu.memory_space<vmem>>, vector<16x16x32xf32>
    %13 = arith.maximumf %11, %12 : vector<16x16x32xf32>
    %c0_12 = arith.constant 0 : index
    %c0_13 = arith.constant 0 : index
    %c0_14 = arith.constant 0 : index
    %14 = vector.load %arg5[%c0_12, %c0_13, %c0_14] : memref<1x1x32xf32, #tpu.memory_space<vmem>>, vector<1x1x32xf32>
    %15 = vector.broadcast %14 : vector<1x1x32xf32> to vector<16x16x32xf32>
    %16 = arith.addf %13, %15 : vector<16x16x32xf32>
    %cst_15 = arith.constant 0.000000e+00 : f32
    %17 = vector.broadcast %cst_15 : f32 to vector<2x20x32xf32>
    %c0_16 = arith.constant 0 : index
    %c0_17 = arith.constant 0 : index
    %c0_18 = arith.constant 0 : index
    %18 = vector.load %arg9[%c0_16, %c0_17, %c0_18] : memref<20x20x32xf32, #tpu.memory_space<vmem>>, vector<2x20x32xf32>
    tpu.vector_store %arg9[%c0_16, %c0_17, %c0_18], %17 {strides = array<i32>} : memref<20x20x32xf32, #tpu.memory_space<vmem>>, vector<2x20x32xf32>,
    %c18 = arith.constant 18 : index
    %c0_19 = arith.constant 0 : index
    %c0_20 = arith.constant 0 : index
    %19 = vector.load %arg9[%c18, %c0_19, %c0_20] : memref<20x20x32xf32, #tpu.memory_space<vmem>>, vector<2x20x32xf32>
    tpu.vector_store %arg9[%c18, %c0_19, %c0_20], %17 {strides = array<i32>} : memref<20x20x32xf32, #tpu.memory_space<vmem>>, vector<2x20x32xf32>,
    %cst_21 = arith.constant 0.000000e+00 : f32
    %20 = vector.broadcast %cst_21 : f32 to vector<16x2x32xf32>
    %c2 = arith.constant 2 : index
    %c0_22 = arith.constant 0 : index
    %c0_23 = arith.constant 0 : index
    %21 = vector.load %arg9[%c2, %c0_22, %c0_23] : memref<20x20x32xf32, #tpu.memory_space<vmem>>, vector<16x2x32xf32>
    tpu.vector_store %arg9[%c2, %c0_22, %c0_23], %20 {strides = array<i32>} : memref<20x20x32xf32, #tpu.memory_space<vmem>>, vector<16x2x32xf32>,
    %c2_24 = arith.constant 2 : index
    %c18_25 = arith.constant 18 : index
    %c0_26 = arith.constant 0 : index
    %22 = vector.load %arg9[%c2_24, %c18_25, %c0_26] : memref<20x20x32xf32, #tpu.memory_space<vmem>>, vector<16x2x32xf32>
    tpu.vector_store %arg9[%c2_24, %c18_25, %c0_26], %20 {strides = array<i32>} : memref<20x20x32xf32, #tpu.memory_space<vmem>>, vector<16x2x32xf32>,
    %c2_27 = arith.constant 2 : index
    %c2_28 = arith.constant 2 : index
    %c0_29 = arith.constant 0 : index
    %23 = vector.load %arg9[%c2_27, %c2_28, %c0_29] : memref<20x20x32xf32, #tpu.memory_space<vmem>>, vector<16x16x32xf32>
    tpu.vector_store %arg9[%c2_27, %c2_28, %c0_29], %16 {strides = array<i32>} : memref<20x20x32xf32, #tpu.memory_space<vmem>>, vector<16x16x32xf32>,
    %cst_30 = arith.constant 0.000000e+00 : f32
    %24 = vector.broadcast %cst_30 : f32 to vector<256x32xf32>
    %c0_31 = arith.constant 0 : index
    %c0_32 = arith.constant 0 : index
    %c0_33 = arith.constant 0 : index
    %25 = vector.load %arg9[%c0_31, %c0_32, %c0_33] : memref<20x20x32xf32, #tpu.memory_space<vmem>>, vector<16x16x32xf32>
    %26 = vector.shape_cast %25 : vector<16x16x32xf32> to vector<256x32xf32>
    %27 = arith.truncf %26 : vector<256x32xf32> to vector<256x32xbf16>
    %c0_34 = arith.constant 0 : index
    %c0_35 = arith.constant 0 : index
    %c0_36 = arith.constant 0 : index
    %28 = vector.load %arg3[%c0_34, %c0_35, %c0_36] : memref<25x32x32xbf16, #tpu.memory_space<vmem>>, vector<1x32x32xbf16>
    %29 = vector.shape_cast %28 : vector<1x32x32xbf16> to vector<32x32xbf16>
    %cst_37 = arith.constant dense<0.000000e+00> : vector<256x32xf32>
    %30 = tpu.matmul %27, %29, %cst_37 {dimension_numbers = #tpu.dot_dimension_numbers<[1], [0], [0], [1], [0, 0, 1, 1], [], []>} : vector<256x32xbf16>, vector<32x32xbf16>, vector<256x32xf32> -> vector<256x32xf32>
    %31 = arith.addf %24, %30 : vector<256x32xf32>
    %c0_38 = arith.constant 0 : index
    %c1_39 = arith.constant 1 : index
    %c0_40 = arith.constant 0 : index
    %32 = vector.load %arg9[%c0_38, %c1_39, %c0_40] : memref<20x20x32xf32, #tpu.memory_space<vmem>>, vector<16x16x32xf32>
    %33 = vector.shape_cast %32 : vector<16x16x32xf32> to vector<256x32xf32>
    %34 = arith.truncf %33 : vector<256x32xf32> to vector<256x32xbf16>
    %c1_41 = arith.constant 1 : index
    %c0_42 = arith.constant 0 : index
    %c0_43 = arith.constant 0 : index
    %35 = vector.load %arg3[%c1_41, %c0_42, %c0_43] : memref<25x32x32xbf16, #tpu.memory_space<vmem>>, vector<1x32x32xbf16>
    %36 = vector.shape_cast %35 : vector<1x32x32xbf16> to vector<32x32xbf16>
    %cst_44 = arith.constant dense<0.000000e+00> : vector<256x32xf32>
    %37 = tpu.matmul %34, %36, %cst_44 {dimension_numbers = #tpu.dot_dimension_numbers<[1], [0], [0], [1], [0, 0, 1, 1], [], []>} : vector<256x32xbf16>, vector<32x32xbf16>, vector<256x32xf32> -> vector<256x32xf32>
    %38 = arith.addf %31, %37 : vector<256x32xf32>
    %c0_45 = arith.constant 0 : index
    %c2_46 = arith.constant 2 : index
    %c0_47 = arith.constant 0 : index
    %39 = vector.load %arg9[%c0_45, %c2_46, %c0_47] : memref<20x20x32xf32, #tpu.memory_space<vmem>>, vector<16x16x32xf32>
    %40 = vector.shape_cast %39 : vector<16x16x32xf32> to vector<256x32xf32>
    %41 = arith.truncf %40 : vector<256x32xf32> to vector<256x32xbf16>
    %c2_48 = arith.constant 2 : index
    %c0_49 = arith.constant 0 : index
    %c0_50 = arith.constant 0 : index
    %42 = vector.load %arg3[%c2_48, %c0_49, %c0_50] : memref<25x32x32xbf16, #tpu.memory_space<vmem>>, vector<1x32x32xbf16>
    %43 = vector.shape_cast %42 : vector<1x32x32xbf16> to vector<32x32xbf16>
    %cst_51 = arith.constant dense<0.000000e+00> : vector<256x32xf32>
    %44 = tpu.matmul %41, %43, %cst_51 {dimension_numbers = #tpu.dot_dimension_numbers<[1], [0], [0], [1], [0, 0, 1, 1], [], []>} : vector<256x32xbf16>, vector<32x32xbf16>, vector<256x32xf32> -> vector<256x32xf32>
    %45 = arith.addf %38, %44 : vector<256x32xf32>
    %c0_52 = arith.constant 0 : index
    %c3 = arith.constant 3 : index
    %c0_53 = arith.constant 0 : index
    %46 = vector.load %arg9[%c0_52, %c3, %c0_53] : memref<20x20x32xf32, #tpu.memory_space<vmem>>, vector<16x16x32xf32>
    %47 = vector.shape_cast %46 : vector<16x16x32xf32> to vector<256x32xf32>
    %48 = arith.truncf %47 : vector<256x32xf32> to vector<256x32xbf16>
    %c3_54 = arith.constant 3 : index
    %c0_55 = arith.constant 0 : index
    %c0_56 = arith.constant 0 : index
    %49 = vector.load %arg3[%c3_54, %c0_55, %c0_56] : memref<25x32x32xbf16, #tpu.memory_space<vmem>>, vector<1x32x32xbf16>
    %50 = vector.shape_cast %49 : vector<1x32x32xbf16> to vector<32x32xbf16>
    %cst_57 = arith.constant dense<0.000000e+00> : vector<256x32xf32>
    %51 = tpu.matmul %48, %50, %cst_57 {dimension_numbers = #tpu.dot_dimension_numbers<[1], [0], [0], [1], [0, 0, 1, 1], [], []>} : vector<256x32xbf16>, vector<32x32xbf16>, vector<256x32xf32> -> vector<256x32xf32>
    %52 = arith.addf %45, %51 : vector<256x32xf32>
    %c0_58 = arith.constant 0 : index
    %c4 = arith.constant 4 : index
    %c0_59 = arith.constant 0 : index
    %53 = vector.load %arg9[%c0_58, %c4, %c0_59] : memref<20x20x32xf32, #tpu.memory_space<vmem>>, vector<16x16x32xf32>
    %54 = vector.shape_cast %53 : vector<16x16x32xf32> to vector<256x32xf32>
    %55 = arith.truncf %54 : vector<256x32xf32> to vector<256x32xbf16>
    %c4_60 = arith.constant 4 : index
    %c0_61 = arith.constant 0 : index
    %c0_62 = arith.constant 0 : index
    %56 = vector.load %arg3[%c4_60, %c0_61, %c0_62] : memref<25x32x32xbf16, #tpu.memory_space<vmem>>, vector<1x32x32xbf16>
    %57 = vector.shape_cast %56 : vector<1x32x32xbf16> to vector<32x32xbf16>
    %cst_63 = arith.constant dense<0.000000e+00> : vector<256x32xf32>
    %58 = tpu.matmul %55, %57, %cst_63 {dimension_numbers = #tpu.dot_dimension_numbers<[1], [0], [0], [1], [0, 0, 1, 1], [], []>} : vector<256x32xbf16>, vector<32x32xbf16>, vector<256x32xf32> -> vector<256x32xf32>
    %59 = arith.addf %52, %58 : vector<256x32xf32>
    %c1_64 = arith.constant 1 : index
    %c0_65 = arith.constant 0 : index
    %c0_66 = arith.constant 0 : index
    %60 = vector.load %arg9[%c1_64, %c0_65, %c0_66] : memref<20x20x32xf32, #tpu.memory_space<vmem>>, vector<16x16x32xf32>
    %61 = vector.shape_cast %60 : vector<16x16x32xf32> to vector<256x32xf32>
    %62 = arith.truncf %61 : vector<256x32xf32> to vector<256x32xbf16>
    %c5 = arith.constant 5 : index
    %c0_67 = arith.constant 0 : index
    %c0_68 = arith.constant 0 : index
    %63 = vector.load %arg3[%c5, %c0_67, %c0_68] : memref<25x32x32xbf16, #tpu.memory_space<vmem>>, vector<1x32x32xbf16>
    %64 = vector.shape_cast %63 : vector<1x32x32xbf16> to vector<32x32xbf16>
    %cst_69 = arith.constant dense<0.000000e+00> : vector<256x32xf32>
    %65 = tpu.matmul %62, %64, %cst_69 {dimension_numbers = #tpu.dot_dimension_numbers<[1], [0], [0], [1], [0, 0, 1, 1], [], []>} : vector<256x32xbf16>, vector<32x32xbf16>, vector<256x32xf32> -> vector<256x32xf32>
    %66 = arith.addf %59, %65 : vector<256x32xf32>
    %c1_70 = arith.constant 1 : index
    %c1_71 = arith.constant 1 : index
    %c0_72 = arith.constant 0 : index
    %67 = vector.load %arg9[%c1_70, %c1_71, %c0_72] : memref<20x20x32xf32, #tpu.memory_space<vmem>>, vector<16x16x32xf32>
    %68 = vector.shape_cast %67 : vector<16x16x32xf32> to vector<256x32xf32>
    %69 = arith.truncf %68 : vector<256x32xf32> to vector<256x32xbf16>
    %c6 = arith.constant 6 : index
    %c0_73 = arith.constant 0 : index
    %c0_74 = arith.constant 0 : index
    %70 = vector.load %arg3[%c6, %c0_73, %c0_74] : memref<25x32x32xbf16, #tpu.memory_space<vmem>>, vector<1x32x32xbf16>
    %71 = vector.shape_cast %70 : vector<1x32x32xbf16> to vector<32x32xbf16>
    %cst_75 = arith.constant dense<0.000000e+00> : vector<256x32xf32>
    %72 = tpu.matmul %69, %71, %cst_75 {dimension_numbers = #tpu.dot_dimension_numbers<[1], [0], [0], [1], [0, 0, 1, 1], [], []>} : vector<256x32xbf16>, vector<32x32xbf16>, vector<256x32xf32> -> vector<256x32xf32>
    %73 = arith.addf %66, %72 : vector<256x32xf32>
    %c1_76 = arith.constant 1 : index
    %c2_77 = arith.constant 2 : index
    %c0_78 = arith.constant 0 : index
    %74 = vector.load %arg9[%c1_76, %c2_77, %c0_78] : memref<20x20x32xf32, #tpu.memory_space<vmem>>, vector<16x16x32xf32>
    %75 = vector.shape_cast %74 : vector<16x16x32xf32> to vector<256x32xf32>
    %76 = arith.truncf %75 : vector<256x32xf32> to vector<256x32xbf16>
    %c7 = arith.constant 7 : index
    %c0_79 = arith.constant 0 : index
    %c0_80 = arith.constant 0 : index
    %77 = vector.load %arg3[%c7, %c0_79, %c0_80] : memref<25x32x32xbf16, #tpu.memory_space<vmem>>, vector<1x32x32xbf16>
    %78 = vector.shape_cast %77 : vector<1x32x32xbf16> to vector<32x32xbf16>
    %cst_81 = arith.constant dense<0.000000e+00> : vector<256x32xf32>
    %79 = tpu.matmul %76, %78, %cst_81 {dimension_numbers = #tpu.dot_dimension_numbers<[1], [0], [0], [1], [0, 0, 1, 1], [], []>} : vector<256x32xbf16>, vector<32x32xbf16>, vector<256x32xf32> -> vector<256x32xf32>
    %80 = arith.addf %73, %79 : vector<256x32xf32>
    %c1_82 = arith.constant 1 : index
    %c3_83 = arith.constant 3 : index
    %c0_84 = arith.constant 0 : index
    %81 = vector.load %arg9[%c1_82, %c3_83, %c0_84] : memref<20x20x32xf32, #tpu.memory_space<vmem>>, vector<16x16x32xf32>
    %82 = vector.shape_cast %81 : vector<16x16x32xf32> to vector<256x32xf32>
    %83 = arith.truncf %82 : vector<256x32xf32> to vector<256x32xbf16>
    %c8 = arith.constant 8 : index
    %c0_85 = arith.constant 0 : index
    %c0_86 = arith.constant 0 : index
    %84 = vector.load %arg3[%c8, %c0_85, %c0_86] : memref<25x32x32xbf16, #tpu.memory_space<vmem>>, vector<1x32x32xbf16>
    %85 = vector.shape_cast %84 : vector<1x32x32xbf16> to vector<32x32xbf16>
    %cst_87 = arith.constant dense<0.000000e+00> : vector<256x32xf32>
    %86 = tpu.matmul %83, %85, %cst_87 {dimension_numbers = #tpu.dot_dimension_numbers<[1], [0], [0], [1], [0, 0, 1, 1], [], []>} : vector<256x32xbf16>, vector<32x32xbf16>, vector<256x32xf32> -> vector<256x32xf32>
    %87 = arith.addf %80, %86 : vector<256x32xf32>
    %c1_88 = arith.constant 1 : index
    %c4_89 = arith.constant 4 : index
    %c0_90 = arith.constant 0 : index
    %88 = vector.load %arg9[%c1_88, %c4_89, %c0_90] : memref<20x20x32xf32, #tpu.memory_space<vmem>>, vector<16x16x32xf32>
    %89 = vector.shape_cast %88 : vector<16x16x32xf32> to vector<256x32xf32>
    %90 = arith.truncf %89 : vector<256x32xf32> to vector<256x32xbf16>
    %c9 = arith.constant 9 : index
    %c0_91 = arith.constant 0 : index
    %c0_92 = arith.constant 0 : index
    %91 = vector.load %arg3[%c9, %c0_91, %c0_92] : memref<25x32x32xbf16, #tpu.memory_space<vmem>>, vector<1x32x32xbf16>
    %92 = vector.shape_cast %91 : vector<1x32x32xbf16> to vector<32x32xbf16>
    %cst_93 = arith.constant dense<0.000000e+00> : vector<256x32xf32>
    %93 = tpu.matmul %90, %92, %cst_93 {dimension_numbers = #tpu.dot_dimension_numbers<[1], [0], [0], [1], [0, 0, 1, 1], [], []>} : vector<256x32xbf16>, vector<32x32xbf16>, vector<256x32xf32> -> vector<256x32xf32>
    %94 = arith.addf %87, %93 : vector<256x32xf32>
    %c2_94 = arith.constant 2 : index
    %c0_95 = arith.constant 0 : index
    %c0_96 = arith.constant 0 : index
    %95 = vector.load %arg9[%c2_94, %c0_95, %c0_96] : memref<20x20x32xf32, #tpu.memory_space<vmem>>, vector<16x16x32xf32>
    %96 = vector.shape_cast %95 : vector<16x16x32xf32> to vector<256x32xf32>
    %97 = arith.truncf %96 : vector<256x32xf32> to vector<256x32xbf16>
    %c10 = arith.constant 10 : index
    %c0_97 = arith.constant 0 : index
    %c0_98 = arith.constant 0 : index
    %98 = vector.load %arg3[%c10, %c0_97, %c0_98] : memref<25x32x32xbf16, #tpu.memory_space<vmem>>, vector<1x32x32xbf16>
    %99 = vector.shape_cast %98 : vector<1x32x32xbf16> to vector<32x32xbf16>
    %cst_99 = arith.constant dense<0.000000e+00> : vector<256x32xf32>
    %100 = tpu.matmul %97, %99, %cst_99 {dimension_numbers = #tpu.dot_dimension_numbers<[1], [0], [0], [1], [0, 0, 1, 1], [], []>} : vector<256x32xbf16>, vector<32x32xbf16>, vector<256x32xf32> -> vector<256x32xf32>
    %101 = arith.addf %94, %100 : vector<256x32xf32>
    %c2_100 = arith.constant 2 : index
    %c1_101 = arith.constant 1 : index
    %c0_102 = arith.constant 0 : index
    %102 = vector.load %arg9[%c2_100, %c1_101, %c0_102] : memref<20x20x32xf32, #tpu.memory_space<vmem>>, vector<16x16x32xf32>
    %103 = vector.shape_cast %102 : vector<16x16x32xf32> to vector<256x32xf32>
    %104 = arith.truncf %103 : vector<256x32xf32> to vector<256x32xbf16>
    %c11 = arith.constant 11 : index
    %c0_103 = arith.constant 0 : index
    %c0_104 = arith.constant 0 : index
    %105 = vector.load %arg3[%c11, %c0_103, %c0_104] : memref<25x32x32xbf16, #tpu.memory_space<vmem>>, vector<1x32x32xbf16>
    %106 = vector.shape_cast %105 : vector<1x32x32xbf16> to vector<32x32xbf16>
    %cst_105 = arith.constant dense<0.000000e+00> : vector<256x32xf32>
    %107 = tpu.matmul %104, %106, %cst_105 {dimension_numbers = #tpu.dot_dimension_numbers<[1], [0], [0], [1], [0, 0, 1, 1], [], []>} : vector<256x32xbf16>, vector<32x32xbf16>, vector<256x32xf32> -> vector<256x32xf32>
    %108 = arith.addf %101, %107 : vector<256x32xf32>
    %c2_106 = arith.constant 2 : index
    %c2_107 = arith.constant 2 : index
    %c0_108 = arith.constant 0 : index
    %109 = vector.load %arg9[%c2_106, %c2_107, %c0_108] : memref<20x20x32xf32, #tpu.memory_space<vmem>>, vector<16x16x32xf32>
    %110 = vector.shape_cast %109 : vector<16x16x32xf32> to vector<256x32xf32>
    %111 = arith.truncf %110 : vector<256x32xf32> to vector<256x32xbf16>
    %c12 = arith.constant 12 : index
    %c0_109 = arith.constant 0 : index
    %c0_110 = arith.constant 0 : index
    %112 = vector.load %arg3[%c12, %c0_109, %c0_110] : memref<25x32x32xbf16, #tpu.memory_space<vmem>>, vector<1x32x32xbf16>
    %113 = vector.shape_cast %112 : vector<1x32x32xbf16> to vector<32x32xbf16>
    %cst_111 = arith.constant dense<0.000000e+00> : vector<256x32xf32>
    %114 = tpu.matmul %111, %113, %cst_111 {dimension_numbers = #tpu.dot_dimension_numbers<[1], [0], [0], [1], [0, 0, 1, 1], [], []>} : vector<256x32xbf16>, vector<32x32xbf16>, vector<256x32xf32> -> vector<256x32xf32>
    %115 = arith.addf %108, %114 : vector<256x32xf32>
    %c2_112 = arith.constant 2 : index
    %c3_113 = arith.constant 3 : index
    %c0_114 = arith.constant 0 : index
    %116 = vector.load %arg9[%c2_112, %c3_113, %c0_114] : memref<20x20x32xf32, #tpu.memory_space<vmem>>, vector<16x16x32xf32>
    %117 = vector.shape_cast %116 : vector<16x16x32xf32> to vector<256x32xf32>
    %118 = arith.truncf %117 : vector<256x32xf32> to vector<256x32xbf16>
    %c13 = arith.constant 13 : index
    %c0_115 = arith.constant 0 : index
    %c0_116 = arith.constant 0 : index
    %119 = vector.load %arg3[%c13, %c0_115, %c0_116] : memref<25x32x32xbf16, #tpu.memory_space<vmem>>, vector<1x32x32xbf16>
    %120 = vector.shape_cast %119 : vector<1x32x32xbf16> to vector<32x32xbf16>
    %cst_117 = arith.constant dense<0.000000e+00> : vector<256x32xf32>
    %121 = tpu.matmul %118, %120, %cst_117 {dimension_numbers = #tpu.dot_dimension_numbers<[1], [0], [0], [1], [0, 0, 1, 1], [], []>} : vector<256x32xbf16>, vector<32x32xbf16>, vector<256x32xf32> -> vector<256x32xf32>
    %122 = arith.addf %115, %121 : vector<256x32xf32>
    %c2_118 = arith.constant 2 : index
    %c4_119 = arith.constant 4 : index
    %c0_120 = arith.constant 0 : index
    %123 = vector.load %arg9[%c2_118, %c4_119, %c0_120] : memref<20x20x32xf32, #tpu.memory_space<vmem>>, vector<16x16x32xf32>
    %124 = vector.shape_cast %123 : vector<16x16x32xf32> to vector<256x32xf32>
    %125 = arith.truncf %124 : vector<256x32xf32> to vector<256x32xbf16>
    %c14 = arith.constant 14 : index
    %c0_121 = arith.constant 0 : index
    %c0_122 = arith.constant 0 : index
    %126 = vector.load %arg3[%c14, %c0_121, %c0_122] : memref<25x32x32xbf16, #tpu.memory_space<vmem>>, vector<1x32x32xbf16>
    %127 = vector.shape_cast %126 : vector<1x32x32xbf16> to vector<32x32xbf16>
    %cst_123 = arith.constant dense<0.000000e+00> : vector<256x32xf32>
    %128 = tpu.matmul %125, %127, %cst_123 {dimension_numbers = #tpu.dot_dimension_numbers<[1], [0], [0], [1], [0, 0, 1, 1], [], []>} : vector<256x32xbf16>, vector<32x32xbf16>, vector<256x32xf32> -> vector<256x32xf32>
    %129 = arith.addf %122, %128 : vector<256x32xf32>
    %c3_124 = arith.constant 3 : index
    %c0_125 = arith.constant 0 : index
    %c0_126 = arith.constant 0 : index
    %130 = vector.load %arg9[%c3_124, %c0_125, %c0_126] : memref<20x20x32xf32, #tpu.memory_space<vmem>>, vector<16x16x32xf32>
    %131 = vector.shape_cast %130 : vector<16x16x32xf32> to vector<256x32xf32>
    %132 = arith.truncf %131 : vector<256x32xf32> to vector<256x32xbf16>
    %c15 = arith.constant 15 : index
    %c0_127 = arith.constant 0 : index
    %c0_128 = arith.constant 0 : index
    %133 = vector.load %arg3[%c15, %c0_127, %c0_128] : memref<25x32x32xbf16, #tpu.memory_space<vmem>>, vector<1x32x32xbf16>
    %134 = vector.shape_cast %133 : vector<1x32x32xbf16> to vector<32x32xbf16>
    %cst_129 = arith.constant dense<0.000000e+00> : vector<256x32xf32>
    %135 = tpu.matmul %132, %134, %cst_129 {dimension_numbers = #tpu.dot_dimension_numbers<[1], [0], [0], [1], [0, 0, 1, 1], [], []>} : vector<256x32xbf16>, vector<32x32xbf16>, vector<256x32xf32> -> vector<256x32xf32>
    %136 = arith.addf %129, %135 : vector<256x32xf32>
    %c3_130 = arith.constant 3 : index
    %c1_131 = arith.constant 1 : index
    %c0_132 = arith.constant 0 : index
    %137 = vector.load %arg9[%c3_130, %c1_131, %c0_132] : memref<20x20x32xf32, #tpu.memory_space<vmem>>, vector<16x16x32xf32>
    %138 = vector.shape_cast %137 : vector<16x16x32xf32> to vector<256x32xf32>
    %139 = arith.truncf %138 : vector<256x32xf32> to vector<256x32xbf16>
    %c16 = arith.constant 16 : index
    %c0_133 = arith.constant 0 : index
    %c0_134 = arith.constant 0 : index
    %140 = vector.load %arg3[%c16, %c0_133, %c0_134] : memref<25x32x32xbf16, #tpu.memory_space<vmem>>, vector<1x32x32xbf16>
    %141 = vector.shape_cast %140 : vector<1x32x32xbf16> to vector<32x32xbf16>
    %cst_135 = arith.constant dense<0.000000e+00> : vector<256x32xf32>
    %142 = tpu.matmul %139, %141, %cst_135 {dimension_numbers = #tpu.dot_dimension_numbers<[1], [0], [0], [1], [0, 0, 1, 1], [], []>} : vector<256x32xbf16>, vector<32x32xbf16>, vector<256x32xf32> -> vector<256x32xf32>
    %143 = arith.addf %136, %142 : vector<256x32xf32>
    %c3_136 = arith.constant 3 : index
    %c2_137 = arith.constant 2 : index
    %c0_138 = arith.constant 0 : index
    %144 = vector.load %arg9[%c3_136, %c2_137, %c0_138] : memref<20x20x32xf32, #tpu.memory_space<vmem>>, vector<16x16x32xf32>
    %145 = vector.shape_cast %144 : vector<16x16x32xf32> to vector<256x32xf32>
    %146 = arith.truncf %145 : vector<256x32xf32> to vector<256x32xbf16>
    %c17 = arith.constant 17 : index
    %c0_139 = arith.constant 0 : index
    %c0_140 = arith.constant 0 : index
    %147 = vector.load %arg3[%c17, %c0_139, %c0_140] : memref<25x32x32xbf16, #tpu.memory_space<vmem>>, vector<1x32x32xbf16>
    %148 = vector.shape_cast %147 : vector<1x32x32xbf16> to vector<32x32xbf16>
    %cst_141 = arith.constant dense<0.000000e+00> : vector<256x32xf32>
    %149 = tpu.matmul %146, %148, %cst_141 {dimension_numbers = #tpu.dot_dimension_numbers<[1], [0], [0], [1], [0, 0, 1, 1], [], []>} : vector<256x32xbf16>, vector<32x32xbf16>, vector<256x32xf32> -> vector<256x32xf32>
    %150 = arith.addf %143, %149 : vector<256x32xf32>
    %c3_142 = arith.constant 3 : index
    %c3_143 = arith.constant 3 : index
    %c0_144 = arith.constant 0 : index
    %151 = vector.load %arg9[%c3_142, %c3_143, %c0_144] : memref<20x20x32xf32, #tpu.memory_space<vmem>>, vector<16x16x32xf32>
    %152 = vector.shape_cast %151 : vector<16x16x32xf32> to vector<256x32xf32>
    %153 = arith.truncf %152 : vector<256x32xf32> to vector<256x32xbf16>
    %c18_145 = arith.constant 18 : index
    %c0_146 = arith.constant 0 : index
    %c0_147 = arith.constant 0 : index
    %154 = vector.load %arg3[%c18_145, %c0_146, %c0_147] : memref<25x32x32xbf16, #tpu.memory_space<vmem>>, vector<1x32x32xbf16>
    %155 = vector.shape_cast %154 : vector<1x32x32xbf16> to vector<32x32xbf16>
    %cst_148 = arith.constant dense<0.000000e+00> : vector<256x32xf32>
    %156 = tpu.matmul %153, %155, %cst_148 {dimension_numbers = #tpu.dot_dimension_numbers<[1], [0], [0], [1], [0, 0, 1, 1], [], []>} : vector<256x32xbf16>, vector<32x32xbf16>, vector<256x32xf32> -> vector<256x32xf32>
    %157 = arith.addf %150, %156 : vector<256x32xf32>
    %c3_149 = arith.constant 3 : index
    %c4_150 = arith.constant 4 : index
    %c0_151 = arith.constant 0 : index
    %158 = vector.load %arg9[%c3_149, %c4_150, %c0_151] : memref<20x20x32xf32, #tpu.memory_space<vmem>>, vector<16x16x32xf32>
    %159 = vector.shape_cast %158 : vector<16x16x32xf32> to vector<256x32xf32>
    %160 = arith.truncf %159 : vector<256x32xf32> to vector<256x32xbf16>
    %c19 = arith.constant 19 : index
    %c0_152 = arith.constant 0 : index
    %c0_153 = arith.constant 0 : index
    %161 = vector.load %arg3[%c19, %c0_152, %c0_153] : memref<25x32x32xbf16, #tpu.memory_space<vmem>>, vector<1x32x32xbf16>
    %162 = vector.shape_cast %161 : vector<1x32x32xbf16> to vector<32x32xbf16>
    %cst_154 = arith.constant dense<0.000000e+00> : vector<256x32xf32>
    %163 = tpu.matmul %160, %162, %cst_154 {dimension_numbers = #tpu.dot_dimension_numbers<[1], [0], [0], [1], [0, 0, 1, 1], [], []>} : vector<256x32xbf16>, vector<32x32xbf16>, vector<256x32xf32> -> vector<256x32xf32>
    %164 = arith.addf %157, %163 : vector<256x32xf32>
    %c4_155 = arith.constant 4 : index
    %c0_156 = arith.constant 0 : index
    %c0_157 = arith.constant 0 : index
    %165 = vector.load %arg9[%c4_155, %c0_156, %c0_157] : memref<20x20x32xf32, #tpu.memory_space<vmem>>, vector<16x16x32xf32>
    %166 = vector.shape_cast %165 : vector<16x16x32xf32> to vector<256x32xf32>
    %167 = arith.truncf %166 : vector<256x32xf32> to vector<256x32xbf16>
    %c20 = arith.constant 20 : index
    %c0_158 = arith.constant 0 : index
    %c0_159 = arith.constant 0 : index
    %168 = vector.load %arg3[%c20, %c0_158, %c0_159] : memref<25x32x32xbf16, #tpu.memory_space<vmem>>, vector<1x32x32xbf16>
    %169 = vector.shape_cast %168 : vector<1x32x32xbf16> to vector<32x32xbf16>
    %cst_160 = arith.constant dense<0.000000e+00> : vector<256x32xf32>
    %170 = tpu.matmul %167, %169, %cst_160 {dimension_numbers = #tpu.dot_dimension_numbers<[1], [0], [0], [1], [0, 0, 1, 1], [], []>} : vector<256x32xbf16>, vector<32x32xbf16>, vector<256x32xf32> -> vector<256x32xf32>
    %171 = arith.addf %164, %170 : vector<256x32xf32>
    %c4_161 = arith.constant 4 : index
    %c1_162 = arith.constant 1 : index
    %c0_163 = arith.constant 0 : index
    %172 = vector.load %arg9[%c4_161, %c1_162, %c0_163] : memref<20x20x32xf32, #tpu.memory_space<vmem>>, vector<16x16x32xf32>
    %173 = vector.shape_cast %172 : vector<16x16x32xf32> to vector<256x32xf32>
    %174 = arith.truncf %173 : vector<256x32xf32> to vector<256x32xbf16>
    %c21 = arith.constant 21 : index
    %c0_164 = arith.constant 0 : index
    %c0_165 = arith.constant 0 : index
    %175 = vector.load %arg3[%c21, %c0_164, %c0_165] : memref<25x32x32xbf16, #tpu.memory_space<vmem>>, vector<1x32x32xbf16>
    %176 = vector.shape_cast %175 : vector<1x32x32xbf16> to vector<32x32xbf16>
    %cst_166 = arith.constant dense<0.000000e+00> : vector<256x32xf32>
    %177 = tpu.matmul %174, %176, %cst_166 {dimension_numbers = #tpu.dot_dimension_numbers<[1], [0], [0], [1], [0, 0, 1, 1], [], []>} : vector<256x32xbf16>, vector<32x32xbf16>, vector<256x32xf32> -> vector<256x32xf32>
    %178 = arith.addf %171, %177 : vector<256x32xf32>
    %c4_167 = arith.constant 4 : index
    %c2_168 = arith.constant 2 : index
    %c0_169 = arith.constant 0 : index
    %179 = vector.load %arg9[%c4_167, %c2_168, %c0_169] : memref<20x20x32xf32, #tpu.memory_space<vmem>>, vector<16x16x32xf32>
    %180 = vector.shape_cast %179 : vector<16x16x32xf32> to vector<256x32xf32>
    %181 = arith.truncf %180 : vector<256x32xf32> to vector<256x32xbf16>
    %c22 = arith.constant 22 : index
    %c0_170 = arith.constant 0 : index
    %c0_171 = arith.constant 0 : index
    %182 = vector.load %arg3[%c22, %c0_170, %c0_171] : memref<25x32x32xbf16, #tpu.memory_space<vmem>>, vector<1x32x32xbf16>
    %183 = vector.shape_cast %182 : vector<1x32x32xbf16> to vector<32x32xbf16>
    %cst_172 = arith.constant dense<0.000000e+00> : vector<256x32xf32>
    %184 = tpu.matmul %181, %183, %cst_172 {dimension_numbers = #tpu.dot_dimension_numbers<[1], [0], [0], [1], [0, 0, 1, 1], [], []>} : vector<256x32xbf16>, vector<32x32xbf16>, vector<256x32xf32> -> vector<256x32xf32>
    %185 = arith.addf %178, %184 : vector<256x32xf32>
    %c4_173 = arith.constant 4 : index
    %c3_174 = arith.constant 3 : index
    %c0_175 = arith.constant 0 : index
    %186 = vector.load %arg9[%c4_173, %c3_174, %c0_175] : memref<20x20x32xf32, #tpu.memory_space<vmem>>, vector<16x16x32xf32>
    %187 = vector.shape_cast %186 : vector<16x16x32xf32> to vector<256x32xf32>
    %188 = arith.truncf %187 : vector<256x32xf32> to vector<256x32xbf16>
    %c23 = arith.constant 23 : index
    %c0_176 = arith.constant 0 : index
    %c0_177 = arith.constant 0 : index
    %189 = vector.load %arg3[%c23, %c0_176, %c0_177] : memref<25x32x32xbf16, #tpu.memory_space<vmem>>, vector<1x32x32xbf16>
    %190 = vector.shape_cast %189 : vector<1x32x32xbf16> to vector<32x32xbf16>
    %cst_178 = arith.constant dense<0.000000e+00> : vector<256x32xf32>
    %191 = tpu.matmul %188, %190, %cst_178 {dimension_numbers = #tpu.dot_dimension_numbers<[1], [0], [0], [1], [0, 0, 1, 1], [], []>} : vector<256x32xbf16>, vector<32x32xbf16>, vector<256x32xf32> -> vector<256x32xf32>
    %192 = arith.addf %185, %191 : vector<256x32xf32>
    %c4_179 = arith.constant 4 : index
    %c4_180 = arith.constant 4 : index
    %c0_181 = arith.constant 0 : index
    %193 = vector.load %arg9[%c4_179, %c4_180, %c0_181] : memref<20x20x32xf32, #tpu.memory_space<vmem>>, vector<16x16x32xf32>
    %194 = vector.shape_cast %193 : vector<16x16x32xf32> to vector<256x32xf32>
    %195 = arith.truncf %194 : vector<256x32xf32> to vector<256x32xbf16>
    %c24 = arith.constant 24 : index
    %c0_182 = arith.constant 0 : index
    %c0_183 = arith.constant 0 : index
    %196 = vector.load %arg3[%c24, %c0_182, %c0_183] : memref<25x32x32xbf16, #tpu.memory_space<vmem>>, vector<1x32x32xbf16>
    %197 = vector.shape_cast %196 : vector<1x32x32xbf16> to vector<32x32xbf16>
    %cst_184 = arith.constant dense<0.000000e+00> : vector<256x32xf32>
    %198 = tpu.matmul %195, %197, %cst_184 {dimension_numbers = #tpu.dot_dimension_numbers<[1], [0], [0], [1], [0, 0, 1, 1], [], []>} : vector<256x32xbf16>, vector<32x32xbf16>, vector<256x32xf32> -> vector<256x32xf32>
    %199 = arith.addf %192, %198 : vector<256x32xf32>
    %200 = vector.shape_cast %199 : vector<256x32xf32> to vector<8x2x16x32xf32>
    %201 = vector.extract_strided_slice %200 {offsets = [0, 0, 0, 0], sizes = [8, 1, 16, 32], strides = [1, 1, 1, 1]} : vector<8x2x16x32xf32> to vector<8x1x16x32xf32>
    %202 = vector.shape_cast %201 : vector<8x1x16x32xf32> to vector<8x16x32xf32>
    %203 = vector.extract_strided_slice %200 {offsets = [0, 1, 0, 0], sizes = [8, 1, 16, 32], strides = [1, 1, 1, 1]} : vector<8x2x16x32xf32> to vector<8x1x16x32xf32>
    %204 = vector.shape_cast %203 : vector<8x1x16x32xf32> to vector<8x16x32xf32>
    %205 = arith.maximumf %202, %204 : vector<8x16x32xf32>
    %c0_185 = arith.constant 0 : index
    %c0_186 = arith.constant 0 : index
    %c0_187 = arith.constant 0 : index
    %206 = vector.load %arg12[%c0_185, %c0_186, %c0_187] : memref<8x16x32xf32, #tpu.memory_space<vmem>>, vector<8x16x32xf32>
    tpu.vector_store %arg12[%c0_185, %c0_186, %c0_187], %205 {strides = array<i32>} : memref<8x16x32xf32, #tpu.memory_space<vmem>>, vector<8x16x32xf32>,
    %c0_188 = arith.constant 0 : index
    %c0_189 = arith.constant 0 : index
    %c0_190 = arith.constant 0 : index
    %207 = tpu.strided_load %arg12[%c0_188, %c0_189, %c0_190] {strides = array<i32: 1, 2, 1>} : memref<8x16x32xf32, #tpu.memory_space<vmem>>, vector<8x8x32xf32>
    %c0_191 = arith.constant 0 : index
    %c1_192 = arith.constant 1 : index
    %c0_193 = arith.constant 0 : index
    %208 = tpu.strided_load %arg12[%c0_191, %c1_192, %c0_193] {strides = array<i32: 1, 2, 1>} : memref<8x16x32xf32, #tpu.memory_space<vmem>>, vector<8x8x32xf32>
    %209 = arith.maximumf %207, %208 : vector<8x8x32xf32>
    %c0_194 = arith.constant 0 : index
    %c0_195 = arith.constant 0 : index
    %c0_196 = arith.constant 0 : index
    %210 = vector.load %arg6[%c0_194, %c0_195, %c0_196] : memref<1x1x32xf32, #tpu.memory_space<vmem>>, vector<1x1x32xf32>
    %211 = vector.broadcast %210 : vector<1x1x32xf32> to vector<8x8x32xf32>
    %212 = arith.addf %209, %211 : vector<8x8x32xf32>
    %cst_197 = arith.constant 0.000000e+00 : f32
    %213 = vector.broadcast %cst_197 : f32 to vector<2x12x32xf32>
    %c0_198 = arith.constant 0 : index
    %c0_199 = arith.constant 0 : index
    %c0_200 = arith.constant 0 : index
    %214 = vector.load %arg10[%c0_198, %c0_199, %c0_200] : memref<12x12x32xf32, #tpu.memory_space<vmem>>, vector<2x12x32xf32>
    tpu.vector_store %arg10[%c0_198, %c0_199, %c0_200], %213 {strides = array<i32>} : memref<12x12x32xf32, #tpu.memory_space<vmem>>, vector<2x12x32xf32>,
    %c10_201 = arith.constant 10 : index
    %c0_202 = arith.constant 0 : index
    %c0_203 = arith.constant 0 : index
    %215 = vector.load %arg10[%c10_201, %c0_202, %c0_203] : memref<12x12x32xf32, #tpu.memory_space<vmem>>, vector<2x12x32xf32>
    tpu.vector_store %arg10[%c10_201, %c0_202, %c0_203], %213 {strides = array<i32>} : memref<12x12x32xf32, #tpu.memory_space<vmem>>, vector<2x12x32xf32>,
    %cst_204 = arith.constant 0.000000e+00 : f32
    %216 = vector.broadcast %cst_204 : f32 to vector<8x2x32xf32>
    %c2_205 = arith.constant 2 : index
    %c0_206 = arith.constant 0 : index
    %c0_207 = arith.constant 0 : index
    %217 = vector.load %arg10[%c2_205, %c0_206, %c0_207] : memref<12x12x32xf32, #tpu.memory_space<vmem>>, vector<8x2x32xf32>
    tpu.vector_store %arg10[%c2_205, %c0_206, %c0_207], %216 {strides = array<i32>} : memref<12x12x32xf32, #tpu.memory_space<vmem>>, vector<8x2x32xf32>,
    %c2_208 = arith.constant 2 : index
    %c10_209 = arith.constant 10 : index
    %c0_210 = arith.constant 0 : index
    %218 = vector.load %arg10[%c2_208, %c10_209, %c0_210] : memref<12x12x32xf32, #tpu.memory_space<vmem>>, vector<8x2x32xf32>
    tpu.vector_store %arg10[%c2_208, %c10_209, %c0_210], %216 {strides = array<i32>} : memref<12x12x32xf32, #tpu.memory_space<vmem>>, vector<8x2x32xf32>,
    %c2_211 = arith.constant 2 : index
    %c2_212 = arith.constant 2 : index
    %c0_213 = arith.constant 0 : index
    %219 = vector.load %arg10[%c2_211, %c2_212, %c0_213] : memref<12x12x32xf32, #tpu.memory_space<vmem>>, vector<8x8x32xf32>
    tpu.vector_store %arg10[%c2_211, %c2_212, %c0_213], %212 {strides = array<i32>} : memref<12x12x32xf32, #tpu.memory_space<vmem>>, vector<8x8x32xf32>,
    %cst_214 = arith.constant 0.000000e+00 : f32
    %220 = vector.broadcast %cst_214 : f32 to vector<64x64xf32>
    %c0_215 = arith.constant 0 : index
    %c0_216 = arith.constant 0 : index
    %c0_217 = arith.constant 0 : index
    %221 = vector.load %arg10[%c0_215, %c0_216, %c0_217] : memref<12x12x32xf32, #tpu.memory_space<vmem>>, vector<8x8x32xf32>
    %222 = vector.shape_cast %221 : vector<8x8x32xf32> to vector<64x32xf32>
    %223 = arith.truncf %222 : vector<64x32xf32> to vector<64x32xbf16>
    %c0_218 = arith.constant 0 : index
    %c0_219 = arith.constant 0 : index
    %c0_220 = arith.constant 0 : index
    %224 = vector.load %arg4[%c0_218, %c0_219, %c0_220] : memref<25x32x64xbf16, #tpu.memory_space<vmem>>, vector<1x32x64xbf16>
    %225 = vector.shape_cast %224 : vector<1x32x64xbf16> to vector<32x64xbf16>
    %cst_221 = arith.constant dense<0.000000e+00> : vector<64x64xf32>
    %226 = tpu.matmul %223, %225, %cst_221 {dimension_numbers = #tpu.dot_dimension_numbers<[1], [0], [0], [1], [0, 0, 1, 1], [], []>} : vector<64x32xbf16>, vector<32x64xbf16>, vector<64x64xf32> -> vector<64x64xf32>
    %227 = arith.addf %220, %226 : vector<64x64xf32>
    %c0_222 = arith.constant 0 : index
    %c1_223 = arith.constant 1 : index
    %c0_224 = arith.constant 0 : index
    %228 = vector.load %arg10[%c0_222, %c1_223, %c0_224] : memref<12x12x32xf32, #tpu.memory_space<vmem>>, vector<8x8x32xf32>
    %229 = vector.shape_cast %228 : vector<8x8x32xf32> to vector<64x32xf32>
    %230 = arith.truncf %229 : vector<64x32xf32> to vector<64x32xbf16>
    %c1_225 = arith.constant 1 : index
    %c0_226 = arith.constant 0 : index
    %c0_227 = arith.constant 0 : index
    %231 = vector.load %arg4[%c1_225, %c0_226, %c0_227] : memref<25x32x64xbf16, #tpu.memory_space<vmem>>, vector<1x32x64xbf16>
    %232 = vector.shape_cast %231 : vector<1x32x64xbf16> to vector<32x64xbf16>
    %cst_228 = arith.constant dense<0.000000e+00> : vector<64x64xf32>
    %233 = tpu.matmul %230, %232, %cst_228 {dimension_numbers = #tpu.dot_dimension_numbers<[1], [0], [0], [1], [0, 0, 1, 1], [], []>} : vector<64x32xbf16>, vector<32x64xbf16>, vector<64x64xf32> -> vector<64x64xf32>
    %234 = arith.addf %227, %233 : vector<64x64xf32>
    %c0_229 = arith.constant 0 : index
    %c2_230 = arith.constant 2 : index
    %c0_231 = arith.constant 0 : index
    %235 = vector.load %arg10[%c0_229, %c2_230, %c0_231] : memref<12x12x32xf32, #tpu.memory_space<vmem>>, vector<8x8x32xf32>
    %236 = vector.shape_cast %235 : vector<8x8x32xf32> to vector<64x32xf32>
    %237 = arith.truncf %236 : vector<64x32xf32> to vector<64x32xbf16>
    %c2_232 = arith.constant 2 : index
    %c0_233 = arith.constant 0 : index
    %c0_234 = arith.constant 0 : index
    %238 = vector.load %arg4[%c2_232, %c0_233, %c0_234] : memref<25x32x64xbf16, #tpu.memory_space<vmem>>, vector<1x32x64xbf16>
    %239 = vector.shape_cast %238 : vector<1x32x64xbf16> to vector<32x64xbf16>
    %cst_235 = arith.constant dense<0.000000e+00> : vector<64x64xf32>
    %240 = tpu.matmul %237, %239, %cst_235 {dimension_numbers = #tpu.dot_dimension_numbers<[1], [0], [0], [1], [0, 0, 1, 1], [], []>} : vector<64x32xbf16>, vector<32x64xbf16>, vector<64x64xf32> -> vector<64x64xf32>
    %241 = arith.addf %234, %240 : vector<64x64xf32>
    %c0_236 = arith.constant 0 : index
    %c3_237 = arith.constant 3 : index
    %c0_238 = arith.constant 0 : index
    %242 = vector.load %arg10[%c0_236, %c3_237, %c0_238] : memref<12x12x32xf32, #tpu.memory_space<vmem>>, vector<8x8x32xf32>
    %243 = vector.shape_cast %242 : vector<8x8x32xf32> to vector<64x32xf32>
    %244 = arith.truncf %243 : vector<64x32xf32> to vector<64x32xbf16>
    %c3_239 = arith.constant 3 : index
    %c0_240 = arith.constant 0 : index
    %c0_241 = arith.constant 0 : index
    %245 = vector.load %arg4[%c3_239, %c0_240, %c0_241] : memref<25x32x64xbf16, #tpu.memory_space<vmem>>, vector<1x32x64xbf16>
    %246 = vector.shape_cast %245 : vector<1x32x64xbf16> to vector<32x64xbf16>
    %cst_242 = arith.constant dense<0.000000e+00> : vector<64x64xf32>
    %247 = tpu.matmul %244, %246, %cst_242 {dimension_numbers = #tpu.dot_dimension_numbers<[1], [0], [0], [1], [0, 0, 1, 1], [], []>} : vector<64x32xbf16>, vector<32x64xbf16>, vector<64x64xf32> -> vector<64x64xf32>
    %248 = arith.addf %241, %247 : vector<64x64xf32>
    %c0_243 = arith.constant 0 : index
    %c4_244 = arith.constant 4 : index
    %c0_245 = arith.constant 0 : index
    %249 = vector.load %arg10[%c0_243, %c4_244, %c0_245] : memref<12x12x32xf32, #tpu.memory_space<vmem>>, vector<8x8x32xf32>
    %250 = vector.shape_cast %249 : vector<8x8x32xf32> to vector<64x32xf32>
    %251 = arith.truncf %250 : vector<64x32xf32> to vector<64x32xbf16>
    %c4_246 = arith.constant 4 : index
    %c0_247 = arith.constant 0 : index
    %c0_248 = arith.constant 0 : index
    %252 = vector.load %arg4[%c4_246, %c0_247, %c0_248] : memref<25x32x64xbf16, #tpu.memory_space<vmem>>, vector<1x32x64xbf16>
    %253 = vector.shape_cast %252 : vector<1x32x64xbf16> to vector<32x64xbf16>
    %cst_249 = arith.constant dense<0.000000e+00> : vector<64x64xf32>
    %254 = tpu.matmul %251, %253, %cst_249 {dimension_numbers = #tpu.dot_dimension_numbers<[1], [0], [0], [1], [0, 0, 1, 1], [], []>} : vector<64x32xbf16>, vector<32x64xbf16>, vector<64x64xf32> -> vector<64x64xf32>
    %255 = arith.addf %248, %254 : vector<64x64xf32>
    %c1_250 = arith.constant 1 : index
    %c0_251 = arith.constant 0 : index
    %c0_252 = arith.constant 0 : index
    %256 = vector.load %arg10[%c1_250, %c0_251, %c0_252] : memref<12x12x32xf32, #tpu.memory_space<vmem>>, vector<8x8x32xf32>
    %257 = vector.shape_cast %256 : vector<8x8x32xf32> to vector<64x32xf32>
    %258 = arith.truncf %257 : vector<64x32xf32> to vector<64x32xbf16>
    %c5_253 = arith.constant 5 : index
    %c0_254 = arith.constant 0 : index
    %c0_255 = arith.constant 0 : index
    %259 = vector.load %arg4[%c5_253, %c0_254, %c0_255] : memref<25x32x64xbf16, #tpu.memory_space<vmem>>, vector<1x32x64xbf16>
    %260 = vector.shape_cast %259 : vector<1x32x64xbf16> to vector<32x64xbf16>
    %cst_256 = arith.constant dense<0.000000e+00> : vector<64x64xf32>
    %261 = tpu.matmul %258, %260, %cst_256 {dimension_numbers = #tpu.dot_dimension_numbers<[1], [0], [0], [1], [0, 0, 1, 1], [], []>} : vector<64x32xbf16>, vector<32x64xbf16>, vector<64x64xf32> -> vector<64x64xf32>
    %262 = arith.addf %255, %261 : vector<64x64xf32>
    %c1_257 = arith.constant 1 : index
    %c1_258 = arith.constant 1 : index
    %c0_259 = arith.constant 0 : index
    %263 = vector.load %arg10[%c1_257, %c1_258, %c0_259] : memref<12x12x32xf32, #tpu.memory_space<vmem>>, vector<8x8x32xf32>
    %264 = vector.shape_cast %263 : vector<8x8x32xf32> to vector<64x32xf32>
    %265 = arith.truncf %264 : vector<64x32xf32> to vector<64x32xbf16>
    %c6_260 = arith.constant 6 : index
    %c0_261 = arith.constant 0 : index
    %c0_262 = arith.constant 0 : index
    %266 = vector.load %arg4[%c6_260, %c0_261, %c0_262] : memref<25x32x64xbf16, #tpu.memory_space<vmem>>, vector<1x32x64xbf16>
    %267 = vector.shape_cast %266 : vector<1x32x64xbf16> to vector<32x64xbf16>
    %cst_263 = arith.constant dense<0.000000e+00> : vector<64x64xf32>
    %268 = tpu.matmul %265, %267, %cst_263 {dimension_numbers = #tpu.dot_dimension_numbers<[1], [0], [0], [1], [0, 0, 1, 1], [], []>} : vector<64x32xbf16>, vector<32x64xbf16>, vector<64x64xf32> -> vector<64x64xf32>
    %269 = arith.addf %262, %268 : vector<64x64xf32>
    %c1_264 = arith.constant 1 : index
    %c2_265 = arith.constant 2 : index
    %c0_266 = arith.constant 0 : index
    %270 = vector.load %arg10[%c1_264, %c2_265, %c0_266] : memref<12x12x32xf32, #tpu.memory_space<vmem>>, vector<8x8x32xf32>
    %271 = vector.shape_cast %270 : vector<8x8x32xf32> to vector<64x32xf32>
    %272 = arith.truncf %271 : vector<64x32xf32> to vector<64x32xbf16>
    %c7_267 = arith.constant 7 : index
    %c0_268 = arith.constant 0 : index
    %c0_269 = arith.constant 0 : index
    %273 = vector.load %arg4[%c7_267, %c0_268, %c0_269] : memref<25x32x64xbf16, #tpu.memory_space<vmem>>, vector<1x32x64xbf16>
    %274 = vector.shape_cast %273 : vector<1x32x64xbf16> to vector<32x64xbf16>
    %cst_270 = arith.constant dense<0.000000e+00> : vector<64x64xf32>
    %275 = tpu.matmul %272, %274, %cst_270 {dimension_numbers = #tpu.dot_dimension_numbers<[1], [0], [0], [1], [0, 0, 1, 1], [], []>} : vector<64x32xbf16>, vector<32x64xbf16>, vector<64x64xf32> -> vector<64x64xf32>
    %276 = arith.addf %269, %275 : vector<64x64xf32>
    %c1_271 = arith.constant 1 : index
    %c3_272 = arith.constant 3 : index
    %c0_273 = arith.constant 0 : index
    %277 = vector.load %arg10[%c1_271, %c3_272, %c0_273] : memref<12x12x32xf32, #tpu.memory_space<vmem>>, vector<8x8x32xf32>
    %278 = vector.shape_cast %277 : vector<8x8x32xf32> to vector<64x32xf32>
    %279 = arith.truncf %278 : vector<64x32xf32> to vector<64x32xbf16>
    %c8_274 = arith.constant 8 : index
    %c0_275 = arith.constant 0 : index
    %c0_276 = arith.constant 0 : index
    %280 = vector.load %arg4[%c8_274, %c0_275, %c0_276] : memref<25x32x64xbf16, #tpu.memory_space<vmem>>, vector<1x32x64xbf16>
    %281 = vector.shape_cast %280 : vector<1x32x64xbf16> to vector<32x64xbf16>
    %cst_277 = arith.constant dense<0.000000e+00> : vector<64x64xf32>
    %282 = tpu.matmul %279, %281, %cst_277 {dimension_numbers = #tpu.dot_dimension_numbers<[1], [0], [0], [1], [0, 0, 1, 1], [], []>} : vector<64x32xbf16>, vector<32x64xbf16>, vector<64x64xf32> -> vector<64x64xf32>
    %283 = arith.addf %276, %282 : vector<64x64xf32>
    %c1_278 = arith.constant 1 : index
    %c4_279 = arith.constant 4 : index
    %c0_280 = arith.constant 0 : index
    %284 = vector.load %arg10[%c1_278, %c4_279, %c0_280] : memref<12x12x32xf32, #tpu.memory_space<vmem>>, vector<8x8x32xf32>
    %285 = vector.shape_cast %284 : vector<8x8x32xf32> to vector<64x32xf32>
    %286 = arith.truncf %285 : vector<64x32xf32> to vector<64x32xbf16>
    %c9_281 = arith.constant 9 : index
    %c0_282 = arith.constant 0 : index
    %c0_283 = arith.constant 0 : index
    %287 = vector.load %arg4[%c9_281, %c0_282, %c0_283] : memref<25x32x64xbf16, #tpu.memory_space<vmem>>, vector<1x32x64xbf16>
    %288 = vector.shape_cast %287 : vector<1x32x64xbf16> to vector<32x64xbf16>
    %cst_284 = arith.constant dense<0.000000e+00> : vector<64x64xf32>
    %289 = tpu.matmul %286, %288, %cst_284 {dimension_numbers = #tpu.dot_dimension_numbers<[1], [0], [0], [1], [0, 0, 1, 1], [], []>} : vector<64x32xbf16>, vector<32x64xbf16>, vector<64x64xf32> -> vector<64x64xf32>
    %290 = arith.addf %283, %289 : vector<64x64xf32>
    %c2_285 = arith.constant 2 : index
    %c0_286 = arith.constant 0 : index
    %c0_287 = arith.constant 0 : index
    %291 = vector.load %arg10[%c2_285, %c0_286, %c0_287] : memref<12x12x32xf32, #tpu.memory_space<vmem>>, vector<8x8x32xf32>
    %292 = vector.shape_cast %291 : vector<8x8x32xf32> to vector<64x32xf32>
    %293 = arith.truncf %292 : vector<64x32xf32> to vector<64x32xbf16>
    %c10_288 = arith.constant 10 : index
    %c0_289 = arith.constant 0 : index
    %c0_290 = arith.constant 0 : index
    %294 = vector.load %arg4[%c10_288, %c0_289, %c0_290] : memref<25x32x64xbf16, #tpu.memory_space<vmem>>, vector<1x32x64xbf16>
    %295 = vector.shape_cast %294 : vector<1x32x64xbf16> to vector<32x64xbf16>
    %cst_291 = arith.constant dense<0.000000e+00> : vector<64x64xf32>
    %296 = tpu.matmul %293, %295, %cst_291 {dimension_numbers = #tpu.dot_dimension_numbers<[1], [0], [0], [1], [0, 0, 1, 1], [], []>} : vector<64x32xbf16>, vector<32x64xbf16>, vector<64x64xf32> -> vector<64x64xf32>
    %297 = arith.addf %290, %296 : vector<64x64xf32>
    %c2_292 = arith.constant 2 : index
    %c1_293 = arith.constant 1 : index
    %c0_294 = arith.constant 0 : index
    %298 = vector.load %arg10[%c2_292, %c1_293, %c0_294] : memref<12x12x32xf32, #tpu.memory_space<vmem>>, vector<8x8x32xf32>
    %299 = vector.shape_cast %298 : vector<8x8x32xf32> to vector<64x32xf32>
    %300 = arith.truncf %299 : vector<64x32xf32> to vector<64x32xbf16>
    %c11_295 = arith.constant 11 : index
    %c0_296 = arith.constant 0 : index
    %c0_297 = arith.constant 0 : index
    %301 = vector.load %arg4[%c11_295, %c0_296, %c0_297] : memref<25x32x64xbf16, #tpu.memory_space<vmem>>, vector<1x32x64xbf16>
    %302 = vector.shape_cast %301 : vector<1x32x64xbf16> to vector<32x64xbf16>
    %cst_298 = arith.constant dense<0.000000e+00> : vector<64x64xf32>
    %303 = tpu.matmul %300, %302, %cst_298 {dimension_numbers = #tpu.dot_dimension_numbers<[1], [0], [0], [1], [0, 0, 1, 1], [], []>} : vector<64x32xbf16>, vector<32x64xbf16>, vector<64x64xf32> -> vector<64x64xf32>
    %304 = arith.addf %297, %303 : vector<64x64xf32>
    %c2_299 = arith.constant 2 : index
    %c2_300 = arith.constant 2 : index
    %c0_301 = arith.constant 0 : index
    %305 = vector.load %arg10[%c2_299, %c2_300, %c0_301] : memref<12x12x32xf32, #tpu.memory_space<vmem>>, vector<8x8x32xf32>
    %306 = vector.shape_cast %305 : vector<8x8x32xf32> to vector<64x32xf32>
    %307 = arith.truncf %306 : vector<64x32xf32> to vector<64x32xbf16>
    %c12_302 = arith.constant 12 : index
    %c0_303 = arith.constant 0 : index
    %c0_304 = arith.constant 0 : index
    %308 = vector.load %arg4[%c12_302, %c0_303, %c0_304] : memref<25x32x64xbf16, #tpu.memory_space<vmem>>, vector<1x32x64xbf16>
    %309 = vector.shape_cast %308 : vector<1x32x64xbf16> to vector<32x64xbf16>
    %cst_305 = arith.constant dense<0.000000e+00> : vector<64x64xf32>
    %310 = tpu.matmul %307, %309, %cst_305 {dimension_numbers = #tpu.dot_dimension_numbers<[1], [0], [0], [1], [0, 0, 1, 1], [], []>} : vector<64x32xbf16>, vector<32x64xbf16>, vector<64x64xf32> -> vector<64x64xf32>
    %311 = arith.addf %304, %310 : vector<64x64xf32>
    %c2_306 = arith.constant 2 : index
    %c3_307 = arith.constant 3 : index
    %c0_308 = arith.constant 0 : index
    %312 = vector.load %arg10[%c2_306, %c3_307, %c0_308] : memref<12x12x32xf32, #tpu.memory_space<vmem>>, vector<8x8x32xf32>
    %313 = vector.shape_cast %312 : vector<8x8x32xf32> to vector<64x32xf32>
    %314 = arith.truncf %313 : vector<64x32xf32> to vector<64x32xbf16>
    %c13_309 = arith.constant 13 : index
    %c0_310 = arith.constant 0 : index
    %c0_311 = arith.constant 0 : index
    %315 = vector.load %arg4[%c13_309, %c0_310, %c0_311] : memref<25x32x64xbf16, #tpu.memory_space<vmem>>, vector<1x32x64xbf16>
    %316 = vector.shape_cast %315 : vector<1x32x64xbf16> to vector<32x64xbf16>
    %cst_312 = arith.constant dense<0.000000e+00> : vector<64x64xf32>
    %317 = tpu.matmul %314, %316, %cst_312 {dimension_numbers = #tpu.dot_dimension_numbers<[1], [0], [0], [1], [0, 0, 1, 1], [], []>} : vector<64x32xbf16>, vector<32x64xbf16>, vector<64x64xf32> -> vector<64x64xf32>
    %318 = arith.addf %311, %317 : vector<64x64xf32>
    %c2_313 = arith.constant 2 : index
    %c4_314 = arith.constant 4 : index
    %c0_315 = arith.constant 0 : index
    %319 = vector.load %arg10[%c2_313, %c4_314, %c0_315] : memref<12x12x32xf32, #tpu.memory_space<vmem>>, vector<8x8x32xf32>
    %320 = vector.shape_cast %319 : vector<8x8x32xf32> to vector<64x32xf32>
    %321 = arith.truncf %320 : vector<64x32xf32> to vector<64x32xbf16>
    %c14_316 = arith.constant 14 : index
    %c0_317 = arith.constant 0 : index
    %c0_318 = arith.constant 0 : index
    %322 = vector.load %arg4[%c14_316, %c0_317, %c0_318] : memref<25x32x64xbf16, #tpu.memory_space<vmem>>, vector<1x32x64xbf16>
    %323 = vector.shape_cast %322 : vector<1x32x64xbf16> to vector<32x64xbf16>
    %cst_319 = arith.constant dense<0.000000e+00> : vector<64x64xf32>
    %324 = tpu.matmul %321, %323, %cst_319 {dimension_numbers = #tpu.dot_dimension_numbers<[1], [0], [0], [1], [0, 0, 1, 1], [], []>} : vector<64x32xbf16>, vector<32x64xbf16>, vector<64x64xf32> -> vector<64x64xf32>
    %325 = arith.addf %318, %324 : vector<64x64xf32>
    %c3_320 = arith.constant 3 : index
    %c0_321 = arith.constant 0 : index
    %c0_322 = arith.constant 0 : index
    %326 = vector.load %arg10[%c3_320, %c0_321, %c0_322] : memref<12x12x32xf32, #tpu.memory_space<vmem>>, vector<8x8x32xf32>
    %327 = vector.shape_cast %326 : vector<8x8x32xf32> to vector<64x32xf32>
    %328 = arith.truncf %327 : vector<64x32xf32> to vector<64x32xbf16>
    %c15_323 = arith.constant 15 : index
    %c0_324 = arith.constant 0 : index
    %c0_325 = arith.constant 0 : index
    %329 = vector.load %arg4[%c15_323, %c0_324, %c0_325] : memref<25x32x64xbf16, #tpu.memory_space<vmem>>, vector<1x32x64xbf16>
    %330 = vector.shape_cast %329 : vector<1x32x64xbf16> to vector<32x64xbf16>
    %cst_326 = arith.constant dense<0.000000e+00> : vector<64x64xf32>
    %331 = tpu.matmul %328, %330, %cst_326 {dimension_numbers = #tpu.dot_dimension_numbers<[1], [0], [0], [1], [0, 0, 1, 1], [], []>} : vector<64x32xbf16>, vector<32x64xbf16>, vector<64x64xf32> -> vector<64x64xf32>
    %332 = arith.addf %325, %331 : vector<64x64xf32>
    %c3_327 = arith.constant 3 : index
    %c1_328 = arith.constant 1 : index
    %c0_329 = arith.constant 0 : index
    %333 = vector.load %arg10[%c3_327, %c1_328, %c0_329] : memref<12x12x32xf32, #tpu.memory_space<vmem>>, vector<8x8x32xf32>
    %334 = vector.shape_cast %333 : vector<8x8x32xf32> to vector<64x32xf32>
    %335 = arith.truncf %334 : vector<64x32xf32> to vector<64x32xbf16>
    %c16_330 = arith.constant 16 : index
    %c0_331 = arith.constant 0 : index
    %c0_332 = arith.constant 0 : index
    %336 = vector.load %arg4[%c16_330, %c0_331, %c0_332] : memref<25x32x64xbf16, #tpu.memory_space<vmem>>, vector<1x32x64xbf16>
    %337 = vector.shape_cast %336 : vector<1x32x64xbf16> to vector<32x64xbf16>
    %cst_333 = arith.constant dense<0.000000e+00> : vector<64x64xf32>
    %338 = tpu.matmul %335, %337, %cst_333 {dimension_numbers = #tpu.dot_dimension_numbers<[1], [0], [0], [1], [0, 0, 1, 1], [], []>} : vector<64x32xbf16>, vector<32x64xbf16>, vector<64x64xf32> -> vector<64x64xf32>
    %339 = arith.addf %332, %338 : vector<64x64xf32>
    %c3_334 = arith.constant 3 : index
    %c2_335 = arith.constant 2 : index
    %c0_336 = arith.constant 0 : index
    %340 = vector.load %arg10[%c3_334, %c2_335, %c0_336] : memref<12x12x32xf32, #tpu.memory_space<vmem>>, vector<8x8x32xf32>
    %341 = vector.shape_cast %340 : vector<8x8x32xf32> to vector<64x32xf32>
    %342 = arith.truncf %341 : vector<64x32xf32> to vector<64x32xbf16>
    %c17_337 = arith.constant 17 : index
    %c0_338 = arith.constant 0 : index
    %c0_339 = arith.constant 0 : index
    %343 = vector.load %arg4[%c17_337, %c0_338, %c0_339] : memref<25x32x64xbf16, #tpu.memory_space<vmem>>, vector<1x32x64xbf16>
    %344 = vector.shape_cast %343 : vector<1x32x64xbf16> to vector<32x64xbf16>
    %cst_340 = arith.constant dense<0.000000e+00> : vector<64x64xf32>
    %345 = tpu.matmul %342, %344, %cst_340 {dimension_numbers = #tpu.dot_dimension_numbers<[1], [0], [0], [1], [0, 0, 1, 1], [], []>} : vector<64x32xbf16>, vector<32x64xbf16>, vector<64x64xf32> -> vector<64x64xf32>
    %346 = arith.addf %339, %345 : vector<64x64xf32>
    %c3_341 = arith.constant 3 : index
    %c3_342 = arith.constant 3 : index
    %c0_343 = arith.constant 0 : index
    %347 = vector.load %arg10[%c3_341, %c3_342, %c0_343] : memref<12x12x32xf32, #tpu.memory_space<vmem>>, vector<8x8x32xf32>
    %348 = vector.shape_cast %347 : vector<8x8x32xf32> to vector<64x32xf32>
    %349 = arith.truncf %348 : vector<64x32xf32> to vector<64x32xbf16>
    %c18_344 = arith.constant 18 : index
    %c0_345 = arith.constant 0 : index
    %c0_346 = arith.constant 0 : index
    %350 = vector.load %arg4[%c18_344, %c0_345, %c0_346] : memref<25x32x64xbf16, #tpu.memory_space<vmem>>, vector<1x32x64xbf16>
    %351 = vector.shape_cast %350 : vector<1x32x64xbf16> to vector<32x64xbf16>
    %cst_347 = arith.constant dense<0.000000e+00> : vector<64x64xf32>
    %352 = tpu.matmul %349, %351, %cst_347 {dimension_numbers = #tpu.dot_dimension_numbers<[1], [0], [0], [1], [0, 0, 1, 1], [], []>} : vector<64x32xbf16>, vector<32x64xbf16>, vector<64x64xf32> -> vector<64x64xf32>
    %353 = arith.addf %346, %352 : vector<64x64xf32>
    %c3_348 = arith.constant 3 : index
    %c4_349 = arith.constant 4 : index
    %c0_350 = arith.constant 0 : index
    %354 = vector.load %arg10[%c3_348, %c4_349, %c0_350] : memref<12x12x32xf32, #tpu.memory_space<vmem>>, vector<8x8x32xf32>
    %355 = vector.shape_cast %354 : vector<8x8x32xf32> to vector<64x32xf32>
    %356 = arith.truncf %355 : vector<64x32xf32> to vector<64x32xbf16>
    %c19_351 = arith.constant 19 : index
    %c0_352 = arith.constant 0 : index
    %c0_353 = arith.constant 0 : index
    %357 = vector.load %arg4[%c19_351, %c0_352, %c0_353] : memref<25x32x64xbf16, #tpu.memory_space<vmem>>, vector<1x32x64xbf16>
    %358 = vector.shape_cast %357 : vector<1x32x64xbf16> to vector<32x64xbf16>
    %cst_354 = arith.constant dense<0.000000e+00> : vector<64x64xf32>
    %359 = tpu.matmul %356, %358, %cst_354 {dimension_numbers = #tpu.dot_dimension_numbers<[1], [0], [0], [1], [0, 0, 1, 1], [], []>} : vector<64x32xbf16>, vector<32x64xbf16>, vector<64x64xf32> -> vector<64x64xf32>
    %360 = arith.addf %353, %359 : vector<64x64xf32>
    %c4_355 = arith.constant 4 : index
    %c0_356 = arith.constant 0 : index
    %c0_357 = arith.constant 0 : index
    %361 = vector.load %arg10[%c4_355, %c0_356, %c0_357] : memref<12x12x32xf32, #tpu.memory_space<vmem>>, vector<8x8x32xf32>
    %362 = vector.shape_cast %361 : vector<8x8x32xf32> to vector<64x32xf32>
    %363 = arith.truncf %362 : vector<64x32xf32> to vector<64x32xbf16>
    %c20_358 = arith.constant 20 : index
    %c0_359 = arith.constant 0 : index
    %c0_360 = arith.constant 0 : index
    %364 = vector.load %arg4[%c20_358, %c0_359, %c0_360] : memref<25x32x64xbf16, #tpu.memory_space<vmem>>, vector<1x32x64xbf16>
    %365 = vector.shape_cast %364 : vector<1x32x64xbf16> to vector<32x64xbf16>
    %cst_361 = arith.constant dense<0.000000e+00> : vector<64x64xf32>
    %366 = tpu.matmul %363, %365, %cst_361 {dimension_numbers = #tpu.dot_dimension_numbers<[1], [0], [0], [1], [0, 0, 1, 1], [], []>} : vector<64x32xbf16>, vector<32x64xbf16>, vector<64x64xf32> -> vector<64x64xf32>
    %367 = arith.addf %360, %366 : vector<64x64xf32>
    %c4_362 = arith.constant 4 : index
    %c1_363 = arith.constant 1 : index
    %c0_364 = arith.constant 0 : index
    %368 = vector.load %arg10[%c4_362, %c1_363, %c0_364] : memref<12x12x32xf32, #tpu.memory_space<vmem>>, vector<8x8x32xf32>
    %369 = vector.shape_cast %368 : vector<8x8x32xf32> to vector<64x32xf32>
    %370 = arith.truncf %369 : vector<64x32xf32> to vector<64x32xbf16>
    %c21_365 = arith.constant 21 : index
    %c0_366 = arith.constant 0 : index
    %c0_367 = arith.constant 0 : index
    %371 = vector.load %arg4[%c21_365, %c0_366, %c0_367] : memref<25x32x64xbf16, #tpu.memory_space<vmem>>, vector<1x32x64xbf16>
    %372 = vector.shape_cast %371 : vector<1x32x64xbf16> to vector<32x64xbf16>
    %cst_368 = arith.constant dense<0.000000e+00> : vector<64x64xf32>
    %373 = tpu.matmul %370, %372, %cst_368 {dimension_numbers = #tpu.dot_dimension_numbers<[1], [0], [0], [1], [0, 0, 1, 1], [], []>} : vector<64x32xbf16>, vector<32x64xbf16>, vector<64x64xf32> -> vector<64x64xf32>
    %374 = arith.addf %367, %373 : vector<64x64xf32>
    %c4_369 = arith.constant 4 : index
    %c2_370 = arith.constant 2 : index
    %c0_371 = arith.constant 0 : index
    %375 = vector.load %arg10[%c4_369, %c2_370, %c0_371] : memref<12x12x32xf32, #tpu.memory_space<vmem>>, vector<8x8x32xf32>
    %376 = vector.shape_cast %375 : vector<8x8x32xf32> to vector<64x32xf32>
    %377 = arith.truncf %376 : vector<64x32xf32> to vector<64x32xbf16>
    %c22_372 = arith.constant 22 : index
    %c0_373 = arith.constant 0 : index
    %c0_374 = arith.constant 0 : index
    %378 = vector.load %arg4[%c22_372, %c0_373, %c0_374] : memref<25x32x64xbf16, #tpu.memory_space<vmem>>, vector<1x32x64xbf16>
    %379 = vector.shape_cast %378 : vector<1x32x64xbf16> to vector<32x64xbf16>
    %cst_375 = arith.constant dense<0.000000e+00> : vector<64x64xf32>
    %380 = tpu.matmul %377, %379, %cst_375 {dimension_numbers = #tpu.dot_dimension_numbers<[1], [0], [0], [1], [0, 0, 1, 1], [], []>} : vector<64x32xbf16>, vector<32x64xbf16>, vector<64x64xf32> -> vector<64x64xf32>
    %381 = arith.addf %374, %380 : vector<64x64xf32>
    %c4_376 = arith.constant 4 : index
    %c3_377 = arith.constant 3 : index
    %c0_378 = arith.constant 0 : index
    %382 = vector.load %arg10[%c4_376, %c3_377, %c0_378] : memref<12x12x32xf32, #tpu.memory_space<vmem>>, vector<8x8x32xf32>
    %383 = vector.shape_cast %382 : vector<8x8x32xf32> to vector<64x32xf32>
    %384 = arith.truncf %383 : vector<64x32xf32> to vector<64x32xbf16>
    %c23_379 = arith.constant 23 : index
    %c0_380 = arith.constant 0 : index
    %c0_381 = arith.constant 0 : index
    %385 = vector.load %arg4[%c23_379, %c0_380, %c0_381] : memref<25x32x64xbf16, #tpu.memory_space<vmem>>, vector<1x32x64xbf16>
    %386 = vector.shape_cast %385 : vector<1x32x64xbf16> to vector<32x64xbf16>
    %cst_382 = arith.constant dense<0.000000e+00> : vector<64x64xf32>
    %387 = tpu.matmul %384, %386, %cst_382 {dimension_numbers = #tpu.dot_dimension_numbers<[1], [0], [0], [1], [0, 0, 1, 1], [], []>} : vector<64x32xbf16>, vector<32x64xbf16>, vector<64x64xf32> -> vector<64x64xf32>
    %388 = arith.addf %381, %387 : vector<64x64xf32>
    %c4_383 = arith.constant 4 : index
    %c4_384 = arith.constant 4 : index
    %c0_385 = arith.constant 0 : index
    %389 = vector.load %arg10[%c4_383, %c4_384, %c0_385] : memref<12x12x32xf32, #tpu.memory_space<vmem>>, vector<8x8x32xf32>
    %390 = vector.shape_cast %389 : vector<8x8x32xf32> to vector<64x32xf32>
    %391 = arith.truncf %390 : vector<64x32xf32> to vector<64x32xbf16>
    %c24_386 = arith.constant 24 : index
    %c0_387 = arith.constant 0 : index
    %c0_388 = arith.constant 0 : index
    %392 = vector.load %arg4[%c24_386, %c0_387, %c0_388] : memref<25x32x64xbf16, #tpu.memory_space<vmem>>, vector<1x32x64xbf16>
    %393 = vector.shape_cast %392 : vector<1x32x64xbf16> to vector<32x64xbf16>
    %cst_389 = arith.constant dense<0.000000e+00> : vector<64x64xf32>
    %394 = tpu.matmul %391, %393, %cst_389 {dimension_numbers = #tpu.dot_dimension_numbers<[1], [0], [0], [1], [0, 0, 1, 1], [], []>} : vector<64x32xbf16>, vector<32x64xbf16>, vector<64x64xf32> -> vector<64x64xf32>
    %395 = arith.addf %388, %394 : vector<64x64xf32>
    %396 = vector.shape_cast %395 : vector<64x64xf32> to vector<4x2x8x64xf32>
    %397 = vector.extract_strided_slice %396 {offsets = [0, 0, 0, 0], sizes = [4, 1, 8, 64], strides = [1, 1, 1, 1]} : vector<4x2x8x64xf32> to vector<4x1x8x64xf32>
    %398 = vector.shape_cast %397 : vector<4x1x8x64xf32> to vector<4x8x64xf32>
    %399 = vector.extract_strided_slice %396 {offsets = [0, 1, 0, 0], sizes = [4, 1, 8, 64], strides = [1, 1, 1, 1]} : vector<4x2x8x64xf32> to vector<4x1x8x64xf32>
    %400 = vector.shape_cast %399 : vector<4x1x8x64xf32> to vector<4x8x64xf32>
    %401 = arith.maximumf %398, %400 : vector<4x8x64xf32>
    %c0_390 = arith.constant 0 : index
    %c0_391 = arith.constant 0 : index
    %c0_392 = arith.constant 0 : index
    %402 = vector.load %arg13[%c0_390, %c0_391, %c0_392] : memref<4x8x64xf32, #tpu.memory_space<vmem>>, vector<4x8x64xf32>
    tpu.vector_store %arg13[%c0_390, %c0_391, %c0_392], %401 {strides = array<i32>} : memref<4x8x64xf32, #tpu.memory_space<vmem>>, vector<4x8x64xf32>,
    %c0_393 = arith.constant 0 : index
    %c0_394 = arith.constant 0 : index
    %c0_395 = arith.constant 0 : index
    %403 = tpu.strided_load %arg13[%c0_393, %c0_394, %c0_395] {strides = array<i32: 1, 2, 1>} : memref<4x8x64xf32, #tpu.memory_space<vmem>>, vector<4x4x64xf32>
    %c0_396 = arith.constant 0 : index
    %c1_397 = arith.constant 1 : index
    %c0_398 = arith.constant 0 : index
    %404 = tpu.strided_load %arg13[%c0_396, %c1_397, %c0_398] {strides = array<i32: 1, 2, 1>} : memref<4x8x64xf32, #tpu.memory_space<vmem>>, vector<4x4x64xf32>
    %405 = arith.maximumf %403, %404 : vector<4x4x64xf32>
    %c0_399 = arith.constant 0 : index
    %c0_400 = arith.constant 0 : index
    %c0_401 = arith.constant 0 : index
    %406 = vector.load %arg7[%c0_399, %c0_400, %c0_401] : memref<1x1x64xf32, #tpu.memory_space<vmem>>, vector<1x1x64xf32>
    %407 = vector.broadcast %406 : vector<1x1x64xf32> to vector<4x4x64xf32>
    %408 = arith.addf %405, %407 : vector<4x4x64xf32>
    %409 = arith.truncf %408 : vector<4x4x64xf32> to vector<4x4x64xbf16>
    %c0_402 = arith.constant 0 : index
    %c0_403 = arith.constant 0 : index
    %c0_404 = arith.constant 0 : index
    %c0_405 = arith.constant 0 : index
    %410 = vector.load %arg8[%c0_402, %c0_403, %c0_404, %c0_405] : memref<1x4x4x64xbf16, #tpu.memory_space<vmem>>, vector<1x4x4x64xbf16>
    %411 = vector.shape_cast %410 : vector<1x4x4x64xbf16> to vector<4x4x64xbf16>
    %412 = vector.shape_cast %409 : vector<4x4x64xbf16> to vector<1x4x4x64xbf16>
    tpu.vector_store %arg8[%c0_402, %c0_403, %c0_404, %c0_405], %412 {strides = array<i32>} : memref<1x4x4x64xbf16, #tpu.memory_space<vmem>>, vector<1x4x4x64xbf16>,
    return
  }
  func.func @transform_0(%arg0: i32) -> (i32, i32, i32) {
    %c0_i32 = arith.constant 0 : i32
    %c0_i32_0 = arith.constant 0 : i32
    %c0_i32_1 = arith.constant 0 : i32
    return %arg0, %c0_i32, %c0_i32_0 : i32, i32, i32
  }
  func.func @transform_1(%arg0: i32) -> (i32, i32) {
    %c0_i32 = arith.constant 0 : i32
    %c0_i32_0 = arith.constant 0 : i32
    %c0_i32_1 = arith.constant 0 : i32
    return %c0_i32, %c0_i32_0 : i32, i32
  }
  func.func @transform_2(%arg0: i32) -> (i32, i32, i32) {
    %c0_i32 = arith.constant 0 : i32
    %c0_i32_0 = arith.constant 0 : i32
    %c0_i32_1 = arith.constant 0 : i32
    %c0_i32_2 = arith.constant 0 : i32
    return %c0_i32, %c0_i32_0, %c0_i32_1 : i32, i32, i32
  }
  func.func @transform_3(%arg0: i32) -> (i32, i32, i32) {
    %c0_i32 = arith.constant 0 : i32
    %c0_i32_0 = arith.constant 0 : i32
    %c0_i32_1 = arith.constant 0 : i32
    %c0_i32_2 = arith.constant 0 : i32
    return %c0_i32, %c0_i32_0, %c0_i32_1 : i32, i32, i32
  }
  func.func @transform_4(%arg0: i32) -> (i32, i32, i32) {
    %c0_i32 = arith.constant 0 : i32
    %c0_i32_0 = arith.constant 0 : i32
    %c0_i32_1 = arith.constant 0 : i32
    %c0_i32_2 = arith.constant 0 : i32
    return %c0_i32, %c0_i32_0, %c0_i32_1 : i32, i32, i32
  }
  func.func @transform_5(%arg0: i32) -> (i32, i32, i32) {
    %c0_i32 = arith.constant 0 : i32
    %c0_i32_0 = arith.constant 0 : i32
    %c0_i32_1 = arith.constant 0 : i32
    %c0_i32_2 = arith.constant 0 : i32
    return %c0_i32, %c0_i32_0, %c0_i32_1 : i32, i32, i32
  }
  func.func @transform_6(%arg0: i32) -> (i32, i32, i32) {
    %c0_i32 = arith.constant 0 : i32
    %c0_i32_0 = arith.constant 0 : i32
    %c0_i32_1 = arith.constant 0 : i32
    %c0_i32_2 = arith.constant 0 : i32
    return %c0_i32, %c0_i32_0, %c0_i32_1 : i32, i32, i32
  }
  func.func @transform_7(%arg0: i32) -> (i32, i32, i32, i32) {
    %c0_i32 = arith.constant 0 : i32
    %c0_i32_0 = arith.constant 0 : i32
    %c0_i32_1 = arith.constant 0 : i32
    %c0_i32_2 = arith.constant 0 : i32
    return %arg0, %c0_i32, %c0_i32_0, %c0_i32_1 : i32, i32, i32, i32
  }
}

module attributes {stable_mosaic.version = 11 : i64} {
  func.func @_head_kernel(%arg0: i32, %arg1: memref<8x1024xbf16, #tpu.memory_space<vmem>>, %arg2: memref<1024x64xbf16, #tpu.memory_space<vmem>>, %arg3: memref<1x64xf32, #tpu.memory_space<vmem>>, %arg4: memref<64x128xbf16, #tpu.memory_space<vmem>>, %arg5: memref<1x128xf32, #tpu.memory_space<vmem>>, %arg6: memref<8x128xf32, #tpu.memory_space<vmem>>) attributes {dimension_semantics = [#tpu.dimension_semantics<parallel>], iteration_bounds = array<i64: 1>, scalar_prefetch = 0 : i64, scratch_operands = 0 : i64, tpu.core_type = #tpu.core_type<tc>, window_params = [{transform_indices = @transform_0, window_bounds = array<i64: 8, 1024>}, {pipeline_mode = #tpu.pipeline_mode<synchronous>, transform_indices = @transform_1, window_bounds = array<i64: 1024, 64>}, {pipeline_mode = #tpu.pipeline_mode<synchronous>, transform_indices = @transform_2, window_bounds = array<i64: 1, 64>}, {pipeline_mode = #tpu.pipeline_mode<synchronous>, transform_indices = @transform_3, window_bounds = array<i64: 64, 128>}, {pipeline_mode = #tpu.pipeline_mode<synchronous>, transform_indices = @transform_4, window_bounds = array<i64: 1, 128>}, {transform_indices = @transform_5, window_bounds = array<i64: 8, 128>}]} {
    %c0 = arith.constant 0 : index
    %c0_0 = arith.constant 0 : index
    %0 = vector.load %arg1[%c0, %c0_0] : memref<8x1024xbf16, #tpu.memory_space<vmem>>, vector<8x1024xbf16>
    %c0_1 = arith.constant 0 : index
    %c0_2 = arith.constant 0 : index
    %1 = vector.load %arg2[%c0_1, %c0_2] : memref<1024x64xbf16, #tpu.memory_space<vmem>>, vector<1024x64xbf16>
    %cst = arith.constant dense<0.000000e+00> : vector<8x64xf32>
    %2 = tpu.matmul %0, %1, %cst {dimension_numbers = #tpu.dot_dimension_numbers<[1], [0], [0], [1], [0, 0, 1, 1], [], []>} : vector<8x1024xbf16>, vector<1024x64xbf16>, vector<8x64xf32> -> vector<8x64xf32>
    %c0_3 = arith.constant 0 : index
    %c0_4 = arith.constant 0 : index
    %3 = vector.load %arg3[%c0_3, %c0_4] : memref<1x64xf32, #tpu.memory_space<vmem>>, vector<1x64xf32>
    %4 = vector.broadcast %3 : vector<1x64xf32> to vector<8x64xf32>
    %5 = arith.addf %2, %4 : vector<8x64xf32>
    %6 = arith.truncf %5 : vector<8x64xf32> to vector<8x64xbf16>
    %c0_5 = arith.constant 0 : index
    %c0_6 = arith.constant 0 : index
    %7 = vector.load %arg4[%c0_5, %c0_6] : memref<64x128xbf16, #tpu.memory_space<vmem>>, vector<64x128xbf16>
    %cst_7 = arith.constant dense<0.000000e+00> : vector<8x128xf32>
    %8 = tpu.matmul %6, %7, %cst_7 {dimension_numbers = #tpu.dot_dimension_numbers<[1], [0], [0], [1], [0, 0, 1, 1], [], []>} : vector<8x64xbf16>, vector<64x128xbf16>, vector<8x128xf32> -> vector<8x128xf32>
    %c0_8 = arith.constant 0 : index
    %c0_9 = arith.constant 0 : index
    %9 = vector.load %arg5[%c0_8, %c0_9] : memref<1x128xf32, #tpu.memory_space<vmem>>, vector<1x128xf32>
    %10 = vector.broadcast %9 : vector<1x128xf32> to vector<8x128xf32>
    %11 = arith.addf %8, %10 : vector<8x128xf32>
    %c0_10 = arith.constant 0 : index
    %c0_11 = arith.constant 0 : index
    %12 = vector.load %arg6[%c0_10, %c0_11] : memref<8x128xf32, #tpu.memory_space<vmem>>, vector<8x128xf32>
    tpu.vector_store %arg6[%c0_10, %c0_11], %11 {strides = array<i32>} : memref<8x128xf32, #tpu.memory_space<vmem>>, vector<8x128xf32>,
    return
  }
  func.func @transform_0(%arg0: i32) -> (i32, i32) {
    %c0_i32 = arith.constant 0 : i32
    %c0_i32_0 = arith.constant 0 : i32
    return %arg0, %c0_i32 : i32, i32
  }
  func.func @transform_1(%arg0: i32) -> (i32, i32) {
    %c0_i32 = arith.constant 0 : i32
    %c0_i32_0 = arith.constant 0 : i32
    %c0_i32_1 = arith.constant 0 : i32
    return %c0_i32, %c0_i32_0 : i32, i32
  }
  func.func @transform_2(%arg0: i32) -> (i32, i32) {
    %c0_i32 = arith.constant 0 : i32
    %c0_i32_0 = arith.constant 0 : i32
    %c0_i32_1 = arith.constant 0 : i32
    return %c0_i32, %c0_i32_0 : i32, i32
  }
  func.func @transform_3(%arg0: i32) -> (i32, i32) {
    %c0_i32 = arith.constant 0 : i32
    %c0_i32_0 = arith.constant 0 : i32
    %c0_i32_1 = arith.constant 0 : i32
    return %c0_i32, %c0_i32_0 : i32, i32
  }
  func.func @transform_4(%arg0: i32) -> (i32, i32) {
    %c0_i32 = arith.constant 0 : i32
    %c0_i32_0 = arith.constant 0 : i32
    %c0_i32_1 = arith.constant 0 : i32
    return %c0_i32, %c0_i32_0 : i32, i32
  }
  func.func @transform_5(%arg0: i32) -> (i32, i32) {
    %c0_i32 = arith.constant 0 : i32
    %c0_i32_0 = arith.constant 0 : i32
    return %arg0, %c0_i32 : i32, i32
  }
}

</mosaic_0001>

<bundles_post_ra>
// kernel: forward.3
= control target key start
LH: loop header
LB: loop body
LE: loop exit
PB: predicated region body
PF: predicated region fallthrough
CT: control target
= control target key end

     0   :  { %vm1084_vm0 = vmmov 0   ;;  %vm772_vm1 = vcmask 523264   ;;  %s1340_s1 = inlined_call_operand.vmem [shape: bf16[1024,64], index: 1, kind: input, shape index: {}]   ;;  %s1341_s0 = inlined_call_operand.vmem [shape: bf16[8,1024], index: 0, kind: input, shape index: {}]   ;;  %s1342_s3 = inlined_call_operand.vmem [shape: bf16[64,128], index: 3, kind: input, shape index: {}]   ;;  %s1343_s2 = inlined_call_operand.vmem [shape: f32[1,64], index: 2, kind: input, shape index: {}]   ;;  %s1344_s4 = inlined_call_operand.vmem [shape: f32[1,128], index: 4, kind: input, shape index: {}]   ;;  %s1345_s5 = inlined_call_operand.vmem [shape: f32[8,128], index: 5, kind: output, shape index: {}]  }
   0x1   :  { %v1007_v0 = vld [vmem:[%s1340_s1 + $0x40] sm:$0xff]   ;;  %v1011_v4 = vld [vmem:[%s1340_s1 + $0x48] sm:$0xff]   ;;  %v1015_v8 = vld [vmem:[%s1340_s1 + $0x50] sm:$0xff]  }
   0x2   :  { %v1008_v1 = vld [vmem:[%s1340_s1 + $0xc0] sm:$0xff]   ;;  %900 = vmatprep.subr.bf16.mxu0 %v1007_v0  ;;  %v1012_v5 = vld [vmem:[%s1340_s1 + $0xc8] sm:$0xff]   ;;  %v1016_v9 = vld [vmem:[%s1340_s1 + $0xd0] sm:$0xff]  }
   0x3   :  { %v1009_v2 = vld [vmem:[%s1340_s1] sm:$0xff]   ;;  %922 = vmatprep.subr.bf16.mxu1 %v1008_v1  ;;  %v1013_v6 = vld [vmem:[%s1340_s1 + $0x8] sm:$0xff]   ;;  %v1017_v10 = vld [vmem:[%s1340_s1 + $0x10] sm:$0xff]  }
   0x4   :  { %v1010_v3 = vld [vmem:[%s1340_s1 + $0x80] sm:$0xff]   ;;  %901 = vmatpush3.bf16.msra.mxu0 %v1009_v2  ;;  %v1014_v7 = vld [vmem:[%s1340_s1 + $0x88] sm:$0xff]   ;;  %v1018_v11 = vld [vmem:[%s1340_s1 + $0x90] sm:$0xff]  }
   0x5   :  { %923 = vmatpush3.bf16.msra.mxu1 %v1010_v3  ;;  %902 = vmatprep.subr.bf16.mxu0 %v1011_v4  ;;  %v1019_v12 = vld [vmem:[%s1340_s1 + $0x58] sm:$0xff]   ;;  %v1023_v16 = vld [vmem:[%s1340_s1 + $0x60] sm:$0xff]   ;;  %v1027_v20 = vld [vmem:[%s1340_s1 + $0x68] sm:$0xff]  }
   0x6   :  { %924 = vmatprep.subr.bf16.mxu1 %v1012_v5  ;;  %v1020_v13 = vld [vmem:[%s1340_s1 + $0xd8] sm:$0xff]   ;;  %v1024_v17 = vld [vmem:[%s1340_s1 + $0xe0] sm:$0xff]   ;;  %v1028_v21 = vld [vmem:[%s1340_s1 + $0xe8] sm:$0xff]  }
   0x7   :  { %v1021_v14 = vld [vmem:[%s1340_s1 + $0x18] sm:$0xff]   ;;  %v1025_v18 = vld [vmem:[%s1340_s1 + $0x20] sm:$0xff]   ;;  %v1029_v22 = vld [vmem:[%s1340_s1 + $0x28] sm:$0xff]  }
   0x8   :  { %903 = vmatpush3.bf16.msra.mxu0 %v1013_v6  ;;  %v1022_v15 = vld [vmem:[%s1340_s1 + $0x98] sm:$0xff]   ;;  %v1026_v19 = vld [vmem:[%s1340_s1 + $0xa0] sm:$0xff]   ;;  %v1030_v23 = vld [vmem:[%s1340_s1 + $0xa8] sm:$0xff]  }
   0x9   :  { %925 = vmatpush3.bf16.msra.mxu1 %v1014_v7  ;;  %904 = vmatprep.subr.bf16.mxu0 %v1015_v8  ;;  %v1031_v24 = vld [vmem:[%s1340_s1 + $0x70] sm:$0xff]   ;;  %v1035_v28 = vld [vmem:[%s1340_s1 + $0x78] sm:$0xff]   ;;  %v21_v32 = vld [vmem:[%s1341_s0] sm:$0xff] }
   0xa   :  { %926 = vmatprep.subr.bf16.mxu1 %v1016_v9  ;;  %v1032_v25 = vld [vmem:[%s1340_s1 + $0xf0] sm:$0xff]   ;;  %v1036_v29 = vld [vmem:[%s1340_s1 + $0xf8] sm:$0xff]   ;;  %v22_v33 = vld [vmem:[%s1341_s0 + $0x8] sm:$0xff]  ;;  %v822_v34 = vcombine.low %v21_v32, %v21_v32  ;;  %v823_v35 = vcombine.high %v21_v32, %v21_v32 }
   0xb   :  { %v1033_v26 = vld [vmem:[%s1340_s1 + $0x30] sm:$0xff]   ;;  %v1037_v30 = vld [vmem:[%s1340_s1 + $0x38] sm:$0xff]   ;;  %v824_v36 = vcombine.low %v22_v33, %v22_v33  ;;  %v825_v37 = vcombine.high %v22_v33, %v22_v33  ;;  %v1043_v38 = vld [vmem:[%s1340_s1 + $0x140] sm:$0xff]  }
   0xc   :  { %905 = vmatpush3.bf16.msra.mxu0 %v1017_v10  ;;  %v1034_v27 = vld [vmem:[%s1340_s1 + $0xb0] sm:$0xff]   ;;  %v1038_v31 = vld [vmem:[%s1340_s1 + $0xb8] sm:$0xff]   ;;  %v1044_v39 = vld [vmem:[%s1340_s1 + $0x1c0] sm:$0xff]   ;;  %604 = vmatprep.mubr.bf16.mxu0 %v823_v35 }
   0xd   :  { %927 = vmatpush3.bf16.msra.mxu1 %v1018_v11  ;;  %906 = vmatprep.subr.bf16.mxu0 %v1019_v12  ;;  %v1045_v40 = vld [vmem:[%s1340_s1 + $0x100] sm:$0xff]   ;;  %v1047_v42 = vld [vmem:[%s1340_s1 + $0x148] sm:$0xff]   ;;  %v1051_v46 = vld [vmem:[%s1340_s1 + $0x150] sm:$0xff]   ;;  %v1083_v12 = vmov 0.0  }
   0xe   :  { %928 = vmatprep.subr.bf16.mxu1 %v1020_v13  ;;  %644 = vmatprep.mubr.bf16.mxu1 %v825_v37  ;;  %v1046_v41 = vld [vmem:[%s1340_s1 + $0x180] sm:$0xff]   ;;  %v1048_v43 = vld [vmem:[%s1340_s1 + $0x1c8] sm:$0xff]   ;;  %v1052_v47 = vld [vmem:[%s1340_s1 + $0x1d0] sm:$0xff]  }
   0xf   :  { %v1049_v44 = vld [vmem:[%s1340_s1 + $0x108] sm:$0xff]   ;;  %v1053_v48 = vld [vmem:[%s1340_s1 + $0x110] sm:$0xff]   ;;  %v1055_v50 = vld [vmem:[%s1340_s1 + $0x158] sm:$0xff]  }
  0x10   :  { %907 = vmatpush3.bf16.msra.mxu0 %v1021_v14  ;;  %v1050_v45 = vld [vmem:[%s1340_s1 + $0x188] sm:$0xff]   ;;  %v1054_v49 = vld [vmem:[%s1340_s1 + $0x190] sm:$0xff]   ;;  %v1056_v51 = vld [vmem:[%s1340_s1 + $0x1d8] sm:$0xff]  }
  0x11   :  { %929 = vmatpush3.bf16.msra.mxu1 %v1022_v15  ;;  %908 = vmatprep.subr.bf16.mxu0 %v1023_v16  ;;  %v1057_v52 = vld [vmem:[%s1340_s1 + $0x118] sm:$0xff]   ;;  %v1059_v54 = vld [vmem:[%s1340_s1 + $0x160] sm:$0xff]   ;;  %v1063_v58 = vld [vmem:[%s1340_s1 + $0x168] sm:$0xff]  }
  0x12   :  { %930 = vmatprep.subr.bf16.mxu1 %v1024_v17  ;;  %v1058_v53 = vld [vmem:[%s1340_s1 + $0x198] sm:$0xff]   ;;  %v1060_v55 = vld [vmem:[%s1340_s1 + $0x1e0] sm:$0xff]   ;;  %v1064_v59 = vld [vmem:[%s1340_s1 + $0x1e8] sm:$0xff]  }
  0x13   :  { %v1061_v56 = vld [vmem:[%s1340_s1 + $0x120] sm:$0xff]   ;;  %v1065_v60 = vld [vmem:[%s1340_s1 + $0x128] sm:$0xff]   ;;  %v1067_v62 = vld [vmem:[%s1340_s1 + $0x170] sm:$0xff]  }
  0x14   :  { %909 = vmatpush3.bf16.msra.mxu0 %v1025_v18  ;;  %v1062_v57 = vld [vmem:[%s1340_s1 + $0x1a0] sm:$0xff]   ;;  %v1066_v61 = vld [vmem:[%s1340_s1 + $0x1a8] sm:$0xff]   ;;  %v1068_v63 = vld [vmem:[%s1340_s1 + $0x1f0] sm:$0xff]  }
  0x15   :  { %931 = vmatpush3.bf16.msra.mxu1 %v1026_v19  ;;  %910 = vmatprep.subr.bf16.mxu0 %v1027_v20  ;;  %v1069_v0 = vld [vmem:[%s1340_s1 + $0x130] sm:$0xff]   ;;  %v1071_v2 = vld [vmem:[%s1340_s1 + $0x178] sm:$0xff]   ;;  %v1079_v13 = vld [vmem:[%s1342_s3] sm:$0xff]  }
  0x16   :  { %932 = vmatprep.subr.bf16.mxu1 %v1028_v21  ;;  %v1070_v1 = vld [vmem:[%s1340_s1 + $0x1b0] sm:$0xff]   ;;  %v1072_v3 = vld [vmem:[%s1340_s1 + $0x1f8] sm:$0xff]   ;;  %v1080_v14 = vld [vmem:[%s1342_s3 + $0x8] sm:$0xff]  }
  0x17   :  { %v1073_v4 = vld [vmem:[%s1340_s1 + $0x138] sm:$0xff]   ;;  %v23_v6 = vld [vmem:[%s1341_s0 + $0x10] sm:$0xff]  ;;  %v821_v19 = vld [vmem:[%s1343_s2] ss:$0 sm:$0xff] }
  0x18   :  { %911 = vmatpush3.bf16.msra.mxu0 %v1029_v22  ;;  %v1074_v5 = vld [vmem:[%s1340_s1 + $0x1b8] sm:$0xff]   ;;  %v826_v7 = vcombine.low %v23_v6, %v23_v6  ;;  %v827_v8 = vcombine.high %v23_v6, %v23_v6  ;;  %v1081_v15 = vld [vmem:[%s1342_s3 + $0x10] sm:$0xff]  }
  0x19   :  { %933 = vmatpush3.bf16.msra.mxu1 %v1030_v23  ;;  %912 = vmatprep.subr.bf16.mxu0 %v1031_v24  ;;  %v24_v9 = vld [vmem:[%s1341_s0 + $0x18] sm:$0xff] }
  0x1a   :  { %934 = vmatprep.subr.bf16.mxu1 %v1032_v25  ;;  %v828_v10 = vcombine.low %v24_v9, %v24_v9  ;;  %v829_v11 = vcombine.high %v24_v9, %v24_v9  ;;  %v1082_v16 = vld [vmem:[%s1342_s3 + $0x18] sm:$0xff]  }
  0x1c   :  { %913 = vmatpush3.bf16.msra.mxu0 %v1033_v26 }
  0x1d   :  { %935 = vmatpush3.bf16.msra.mxu1 %v1034_v27  ;;  %914 = vmatprep.subr.bf16.mxu0 %v1035_v28 }
  0x1e   :  { %936 = vmatprep.subr.bf16.mxu1 %v1036_v29 }
  0x20   :  { %915 = vmatpush3.bf16.msra.mxu0 %v1037_v30 }
  0x21   :  { %937 = vmatpush3.bf16.msra.mxu1 %v1038_v31  ;;  %944 = vmatprep.subr.bf16.mxu0 %v1043_v38 }
  0x22   :  { %966 = vmatprep.subr.bf16.mxu1 %v1044_v39 }
  0x23   :  { %605 = vmatmul.mubr.bf16.vlgmr.msra.gmra.mrb[0].mxu0 %v822_v34 }
  0x24   :  { %645 = vmatmul.mubr.bf16.vlgmr.msra.gmra.mrb[0].mxu1 %v824_v36  ;;  %945 = vmatpush3.bf16.msra.mxu0 %v1045_v40 }
  0x25   :  { %967 = vmatpush3.bf16.msra.mxu1 %v1046_v41  ;;  %946 = vmatprep.subr.bf16.mxu0 %v1047_v42 }
  0x26   :  { %968 = vmatprep.subr.bf16.mxu1 %v1048_v43  ;;  %684 = vmatprep.mubr.bf16.mxu0 %v827_v8  ;;  %v894_v43 = vld [vmem:[%s1344_s4] ss:$0 sm:$0xff] }
  0x27   :  { %724 = vmatprep.mubr.bf16.mxu1 %v829_v11 }
  0x28   :  { %947 = vmatpush3.bf16.msra.mxu0 %v1049_v44 }
  0x29   :  { %969 = vmatpush3.bf16.msra.mxu1 %v1050_v45  ;;  %948 = vmatprep.subr.bf16.mxu0 %v1051_v46 }
  0x2a   :  { %970 = vmatprep.subr.bf16.mxu1 %v1052_v47 }
  0x2c   :  { %949 = vmatpush3.bf16.msra.mxu0 %v1053_v48 }
  0x2d   :  { %971 = vmatpush3.bf16.msra.mxu1 %v1054_v49  ;;  %950 = vmatprep.subr.bf16.mxu0 %v1055_v50 }
  0x2e   :  { %972 = vmatprep.subr.bf16.mxu1 %v1056_v51 }
  0x30   :  { %951 = vmatpush3.bf16.msra.mxu0 %v1057_v52 }
  0x31   :  { %973 = vmatpush3.bf16.msra.mxu1 %v1058_v53  ;;  %952 = vmatprep.subr.bf16.mxu0 %v1059_v54 }
  0x32   :  { %974 = vmatprep.subr.bf16.mxu1 %v1060_v55 }
  0x34   :  { %953 = vmatpush3.bf16.msra.mxu0 %v1061_v56 }
  0x35   :  { %975 = vmatpush3.bf16.msra.mxu1 %v1062_v57  ;;  %954 = vmatprep.subr.bf16.mxu0 %v1063_v58 }
  0x36   :  { %976 = vmatprep.subr.bf16.mxu1 %v1064_v59 }
  0x38   :  { %955 = vmatpush3.bf16.msra.mxu0 %v1065_v60 }
  0x39   :  { %977 = vmatpush3.bf16.msra.mxu1 %v1066_v61  ;;  %956 = vmatprep.subr.bf16.mxu0 %v1067_v62 }
  0x3a   :  { %978 = vmatprep.subr.bf16.mxu1 %v1068_v63 }
  0x3c   :  { %957 = vmatpush3.bf16.msra.mxu0 %v1069_v0 }
  0x3d   :  { %979 = vmatpush3.bf16.msra.mxu1 %v1070_v1  ;;  %958 = vmatprep.subr.bf16.mxu0 %v1071_v2 }
  0x3e   :  { %980 = vmatprep.subr.bf16.mxu1 %v1072_v3 }
  0x40   :  { %959 = vmatpush3.bf16.msra.mxu0 %v1073_v4 }
  0x41   :  { %981 = vmatpush3.bf16.msra.mxu1 %v1074_v5  ;;  %993 = vmatprep.subr.bf16.mxu0 %v1083_v12 }
  0x43   :  { %685 = vmatmul.mubr.bf16.vlgmr.msra.gmra.mrb[4].mxu0 %v826_v7 }
  0x44   :  { %725 = vmatmul.mubr.bf16.vlgmr.msra.gmra.mrb[4].mxu1 %v828_v10  ;;  %994 = vmatpush3.bf16.msra.mxu0 %v1079_v13 }
  0x45   :  { %995 = vmatprep.subr.bf16.mxu0 %v1083_v12  ;;  %1001 = vmatprep.mubr.msk.bf16.mxu0 %vm1084_vm0, %v1083_v12 }
  0x48   :  { %996 = vmatpush3.bf16.msra.mxu0 %v1080_v14 }
  0x49   :  { %997 = vmatprep.subr.bf16.mxu0 %v1083_v12 }
  0x4c   :  { %998 = vmatpush3.bf16.msra.mxu0 %v1081_v15 }
  0x4d   :  { %999 = vmatprep.subr.bf16.mxu0 %v1083_v12 }
  0x50   :  { %1000 = vmatpush3.bf16.msra.mxu0 %v1082_v16 }
  0xf6   :  { %v916_v17 = vpop.f32.mrb[0].mxu0 }
  0xf7   :  { %v938_v18 = vpop.f32.mrb[0].mxu1  ;;  %v917_v20 = vpop.f32.mrb[1].mxu0 }
  0xf8   :  { %v939_v21 = vpop.f32.mrb[1].mxu1  ;;  %v918_v22 = vadd.f32 %v917_v20, %v916_v17  ;;  %v919_v24 = vpop.f32.mrb[2].mxu0 }
  0xf9   :  { %v940_v23 = vadd.f32 %v939_v21, %v938_v18  ;;  %v941_v25 = vpop.f32.mrb[2].mxu1  ;;  %v920_v26 = vpop.f32.mrb[3].mxu0 }
  0xfa   :  { %v942_v27 = vpop.f32.mrb[3].mxu1  ;;  %v607_v28 = vadd.f32 %v918_v22, %v821_v19 }
  0xfc   :  { %v647_v29 = vadd.f32 %v940_v23, %v607_v28 }
 0x116   :  { %v960_v30 = vpop.f32.mrb[4].mxu0 }
 0x117   :  { %v982_v31 = vpop.f32.mrb[4].mxu1  ;;  %v961_v32 = vpop.f32.mrb[5].mxu0 }
 0x118   :  { %v983_v33 = vpop.f32.mrb[5].mxu1  ;;  %v962_v34 = vadd.f32 %v961_v32, %v960_v30  ;;  %v963_v36 = vpop.f32.mrb[6].mxu0 }
 0x119   :  { %v984_v35 = vadd.f32 %v983_v33, %v982_v31  ;;  %v985_v37 = vpop.f32.mrb[6].mxu1  ;;  %v964_v38 = vpop.f32.mrb[7].mxu0 }
 0x11a   :  { %v986_v39 = vpop.f32.mrb[7].mxu1  ;;  %v687_v40 = vadd.f32 %v962_v34, %v647_v29 }
 0x11c   :  { %v727_v41 = vadd.f32 %v984_v35, %v687_v40 }
 0x11e   :  { %v732_v42 = vpack.c.bf16 %v727_v41, %v727_v41 }
 0x120   :  { %1002 = vmatmul.mubr.msk.bf16.vlgmr.msra.gmra.mrb[8].mxu0 %vm772_vm1, %v732_v42 }
 0x1f3   :  { %v810_v44 = vpop.f32.mrb[8].mxu0 }
 0x1f4   :  { %v811_v45 = vadd.f32 %v894_v43, %v810_v44  ;;  %v1003_v46 = vpop.f32.mrb[9].mxu0 }
 0x1f5   :  { %v813_v47 = vpop.f32.mrb[10].mxu0 }
 0x1f6   :  { %816 = vst [vmem:[%s1345_s5] sm:$0xff] %v811_v45  ;;  %v1004_v48 = vpop.f32.mrb[11].mxu0 }

// kernel: forward.2
= control target key start
LH: loop header
LB: loop body
LE: loop exit
PB: predicated region body
PF: predicated region fallthrough
CT: control target
= control target key end

     0   :  { %s16548_s24 = smov 0   ;;  %s18861_s0 = inlined_call_operand.vmem [shape: bf16[2,1024,128], index: 0, kind: input, shape index: {}]   ;;  %s18862_s1 = inlined_call_operand.vmem [shape: bf16[128,32], index: 1, kind: input, shape index: {}]   ;;  %s18863_s2 = inlined_call_operand.vmem [shape: bf16[25,32,32], index: 2, kind: input, shape index: {}]   ;;  %s18864_s3 = inlined_call_operand.vmem [shape: bf16[25,32,64], index: 3, kind: input, shape index: {}]   ;;  %s18865_s4 = inlined_call_operand.vmem [shape: f32[1,1,32], index: 4, kind: input, shape index: {}]   ;;  %s18866_s5 = inlined_call_operand.vmem [shape: f32[1,1,32], index: 5, kind: input, shape index: {}]   ;;  %s18867_s6 = inlined_call_operand.vmem [shape: f32[1,1,64], index: 6, kind: input, shape index: {}]   ;;  %s18868_s7 = inlined_call_operand.vmem [shape: bf16[2,4,4,64], index: 7, kind: output, shape index: {}]  }
   0x1 LB: > { %s12455_s25 = sadd.s32 4294967295, %s16505_s24   ;;  %p12459_p0 = scmp.ge.s32.totalorder %s16505_s24, 1  ;;  %s16505_s24 = sphi %s16548_s24, %s17_s24  }
   0x2   : > { %p237_p1 = scmp.lt.s32.totalorder %s16505_s24, 3 }
   0x4   : > { %p238_p2 = pnand %p12459_p0, %p237_p1 }
   0x6   : > { %241 = sbr.rel (%p238_p2) target bundleno = 2447 (0x98f), region = 48 }
   0xd   : > { %v16324_v0 = vld [vmem:[%s18862_s1] sm:$0xff]   ;;  %p269_p3 = scmp.lt.s32.totalorder %s12455_s25, 1  ;;  %v16325_v1 = vld [vmem:[%s18862_s1 + $0x8] sm:$0xff]   ;;  %v16326_v2 = vld [vmem:[%s18862_s1 + $0x10] sm:$0xff]   ;;  %vm1465_vm0 = vcmask 261120   ;;  %vm1743_vm1 = vcmask 254976  }
   0xe   : > { %14007 = vmatprep.subr.bf16.mxu0 %v16324_v0  ;;  %v16327_v3 = vld [vmem:[%s18862_s1 + $0x18] sm:$0xff]   ;;  %v16328_v5 = vld [vmem:[%s18862_s1 + $0x20] sm:$0xff]   ;;  %v16329_v6 = vld [vmem:[%s18862_s1 + $0x28] sm:$0xff]   ;;  %v16507_v38 = vmov 0.0   ;;  %vm1730_vm2 = vcmask 257024   ;;  %vm12356_vm3 = vcmask 523264  }
   0xf   : > { %s18947_s25 = smov (!%p269_p3, %s12455_s25), 1  ;;  %14008 = vmatpush3.bf16.msra.mxu0 %v16324_v0  ;;  %v16330_v7 = vld [vmem:[%s18862_s1 + $0x30] sm:$0xff]   ;;  %v16331_v8 = vld [vmem:[%s18862_s1 + $0x38] sm:$0xff]   ;;  %1728 = vst.msk [vmem:[#allocation2] sm:$0xff] %vm1465_vm0, %v16507_v38  ;;  %1729 = vst.msk [vmem:[#allocation2 + $0x8] sm:$0xff] %vm1465_vm0, %v16507_v38  ;;  %vm12395_vm4 = vcmask 517120  }
  0x10   : > { %14009 = vmatprep.subr.bf16.mxu0 %v16325_v1  ;;  %s13333_s9 = sshll.u32 %s18947_s25, 9  ;;  %1732 = vst.msk [vmem:[#allocation2 + $0x18] sm:$0xff] %vm1465_vm0, %v16507_v38  ;;  %1733 = vst.msk [vmem:[#allocation2 + $0x20] sm:$0xff] %vm1465_vm0, %v16507_v38  ;;  %v16396_v42 = vld [vmem:[%s18863_s2 + $0x10] sm:$0xff]   ;;  %v16397_v43 = vld [vmem:[%s18863_s2 + $0x18] sm:$0xff]   ;;  %s13334_s23 = sshll.u32 %s18947_s25, 3 }
  0x11   : > { %s16571_s12 = scalar_lea.vmem %s18861_s0, %s13333_s9  ;;  %1736 = vst.msk [vmem:[#allocation2 + $0x1b0] sm:$0xff] %vm1465_vm0, %v16507_v38  ;;  %1737 = vst.msk [vmem:[#allocation2 + $0x1b8] sm:$0xff] %vm1465_vm0, %v16507_v38  ;;  %v16398_v50 = vld [vmem:[%s18863_s2 + $0x70] sm:$0xff]   ;;  %v16399_v51 = vld [vmem:[%s18863_s2 + $0x78] sm:$0xff]   ;;  %s278_s29 = scalar_lea.vmem %s18868_s7, %s13334_s23 }
  0x12   : > { %v16332_v4 = vld [vmem:[%s16571_s12] sm:$0xff]   ;;  %v16333_v9 = vld [vmem:[%s16571_s12 + $0x8] sm:$0xff]   ;;  %v16334_v10 = vld [vmem:[%s16571_s12 + $0x10] sm:$0xff]   ;;  %1739 = vst.msk [vmem:[#allocation2 + $0x1c8] sm:$0xff] %vm1465_vm0, %v16507_v38  ;;  %15351 = vmatprep.subr.bf16.mxu1 %v16398_v50 }
  0x13   : > { %14010 = vmatpush3.bf16.msra.mxu0 %v16325_v1  ;;  %14023 = vmatprep.mubr.bf16.mxu0 %v16332_v4  ;;  %v16335_v11 = vld [vmem:[%s16571_s12 + $0x18] sm:$0xff]   ;;  %v16336_v12 = vld [vmem:[%s16571_s12 + $0x20] sm:$0xff]   ;;  %v16337_v13 = vld [vmem:[%s16571_s12 + $0x28] sm:$0xff]   ;;  %1740 = vst.msk [vmem:[#allocation2 + $0x1d0] sm:$0xff] %vm1465_vm0, %v16507_v38 }
  0x14   : > { %14011 = vmatprep.subr.bf16.mxu0 %v16326_v2  ;;  %v16338_v14 = vld [vmem:[%s16571_s12 + $0x30] sm:$0xff]   ;;  %v16339_v15 = vld [vmem:[%s16571_s12 + $0x38] sm:$0xff]   ;;  %v16340_v16 = vld [vmem:[%s16571_s12 + $0x40] sm:$0xff]   ;;  %9482 = vst.msk [vmem:[#allocation3] sm:$0xff] %vm1465_vm0, %v16507_v38  ;;  %15353 = vmatpush3.bf16.msra.mxu1 %v16398_v50 }
  0x15   : > { %v16341_v17 = vld [vmem:[%s16571_s12 + $0x48] sm:$0xff]   ;;  %v16342_v18 = vld [vmem:[%s16571_s12 + $0x50] sm:$0xff]   ;;  %v16343_v19 = vld [vmem:[%s16571_s12 + $0x58] sm:$0xff]   ;;  %9484 = vst.msk [vmem:[#allocation3 + $0x10] sm:$0xff] %vm1465_vm0, %v16507_v38  ;;  %15352 = vmatprep.subr.bf16.mxu1 %v16399_v51 }
  0x16   : > { %v16344_v20 = vld [vmem:[%s16571_s12 + $0x60] sm:$0xff]   ;;  %v16345_v21 = vld [vmem:[%s16571_s12 + $0x68] sm:$0xff]   ;;  %v16346_v22 = vld [vmem:[%s16571_s12 + $0x70] sm:$0xff]   ;;  %9487 = vst.msk [vmem:[#allocation3 + $0xa0] sm:$0xff] %vm1465_vm0, %v16507_v38 }
  0x17   : > { %14012 = vmatpush3.bf16.msra.mxu0 %v16326_v2  ;;  %v16347_v23 = vld [vmem:[%s16571_s12 + $0x78] sm:$0xff]   ;;  %v16348_v24 = vld [vmem:[%s16571_s12 + $0x80] sm:$0xff]   ;;  %v16349_v25 = vld [vmem:[%s16571_s12 + $0x88] sm:$0xff]   ;;  %9489 = vst.msk [vmem:[#allocation3 + $0xb0] sm:$0xff] %vm1465_vm0, %v16507_v38 }
  0x18   : > { %14013 = vmatprep.subr.bf16.mxu0 %v16327_v3  ;;  %v16350_v26 = vld [vmem:[%s16571_s12 + $0x90] sm:$0xff]   ;;  %v16351_v27 = vld [vmem:[%s16571_s12 + $0x98] sm:$0xff]   ;;  %v16352_v28 = vld [vmem:[%s16571_s12 + $0xa0] sm:$0xff]   ;;  %1744 = vst.msk [vmem:[#allocation2 + $0x30] sm:$0x3] %vm1743_vm1, %v16507_v38  ;;  %15354 = vmatpush3.bf16.msra.mxu1 %v16399_v51 }
  0x19   : > { %v16353_v29 = vld [vmem:[%s16571_s12 + $0xa8] sm:$0xff]   ;;  %v16354_v30 = vld [vmem:[%s16571_s12 + $0xb0] sm:$0xff]   ;;  %v16355_v31 = vld [vmem:[%s16571_s12 + $0xb8] sm:$0xff]   ;;  %1745 = vst.msk [vmem:[#allocation2 + $0x48] sm:$0x3] %vm1743_vm1, %v16507_v38 }
  0x1a   : > { %v16356_v32 = vld [vmem:[%s16571_s12 + $0xc0] sm:$0xff]   ;;  %v16357_v33 = vld [vmem:[%s16571_s12 + $0xc8] sm:$0xff]   ;;  %v16358_v34 = vld [vmem:[%s16571_s12 + $0xd0] sm:$0xff]   ;;  %1746 = vst.msk [vmem:[#allocation2 + $0x60] sm:$0x3] %vm1743_vm1, %v16507_v38 }
  0x1b   : > { %14014 = vmatpush3.bf16.msra.mxu0 %v16327_v3  ;;  %v16359_v35 = vld [vmem:[%s16571_s12 + $0xd8] sm:$0xff]   ;;  %v16360_v36 = vld [vmem:[%s16571_s12 + $0xe0] sm:$0xff]   ;;  %v16361_v37 = vld [vmem:[%s16571_s12 + $0xe8] sm:$0xff]   ;;  %1747 = vst.msk [vmem:[#allocation2 + $0x78] sm:$0x3] %vm1743_vm1, %v16507_v38 }
  0x1c   : > { %14015 = vmatprep.subr.bf16.mxu0 %v16328_v5  ;;  %1748 = vst.msk [vmem:[#allocation2 + $0x90] sm:$0x3] %vm1743_vm1, %v16507_v38  ;;  %1749 = vst.msk [vmem:[#allocation2 + $0xa8] sm:$0x3] %vm1743_vm1, %v16507_v38  ;;  %v16362_v39 = vld [vmem:[%s16571_s12 + $0xf0] sm:$0xff]   ;;  %v16363_v40 = vld [vmem:[%s16571_s12 + $0xf8] sm:$0xff]  }
  0x1d   : > { %1750 = vst.msk [vmem:[#allocation2 + $0xc0] sm:$0x3] %vm1743_vm1, %v16507_v38  ;;  %1751 = vst.msk [vmem:[#allocation2 + $0xd8] sm:$0x3] %vm1743_vm1, %v16507_v38  ;;  %v16364_v41 = vld [vmem:[%s16571_s12 + $0x100] sm:$0xff]   ;;  %v16365_v44 = vld [vmem:[%s16571_s12 + $0x108] sm:$0xff]  }
  0x1e   : > { %1752 = vst.msk [vmem:[#allocation2 + $0xf0] sm:$0x3] %vm1743_vm1, %v16507_v38  ;;  %1753 = vst.msk [vmem:[#allocation2 + $0x108] sm:$0x3] %vm1743_vm1, %v16507_v38  ;;  %v16366_v45 = vld [vmem:[%s16571_s12 + $0x110] sm:$0xff]   ;;  %v16367_v46 = vld [vmem:[%s16571_s12 + $0x118] sm:$0xff]  }
  0x1f   : > { %14016 = vmatpush3.bf16.msra.mxu0 %v16328_v5  ;;  %1754 = vst.msk [vmem:[#allocation2 + $0x120] sm:$0x3] %vm1743_vm1, %v16507_v38  ;;  %1755 = vst.msk [vmem:[#allocation2 + $0x138] sm:$0x3] %vm1743_vm1, %v16507_v38  ;;  %v16368_v47 = vld [vmem:[%s16571_s12 + $0x120] sm:$0xff]   ;;  %v16369_v48 = vld [vmem:[%s16571_s12 + $0x128] sm:$0xff]  }
  0x20   : > { %14017 = vmatprep.subr.bf16.mxu0 %v16329_v6  ;;  %1756 = vst.msk [vmem:[#allocation2 + $0x150] sm:$0x3] %vm1743_vm1, %v16507_v38  ;;  %1757 = vst.msk [vmem:[#allocation2 + $0x168] sm:$0x3] %vm1743_vm1, %v16507_v38  ;;  %v16370_v49 = vld [vmem:[%s16571_s12 + $0x130] sm:$0xff]   ;;  %v16371_v52 = vld [vmem:[%s16571_s12 + $0x138] sm:$0xff]  }
  0x21   : > { %1758 = vst.msk [vmem:[#allocation2 + $0x180] sm:$0x3] %vm1743_vm1, %v16507_v38  ;;  %1759 = vst.msk [vmem:[#allocation2 + $0x198] sm:$0x3] %vm1743_vm1, %v16507_v38  ;;  %v16372_v53 = vld [vmem:[%s16571_s12 + $0x140] sm:$0xff]   ;;  %v16373_v54 = vld [vmem:[%s16571_s12 + $0x148] sm:$0xff]  }
  0x22   : > { %1760 = vst.msk [vmem:[#allocation2 + $0x42] sm:$0x3] %vm1743_vm1, %v16507_v38  ;;  %1761 = vst.msk [vmem:[#allocation2 + $0x5a] sm:$0x3] %vm1743_vm1, %v16507_v38  ;;  %v16374_v55 = vld [vmem:[%s16571_s12 + $0x150] sm:$0xff]   ;;  %v16375_v56 = vld [vmem:[%s16571_s12 + $0x158] sm:$0xff]  }
  0x23   : > { %14018 = vmatpush3.bf16.msra.mxu0 %v16329_v6  ;;  %1762 = vst.msk [vmem:[#allocation2 + $0x72] sm:$0x3] %vm1743_vm1, %v16507_v38  ;;  %1763 = vst.msk [vmem:[#allocation2 + $0x8a] sm:$0x3] %vm1743_vm1, %v16507_v38  ;;  %v16376_v57 = vld [vmem:[%s16571_s12 + $0x160] sm:$0xff]   ;;  %v16377_v58 = vld [vmem:[%s16571_s12 + $0x168] sm:$0xff]  }
  0x24   : > { %14019 = vmatprep.subr.bf16.mxu0 %v16330_v7  ;;  %1764 = vst.msk [vmem:[#allocation2 + $0xa2] sm:$0x3] %vm1743_vm1, %v16507_v38  ;;  %1765 = vst.msk [vmem:[#allocation2 + $0xba] sm:$0x3] %vm1743_vm1, %v16507_v38  ;;  %v16378_v59 = vld [vmem:[%s16571_s12 + $0x170] sm:$0xff]   ;;  %v16379_v60 = vld [vmem:[%s16571_s12 + $0x178] sm:$0xff]  }
  0x25   : > { %1766 = vst.msk [vmem:[#allocation2 + $0xd2] sm:$0x3] %vm1743_vm1, %v16507_v38  ;;  %1767 = vst.msk [vmem:[#allocation2 + $0xea] sm:$0x3] %vm1743_vm1, %v16507_v38  ;;  %v16380_v61 = vld [vmem:[%s16571_s12 + $0x180] sm:$0xff]   ;;  %v16381_v62 = vld [vmem:[%s16571_s12 + $0x188] sm:$0xff]  }
  0x26   : > { %1768 = vst.msk [vmem:[#allocation2 + $0x102] sm:$0x3] %vm1743_vm1, %v16507_v38  ;;  %1769 = vst.msk [vmem:[#allocation2 + $0x11a] sm:$0x3] %vm1743_vm1, %v16507_v38  ;;  %v16382_v63 = vld [vmem:[%s16571_s12 + $0x190] sm:$0xff]   ;;  %v16383_v0 = vld [vmem:[%s16571_s12 + $0x198] sm:$0xff]  }
  0x27   : > { %14020 = vmatpush3.bf16.msra.mxu0 %v16330_v7  ;;  %1770 = vst.msk [vmem:[#allocation2 + $0x132] sm:$0x3] %vm1743_vm1, %v16507_v38  ;;  %1771 = vst.msk [vmem:[#allocation2 + $0x14a] sm:$0x3] %vm1743_vm1, %v16507_v38  ;;  %v16384_v1 = vld [vmem:[%s16571_s12 + $0x1a0] sm:$0xff]   ;;  %v16385_v2 = vld [vmem:[%s16571_s12 + $0x1a8] sm:$0xff]  }
  0x28   : > { %14021 = vmatprep.subr.bf16.mxu0 %v16331_v8  ;;  %1772 = vst.msk [vmem:[#allocation2 + $0x162] sm:$0x3] %vm1743_vm1, %v16507_v38  ;;  %1773 = vst.msk [vmem:[#allocation2 + $0x17a] sm:$0x3] %vm1743_vm1, %v16507_v38  ;;  %v16386_v3 = vld [vmem:[%s16571_s12 + $0x1b0] sm:$0xff]   ;;  %v16387_v6 = vld [vmem:[%s16571_s12 + $0x1b8] sm:$0xff]  }
  0x29   : > { %1774 = vst.msk [vmem:[#allocation2 + $0x192] sm:$0x3] %vm1743_vm1, %v16507_v38  ;;  %1775 = vst.msk [vmem:[#allocation2 + $0x1aa] sm:$0x3] %vm1743_vm1, %v16507_v38 }
  0x2a   : > { %9492 = vst.msk [vmem:[#allocation3 + $0x20] sm:$0x3] %vm1743_vm1, %v16507_v38  ;;  %9493 = vst.msk [vmem:[#allocation3 + $0x30] sm:$0x3] %vm1743_vm1, %v16507_v38 }
  0x2b   : > { %14022 = vmatpush3.bf16.msra.mxu0 %v16331_v8  ;;  %9494 = vst.msk [vmem:[#allocation3 + $0x40] sm:$0x3] %vm1743_vm1, %v16507_v38  ;;  %9495 = vst.msk [vmem:[#allocation3 + $0x50] sm:$0x3] %vm1743_vm1, %v16507_v38  ;;  %v16388_v8 = vld [vmem:[%s16571_s12 + $0x1c0] sm:$0xff]  }
  0x2c   : > { %9496 = vst.msk [vmem:[#allocation3 + $0x60] sm:$0x3] %vm1743_vm1, %v16507_v38  ;;  %9497 = vst.msk [vmem:[#allocation3 + $0x70] sm:$0x3] %vm1743_vm1, %v16507_v38  ;;  %14151 = vmatprep.subr.bf16.mxu0 %v16396_v42 }
  0x2d   : > { %9498 = vst.msk [vmem:[#allocation3 + $0x80] sm:$0x3] %vm1743_vm1, %v16507_v38  ;;  %9499 = vst.msk [vmem:[#allocation3 + $0x90] sm:$0x3] %vm1743_vm1, %v16507_v38 }
  0x2e   : > { %14024 = vmatmul.mubr.bf16.vlgmr.msra.gmra.mrb[0].mxu0 %v16333_v9  ;;  %9500 = vst.msk [vmem:[#allocation3 + $0x2a] sm:$0x3] %vm1743_vm1, %v16507_v38  ;;  %9501 = vst.msk [vmem:[#allocation3 + $0x3a] sm:$0x3] %vm1743_vm1, %v16507_v38 }
  0x2f   : > { %14027 = vmatprep.mubr.bf16.mxu0 %v16334_v10  ;;  %9502 = vst.msk [vmem:[#allocation3 + $0x4a] sm:$0x3] %vm1743_vm1, %v16507_v38  ;;  %9503 = vst.msk [vmem:[#allocation3 + $0x5a] sm:$0x3] %vm1743_vm1, %v16507_v38  ;;  %14152 = vmatpush3.bf16.msra.mxu0 %v16396_v42 }
  0x30   : > { %9504 = vst.msk [vmem:[#allocation3 + $0x6a] sm:$0x3] %vm1743_vm1, %v16507_v38  ;;  %9505 = vst.msk [vmem:[#allocation3 + $0x7a] sm:$0x3] %vm1743_vm1, %v16507_v38  ;;  %14153 = vmatprep.subr.bf16.mxu0 %v16397_v43 }
  0x31   : > { %9506 = vst.msk [vmem:[#allocation3 + $0x8a] sm:$0x3] %vm1743_vm1, %v16507_v38  ;;  %9507 = vst.msk [vmem:[#allocation3 + $0x9a] sm:$0x3] %vm1743_vm1, %v16507_v38 }
  0x32   : > { %1731 = vst.msk [vmem:[#allocation2 + $0x10] sm:$0xf] %vm1730_vm2, %v16507_v38  ;;  %1734 = vst.msk [vmem:[#allocation2 + $0x28] sm:$0xf] %vm1730_vm2, %v16507_v38 }
  0x33   : > { %1738 = vst.msk [vmem:[#allocation2 + $0x1c0] sm:$0xf] %vm1730_vm2, %v16507_v38  ;;  %1741 = vst.msk [vmem:[#allocation2 + $0x1d8] sm:$0xf] %vm1730_vm2, %v16507_v38  ;;  %14154 = vmatpush3.bf16.msra.mxu0 %v16397_v43 }
  0x34   : > { %9483 = vst.msk [vmem:[#allocation3 + $0x8] sm:$0xf] %vm1730_vm2, %v16507_v38  ;;  %9485 = vst.msk [vmem:[#allocation3 + $0x18] sm:$0xf] %vm1730_vm2, %v16507_v38 }
  0x35   : > { %9488 = vst.msk [vmem:[#allocation3 + $0xa8] sm:$0xf] %vm1730_vm2, %v16507_v38  ;;  %9490 = vst.msk [vmem:[#allocation3 + $0xb8] sm:$0xf] %vm1730_vm2, %v16507_v38  ;;  %v16393_v38 = vld [vmem:[%s16571_s12 + $0x1e8] sm:$0xff]  }
  0x36   : > { %14028 = vmatmul.mubr.bf16.gmra.mrb[4].mxu0 %v16335_v11 }
  0x37   : > { %14031 = vmatprep.mubr.bf16.mxu0 %v16336_v12 }
  0x3e   : > { %14032 = vmatmul.mubr.bf16.gmra.mrb[8].mxu0 %v16337_v13  ;;  %v16389_v13 = vld [vmem:[%s16571_s12 + $0x1c8] sm:$0xff]  }
  0x3f   : > { %14035 = vmatprep.mubr.bf16.mxu0 %v16338_v14 }
  0x46   : > { %14036 = vmatmul.mubr.bf16.gmra.mrb[12].mxu0 %v16339_v15 }
  0x47   : > { %14039 = vmatprep.mubr.bf16.mxu0 %v16340_v16  ;;  %v16390_v16 = vld [vmem:[%s16571_s12 + $0x1d0] sm:$0xff]  }
  0x4e   : > { %14040 = vmatmul.mubr.bf16.gmra.mrb[16].mxu0 %v16341_v17 }
  0x4f   : > { %14043 = vmatprep.mubr.bf16.mxu0 %v16342_v18 }
  0x56   : > { %14044 = vmatmul.mubr.bf16.gmra.mrb[20].mxu0 %v16343_v19 }
  0x57   : > { %14047 = vmatprep.mubr.bf16.mxu0 %v16344_v20 }
  0x5e   : > { %14048 = vmatmul.mubr.bf16.gmra.mrb[24].mxu0 %v16345_v21 }
  0x5f   : > { %14051 = vmatprep.mubr.bf16.mxu0 %v16346_v22  ;;  %v16391_v22 = vld [vmem:[%s16571_s12 + $0x1d8] sm:$0xff]  }
  0x66   : > { %14052 = vmatmul.mubr.bf16.gmra.mrb[28].mxu0 %v16347_v23 }
  0x67   : > { %14055 = vmatprep.mubr.bf16.mxu0 %v16348_v24  ;;  %v16392_v24 = vld [vmem:[%s16571_s12 + $0x1e0] sm:$0xff]  }
  0x6e   : > { %14056 = vmatmul.mubr.bf16.gmra.mrb[32].mxu0 %v16349_v25 }
  0x6f   : > { %14059 = vmatprep.mubr.bf16.mxu0 %v16350_v26 }
  0x76   : > { %14060 = vmatmul.mubr.bf16.gmra.mrb[36].mxu0 %v16351_v27 }
  0x77   : > { %14063 = vmatprep.mubr.bf16.mxu0 %v16352_v28  ;;  %v16796_v28 = vld [vmem:[%s18865_s4] ss:$0 sm:$0xff] }
  0x7e   : > { %14064 = vmatmul.mubr.bf16.gmra.mrb[40].mxu0 %v16353_v29 }
  0x7f   : > { %14067 = vmatprep.mubr.bf16.mxu0 %v16354_v30 }
  0x86   : > { %14068 = vmatmul.mubr.bf16.gmra.mrb[44].mxu0 %v16355_v31 }
  0x87   : > { %14071 = vmatprep.mubr.bf16.mxu0 %v16356_v32 }
  0x8e   : > { %14072 = vmatmul.mubr.bf16.gmra.mrb[48].mxu0 %v16357_v33 }
  0x8f   : > { %14075 = vmatprep.mubr.bf16.mxu0 %v16358_v34 }
  0x96   : > { %14076 = vmatmul.mubr.bf16.gmra.mrb[52].mxu0 %v16359_v35 }
  0x97   : > { %14079 = vmatprep.mubr.bf16.mxu0 %v16360_v36 }
  0x9e   : > { %14080 = vmatmul.mubr.bf16.gmra.mrb[56].mxu0 %v16361_v37 }
  0x9f   : > { %14083 = vmatprep.mubr.bf16.mxu0 %v16362_v39 }
  0xa6   : > { %14084 = vmatmul.mubr.bf16.gmra.mrb[60].mxu0 %v16363_v40 }
  0xa7   : > { %14087 = vmatprep.mubr.bf16.mxu0 %v16364_v41  ;;  %v16394_v41 = vld [vmem:[%s16571_s12 + $0x1f0] sm:$0xff]  }
  0xae   : > { %14088 = vmatmul.mubr.bf16.gmra.mrb[64].mxu0 %v16365_v44 }
  0xaf   : > { %14091 = vmatprep.mubr.bf16.mxu0 %v16366_v45  ;;  %v1860_v45 = vld [vmem:[#allocation2 + $0x1] sm:$0xff] }
  0xb6   : > { %14092 = vmatmul.mubr.bf16.gmra.mrb[68].mxu0 %v16367_v46  ;;  %v1861_v46 = vld [vmem:[#allocation2 + $0x9] sm:$0xff] }
  0xb7   : > { %14095 = vmatprep.mubr.bf16.mxu0 %v16368_v47  ;;  %v1892_v51 = vpack.c.bf16 %v1861_v46, %v1860_v45 }
  0xbe   : > { %14096 = vmatmul.mubr.bf16.gmra.mrb[72].mxu0 %v16369_v48 }
  0xbf   : > { %14099 = vmatprep.mubr.bf16.mxu0 %v16370_v49  ;;  %v16395_v49 = vld [vmem:[%s16571_s12 + $0x1f8] sm:$0xff]  }
  0xc6   : > { %14100 = vmatmul.mubr.bf16.gmra.mrb[76].mxu0 %v16371_v52 }
  0xc7   : > { %14103 = vmatprep.mubr.bf16.mxu0 %v16372_v53 }
  0xce   : > { %14104 = vmatmul.mubr.bf16.gmra.mrb[80].mxu0 %v16373_v54 }
  0xcf   : > { %14107 = vmatprep.mubr.bf16.mxu0 %v16374_v55 }
  0xd6   : > { %14108 = vmatmul.mubr.bf16.gmra.mrb[84].mxu0 %v16375_v56 }
  0xd7   : > { %14111 = vmatprep.mubr.bf16.mxu0 %v16376_v57 }
  0xde   : > { %14112 = vmatmul.mubr.bf16.gmra.mrb[88].mxu0 %v16377_v58 }
  0xdf   : > { %14115 = vmatprep.mubr.bf16.mxu0 %v16378_v59  ;;  %v1862_v59 = vld [vmem:[#allocation2 + $0x19] sm:$0xff] }
  0xe6   : > { %14116 = vmatmul.mubr.bf16.gmra.mrb[92].mxu0 %v16379_v60  ;;  %v1863_v60 = vld [vmem:[#allocation2 + $0x21] sm:$0xff] }
  0xe7   : > { %14119 = vmatprep.mubr.bf16.mxu0 %v16380_v61 }
  0xee   : > { %14120 = vmatmul.mubr.bf16.gmra.mrb[96].mxu0 %v16381_v62 }
  0xef   : > { %14123 = vmatprep.mubr.bf16.mxu0 %v16382_v63 }
  0xf6   : > { %14124 = vmatmul.mubr.bf16.gmra.mrb[100].mxu0 %v16383_v0 }
  0xf7   : > { %14127 = vmatprep.mubr.bf16.mxu0 %v16384_v1 }
  0xfe   : > { %14128 = vmatmul.mubr.bf16.gmra.mrb[104].mxu0 %v16385_v2  ;;  %v1893_v2 = vpack.c.bf16 %v1863_v60, %v1862_v59 }
  0xff   : > { %14131 = vmatprep.mubr.bf16.mxu0 %v16386_v3 }
 0x101   : > { %v14025_v4 = vpop.f32.mrb[0].mxu0 }
 0x102   : > { %v890_v5 = vpop.f32.mrb[1].mxu0 }
 0x103   : > { %v14026_v7 = vpop.f32.mrb[2].mxu0 }
 0x104   : > { %v893_v9 = vpop.f32.mrb[3].mxu0 }
 0x106   : > { %14132 = vmatmul.mubr.bf16.gmra.mrb[108].mxu0 %v16387_v6 }
 0x107   : > { %14135 = vmatprep.mubr.bf16.mxu0 %v16388_v8 }
 0x109   : > { %v14029_v10 = vpop.f32.mrb[4].mxu0 }
 0x10a   : > { %v1403_v11 = vmax.f32 %v14025_v4, %v14029_v10  ;;  %v906_v12 = vpop.f32.mrb[5].mxu0 }
 0x10b   : > { %v1401_v14 = vmax.f32 %v890_v5, %v906_v12  ;;  %v14030_v15 = vpop.f32.mrb[6].mxu0 }
 0x10c   : > { %1468 = vst.msk [vmem:[#allocation4 + $0x10] sm:$0xff] %vm1465_vm0, %v1403_v11  ;;  %v1404_v17 = vmax.f32 %v14026_v7, %v14030_v15  ;;  %v909_v18 = vpop.f32.mrb[7].mxu0 }
 0x10d   : > { %1466 = vst.msk [vmem:[#allocation4] sm:$0xff] %vm1465_vm0, %v1401_v14  ;;  %v1402_v19 = vmax.f32 %v893_v9, %v909_v18 }
 0x10e   : > { %1469 = vst.msk [vmem:[#allocation4 + $0x18] sm:$0xff] %vm1465_vm0, %v1404_v17  ;;  %14136 = vmatmul.mubr.bf16.gmra.mrb[112].mxu0 %v16389_v13 }
 0x10f   : > { %1467 = vst.msk [vmem:[#allocation4 + $0x8] sm:$0xff] %vm1465_vm0, %v1402_v19  ;;  %14139 = vmatprep.mubr.bf16.mxu0 %v16390_v16 }
 0x111   : > { %v14033_v20 = vpop.f32.mrb[8].mxu0 }
 0x112   : > { %v922_v21 = vpop.f32.mrb[9].mxu0 }
 0x113   : > { %v14034_v23 = vpop.f32.mrb[10].mxu0 }
 0x114   : > { %v925_v25 = vpop.f32.mrb[11].mxu0 }
 0x115   : > { %v1532_v26 = vld [vmem:[#allocation4 + $0x10] ss:$2 sm:$0xff]  ;;  %v1596_v27 = vld [vmem:[#allocation4 + $0x11] ss:$2 sm:$0xff] }
 0x116   : > { %v1658_v29 = vmax.f32 %v1532_v26, %v1596_v27  ;;  %v1530_v30 = vld [vmem:[#allocation4] ss:$2 sm:$0xff]  ;;  %v1594_v31 = vld [vmem:[#allocation4 + $0x1] ss:$2 sm:$0xff]  ;;  %14140 = vmatmul.mubr.bf16.gmra.mrb[116].mxu0 %v16391_v22 }
 0x117   : > { %v1657_v32 = vmax.f32 %v1530_v30, %v1594_v31  ;;  %14143 = vmatprep.mubr.bf16.mxu0 %v16392_v24 }
 0x118   : > { %v1697_v33 = vadd.f32 %v16796_v28, %v1658_v29 }
 0x119   : > { %v1696_v34 = vadd.f32 %v16796_v28, %v1657_v32  ;;  %v14037_v35 = vpop.f32.mrb[12].mxu0 }
 0x11a   : > { %1777 = vst.msk [vmem:[#allocation2 + $0x3a] sm:$0xff] %vm1465_vm0, %v1697_v33  ;;  %v1407_v36 = vmax.f32 %v14033_v20, %v14037_v35  ;;  %v938_v37 = vpop.f32.mrb[13].mxu0 }
 0x11b   : > { %1776 = vst.msk [vmem:[#allocation2 + $0x32] sm:$0xff] %vm1465_vm0, %v1696_v34  ;;  %v1405_v39 = vmax.f32 %v922_v21, %v938_v37  ;;  %v14038_v40 = vpop.f32.mrb[14].mxu0 }
 0x11c   : > { %1472 = vst.msk [vmem:[#allocation4 + $0x30] sm:$0xff] %vm1465_vm0, %v1407_v36  ;;  %v1408_v42 = vmax.f32 %v14034_v23, %v14038_v40  ;;  %v941_v43 = vpop.f32.mrb[15].mxu0 }
 0x11d   : > { %1470 = vst.msk [vmem:[#allocation4 + $0x20] sm:$0xff] %vm1465_vm0, %v1405_v39  ;;  %v1406_v44 = vmax.f32 %v925_v25, %v941_v43 }
 0x11e   : > { %1473 = vst.msk [vmem:[#allocation4 + $0x38] sm:$0xff] %vm1465_vm0, %v1408_v42  ;;  %14144 = vmatmul.mubr.bf16.gmra.mrb[120].mxu0 %v16393_v38 }
 0x11f   : > { %1471 = vst.msk [vmem:[#allocation4 + $0x28] sm:$0xff] %vm1465_vm0, %v1406_v44  ;;  %14147 = vmatprep.mubr.bf16.mxu0 %v16394_v41 }
 0x121   : > { %v14041_v47 = vpop.f32.mrb[16].mxu0 }
 0x122   : > { %v954_v48 = vpop.f32.mrb[17].mxu0  ;;  %v1864_v3 = vld [vmem:[#allocation2 + $0x31] sm:$0xff]  ;;  %v1865_v4 = vld [vmem:[#allocation2 + $0x39] sm:$0xff] }
 0x123   : > { %v14042_v50 = vpop.f32.mrb[18].mxu0  ;;  %v1894_v10 = vpack.c.bf16 %v1865_v4, %v1864_v3 }
 0x124   : > { %v957_v52 = vpop.f32.mrb[19].mxu0 }
 0x125   : > { %v1536_v53 = vld [vmem:[#allocation4 + $0x30] ss:$2 sm:$0xff]  ;;  %v1600_v54 = vld [vmem:[#allocation4 + $0x31] ss:$2 sm:$0xff] }
 0x126   : > { %v1660_v55 = vmax.f32 %v1536_v53, %v1600_v54  ;;  %v1534_v56 = vld [vmem:[#allocation4 + $0x20] ss:$2 sm:$0xff]  ;;  %v1598_v57 = vld [vmem:[#allocation4 + $0x21] ss:$2 sm:$0xff]  ;;  %14148 = vmatmul.mubr.bf16.gmra.mrb[124].mxu0 %v16395_v49 }
 0x127   : > { %v1659_v58 = vmax.f32 %v1534_v56, %v1598_v57  ;;  %14155 = vmatprep.mubr.msk.bf16.mxu0 %vm1465_vm0, %v1892_v51 }
 0x128   : > { %v1699_v61 = vadd.f32 %v16796_v28, %v1660_v55 }
 0x129   : > { %v14045_v62 = vpop.f32.mrb[20].mxu0  ;;  %v1698_v63 = vadd.f32 %v16796_v28, %v1659_v58 }
 0x12a   : > { %v1411_v0 = vmax.f32 %v14041_v47, %v14045_v62  ;;  %v970_v1 = vpop.f32.mrb[21].mxu0  ;;  %1779 = vst.msk [vmem:[#allocation2 + $0x52] sm:$0xff] %vm1465_vm0, %v1699_v61 }
 0x12b   : > { %v1409_v5 = vmax.f32 %v954_v48, %v970_v1  ;;  %v14046_v6 = vpop.f32.mrb[22].mxu0  ;;  %1778 = vst.msk [vmem:[#allocation2 + $0x4a] sm:$0xff] %vm1465_vm0, %v1698_v63 }
 0x12c   : > { %1476 = vst.msk [vmem:[#allocation4 + $0x50] sm:$0xff] %vm1465_vm0, %v1411_v0  ;;  %v1412_v7 = vmax.f32 %v14042_v50, %v14046_v6  ;;  %v973_v8 = vpop.f32.mrb[23].mxu0 }
 0x12d   : > { %1474 = vst.msk [vmem:[#allocation4 + $0x40] sm:$0xff] %vm1465_vm0, %v1409_v5  ;;  %v1410_v9 = vmax.f32 %v957_v52, %v973_v8 }
 0x12e   : > { %1477 = vst.msk [vmem:[#allocation4 + $0x58] sm:$0xff] %vm1465_vm0, %v1412_v7  ;;  %14156 = vmatmul.mubr.msk.bf16.vlgmr.msra.gmra.mrb[128].mxu0 %vm1465_vm0, %v1893_v2 }
 0x12f   : > { %1475 = vst.msk [vmem:[#allocation4 + $0x48] sm:$0xff] %vm1465_vm0, %v1410_v9  ;;  %14159 = vmatprep.mubr.msk.bf16.mxu0 %vm1465_vm0, %v1894_v10 }
 0x131   : > { %v14049_v11 = vpop.f32.mrb[24].mxu0  ;;  %v3891_v12 = vld [vmem:[#allocation2 + $0x52] sm:$0xff] }
 0x132   : > { %v986_v13 = vpop.f32.mrb[25].mxu0  ;;  %v3890_v14 = vld [vmem:[#allocation2 + $0x4a] sm:$0xff] }
 0x133   : > { %v1866_v15 = vld [vmem:[#allocation2 + $0x49] sm:$0xff]  ;;  %v1867_v16 = vld [vmem:[#allocation2 + $0x51] sm:$0xff]  ;;  %v14050_v17 = vpop.f32.mrb[26].mxu0  ;;  %v3920_v18 = vpack.c.bf16 %v3891_v12, %v3890_v14 }
 0x134   : > { %v1895_v19 = vpack.c.bf16 %v1867_v16, %v1866_v15  ;;  %v989_v20 = vpop.f32.mrb[27].mxu0 }
 0x135   : > { %v1540_v21 = vld [vmem:[#allocation4 + $0x50] ss:$2 sm:$0xff]  ;;  %v1604_v22 = vld [vmem:[#allocation4 + $0x51] ss:$2 sm:$0xff]  ;;  %14411 = vmatprep.mubr.msk.bf16.mxu1 %vm1465_vm0, %v3920_v18 }
 0x136   : > { %v1662_v23 = vmax.f32 %v1540_v21, %v1604_v22  ;;  %v1538_v24 = vld [vmem:[#allocation4 + $0x40] ss:$2 sm:$0xff]  ;;  %v1602_v25 = vld [vmem:[#allocation4 + $0x41] ss:$2 sm:$0xff]  ;;  %14160 = vmatmul.mubr.msk.bf16.gmra.mrb[132].mxu0 %vm1465_vm0, %v1895_v19 }
 0x137   : > { %v1661_v26 = vmax.f32 %v1538_v24, %v1602_v25 }
 0x138   : > { %v1701_v27 = vadd.f32 %v16796_v28, %v1662_v23  ;;  %v16400_v23 = vld [vmem:[%s18863_s2 + $0x80] sm:$0xff]  }
 0x139   : > { %v1700_v29 = vadd.f32 %v16796_v28, %v1661_v26  ;;  %v14053_v30 = vpop.f32.mrb[28].mxu0  ;;  %14439 = vmatprep.subr.bf16.mxu1 %v16400_v23 }
 0x13a   : > { %1781 = vst.msk [vmem:[#allocation2 + $0x6a] sm:$0xff] %vm1465_vm0, %v1701_v27  ;;  %v1415_v31 = vmax.f32 %v14049_v11, %v14053_v30  ;;  %v1002_v32 = vpop.f32.mrb[29].mxu0 }
 0x13b   : > { %1780 = vst.msk [vmem:[#allocation2 + $0x62] sm:$0xff] %vm1465_vm0, %v1700_v29  ;;  %v1413_v33 = vmax.f32 %v986_v13, %v1002_v32  ;;  %v14054_v34 = vpop.f32.mrb[30].mxu0 }
 0x13c   : > { %1480 = vst.msk [vmem:[#allocation4 + $0x70] sm:$0xff] %vm1465_vm0, %v1415_v31  ;;  %v1416_v35 = vmax.f32 %v14050_v17, %v14054_v34  ;;  %v1005_v36 = vpop.f32.mrb[31].mxu0 }
 0x13d   : > { %1478 = vst.msk [vmem:[#allocation4 + $0x60] sm:$0xff] %vm1465_vm0, %v1413_v33  ;;  %v1414_v37 = vmax.f32 %v989_v20, %v1005_v36 }
 0x13e   : > { %1481 = vst.msk [vmem:[#allocation4 + $0x78] sm:$0xff] %vm1465_vm0, %v1416_v35 }
 0x13f   : > { %1479 = vst.msk [vmem:[#allocation4 + $0x68] sm:$0xff] %vm1465_vm0, %v1414_v37 }
 0x141   : > { %v14057_v38 = vpop.f32.mrb[32].mxu0  ;;  %v3893_v39 = vld [vmem:[#allocation2 + $0x6a] sm:$0xff] }
 0x142   : > { %v1018_v40 = vpop.f32.mrb[33].mxu0  ;;  %v1868_v41 = vld [vmem:[#allocation2 + $0x61] sm:$0xff]  ;;  %v1869_v42 = vld [vmem:[#allocation2 + $0x69] sm:$0xff] }
 0x143   : > { %v3892_v43 = vld [vmem:[#allocation2 + $0x62] sm:$0xff]  ;;  %v14058_v44 = vpop.f32.mrb[34].mxu0  ;;  %v1896_v45 = vpack.c.bf16 %v1869_v42, %v1868_v41 }
 0x144   : > { %v3921_v46 = vpack.c.bf16 %v3893_v39, %v3892_v43  ;;  %v1021_v47 = vpop.f32.mrb[35].mxu0 }
 0x145   : > { %v1544_v48 = vld [vmem:[#allocation4 + $0x70] ss:$2 sm:$0xff]  ;;  %v1608_v49 = vld [vmem:[#allocation4 + $0x71] ss:$2 sm:$0xff]  ;;  %14163 = vmatprep.mubr.msk.bf16.mxu0 %vm1465_vm0, %v1896_v45 }
 0x146   : > { %14412 = vmatmul.mubr.msk.bf16.vlgmr.msra.gmra.mrb[0].mxu1 %vm1465_vm0, %v3921_v46  ;;  %v1664_v50 = vmax.f32 %v1544_v48, %v1608_v49  ;;  %v1542_v51 = vld [vmem:[#allocation4 + $0x60] ss:$2 sm:$0xff]  ;;  %v1606_v52 = vld [vmem:[#allocation4 + $0x61] ss:$2 sm:$0xff] }
 0x147   : > { %v1663_v53 = vmax.f32 %v1542_v51, %v1606_v52  ;;  %14440 = vmatpush3.bf16.msra.mxu1 %v16400_v23 }
 0x148   : > { %v1703_v54 = vadd.f32 %v16796_v28, %v1664_v50 }
 0x149   : > { %v1702_v55 = vadd.f32 %v16796_v28, %v1663_v53  ;;  %v14061_v56 = vpop.f32.mrb[36].mxu0 }
 0x14a   : > { %1783 = vst.msk [vmem:[#allocation2 + $0x82] sm:$0xff] %vm1465_vm0, %v1703_v54  ;;  %v1419_v57 = vmax.f32 %v14057_v38, %v14061_v56  ;;  %v1034_v58 = vpop.f32.mrb[37].mxu0 }
 0x14b   : > { %1782 = vst.msk [vmem:[#allocation2 + $0x7a] sm:$0xff] %vm1465_vm0, %v1702_v55  ;;  %v1417_v59 = vmax.f32 %v1018_v40, %v1034_v58  ;;  %v14062_v60 = vpop.f32.mrb[38].mxu0 }
 0x14c   : > { %1484 = vst.msk [vmem:[#allocation4 + $0x90] sm:$0xff] %vm1465_vm0, %v1419_v57  ;;  %v1420_v61 = vmax.f32 %v14058_v44, %v14062_v60  ;;  %v1037_v62 = vpop.f32.mrb[39].mxu0 }
 0x14d   : > { %1482 = vst.msk [vmem:[#allocation4 + $0x80] sm:$0xff] %vm1465_vm0, %v1417_v59  ;;  %v1418_v63 = vmax.f32 %v1021_v47, %v1037_v62 }
 0x14e   : > { %1485 = vst.msk [vmem:[#allocation4 + $0x98] sm:$0xff] %vm1465_vm0, %v1420_v61 }
 0x14f   : > { %1483 = vst.msk [vmem:[#allocation4 + $0x88] sm:$0xff] %vm1465_vm0, %v1418_v63  ;;  %v16402_v63 = vld [vmem:[%s18863_s2] sm:$0xff]  }
 0x150   : > { %14187 = vmatprep.subr.bf16.mxu0 %v16402_v63 }
 0x151   : > { %v14065_v0 = vpop.f32.mrb[40].mxu0  ;;  %v3895_v1 = vld [vmem:[#allocation2 + $0x82] sm:$0xff]  ;;  %14188 = vmatpush3.bf16.msra.mxu0 %v16402_v63 }
 0x152   : > { %v1050_v2 = vpop.f32.mrb[41].mxu0  ;;  %v1870_v3 = vld [vmem:[#allocation2 + $0x79] sm:$0xff]  ;;  %v1871_v4 = vld [vmem:[#allocation2 + $0x81] sm:$0xff] }
 0x153   : > { %v3894_v5 = vld [vmem:[#allocation2 + $0x7a] sm:$0xff]  ;;  %v14066_v6 = vpop.f32.mrb[42].mxu0  ;;  %v1897_v7 = vpack.c.bf16 %v1871_v4, %v1870_v3 }
 0x154   : > { %v3922_v8 = vpack.c.bf16 %v3895_v1, %v3894_v5  ;;  %v1053_v9 = vpop.f32.mrb[43].mxu0 }
 0x155   : > { %v1548_v10 = vld [vmem:[#allocation4 + $0x90] ss:$2 sm:$0xff]  ;;  %v1612_v11 = vld [vmem:[#allocation4 + $0x91] ss:$2 sm:$0xff]  ;;  %14164 = vmatmul.mubr.msk.bf16.gmra.mrb[136].mxu0 %vm1465_vm0, %v1897_v7  ;;  %v16403_v7 = vld [vmem:[%s18863_s2 + $0x8] sm:$0xff]  }
 0x156   : > { %14415 = vmatprep.mubr.msk.bf16.mxu1 %vm1465_vm0, %v3922_v8  ;;  %v1666_v12 = vmax.f32 %v1548_v10, %v1612_v11  ;;  %v1546_v13 = vld [vmem:[#allocation4 + $0x80] ss:$2 sm:$0xff]  ;;  %v1610_v14 = vld [vmem:[#allocation4 + $0x81] ss:$2 sm:$0xff]  ;;  %14189 = vmatprep.subr.bf16.mxu0 %v16403_v7 }
 0x157   : > { %v1665_v15 = vmax.f32 %v1546_v13, %v1610_v14  ;;  %14190 = vmatpush3.bf16.msra.mxu0 %v16403_v7 }
 0x158   : > { %v1705_v16 = vadd.f32 %v16796_v28, %v1666_v12 }
 0x159   : > { %v1704_v17 = vadd.f32 %v16796_v28, %v1665_v15  ;;  %v14069_v18 = vpop.f32.mrb[44].mxu0  ;;  %v16401_v15 = vld [vmem:[%s18863_s2 + $0x88] sm:$0xff]  }
 0x15a   : > { %1785 = vst.msk [vmem:[#allocation2 + $0x9a] sm:$0xff] %vm1465_vm0, %v1705_v16  ;;  %v1423_v19 = vmax.f32 %v14065_v0, %v14069_v18  ;;  %v1066_v20 = vpop.f32.mrb[45].mxu0  ;;  %14441 = vmatprep.subr.bf16.mxu1 %v16401_v15 }
 0x15b   : > { %1784 = vst.msk [vmem:[#allocation2 + $0x92] sm:$0xff] %vm1465_vm0, %v1704_v17  ;;  %v1421_v21 = vmax.f32 %v1050_v2, %v1066_v20  ;;  %v14070_v22 = vpop.f32.mrb[46].mxu0  ;;  %14442 = vmatpush3.bf16.msra.mxu1 %v16401_v15 }
 0x15c   : > { %1488 = vst.msk [vmem:[#allocation4 + $0xb0] sm:$0xff] %vm1465_vm0, %v1423_v19  ;;  %v1424_v24 = vmax.f32 %v14066_v6, %v14070_v22  ;;  %v1069_v25 = vpop.f32.mrb[47].mxu0 }
 0x15d   : > { %1486 = vst.msk [vmem:[#allocation4 + $0xa0] sm:$0xff] %vm1465_vm0, %v1421_v21  ;;  %v1422_v26 = vmax.f32 %v1053_v9, %v1069_v25 }
 0x15e   : > { %1489 = vst.msk [vmem:[#allocation4 + $0xb8] sm:$0xff] %vm1465_vm0, %v1424_v24 }
 0x15f   : > { %1487 = vst.msk [vmem:[#allocation4 + $0xa8] sm:$0xff] %vm1465_vm0, %v1422_v26 }
 0x161   : > { %v14073_v27 = vpop.f32.mrb[48].mxu0  ;;  %v3897_v29 = vld [vmem:[#allocation2 + $0x9a] sm:$0xff] }
 0x162   : > { %v1082_v30 = vpop.f32.mrb[49].mxu0  ;;  %v1872_v31 = vld [vmem:[#allocation2 + $0x91] sm:$0xff]  ;;  %v1873_v32 = vld [vmem:[#allocation2 + $0x99] sm:$0xff] }
 0x163   : > { %v3896_v33 = vld [vmem:[#allocation2 + $0x92] sm:$0xff]  ;;  %v14074_v34 = vpop.f32.mrb[50].mxu0  ;;  %v1898_v35 = vpack.c.bf16 %v1873_v32, %v1872_v31 }
 0x164   : > { %v3923_v36 = vpack.c.bf16 %v3897_v29, %v3896_v33  ;;  %v1085_v37 = vpop.f32.mrb[51].mxu0 }
 0x165   : > { %v1552_v38 = vld [vmem:[#allocation4 + $0xb0] ss:$2 sm:$0xff]  ;;  %v1616_v39 = vld [vmem:[#allocation4 + $0xb1] ss:$2 sm:$0xff]  ;;  %14167 = vmatprep.mubr.msk.bf16.mxu0 %vm1465_vm0, %v1898_v35 }
 0x166   : > { %14416 = vmatmul.mubr.msk.bf16.gmra.mrb[4].mxu1 %vm1465_vm0, %v3923_v36  ;;  %v1668_v40 = vmax.f32 %v1552_v38, %v1616_v39  ;;  %v1550_v41 = vld [vmem:[#allocation4 + $0xa0] ss:$2 sm:$0xff]  ;;  %v1614_v42 = vld [vmem:[#allocation4 + $0xa1] ss:$2 sm:$0xff]  ;;  %v16893_v36 = vld [vmem:[%s18863_s2 + $0x90] sm:$0xff]  }
 0x167   : > { %v1667_v43 = vmax.f32 %v1550_v41, %v1614_v42  ;;  %14475 = vmatprep.subr.bf16.mxu1 %v16893_v36 }
 0x168   : > { %v1707_v44 = vadd.f32 %v16796_v28, %v1668_v40 }
 0x169   : > { %v1706_v45 = vadd.f32 %v16796_v28, %v1667_v43  ;;  %v14077_v46 = vpop.f32.mrb[52].mxu0 }
 0x16a   : > { %1787 = vst.msk [vmem:[#allocation2 + $0xb2] sm:$0xff] %vm1465_vm0, %v1707_v44  ;;  %v1427_v47 = vmax.f32 %v14073_v27, %v14077_v46  ;;  %v1098_v48 = vpop.f32.mrb[53].mxu0 }
 0x16b   : > { %1786 = vst.msk [vmem:[#allocation2 + $0xaa] sm:$0xff] %vm1465_vm0, %v1706_v45  ;;  %v1425_v49 = vmax.f32 %v1082_v30, %v1098_v48  ;;  %v14078_v50 = vpop.f32.mrb[54].mxu0 }
 0x16c   : > { %1492 = vst.msk [vmem:[#allocation4 + $0xd0] sm:$0xff] %vm1465_vm0, %v1427_v47  ;;  %v1428_v51 = vmax.f32 %v14074_v34, %v14078_v50  ;;  %v1101_v52 = vpop.f32.mrb[55].mxu0 }
 0x16d   : > { %1490 = vst.msk [vmem:[#allocation4 + $0xc0] sm:$0xff] %vm1465_vm0, %v1425_v49  ;;  %v1426_v53 = vmax.f32 %v1085_v37, %v1101_v52 }
 0x16e   : > { %1493 = vst.msk [vmem:[#allocation4 + $0xd8] sm:$0xff] %vm1465_vm0, %v1428_v51 }
 0x16f   : > { %1491 = vst.msk [vmem:[#allocation4 + $0xc8] sm:$0xff] %vm1465_vm0, %v1426_v53 }
 0x171   : > { %v14081_v54 = vpop.f32.mrb[56].mxu0  ;;  %v3899_v55 = vld [vmem:[#allocation2 + $0xb2] sm:$0xff] }
 0x172   : > { %v1114_v56 = vpop.f32.mrb[57].mxu0  ;;  %v1874_v57 = vld [vmem:[#allocation2 + $0xa9] sm:$0xff]  ;;  %v1875_v58 = vld [vmem:[#allocation2 + $0xb1] sm:$0xff] }
 0x173   : > { %v3898_v59 = vld [vmem:[#allocation2 + $0xaa] sm:$0xff]  ;;  %v14082_v60 = vpop.f32.mrb[58].mxu0  ;;  %v1899_v61 = vpack.c.bf16 %v1875_v58, %v1874_v57 }
 0x174   : > { %v16863_v62 = vpack.c.bf16 %v3899_v55, %v3898_v59  ;;  %v1117_v0 = vpop.f32.mrb[59].mxu0 }
 0x175   : > { %v1556_v1 = vld [vmem:[#allocation4 + $0xd0] ss:$2 sm:$0xff]  ;;  %v1620_v2 = vld [vmem:[#allocation4 + $0xd1] ss:$2 sm:$0xff]  ;;  %14168 = vmatmul.mubr.msk.bf16.gmra.mrb[140].mxu0 %vm1465_vm0, %v1899_v61 }
 0x176   : > { %14419 = vmatprep.mubr.msk.bf16.mxu1 %vm1465_vm0, %v16863_v62  ;;  %v1670_v3 = vmax.f32 %v1556_v1, %v1620_v2  ;;  %v1554_v4 = vld [vmem:[#allocation4 + $0xc0] ss:$2 sm:$0xff]  ;;  %v1618_v5 = vld [vmem:[#allocation4 + $0xc1] ss:$2 sm:$0xff] }
 0x177   : > { %v1669_v6 = vmax.f32 %v1554_v4, %v1618_v5 }
 0x178   : > { %v1709_v8 = vadd.f32 %v16796_v28, %v1670_v3 }
 0x179   : > { %v1708_v9 = vadd.f32 %v16796_v28, %v1669_v6  ;;  %v14085_v10 = vpop.f32.mrb[60].mxu0 }
 0x17a   : > { %1789 = vst.msk [vmem:[#allocation2 + $0xca] sm:$0xff] %vm1465_vm0, %v1709_v8  ;;  %v1431_v11 = vmax.f32 %v14081_v54, %v14085_v10  ;;  %v1130_v12 = vpop.f32.mrb[61].mxu0 }
 0x17b   : > { %1788 = vst.msk [vmem:[#allocation2 + $0xc2] sm:$0xff] %vm1465_vm0, %v1708_v9  ;;  %v1429_v13 = vmax.f32 %v1114_v56, %v1130_v12  ;;  %v14086_v14 = vpop.f32.mrb[62].mxu0 }
 0x17c   : > { %1496 = vst.msk [vmem:[#allocation4 + $0xf0] sm:$0xff] %vm1465_vm0, %v1431_v11  ;;  %v1432_v16 = vmax.f32 %v14082_v60, %v14086_v14  ;;  %v1133_v17 = vpop.f32.mrb[63].mxu0 }
 0x17d   : > { %1494 = vst.msk [vmem:[#allocation4 + $0xe0] sm:$0xff] %vm1465_vm0, %v1429_v13  ;;  %v1430_v18 = vmax.f32 %v1117_v0, %v1133_v17 }
 0x17e   : > { %1497 = vst.msk [vmem:[#allocation4 + $0xf8] sm:$0xff] %vm1465_vm0, %v1432_v16 }
 0x17f   : > { %1495 = vst.msk [vmem:[#allocation4 + $0xe8] sm:$0xff] %vm1465_vm0, %v1430_v18 }
 0x181   : > { %v14089_v19 = vpop.f32.mrb[64].mxu0  ;;  %v3901_v20 = vld [vmem:[#allocation2 + $0xca] sm:$0xff] }
 0x182   : > { %v1146_v21 = vpop.f32.mrb[65].mxu0  ;;  %v1876_v22 = vld [vmem:[#allocation2 + $0xc1] sm:$0xff]  ;;  %v1877_v23 = vld [vmem:[#allocation2 + $0xc9] sm:$0xff] }
 0x183   : > { %v3900_v24 = vld [vmem:[#allocation2 + $0xc2] sm:$0xff]  ;;  %v14090_v25 = vpop.f32.mrb[66].mxu0  ;;  %v1900_v26 = vpack.c.bf16 %v1877_v23, %v1876_v22 }
 0x184   : > { %v16885_v27 = vpack.c.bf16 %v3901_v20, %v3900_v24  ;;  %v1149_v29 = vpop.f32.mrb[67].mxu0 }
 0x185   : > { %v1560_v30 = vld [vmem:[#allocation4 + $0xf0] ss:$2 sm:$0xff]  ;;  %v1624_v31 = vld [vmem:[#allocation4 + $0xf1] ss:$2 sm:$0xff]  ;;  %14171 = vmatprep.mubr.msk.bf16.mxu0 %vm1465_vm0, %v1900_v26 }
 0x186   : > { %14420 = vmatmul.mubr.msk.bf16.gmra.mrb[8].mxu1 %vm1465_vm0, %v16885_v27  ;;  %v1672_v32 = vmax.f32 %v1560_v30, %v1624_v31  ;;  %v1558_v33 = vld [vmem:[#allocation4 + $0xe0] ss:$2 sm:$0xff]  ;;  %v1622_v34 = vld [vmem:[#allocation4 + $0xe1] ss:$2 sm:$0xff] }
 0x187   : > { %v1671_v35 = vmax.f32 %v1558_v33, %v1622_v34 }
 0x188   : > { %v1711_v37 = vadd.f32 %v16796_v28, %v1672_v32 }
 0x189   : > { %v1710_v38 = vadd.f32 %v16796_v28, %v1671_v35  ;;  %v14093_v39 = vpop.f32.mrb[68].mxu0 }
 0x18a   : > { %1791 = vst.msk [vmem:[#allocation2 + $0xe2] sm:$0xff] %vm1465_vm0, %v1711_v37  ;;  %v1435_v40 = vmax.f32 %v14089_v19, %v14093_v39  ;;  %v1162_v41 = vpop.f32.mrb[69].mxu0 }
 0x18b   : > { %1790 = vst.msk [vmem:[#allocation2 + $0xda] sm:$0xff] %vm1465_vm0, %v1710_v38  ;;  %v1433_v42 = vmax.f32 %v1146_v21, %v1162_v41  ;;  %v14094_v43 = vpop.f32.mrb[70].mxu0 }
 0x18c   : > { %1500 = vst.msk [vmem:[#allocation4 + $0x110] sm:$0xff] %vm1465_vm0, %v1435_v40  ;;  %v1436_v44 = vmax.f32 %v14090_v25, %v14094_v43  ;;  %v1165_v45 = vpop.f32.mrb[71].mxu0 }
 0x18d   : > { %1498 = vst.msk [vmem:[#allocation4 + $0x100] sm:$0xff] %vm1465_vm0, %v1433_v42  ;;  %v1434_v46 = vmax.f32 %v1149_v29, %v1165_v45 }
 0x18e   : > { %1501 = vst.msk [vmem:[#allocation4 + $0x118] sm:$0xff] %vm1465_vm0, %v1436_v44 }
 0x18f   : > { %1499 = vst.msk [vmem:[#allocation4 + $0x108] sm:$0xff] %vm1465_vm0, %v1434_v46 }
 0x191   : > { %v14097_v47 = vpop.f32.mrb[72].mxu0  ;;  %v3903_v48 = vld [vmem:[#allocation2 + $0xe2] sm:$0xff] }
 0x192   : > { %v1178_v49 = vpop.f32.mrb[73].mxu0  ;;  %v1878_v50 = vld [vmem:[#allocation2 + $0xd9] sm:$0xff]  ;;  %v1879_v51 = vld [vmem:[#allocation2 + $0xe1] sm:$0xff] }
 0x193   : > { %v3902_v52 = vld [vmem:[#allocation2 + $0xda] sm:$0xff]  ;;  %v14098_v53 = vpop.f32.mrb[74].mxu0  ;;  %v1901_v54 = vpack.c.bf16 %v1879_v51, %v1878_v50 }
 0x194   : > { %v16904_v55 = vpack.c.bf16 %v3903_v48, %v3902_v52  ;;  %v1181_v56 = vpop.f32.mrb[75].mxu0  ;;  %v16938_v51 = vld [vmem:[%s18863_s2 + $0x20] sm:$0xff]  }
 0x195   : > { %v1564_v57 = vld [vmem:[#allocation4 + $0x110] ss:$2 sm:$0xff]  ;;  %v1628_v58 = vld [vmem:[#allocation4 + $0x111] ss:$2 sm:$0xff]  ;;  %14172 = vmatmul.mubr.msk.bf16.gmra.mrb[144].mxu0 %vm1465_vm0, %v1901_v54  ;;  %14223 = vmatprep.subr.bf16.mxu0 %v16938_v51 }
 0x196   : > { %14423 = vmatprep.mubr.msk.bf16.mxu1 %vm1465_vm0, %v16904_v55  ;;  %v1674_v59 = vmax.f32 %v1564_v57, %v1628_v58  ;;  %v1562_v60 = vld [vmem:[#allocation4 + $0x100] ss:$2 sm:$0xff]  ;;  %v1626_v61 = vld [vmem:[#allocation4 + $0x101] ss:$2 sm:$0xff] }
 0x197   : > { %v1673_v63 = vmax.f32 %v1562_v60, %v1626_v61 }
 0x198   : > { %v1713_v0 = vadd.f32 %v16796_v28, %v1674_v59 }
 0x199   : > { %v1712_v1 = vadd.f32 %v16796_v28, %v1673_v63  ;;  %v14101_v2 = vpop.f32.mrb[76].mxu0 }
 0x19a   : > { %1793 = vst.msk [vmem:[#allocation2 + $0xfa] sm:$0xff] %vm1465_vm0, %v1713_v0  ;;  %v1439_v3 = vmax.f32 %v14097_v47, %v14101_v2  ;;  %v1194_v4 = vpop.f32.mrb[77].mxu0 }
 0x19b   : > { %1792 = vst.msk [vmem:[#allocation2 + $0xf2] sm:$0xff] %vm1465_vm0, %v1712_v1  ;;  %v1437_v5 = vmax.f32 %v1178_v49, %v1194_v4  ;;  %v14102_v6 = vpop.f32.mrb[78].mxu0 }
 0x19c   : > { %1504 = vst.msk [vmem:[#allocation4 + $0x130] sm:$0xff] %vm1465_vm0, %v1439_v3  ;;  %v1440_v7 = vmax.f32 %v14098_v53, %v14102_v6  ;;  %v1197_v8 = vpop.f32.mrb[79].mxu0 }
 0x19d   : > { %1502 = vst.msk [vmem:[#allocation4 + $0x120] sm:$0xff] %vm1465_vm0, %v1437_v5  ;;  %v1438_v9 = vmax.f32 %v1181_v56, %v1197_v8 }
 0x19e   : > { %1505 = vst.msk [vmem:[#allocation4 + $0x138] sm:$0xff] %vm1465_vm0, %v1440_v7 }
 0x19f   : > { %1503 = vst.msk [vmem:[#allocation4 + $0x128] sm:$0xff] %vm1465_vm0, %v1438_v9 }
 0x1a1   : > { %v14105_v10 = vpop.f32.mrb[80].mxu0  ;;  %v3905_v11 = vld [vmem:[#allocation2 + $0xfa] sm:$0xff] }
 0x1a2   : > { %v1210_v12 = vpop.f32.mrb[81].mxu0  ;;  %v1880_v13 = vld [vmem:[#allocation2 + $0xf1] sm:$0xff]  ;;  %v1881_v14 = vld [vmem:[#allocation2 + $0xf9] sm:$0xff] }
 0x1a3   : > { %v3904_v15 = vld [vmem:[#allocation2 + $0xf2] sm:$0xff]  ;;  %v14106_v16 = vpop.f32.mrb[82].mxu0  ;;  %v1902_v17 = vpack.c.bf16 %v1881_v14, %v1880_v13 }
 0x1a4   : > { %v16917_v18 = vpack.c.bf16 %v3905_v11, %v3904_v15  ;;  %v1213_v19 = vpop.f32.mrb[83].mxu0 }
 0x1a5   : > { %v1568_v20 = vld [vmem:[#allocation4 + $0x130] ss:$2 sm:$0xff]  ;;  %v1632_v21 = vld [vmem:[#allocation4 + $0x131] ss:$2 sm:$0xff]  ;;  %14175 = vmatprep.mubr.msk.bf16.mxu0 %vm1465_vm0, %v1902_v17 }
 0x1a6   : > { %14424 = vmatmul.mubr.msk.bf16.gmra.mrb[12].mxu1 %vm1465_vm0, %v16917_v18  ;;  %v1676_v22 = vmax.f32 %v1568_v20, %v1632_v21  ;;  %v1566_v23 = vld [vmem:[#allocation4 + $0x120] ss:$2 sm:$0xff]  ;;  %v1630_v24 = vld [vmem:[#allocation4 + $0x121] ss:$2 sm:$0xff] }
 0x1a7   : > { %v1675_v25 = vmax.f32 %v1566_v23, %v1630_v24 }
 0x1a8   : > { %v1715_v26 = vadd.f32 %v16796_v28, %v1676_v22 }
 0x1a9   : > { %v1714_v29 = vadd.f32 %v16796_v28, %v1675_v25  ;;  %v14109_v30 = vpop.f32.mrb[84].mxu0 }
 0x1aa   : > { %1795 = vst.msk [vmem:[#allocation2 + $0x112] sm:$0xff] %vm1465_vm0, %v1715_v26  ;;  %v1443_v31 = vmax.f32 %v14105_v10, %v14109_v30  ;;  %v1226_v32 = vpop.f32.mrb[85].mxu0 }
 0x1ab   : > { %1794 = vst.msk [vmem:[#allocation2 + $0x10a] sm:$0xff] %vm1465_vm0, %v1714_v29  ;;  %v1441_v33 = vmax.f32 %v1210_v12, %v1226_v32  ;;  %v14110_v34 = vpop.f32.mrb[86].mxu0 }
 0x1ac   : > { %1508 = vst.msk [vmem:[#allocation4 + $0x150] sm:$0xff] %vm1465_vm0, %v1443_v31  ;;  %v1444_v35 = vmax.f32 %v14106_v16, %v14110_v34  ;;  %v1229_v37 = vpop.f32.mrb[87].mxu0 }
 0x1ad   : > { %1506 = vst.msk [vmem:[#allocation4 + $0x140] sm:$0xff] %vm1465_vm0, %v1441_v33  ;;  %v1442_v38 = vmax.f32 %v1213_v19, %v1229_v37 }
 0x1ae   : > { %1509 = vst.msk [vmem:[#allocation4 + $0x158] sm:$0xff] %vm1465_vm0, %v1444_v35 }
 0x1af   : > { %1507 = vst.msk [vmem:[#allocation4 + $0x148] sm:$0xff] %vm1465_vm0, %v1442_v38 }
 0x1b1   : > { %v14113_v39 = vpop.f32.mrb[88].mxu0  ;;  %v3907_v40 = vld [vmem:[#allocation2 + $0x112] sm:$0xff] }
 0x1b2   : > { %v1242_v41 = vpop.f32.mrb[89].mxu0  ;;  %v1882_v42 = vld [vmem:[#allocation2 + $0x109] sm:$0xff]  ;;  %v1883_v43 = vld [vmem:[#allocation2 + $0x111] sm:$0xff] }
 0x1b3   : > { %v3906_v44 = vld [vmem:[#allocation2 + $0x10a] sm:$0xff]  ;;  %v14114_v45 = vpop.f32.mrb[90].mxu0  ;;  %v1903_v46 = vpack.c.bf16 %v1883_v43, %v1882_v42 }
 0x1b4   : > { %v16930_v47 = vpack.c.bf16 %v3907_v40, %v3906_v44  ;;  %v1245_v48 = vpop.f32.mrb[91].mxu0 }
 0x1b5   : > { %v1572_v49 = vld [vmem:[#allocation4 + $0x150] ss:$2 sm:$0xff]  ;;  %v1636_v50 = vld [vmem:[#allocation4 + $0x151] ss:$2 sm:$0xff]  ;;  %14176 = vmatmul.mubr.msk.bf16.gmra.mrb[148].mxu0 %vm1465_vm0, %v1903_v46 }
 0x1b6   : > { %14427 = vmatprep.mubr.msk.bf16.mxu1 %vm1465_vm0, %v16930_v47  ;;  %v1678_v52 = vmax.f32 %v1572_v49, %v1636_v50  ;;  %v1570_v53 = vld [vmem:[#allocation4 + $0x140] ss:$2 sm:$0xff]  ;;  %v1634_v54 = vld [vmem:[#allocation4 + $0x141] ss:$2 sm:$0xff] }
 0x1b7   : > { %v1677_v56 = vmax.f32 %v1570_v53, %v1634_v54 }
 0x1b8   : > { %v1717_v57 = vadd.f32 %v16796_v28, %v1678_v52 }
 0x1b9   : > { %v1716_v58 = vadd.f32 %v16796_v28, %v1677_v56  ;;  %v14117_v59 = vpop.f32.mrb[92].mxu0 }
 0x1ba   : > { %1797 = vst.msk [vmem:[#allocation2 + $0x12a] sm:$0xff] %vm1465_vm0, %v1717_v57  ;;  %v1447_v60 = vmax.f32 %v14113_v39, %v14117_v59  ;;  %v1258_v61 = vpop.f32.mrb[93].mxu0 }
 0x1bb   : > { %1796 = vst.msk [vmem:[#allocation2 + $0x122] sm:$0xff] %vm1465_vm0, %v1716_v58  ;;  %v1445_v63 = vmax.f32 %v1242_v41, %v1258_v61  ;;  %v14118_v0 = vpop.f32.mrb[94].mxu0 }
 0x1bc   : > { %1512 = vst.msk [vmem:[#allocation4 + $0x170] sm:$0xff] %vm1465_vm0, %v1447_v60  ;;  %v1448_v1 = vmax.f32 %v14114_v45, %v14118_v0  ;;  %v1261_v2 = vpop.f32.mrb[95].mxu0 }
 0x1bd   : > { %1510 = vst.msk [vmem:[#allocation4 + $0x160] sm:$0xff] %vm1465_vm0, %v1445_v63  ;;  %v1446_v3 = vmax.f32 %v1245_v48, %v1261_v2 }
 0x1be   : > { %1513 = vst.msk [vmem:[#allocation4 + $0x178] sm:$0xff] %vm1465_vm0, %v1448_v1 }
 0x1bf   : > { %1511 = vst.msk [vmem:[#allocation4 + $0x168] sm:$0xff] %vm1465_vm0, %v1446_v3 }
 0x1c1   : > { %v14121_v4 = vpop.f32.mrb[96].mxu0  ;;  %v3909_v5 = vld [vmem:[#allocation2 + $0x12a] sm:$0xff] }
 0x1c2   : > { %v1274_v6 = vpop.f32.mrb[97].mxu0  ;;  %v1884_v7 = vld [vmem:[#allocation2 + $0x121] sm:$0xff]  ;;  %v1885_v8 = vld [vmem:[#allocation2 + $0x129] sm:$0xff] }
 0x1c3   : > { %v3908_v9 = vld [vmem:[#allocation2 + $0x122] sm:$0xff]  ;;  %v14122_v10 = vpop.f32.mrb[98].mxu0  ;;  %v1904_v11 = vpack.c.bf16 %v1885_v8, %v1884_v7 }
 0x1c4   : > { %v16949_v12 = vpack.c.bf16 %v3909_v5, %v3908_v9  ;;  %v1277_v13 = vpop.f32.mrb[99].mxu0 }
 0x1c5   : > { %v1576_v14 = vld [vmem:[#allocation4 + $0x170] ss:$2 sm:$0xff]  ;;  %v1640_v15 = vld [vmem:[#allocation4 + $0x171] ss:$2 sm:$0xff]  ;;  %14179 = vmatprep.mubr.msk.bf16.mxu0 %vm1465_vm0, %v1904_v11 }
 0x1c6   : > { %14428 = vmatmul.mubr.msk.bf16.gmra.mrb[16].mxu1 %vm1465_vm0, %v16949_v12  ;;  %v1680_v16 = vmax.f32 %v1576_v14, %v1640_v15  ;;  %v1574_v17 = vld [vmem:[#allocation4 + $0x160] ss:$2 sm:$0xff]  ;;  %v1638_v19 = vld [vmem:[#allocation4 + $0x161] ss:$2 sm:$0xff] }
 0x1c7   : > { %v1679_v20 = vmax.f32 %v1574_v17, %v1638_v19 }
 0x1c8   : > { %v1719_v21 = vadd.f32 %v16796_v28, %v1680_v16 }
 0x1c9   : > { %v1718_v22 = vadd.f32 %v16796_v28, %v1679_v20  ;;  %v14125_v23 = vpop.f32.mrb[100].mxu0 }
 0x1ca   : > { %1799 = vst.msk [vmem:[#allocation2 + $0x142] sm:$0xff] %vm1465_vm0, %v1719_v21  ;;  %v1451_v24 = vmax.f32 %v14121_v4, %v14125_v23  ;;  %v1290_v25 = vpop.f32.mrb[101].mxu0 }
 0x1cb   : > { %1798 = vst.msk [vmem:[#allocation2 + $0x13a] sm:$0xff] %vm1465_vm0, %v1718_v22  ;;  %v1449_v26 = vmax.f32 %v1274_v6, %v1290_v25  ;;  %v14126_v29 = vpop.f32.mrb[102].mxu0 }
 0x1cc   : > { %1516 = vst.msk [vmem:[#allocation4 + $0x190] sm:$0xff] %vm1465_vm0, %v1451_v24  ;;  %v1452_v30 = vmax.f32 %v14122_v10, %v14126_v29  ;;  %v1293_v31 = vpop.f32.mrb[103].mxu0 }
 0x1cd   : > { %1514 = vst.msk [vmem:[#allocation4 + $0x180] sm:$0xff] %vm1465_vm0, %v1449_v26  ;;  %v1450_v32 = vmax.f32 %v1277_v13, %v1293_v31  ;;  %v1809_v31 = vld [vmem:[#allocation2 + $0x8] sm:$0xff] }
 0x1ce   : > { %1517 = vst.msk [vmem:[#allocation4 + $0x198] sm:$0xff] %vm1465_vm0, %v1452_v30  ;;  %v1808_v30 = vld [vmem:[#allocation2] sm:$0xff] }
 0x1cf   : > { %1515 = vst.msk [vmem:[#allocation4 + $0x188] sm:$0xff] %vm1465_vm0, %v1450_v32 }
 0x1d1   : > { %v14129_v33 = vpop.f32.mrb[104].mxu0  ;;  %v3911_v34 = vld [vmem:[#allocation2 + $0x142] sm:$0xff] }
 0x1d2   : > { %v1306_v35 = vpop.f32.mrb[105].mxu0  ;;  %v1886_v37 = vld [vmem:[#allocation2 + $0x139] sm:$0xff]  ;;  %v1887_v38 = vld [vmem:[#allocation2 + $0x141] sm:$0xff] }
 0x1d3   : > { %v3910_v39 = vld [vmem:[#allocation2 + $0x13a] sm:$0xff]  ;;  %v14130_v40 = vpop.f32.mrb[106].mxu0  ;;  %v1905_v41 = vpack.c.bf16 %v1887_v38, %v1886_v37  ;;  %v1840_v37 = vpack.c.bf16 %v1809_v31, %v1808_v30  ;;  %v1823_v30 = vld [vmem:[#allocation2 + $0xb0] sm:$0xff]  ;;  %v4201_v31 = vld [vmem:[#allocation2 + $0x83] sm:$0xff] }
 0x1d4   : > { %v16962_v42 = vpack.c.bf16 %v3911_v34, %v3910_v39  ;;  %v1309_v43 = vpop.f32.mrb[107].mxu0 }
 0x1d5   : > { %v1580_v44 = vld [vmem:[#allocation4 + $0x190] ss:$2 sm:$0xff]  ;;  %v1644_v45 = vld [vmem:[#allocation4 + $0x191] ss:$2 sm:$0xff]  ;;  %14180 = vmatmul.mubr.msk.bf16.gmra.mrb[152].mxu0 %vm1465_vm0, %v1905_v41 }
 0x1d6   : > { %14431 = vmatprep.mubr.msk.bf16.mxu1 %vm1465_vm0, %v16962_v42  ;;  %v1682_v46 = vmax.f32 %v1580_v44, %v1644_v45  ;;  %v1578_v48 = vld [vmem:[#allocation4 + $0x180] ss:$2 sm:$0xff]  ;;  %v1642_v49 = vld [vmem:[#allocation4 + $0x181] ss:$2 sm:$0xff] }
 0x1d7   : > { %v1681_v50 = vmax.f32 %v1578_v48, %v1642_v49  ;;  %v1811_v48 = vld [vmem:[#allocation2 + $0x20] sm:$0xff] }
 0x1d8   : > { %v1721_v52 = vadd.f32 %v16796_v28, %v1682_v46 }
 0x1d9   : > { %v1720_v53 = vadd.f32 %v16796_v28, %v1681_v50  ;;  %v14133_v54 = vpop.f32.mrb[108].mxu0 }
 0x1da   : > { %1801 = vst.msk [vmem:[#allocation2 + $0x15a] sm:$0xff] %vm1465_vm0, %v1721_v52  ;;  %v1455_v56 = vmax.f32 %v14129_v33, %v14133_v54  ;;  %v1322_v57 = vpop.f32.mrb[109].mxu0  ;;  %v16998_v52 = vld [vmem:[%s18865_s4] ss:$0 sm:$0xff] }
 0x1db   : > { %1800 = vst.msk [vmem:[#allocation2 + $0x152] sm:$0xff] %vm1465_vm0, %v1720_v53  ;;  %v1453_v58 = vmax.f32 %v1306_v35, %v1322_v57  ;;  %v14134_v59 = vpop.f32.mrb[110].mxu0  ;;  %v1813_v57 = vld [vmem:[#allocation2 + $0x38] sm:$0xff] }
 0x1dc   : > { %1520 = vst.msk [vmem:[#allocation4 + $0x1b0] sm:$0xff] %vm1465_vm0, %v1455_v56  ;;  %v1456_v60 = vmax.f32 %v14130_v40, %v14134_v59  ;;  %v1325_v61 = vpop.f32.mrb[111].mxu0  ;;  %v1812_v56 = vld [vmem:[#allocation2 + $0x30] sm:$0xff] }
 0x1dd   : > { %1518 = vst.msk [vmem:[#allocation4 + $0x1a0] sm:$0xff] %vm1465_vm0, %v1453_v58  ;;  %v1454_v63 = vmax.f32 %v1309_v43, %v1325_v61  ;;  %v1810_v43 = vld [vmem:[#allocation2 + $0x18] sm:$0xff]  ;;  %v16407_v58 = vld [vmem:[%s18863_s2 + $0x28] sm:$0xff]   ;;  %v17006_v59 = vpack.c.bf16 %v1813_v57, %v1812_v56  ;;  %v17015_v61 = vld [vmem:[%s18863_s2 + $0x30] sm:$0xff]  }
 0x1de   : > { %1521 = vst.msk [vmem:[#allocation4 + $0x1b8] sm:$0xff] %vm1465_vm0, %v1456_v60  ;;  %v1841_v54 = vpack.c.bf16 %v1811_v48, %v1810_v43  ;;  %v4193_v60 = vld [vmem:[#allocation2 + $0x23] sm:$0xff]  ;;  %v4203_v43 = vld [vmem:[#allocation2 + $0x9b] sm:$0xff]  ;;  %v4205_v48 = vld [vmem:[#allocation2 + $0xb3] sm:$0xff] }
 0x1df   : > { %1519 = vst.msk [vmem:[#allocation4 + $0x1a8] sm:$0xff] %vm1465_vm0, %v1454_v63  ;;  %v1814_v63 = vld [vmem:[#allocation2 + $0x48] sm:$0xff] }
 0x1e1   : > { %v14137_v0 = vpop.f32.mrb[112].mxu0  ;;  %v3913_v1 = vld [vmem:[#allocation2 + $0x15a] sm:$0xff] }
 0x1e2   : > { %v1338_v2 = vpop.f32.mrb[113].mxu0  ;;  %v1888_v3 = vld [vmem:[#allocation2 + $0x151] sm:$0xff]  ;;  %v1889_v4 = vld [vmem:[#allocation2 + $0x159] sm:$0xff] }
 0x1e3   : > { %v3912_v5 = vld [vmem:[#allocation2 + $0x152] sm:$0xff]  ;;  %v14138_v6 = vpop.f32.mrb[114].mxu0  ;;  %v1906_v7 = vpack.c.bf16 %v1889_v4, %v1888_v3  ;;  %v1817_v3 = vld [vmem:[#allocation2 + $0x68] sm:$0xff] }
 0x1e4   : > { %v16975_v8 = vpack.c.bf16 %v3913_v1, %v3912_v5  ;;  %v1341_v9 = vpop.f32.mrb[115].mxu0 }
 0x1e5   : > { %v1584_v10 = vld [vmem:[#allocation4 + $0x1b0] ss:$2 sm:$0xff]  ;;  %v1648_v11 = vld [vmem:[#allocation4 + $0x1b1] ss:$2 sm:$0xff]  ;;  %14183 = vmatprep.mubr.msk.bf16.mxu0 %vm1465_vm0, %v1906_v7 }
 0x1e6   : > { %14432 = vmatmul.mubr.msk.bf16.gmra.mrb[20].mxu1 %vm1465_vm0, %v16975_v8  ;;  %v1684_v13 = vmax.f32 %v1584_v10, %v1648_v11  ;;  %v1582_v14 = vld [vmem:[#allocation4 + $0x1a0] ss:$2 sm:$0xff]  ;;  %v1646_v15 = vld [vmem:[#allocation4 + $0x1a1] ss:$2 sm:$0xff]  ;;  %v1818_v10 = vld [vmem:[#allocation2 + $0x78] sm:$0xff] }
 0x1e7   : > { %v1683_v16 = vmax.f32 %v1582_v14, %v1646_v15  ;;  %v1819_v11 = vld [vmem:[#allocation2 + $0x80] sm:$0xff]  ;;  %v1820_v14 = vld [vmem:[#allocation2 + $0x90] sm:$0xff]  ;;  %v1821_v15 = vld [vmem:[#allocation2 + $0x98] sm:$0xff] }
 0x1e8   : > { %v1723_v17 = vadd.f32 %v16796_v28, %v1684_v13  ;;  %v4194_v13 = vld [vmem:[#allocation2 + $0x33] sm:$0xff] }
 0x1e9   : > { %v1722_v19 = vadd.f32 %v16796_v28, %v1683_v16  ;;  %v14141_v20 = vpop.f32.mrb[116].mxu0  ;;  %v4196_v16 = vld [vmem:[#allocation2 + $0x4b] sm:$0xff] }
 0x1ea   : > { %1803 = vst.msk [vmem:[#allocation2 + $0x172] sm:$0xff] %vm1465_vm0, %v1723_v17  ;;  %v1459_v21 = vmax.f32 %v14137_v0, %v14141_v20  ;;  %v1354_v22 = vpop.f32.mrb[117].mxu0  ;;  %v1815_v0 = vld [vmem:[#allocation2 + $0x50] sm:$0xff] }
 0x1eb   : > { %1802 = vst.msk [vmem:[#allocation2 + $0x16a] sm:$0xff] %vm1465_vm0, %v1722_v19  ;;  %v1457_v23 = vmax.f32 %v1338_v2, %v1354_v22  ;;  %v14142_v24 = vpop.f32.mrb[118].mxu0  ;;  %v1816_v2 = vld [vmem:[#allocation2 + $0x60] sm:$0xff]  ;;  %v4197_v17 = vld [vmem:[#allocation2 + $0x53] sm:$0xff]  ;;  %v17031_v19 = vpack.c.bf16 %v1819_v11, %v1818_v10  ;;  %v17038_v22 = vpack.c.bf16 %v1821_v15, %v1820_v14 }
 0x1ec   : > { %1524 = vst.msk [vmem:[#allocation4 + $0x1d0] sm:$0xff] %vm1465_vm0, %v1459_v21  ;;  %v1460_v25 = vmax.f32 %v14138_v6, %v14142_v24  ;;  %v1357_v26 = vpop.f32.mrb[119].mxu0  ;;  %v17019_v6 = vpack.c.bf16 %v1815_v0, %v1814_v63  ;;  %v17022_v7 = vpack.c.bf16 %v1817_v3, %v1816_v2  ;;  %v16405_v21 = vld [vmem:[%s18863_s2 + $0x98] sm:$0xff]   ;;  %v4198_v24 = vld [vmem:[#allocation2 + $0x63] sm:$0xff]  ;;  %v4207_v3 = vld [vmem:[#allocation2 + $0xcb] sm:$0xff] }
 0x1ed   : > { %1522 = vst.msk [vmem:[#allocation4 + $0x1c0] sm:$0xff] %vm1465_vm0, %v1457_v23  ;;  %v1458_v29 = vmax.f32 %v1341_v9, %v1357_v26  ;;  %v4195_v9 = vld [vmem:[#allocation2 + $0x3b] sm:$0xff]  ;;  %v17044_v23 = vpack.c.bf16 %v4197_v17, %v4196_v16  ;;  %v4206_v2 = vld [vmem:[#allocation2 + $0xc3] sm:$0xff]  ;;  %v1831_v10 = vld [vmem:[#allocation2 + $0x110] sm:$0xff] }
 0x1ee   : > { %1525 = vst.msk [vmem:[#allocation4 + $0x1d8] sm:$0xff] %vm1465_vm0, %v1460_v25  ;;  %v17033_v20 = vpack.c.bf16 %v4195_v9, %v4194_v13  ;;  %v4199_v25 = vld [vmem:[#allocation2 + $0x6b] sm:$0xff]  ;;  %v17054_v26 = vld [vmem:[%s18863_s2 + $0xa0] sm:$0xff]  }
 0x1ef   : > { %1523 = vst.msk [vmem:[#allocation4 + $0x1c8] sm:$0xff] %vm1465_vm0, %v1458_v29  ;;  %v1822_v29 = vld [vmem:[#allocation2 + $0xa8] sm:$0xff]  ;;  %v1832_v15 = vld [vmem:[#allocation2 + $0x120] sm:$0xff] }
 0x1f0   : > { %v1830_v9 = vld [vmem:[#allocation2 + $0x108] sm:$0xff]  ;;  %v4208_v17 = vld [vmem:[#allocation2 + $0xdb] sm:$0xff] }
 0x1f1   : > { %v3915_v32 = vld [vmem:[#allocation2 + $0x172] sm:$0xff]  ;;  %v4209_v11 = vld [vmem:[#allocation2 + $0xe3] sm:$0xff] }
 0x1f2   : > { %v1890_v33 = vld [vmem:[#allocation2 + $0x169] sm:$0xff]  ;;  %v1891_v34 = vld [vmem:[#allocation2 + $0x171] sm:$0xff] }
 0x1f3   : > { %v3914_v35 = vld [vmem:[#allocation2 + $0x16a] sm:$0xff]  ;;  %v1907_v38 = vpack.c.bf16 %v1891_v34, %v1890_v33  ;;  %v17056_v34 = vpack.c.bf16 %v1823_v30, %v1822_v29  ;;  %v17099_v30 = vpack.c.bf16 %v4209_v11, %v4208_v17 }
 0x1f4   : > { %v16988_v39 = vpack.c.bf16 %v3915_v32, %v3914_v35  ;;  %v1824_v32 = vld [vmem:[#allocation2 + $0xc0] sm:$0xff]  ;;  %v1825_v33 = vld [vmem:[#allocation2 + $0xc8] sm:$0xff]  ;;  %v17058_v35 = vpack.c.bf16 %v4199_v25, %v4198_v24  ;;  %v17092_v24 = vpack.c.bf16 %v1831_v10, %v1830_v9  ;;  %v17094_v25 = vpack.c.bf16 %v4207_v3, %v4206_v2  ;;  %v1839_v10 = vld [vmem:[#allocation2 + $0x170] sm:$0xff] }
 0x1f5   : > { %v1588_v40 = vld [vmem:[#allocation4 + $0x1d0] ss:$2 sm:$0xff]  ;;  %v1652_v41 = vld [vmem:[#allocation4 + $0x1d1] ss:$2 sm:$0xff]  ;;  %14184 = vmatmul.mubr.msk.bf16.gmra.mrb[156].mxu0 %vm1465_vm0, %v1907_v38  ;;  %v1833_v16 = vld [vmem:[#allocation2 + $0x128] sm:$0xff] }
 0x1f6   : > { %14435 = vmatprep.mubr.msk.bf16.mxu1 %vm1465_vm0, %v16988_v39  ;;  %v1686_v44 = vmax.f32 %v1588_v40, %v1652_v41  ;;  %v1586_v45 = vld [vmem:[#allocation4 + $0x1c0] ss:$2 sm:$0xff]  ;;  %v1650_v46 = vld [vmem:[#allocation4 + $0x1c1] ss:$2 sm:$0xff]  ;;  %14191 = vmatprep.mubr.msk.bf16.mxu0 %vm1465_vm0, %v1840_v37  ;;  %v17061_v37 = vpack.c.bf16 %v1825_v33, %v1824_v32  ;;  %v14145_v40 = vpop.f32.mrb[120].mxu0  ;;  %v4202_v41 = vld [vmem:[#allocation2 + $0x93] sm:$0xff]  ;;  %v17097_v29 = vpack.c.bf16 %v1833_v16, %v1832_v15 }
 0x1f7   : > { %v1685_v49 = vmax.f32 %v1586_v45, %v1650_v46  ;;  %v1826_v45 = vld [vmem:[#allocation2 + $0xd8] sm:$0xff]  ;;  %v1827_v46 = vld [vmem:[#allocation2 + $0xe0] sm:$0xff]  ;;  %v4212_v33 = vld [vmem:[#allocation2 + $0x10b] sm:$0xff] }
 0x1f8   : > { %v1725_v50 = vadd.f32 %v16796_v28, %v1686_v44  ;;  %v4192_v28 = vld [vmem:[#allocation2 + $0x1b] sm:$0xff]  ;;  %v1370_v44 = vpop.f32.mrb[121].mxu0  ;;  %v17073_v57 = vpack.c.bf16 %v1827_v46, %v1826_v45  ;;  %v4210_v32 = vld [vmem:[#allocation2 + $0xf3] sm:$0xff]  ;;  %v4215_v3 = vld [vmem:[#allocation2 + $0x12b] sm:$0xff] }
 0x1f9   : > { %v1724_v53 = vadd.f32 %v16998_v52, %v1685_v49  ;;  %v17017_v5 = vpack.c.bf16 %v4193_v60, %v4192_v28  ;;  %v14146_v49 = vpop.f32.mrb[122].mxu0  ;;  %v1838_v9 = vld [vmem:[#allocation2 + $0x168] sm:$0xff] }
 0x1fa   : > { %1805 = vst.msk [vmem:[#allocation2 + $0x18a] sm:$0xff] %vm1465_vm0, %v1725_v50  ;;  %v1828_v50 = vld [vmem:[#allocation2 + $0xf0] sm:$0xff]  ;;  %v1373_v56 = vpop.f32.mrb[123].mxu0  ;;  %v4214_v11 = vld [vmem:[#allocation2 + $0x123] sm:$0xff] }
 0x1fb   : > { %1804 = vst.msk [vmem:[#allocation2 + $0x182] sm:$0xff] %vm1465_vm0, %v1724_v53  ;;  %v1829_v53 = vld [vmem:[#allocation2 + $0xf8] sm:$0xff]  ;;  %v14149_v63 = vpop.f32.mrb[124].mxu0  ;;  %v17131_v16 = vpack.c.bf16 %v4215_v3, %v4214_v11 }
 0x1fc   : > { %v17077_v28 = vpack.c.bf16 %v1829_v53, %v1828_v50  ;;  %v1463_v0 = vmax.f32 %v14145_v40, %v14149_v63  ;;  %v1834_v40 = vld [vmem:[#allocation2 + $0x138] sm:$0xff] }
 0x1fd   : > { %14192 = vmatmul.mubr.msk.bf16.vlgmr.msra.gmra.mrb[128].mxu0 %vm1465_vm0, %v1841_v54  ;;  %v4204_v54 = vld [vmem:[#allocation2 + $0xab] sm:$0xff] }
 0x1fe   : > { %14195 = vmatprep.mubr.msk.bf16.mxu0 %vm1465_vm0, %v17006_v59  ;;  %14224 = vmatpush3.bf16.msra.mxu0 %v16938_v51  ;;  %v17079_v60 = vpack.c.bf16 %v4205_v48, %v4204_v54  ;;  %1528 = vst.msk [vmem:[#allocation4 + $0x1f0] sm:$0xff] %vm1465_vm0, %v1463_v0 }
 0x1ff   : > { %14225 = vmatprep.subr.bf16.mxu0 %v16407_v58 }
 0x201   : > { %v3917_v1 = vld [vmem:[#allocation2 + $0x18a] sm:$0xff] }
 0x202   : > { %v3916_v4 = vld [vmem:[#allocation2 + $0x182] sm:$0xff]  ;;  %14226 = vmatpush3.bf16.msra.mxu0 %v16407_v58  ;;  %v17075_v58 = vpack.c.bf16 %v4203_v43, %v4202_v41  ;;  %v1836_v43 = vld [vmem:[#allocation2 + $0x150] sm:$0xff] }
 0x203   : > { %v3933_v51 = vpack.c.bf16 %v3917_v1, %v3916_v4  ;;  %14259 = vmatprep.subr.bf16.mxu0 %v17015_v61  ;;  %v1386_v1 = vpop.f32.mrb[125].mxu0  ;;  %v1835_v41 = vld [vmem:[#allocation2 + $0x140] sm:$0xff] }
 0x204   : > { %v1461_v4 = vmax.f32 %v1370_v44, %v1386_v1  ;;  %v1837_v44 = vld [vmem:[#allocation2 + $0x158] sm:$0xff]  ;;  %v17109_v53 = vpack.c.bf16 %v1835_v41, %v1834_v40  ;;  %v4222_v3 = vld [vmem:[#allocation2 + $0x183] sm:$0xff] }
 0x205   : > { %14196 = vmatmul.mubr.msk.bf16.gmra.mrb[132].mxu0 %vm1465_vm0, %v17019_v6  ;;  %14436 = vmatmul.mubr.msk.bf16.gmra.mrb[24].mxu1 %vm1465_vm0, %v3933_v51  ;;  %v14150_v51 = vpop.f32.mrb[126].mxu0  ;;  %v17113_v63 = vpack.c.bf16 %v1837_v44, %v1836_v43  ;;  %v2359_v41 = vld [vmem:[#allocation2 + $0x32] sm:$0xff] }
 0x206   : > { %14199 = vmatprep.mubr.msk.bf16.mxu0 %vm1465_vm0, %v17022_v7  ;;  %14443 = vmatprep.mubr.msk.bf16.mxu1 %vm1465_vm0, %v17017_v5  ;;  %v1464_v13 = vmax.f32 %v14146_v49, %v14150_v51  ;;  %v1389_v14 = vpop.f32.mrb[127].mxu0  ;;  %1526 = vst.msk [vmem:[#allocation4 + $0x1e0] sm:$0xff] %vm1465_vm0, %v1461_v4  ;;  %v2355_v4 = vld [vmem:[#allocation2 + $0x2] sm:$0xff]  ;;  %v2356_v51 = vld [vmem:[#allocation2 + $0xa] sm:$0xff]  ;;  %v4221_v44 = vld [vmem:[#allocation2 + $0x173] sm:$0xff] }
 0x207   : > { %v2387_v15 = vpack.c.bf16 %v2356_v51, %v2355_v4  ;;  %v4220_v43 = vld [vmem:[#allocation2 + $0x16b] sm:$0xff]  ;;  %v17162_v51 = vld [vmem:[%s18863_s2 + $0x40] sm:$0xff]  }
 0x208   : > { %1529 = vst.msk [vmem:[#allocation4 + $0x1f8] sm:$0xff] %vm1465_vm0, %v1464_v13  ;;  %v4216_v13 = vld [vmem:[#allocation2 + $0x13b] sm:$0xff]  ;;  %v4223_v4 = vld [vmem:[#allocation2 + $0x18b] sm:$0xff] }
 0x20d   : > { %14200 = vmatmul.mubr.msk.bf16.gmra.mrb[136].mxu0 %vm1465_vm0, %v17031_v19  ;;  %14444 = vmatmul.mubr.msk.bf16.vlgmr.msra.gmra.mrb[28].mxu1 %vm1465_vm0, %v17033_v20 }
 0x20e   : > { %14476 = vmatpush3.bf16.msra.mxu1 %v16893_v36  ;;  %14203 = vmatprep.mubr.msk.bf16.mxu0 %vm1465_vm0, %v17038_v22  ;;  %v4200_v36 = vld [vmem:[#allocation2 + $0x7b] sm:$0xff] }
 0x20f   : > { %14447 = vmatprep.mubr.msk.bf16.mxu1 %vm1465_vm0, %v17044_v23  ;;  %14477 = vmatprep.subr.bf16.mxu1 %v16405_v21  ;;  %v17063_v38 = vpack.c.bf16 %v4201_v31, %v4200_v36  ;;  %v4211_v31 = vld [vmem:[#allocation2 + $0xfb] sm:$0xff]  ;;  %v4213_v36 = vld [vmem:[#allocation2 + $0x113] sm:$0xff] }
 0x210   : > { %v1592_v45 = vld [vmem:[#allocation4 + $0x1f0] ss:$2 sm:$0xff]  ;;  %v1656_v46 = vld [vmem:[#allocation4 + $0x1f1] ss:$2 sm:$0xff]  ;;  %v17111_v54 = vpack.c.bf16 %v4211_v31, %v4210_v32  ;;  %v17115_v0 = vpack.c.bf16 %v4213_v36, %v4212_v33  ;;  %v2358_v31 = vld [vmem:[#allocation2 + $0x22] sm:$0xff] }
 0x211   : > { %v1688_v48 = vmax.f32 %v1592_v45, %v1656_v46  ;;  %v4218_v32 = vld [vmem:[#allocation2 + $0x153] sm:$0xff]  ;;  %v4219_v33 = vld [vmem:[#allocation2 + $0x15b] sm:$0xff] }
 0x212   : > { %14478 = vmatpush3.bf16.msra.mxu1 %v16405_v21  ;;  %v1462_v21 = vmax.f32 %v1373_v56, %v1389_v14  ;;  %v4217_v14 = vld [vmem:[#allocation2 + $0x143] sm:$0xff]  ;;  %v2360_v36 = vld [vmem:[#allocation2 + $0x3a] sm:$0xff]  ;;  %v17142_v45 = vpack.c.bf16 %v4219_v33, %v4218_v32  ;;  %v2367_v33 = vld [vmem:[#allocation2 + $0x92] sm:$0xff] }
 0x213   : > { %14511 = vmatprep.subr.bf16.mxu1 %v17054_v26  ;;  %v1727_v1 = vadd.f32 %v16998_v52, %v1688_v48  ;;  %v17133_v17 = vpack.c.bf16 %v4217_v14, %v4216_v13  ;;  %v17144_v46 = vpack.c.bf16 %v2360_v36, %v2359_v41  ;;  %v17146_v48 = vpack.c.bf16 %v4221_v44, %v4220_v43  ;;  %v4500_v32 = vld [vmem:[#allocation2 + $0x34] sm:$0xff] }
 0x214   : > { %1527 = vst.msk [vmem:[#allocation4 + $0x1e8] sm:$0xff] %vm1465_vm0, %v1462_v21  ;;  %v2357_v21 = vld [vmem:[#allocation2 + $0x1a] sm:$0xff]  ;;  %v4239_v14 = vpack.c.bf16 %v4223_v4, %v4222_v3  ;;  %v4505_v3 = vld [vmem:[#allocation2 + $0x6c] sm:$0xff] }
 0x215   : > { %14204 = vmatmul.mubr.msk.bf16.gmra.mrb[140].mxu0 %vm1465_vm0, %v17056_v34  ;;  %14448 = vmatmul.mubr.msk.bf16.gmra.mrb[0].mxu1 %vm1465_vm0, %v17058_v35  ;;  %1807 = vst.msk [vmem:[#allocation2 + $0x1a2] sm:$0xff] %vm1465_vm0, %v1727_v1  ;;  %v2388_v40 = vpack.c.bf16 %v2358_v31, %v2357_v21  ;;  %v4498_v1 = vld [vmem:[#allocation2 + $0x1c] sm:$0xff]  ;;  %v4503_v41 = vld [vmem:[#allocation2 + $0x54] sm:$0xff] }
 0x216   : > { %14207 = vmatprep.mubr.msk.bf16.mxu0 %vm1465_vm0, %v17061_v37  ;;  %14451 = vmatprep.mubr.msk.bf16.mxu1 %vm1465_vm0, %v17063_v38  ;;  %v2365_v21 = vld [vmem:[#allocation2 + $0x7a] sm:$0xff]  ;;  %v2366_v31 = vld [vmem:[#allocation2 + $0x82] sm:$0xff] }
 0x217   : > { %v2368_v36 = vld [vmem:[#allocation2 + $0x9a] sm:$0xff]  ;;  %v17178_v43 = vpack.c.bf16 %v2366_v31, %v2365_v21  ;;  %v4510_v21 = vld [vmem:[#allocation2 + $0xac] sm:$0xff] }
 0x218   : > { %v4506_v4 = vld [vmem:[#allocation2 + $0x7c] sm:$0xff]  ;;  %v4511_v31 = vld [vmem:[#allocation2 + $0xb4] sm:$0xff] }
 0x21b   : > { %v1590_v49 = vld [vmem:[#allocation4 + $0x1e0] ss:$2 sm:$0xff]  ;;  %v1654_v50 = vld [vmem:[#allocation4 + $0x1e1] ss:$2 sm:$0xff] }
 0x21c   : > { %v1687_v56 = vmax.f32 %v1590_v49, %v1654_v50  ;;  %v16411_v49 = vld [vmem:[%s18863_s2 + $0x38] sm:$0xff]  }
 0x21d   : > { %14208 = vmatmul.mubr.msk.bf16.gmra.mrb[144].mxu0 %vm1465_vm0, %v17073_v57  ;;  %14452 = vmatmul.mubr.msk.bf16.gmra.mrb[4].mxu1 %vm1465_vm0, %v17075_v58  ;;  %v2362_v50 = vld [vmem:[#allocation2 + $0x52] sm:$0xff] }
 0x21e   : > { %14211 = vmatprep.mubr.msk.bf16.mxu0 %vm1465_vm0, %v17077_v28  ;;  %14455 = vmatprep.mubr.msk.bf16.mxu1 %vm1465_vm0, %v17079_v60  ;;  %v1726_v2 = vadd.f32 %v16998_v52, %v1687_v56  ;;  %v17129_v52 = vpack.c.bf16 %v1839_v10, %v1838_v9  ;;  %v2361_v56 = vld [vmem:[#allocation2 + $0x4a] sm:$0xff]  ;;  %v2363_v9 = vld [vmem:[#allocation2 + $0x62] sm:$0xff] }
 0x21f   : > { %v2364_v10 = vld [vmem:[#allocation2 + $0x6a] sm:$0xff]  ;;  %v17166_v13 = vpack.c.bf16 %v2362_v50, %v2361_v56  ;;  %v17185_v50 = vpack.c.bf16 %v2368_v36, %v2367_v33  ;;  %v17218_v33 = vpack.c.bf16 %v4511_v31, %v4510_v21  ;;  %v4514_v36 = vld [vmem:[#allocation2 + $0xdc] sm:$0xff] }
 0x220   : > { %1806 = vst.msk [vmem:[#allocation2 + $0x19a] sm:$0xff] %vm1465_vm0, %v1726_v2  ;;  %v4499_v2 = vld [vmem:[#allocation2 + $0x24] sm:$0xff]  ;;  %v4522_v21 = vld [vmem:[#allocation2 + $0x13c] sm:$0xff] }
 0x221   : > { %v17164_v11 = vpack.c.bf16 %v4499_v2, %v4498_v1  ;;  %v17201_v1 = vld [vmem:[%s18863_s2 + $0xb0] sm:$0xff]   ;;  %v4504_v2 = vld [vmem:[#allocation2 + $0x64] sm:$0xff] }
 0x222   : > { %v4523_v31 = vld [vmem:[#allocation2 + $0x144] sm:$0xff] }
 0x225   : > { %14212 = vmatmul.mubr.msk.bf16.gmra.mrb[148].mxu0 %vm1465_vm0, %v17092_v24  ;;  %14456 = vmatmul.mubr.msk.bf16.gmra.mrb[8].mxu1 %vm1465_vm0, %v17094_v25 }
 0x226   : > { %14215 = vmatprep.mubr.msk.bf16.mxu0 %vm1465_vm0, %v17097_v29  ;;  %14459 = vmatprep.mubr.msk.bf16.mxu1 %vm1465_vm0, %v17099_v30 }
 0x22d   : > { %14216 = vmatmul.mubr.msk.bf16.gmra.mrb[152].mxu0 %vm1465_vm0, %v17109_v53  ;;  %14460 = vmatmul.mubr.msk.bf16.gmra.mrb[12].mxu1 %vm1465_vm0, %v17111_v54 }
 0x22e   : > { %14219 = vmatprep.mubr.msk.bf16.mxu0 %vm1465_vm0, %v17113_v63  ;;  %14463 = vmatprep.mubr.msk.bf16.mxu1 %vm1465_vm0, %v17115_v0 }
 0x235   : > { %14220 = vmatmul.mubr.msk.bf16.gmra.mrb[156].mxu0 %vm1465_vm0, %v17129_v52  ;;  %14464 = vmatmul.mubr.msk.bf16.gmra.mrb[16].mxu1 %vm1465_vm0, %v17131_v16 }
 0x236   : > { %14467 = vmatprep.mubr.msk.bf16.mxu1 %vm1465_vm0, %v17133_v17  ;;  %14227 = vmatprep.mubr.msk.bf16.mxu0 %vm1465_vm0, %v2387_v15  ;;  %v17168_v15 = vpack.c.bf16 %v2364_v10, %v2363_v9  ;;  %v4507_v9 = vld [vmem:[#allocation2 + $0x84] sm:$0xff]  ;;  %v17203_v10 = vpack.c.bf16 %v4505_v3, %v4504_v2  ;;  %v4518_v2 = vld [vmem:[#allocation2 + $0x10c] sm:$0xff]  ;;  %v4519_v3 = vld [vmem:[#allocation2 + $0x114] sm:$0xff] }
 0x23d   : > { %14228 = vmatmul.mubr.msk.bf16.vlgmr.msra.gmra.mrb[128].mxu0 %vm1465_vm0, %v2388_v40  ;;  %14468 = vmatmul.mubr.msk.bf16.gmra.mrb[20].mxu1 %vm1465_vm0, %v17142_v45  ;;  %v4502_v40 = vld [vmem:[#allocation2 + $0x4c] sm:$0xff] }
 0x23e   : > { %14231 = vmatprep.mubr.msk.bf16.mxu0 %vm1465_vm0, %v17144_v46  ;;  %14471 = vmatprep.mubr.msk.bf16.mxu1 %vm1465_vm0, %v17146_v48  ;;  %v17191_v56 = vpack.c.bf16 %v4503_v41, %v4502_v40  ;;  %v4515_v40 = vld [vmem:[#allocation2 + $0xe4] sm:$0xff] }
 0x23f   : > { %14260 = vmatpush3.bf16.msra.mxu0 %v17015_v61  ;;  %v4501_v61 = vld [vmem:[#allocation2 + $0x3c] sm:$0xff] }
 0x240   : > { %14261 = vmatprep.subr.bf16.mxu0 %v16411_v49  ;;  %v17180_v44 = vpack.c.bf16 %v4501_v61, %v4500_v32  ;;  %v4509_v61 = vld [vmem:[#allocation2 + $0x9c] sm:$0xff] }
 0x243   : > { %14262 = vmatpush3.bf16.msra.mxu0 %v16411_v49  ;;  %v16409_v49 = vld [vmem:[%s18863_s2 + $0xa8] sm:$0xff]  }
 0x244   : > { %14295 = vmatprep.subr.bf16.mxu0 %v17162_v51 }
 0x245   : > { %14232 = vmatmul.mubr.msk.bf16.gmra.mrb[132].mxu0 %vm1465_vm0, %v17166_v13  ;;  %14472 = vmatmul.mubr.msk.bf16.gmra.mrb[24].mxu1 %vm1465_vm0, %v4239_v14  ;;  %v4508_v14 = vld [vmem:[#allocation2 + $0x94] sm:$0xff] }
 0x246   : > { %14235 = vmatprep.mubr.msk.bf16.mxu0 %vm1465_vm0, %v17168_v15  ;;  %14479 = vmatprep.mubr.msk.bf16.mxu1 %vm1465_vm0, %v17164_v11  ;;  %v17216_v32 = vpack.c.bf16 %v4509_v61, %v4508_v14  ;;  %v4520_v14 = vld [vmem:[#allocation2 + $0x124] sm:$0xff]  ;;  %v4521_v61 = vld [vmem:[#allocation2 + $0x12c] sm:$0xff] }
 0x24d   : > { %14236 = vmatmul.mubr.msk.bf16.gmra.mrb[136].mxu0 %vm1465_vm0, %v17178_v43  ;;  %14480 = vmatmul.mubr.msk.bf16.vlgmr.msra.gmra.mrb[28].mxu1 %vm1465_vm0, %v17180_v44 }
 0x24e   : > { %14512 = vmatpush3.bf16.msra.mxu1 %v17054_v26  ;;  %14239 = vmatprep.mubr.msk.bf16.mxu0 %vm1465_vm0, %v17185_v50  ;;  %v17206_v26 = vpack.c.bf16 %v4507_v9, %v4506_v4  ;;  %v17242_v9 = vpack.c.bf16 %v4519_v3, %v4518_v2  ;;  %v4528_v3 = vld [vmem:[#allocation2 + $0x184] sm:$0xff] }
 0x24f   : > { %14483 = vmatprep.mubr.msk.bf16.mxu1 %vm1465_vm0, %v17191_v56  ;;  %14513 = vmatprep.subr.bf16.mxu1 %v16409_v49 }
 0x252   : > { %14514 = vmatpush3.bf16.msra.mxu1 %v16409_v49  ;;  %v17230_v49 = vpack.c.bf16 %v4515_v40, %v4514_v36  ;;  %v17254_v36 = vpack.c.bf16 %v4523_v31, %v4522_v21  ;;  %v4526_v40 = vld [vmem:[#allocation2 + $0x16c] sm:$0xff] }
 0x253   : > { %14547 = vmatprep.subr.bf16.mxu1 %v17201_v1 }
 0x255   : > { %14240 = vmatmul.mubr.msk.bf16.gmra.mrb[140].mxu0 %vm1465_vm0, %v16863_v62  ;;  %14484 = vmatmul.mubr.msk.bf16.gmra.mrb[0].mxu1 %vm1465_vm0, %v17203_v10  ;;  %v4512_v62 = vld [vmem:[#allocation2 + $0xc4] sm:$0xff] }
 0x256   : > { %14243 = vmatprep.mubr.msk.bf16.mxu0 %vm1465_vm0, %v16885_v27  ;;  %14487 = vmatprep.mubr.msk.bf16.mxu1 %vm1465_vm0, %v17206_v26  ;;  %v4513_v27 = vld [vmem:[#allocation2 + $0xcc] sm:$0xff] }
 0x257   : > { %v17228_v41 = vpack.c.bf16 %v4513_v27, %v4512_v62  ;;  %v17252_v27 = vpack.c.bf16 %v4521_v61, %v4520_v14  ;;  %v5127_v61 = vld [vmem:[#allocation2 + $0xf9] sm:$0xff] }
 0x25d   : > { %14244 = vmatmul.mubr.msk.bf16.gmra.mrb[144].mxu0 %vm1465_vm0, %v16904_v55  ;;  %14488 = vmatmul.mubr.msk.bf16.gmra.mrb[4].mxu1 %vm1465_vm0, %v17216_v32  ;;  %v4516_v55 = vld [vmem:[#allocation2 + $0xf4] sm:$0xff] }
 0x25e   : > { %14247 = vmatprep.mubr.msk.bf16.mxu0 %vm1465_vm0, %v16917_v18  ;;  %14491 = vmatprep.mubr.msk.bf16.mxu1 %vm1465_vm0, %v17218_v33  ;;  %v4517_v18 = vld [vmem:[#allocation2 + $0xfc] sm:$0xff] }
 0x25f   : > { %v17240_v4 = vpack.c.bf16 %v4517_v18, %v4516_v55  ;;  %v4527_v55 = vld [vmem:[#allocation2 + $0x174] sm:$0xff] }
 0x260   : > { %v17265_v2 = vpack.c.bf16 %v4527_v55, %v4526_v40  ;;  %v5132_v55 = vld [vmem:[#allocation2 + $0x139] sm:$0xff] }
 0x265   : > { %14248 = vmatmul.mubr.msk.bf16.gmra.mrb[148].mxu0 %vm1465_vm0, %v16930_v47  ;;  %14492 = vmatmul.mubr.msk.bf16.gmra.mrb[8].mxu1 %vm1465_vm0, %v17228_v41  ;;  %v2661_v47 = vld [vmem:[#allocation2 + $0x3] sm:$0xff] }
 0x266   : > { %14251 = vmatprep.mubr.msk.bf16.mxu0 %vm1465_vm0, %v16949_v12  ;;  %14495 = vmatprep.mubr.msk.bf16.mxu1 %vm1465_vm0, %v17230_v49  ;;  %v2662_v12 = vld [vmem:[#allocation2 + $0xb] sm:$0xff] }
 0x267   : > { %v2693_v62 = vpack.c.bf16 %v2662_v12, %v2661_v47  ;;  %v4529_v47 = vld [vmem:[#allocation2 + $0x18c] sm:$0xff] }
 0x268   : > { %v16418_v12 = vld [vmem:[%s18863_s2 + $0x50] sm:$0xff]   ;;  %v4545_v14 = vpack.c.bf16 %v4529_v47, %v4528_v3  ;;  %v5135_v47 = vld [vmem:[#allocation2 + $0x159] sm:$0xff] }
 0x269   : > { %v5134_v3 = vld [vmem:[#allocation2 + $0x151] sm:$0xff] }
 0x26d   : > { %14252 = vmatmul.mubr.msk.bf16.gmra.mrb[152].mxu0 %vm1465_vm0, %v16962_v42  ;;  %14496 = vmatmul.mubr.msk.bf16.gmra.mrb[12].mxu1 %vm1465_vm0, %v17240_v4  ;;  %v4524_v42 = vld [vmem:[#allocation2 + $0x154] sm:$0xff] }
 0x26e   : > { %14255 = vmatprep.mubr.msk.bf16.mxu0 %vm1465_vm0, %v16975_v8  ;;  %14499 = vmatprep.mubr.msk.bf16.mxu1 %vm1465_vm0, %v17242_v9  ;;  %v4525_v8 = vld [vmem:[#allocation2 + $0x15c] sm:$0xff] }
 0x26f   : > { %v17263_v18 = vpack.c.bf16 %v4525_v8, %v4524_v42  ;;  %v5131_v42 = vld [vmem:[#allocation2 + $0x129] sm:$0xff] }
 0x275   : > { %14256 = vmatmul.mubr.msk.bf16.gmra.mrb[156].mxu0 %vm1465_vm0, %v16988_v39  ;;  %14500 = vmatmul.mubr.msk.bf16.gmra.mrb[16].mxu1 %vm1465_vm0, %v17252_v27  ;;  %v16415_v39 = vld [vmem:[%s18863_s2 + $0x48] sm:$0xff]  }
 0x276   : > { %14503 = vmatprep.mubr.msk.bf16.mxu1 %vm1465_vm0, %v17254_v36  ;;  %14263 = vmatprep.mubr.msk.bf16.mxu0 %vm1465_vm0, %v2693_v62  ;;  %v5130_v62 = vld [vmem:[#allocation2 + $0x121] sm:$0xff] }
 0x277   : > { %v17430_v40 = vpack.c.bf16 %v5131_v42, %v5130_v62  ;;  %v3292_v62 = vld [vmem:[#allocation2 + $0xf0] sm:$0xff]  ;;  %v3293_v42 = vld [vmem:[#allocation2 + $0xf8] sm:$0xff] }
 0x27d   : > { %14264 = vmatmul.mubr.msk.bf16.vlgmr.msra.gmra.mrb[128].mxu0 %vm1465_vm0, %v17017_v5  ;;  %14504 = vmatmul.mubr.msk.bf16.gmra.mrb[20].mxu1 %vm1465_vm0, %v17263_v18  ;;  %v16413_v5 = vld [vmem:[%s18863_s2 + $0xb8] sm:$0xff]  }
 0x27e   : > { %14267 = vmatprep.mubr.msk.bf16.mxu0 %vm1465_vm0, %v17033_v20  ;;  %14507 = vmatprep.mubr.msk.bf16.mxu1 %vm1465_vm0, %v17265_v2  ;;  %v4832_v20 = vld [vmem:[#allocation2 + $0x180] sm:$0xff] }
 0x27f   : > { %14296 = vmatpush3.bf16.msra.mxu0 %v17162_v51 }
 0x280   : > { %14297 = vmatprep.subr.bf16.mxu0 %v16415_v39 }
 0x283   : > { %14298 = vmatpush3.bf16.msra.mxu0 %v16415_v39  ;;  %v5133_v39 = vld [vmem:[#allocation2 + $0x141] sm:$0xff] }
 0x284   : > { %14331 = vmatprep.subr.bf16.mxu0 %v16418_v12 }
 0x285   : > { %14268 = vmatmul.mubr.msk.bf16.gmra.mrb[132].mxu0 %vm1465_vm0, %v17044_v23  ;;  %14508 = vmatmul.mubr.msk.bf16.gmra.mrb[24].mxu1 %vm1465_vm0, %v4545_v14  ;;  %v17440_v14 = vpack.c.bf16 %v5133_v39, %v5132_v55  ;;  %v3295_v55 = vld [vmem:[#allocation2 + $0x110] sm:$0xff] }
 0x286   : > { %14271 = vmatprep.mubr.msk.bf16.mxu0 %vm1465_vm0, %v17058_v35  ;;  %14515 = vmatprep.mubr.msk.bf16.mxu1 %vm1465_vm0, %v17006_v59  ;;  %v16416_v59 = vld [vmem:[%s18863_s2 + $0xc0] sm:$0xff]   ;;  %v4834_v35 = vld [vmem:[#allocation2 + $0x198] sm:$0xff]  ;;  %v5429_v39 = vld [vmem:[#allocation2 + $0xca] sm:$0xff] }
 0x28d   : > { %14272 = vmatmul.mubr.msk.bf16.gmra.mrb[136].mxu0 %vm1465_vm0, %v17063_v38  ;;  %14516 = vmatmul.mubr.msk.bf16.vlgmr.msra.gmra.mrb[28].mxu1 %vm1465_vm0, %v17019_v6  ;;  %v2967_v6 = vld [vmem:[#allocation2 + $0x4] sm:$0xff] }
 0x28e   : > { %14548 = vmatpush3.bf16.msra.mxu1 %v17201_v1  ;;  %14275 = vmatprep.mubr.msk.bf16.mxu0 %vm1465_vm0, %v17075_v58  ;;  %v17359_v38 = vld [vmem:[%s18863_s2 + $0x60] sm:$0xff]   ;;  %v5123_v1 = vld [vmem:[#allocation2 + $0xc9] sm:$0xff] }
 0x28f   : > { %14519 = vmatprep.mubr.msk.bf16.mxu1 %vm1465_vm0, %v17022_v7  ;;  %14549 = vmatprep.subr.bf16.mxu1 %v16413_v5  ;;  %v2968_v7 = vld [vmem:[#allocation2 + $0xc] sm:$0xff]  ;;  %v5111_v58 = vld [vmem:[#allocation2 + $0x39] sm:$0xff] }
 0x292   : > { %14550 = vmatpush3.bf16.msra.mxu1 %v16413_v5  ;;  %v17442_v5 = vpack.c.bf16 %v5135_v47, %v5134_v3  ;;  %v17519_v3 = vpack.c.bf16 %v3293_v42, %v3292_v62  ;;  %v5441_v62 = vld [vmem:[#allocation2 + $0x15a] sm:$0xff] }
 0x293   : > { %14583 = vmatprep.subr.bf16.mxu1 %v16416_v59 }
 0x295   : > { %14276 = vmatmul.mubr.msk.bf16.gmra.mrb[140].mxu0 %vm1465_vm0, %v17079_v60  ;;  %14520 = vmatmul.mubr.msk.bf16.gmra.mrb[0].mxu1 %vm1465_vm0, %v17031_v19  ;;  %v2999_v19 = vpack.c.bf16 %v2968_v7, %v2967_v6  ;;  %v5137_v6 = vld [vmem:[#allocation2 + $0x171] sm:$0xff]  ;;  %v3278_v7 = vld [vmem:[#allocation2 + $0x48] sm:$0xff] }
 0x296   : > { %14279 = vmatprep.mubr.msk.bf16.mxu0 %vm1465_vm0, %v17094_v25  ;;  %14523 = vmatprep.mubr.msk.bf16.mxu1 %vm1465_vm0, %v17038_v22  ;;  %v4833_v22 = vld [vmem:[#allocation2 + $0x188] sm:$0xff]  ;;  %v5113_v25 = vld [vmem:[#allocation2 + $0x51] sm:$0xff] }
 0x297   : > { %v17343_v23 = vpack.c.bf16 %v4833_v22, %v4832_v20  ;;  %v5138_v20 = vld [vmem:[#allocation2 + $0x181] sm:$0xff]  ;;  %v5139_v22 = vld [vmem:[#allocation2 + $0x189] sm:$0xff] }
 0x29d   : > { %14280 = vmatmul.mubr.msk.bf16.gmra.mrb[144].mxu0 %vm1465_vm0, %v17099_v30  ;;  %14524 = vmatmul.mubr.msk.bf16.gmra.mrb[4].mxu1 %vm1465_vm0, %v17056_v34  ;;  %v16419_v34 = vld [vmem:[%s18863_s2 + $0x58] sm:$0xff]   ;;  %v5115_v30 = vld [vmem:[#allocation2 + $0x69] sm:$0xff] }
 0x29e   : > { %14283 = vmatprep.mubr.msk.bf16.mxu0 %vm1465_vm0, %v17111_v54  ;;  %14527 = vmatprep.mubr.msk.bf16.mxu1 %vm1465_vm0, %v17061_v37  ;;  %v4835_v37 = vld [vmem:[#allocation2 + $0x1a0] sm:$0xff]  ;;  %v16417_v54 = vld [vmem:[%s18863_s2 + $0xc8] sm:$0xff]  }
 0x2a5   : > { %14284 = vmatmul.mubr.msk.bf16.gmra.mrb[148].mxu0 %vm1465_vm0, %v17115_v0  ;;  %14528 = vmatmul.mubr.msk.bf16.gmra.mrb[8].mxu1 %vm1465_vm0, %v17073_v57  ;;  %v5110_v57 = vld [vmem:[#allocation2 + $0x31] sm:$0xff] }
 0x2a6   : > { %14287 = vmatprep.mubr.msk.bf16.mxu0 %vm1465_vm0, %v17131_v16  ;;  %14531 = vmatprep.mubr.msk.bf16.mxu1 %vm1465_vm0, %v17077_v28  ;;  %v4851_v28 = vpack.c.bf16 %v4835_v37, %v4834_v35  ;;  %v17361_v60 = vpack.c.bf16 %v5111_v58, %v5110_v57  ;;  %v17389_v0 = vld [vmem:[%s18863_s2 + $0xd0] sm:$0xff]   ;;  %v5117_v16 = vld [vmem:[#allocation2 + $0x81] sm:$0xff]  ;;  %v17455_v37 = vpack.c.bf16 %v5139_v22, %v5138_v20 }
 0x2a7   : > { %v16423_v57 = vld [vmem:[%s18863_s2 + $0x68] sm:$0xff]   ;;  %v3280_v58 = vld [vmem:[#allocation2 + $0x60] sm:$0xff] }
 0x2a8   : > { %v5433_v20 = vld [vmem:[#allocation2 + $0xfa] sm:$0xff] }
 0x2ad   : > { %14288 = vmatmul.mubr.msk.bf16.gmra.mrb[152].mxu0 %vm1465_vm0, %v17133_v17  ;;  %14532 = vmatmul.mubr.msk.bf16.gmra.mrb[12].mxu1 %vm1465_vm0, %v17092_v24  ;;  %v5112_v24 = vld [vmem:[#allocation2 + $0x49] sm:$0xff]  ;;  %v5118_v17 = vld [vmem:[#allocation2 + $0x91] sm:$0xff] }
 0x2ae   : > { %14291 = vmatprep.mubr.msk.bf16.mxu0 %vm1465_vm0, %v17142_v45  ;;  %14535 = vmatprep.mubr.msk.bf16.mxu1 %vm1465_vm0, %v17097_v29  ;;  %v5114_v29 = vld [vmem:[#allocation2 + $0x61] sm:$0xff]  ;;  %v5119_v45 = vld [vmem:[#allocation2 + $0x99] sm:$0xff] }
 0x2af   : > { %v17394_v51 = vpack.c.bf16 %v5119_v45, %v5118_v17  ;;  %v17475_v17 = vld [vmem:[%s18863_s2 + $0x70] sm:$0xff]   ;;  %v3285_v45 = vld [vmem:[#allocation2 + $0x98] sm:$0xff] }
 0x2b5   : > { %14292 = vmatmul.mubr.msk.bf16.gmra.mrb[156].mxu0 %vm1465_vm0, %v17146_v48  ;;  %14536 = vmatmul.mubr.msk.bf16.gmra.mrb[16].mxu1 %vm1465_vm0, %v17109_v53  ;;  %v17371_v53 = vpack.c.bf16 %v5113_v25, %v5112_v24  ;;  %v5140_v24 = vld [vmem:[#allocation2 + $0x199] sm:$0xff]  ;;  %v5141_v25 = vld [vmem:[#allocation2 + $0x1a1] sm:$0xff] }
 0x2b6   : > { %14539 = vmatprep.mubr.msk.bf16.mxu1 %vm1465_vm0, %v17113_v63  ;;  %14299 = vmatprep.mubr.msk.bf16.mxu0 %vm1465_vm0, %v2999_v19  ;;  %v17380_v63 = vpack.c.bf16 %v5115_v30, %v5114_v29  ;;  %v3279_v19 = vld [vmem:[#allocation2 + $0x50] sm:$0xff]  ;;  %v3282_v29 = vld [vmem:[#allocation2 + $0x78] sm:$0xff]  ;;  %v3283_v30 = vld [vmem:[#allocation2 + $0x80] sm:$0xff] }
 0x2bd   : > { %14300 = vmatmul.mubr.msk.bf16.vlgmr.msra.gmra.mrb[128].mxu0 %vm1465_vm0, %v17164_v11  ;;  %14540 = vmatmul.mubr.msk.bf16.gmra.mrb[20].mxu1 %vm1465_vm0, %v17129_v52  ;;  %v5116_v52 = vld [vmem:[#allocation2 + $0x79] sm:$0xff]  ;;  %v5120_v11 = vld [vmem:[#allocation2 + $0xa9] sm:$0xff] }
 0x2be   : > { %14303 = vmatprep.mubr.msk.bf16.mxu0 %vm1465_vm0, %v17180_v44  ;;  %14543 = vmatprep.mubr.msk.bf16.mxu1 %vm1465_vm0, %v17343_v23  ;;  %v17391_v48 = vpack.c.bf16 %v5117_v16, %v5116_v52  ;;  %v5121_v44 = vld [vmem:[#allocation2 + $0xb1] sm:$0xff]  ;;  %v5157_v52 = vpack.c.bf16 %v5141_v25, %v5140_v24  ;;  %v17470_v16 = vpack.c.bf16 %v3283_v30, %v3282_v29  ;;  %v5436_v30 = vld [vmem:[#allocation2 + $0x122] sm:$0xff] }
 0x2bf   : > { %14332 = vmatpush3.bf16.msra.mxu0 %v16418_v12  ;;  %v5435_v24 = vld [vmem:[#allocation2 + $0x112] sm:$0xff] }
 0x2c0   : > { %14333 = vmatprep.subr.bf16.mxu0 %v16419_v34  ;;  %v3300_v25 = vld [vmem:[#allocation2 + $0x150] sm:$0xff]  ;;  %v3301_v29 = vld [vmem:[#allocation2 + $0x158] sm:$0xff] }
 0x2c3   : > { %14334 = vmatpush3.bf16.msra.mxu0 %v16419_v34 }
 0x2c4   : > { %14367 = vmatprep.subr.bf16.mxu0 %v17359_v38 }
 0x2c5   : > { %14304 = vmatmul.mubr.msk.bf16.gmra.mrb[132].mxu0 %vm1465_vm0, %v17191_v56  ;;  %14544 = vmatmul.mubr.msk.bf16.gmra.mrb[24].mxu1 %vm1465_vm0, %v4851_v28  ;;  %v5122_v56 = vld [vmem:[#allocation2 + $0xc1] sm:$0xff] }
 0x2c6   : > { %14307 = vmatprep.mubr.msk.bf16.mxu0 %vm1465_vm0, %v17203_v10  ;;  %14551 = vmatprep.mubr.msk.bf16.mxu1 %vm1465_vm0, %v17361_v60  ;;  %v17404_v10 = vpack.c.bf16 %v5121_v44, %v5120_v11  ;;  %v3281_v28 = vld [vmem:[#allocation2 + $0x68] sm:$0xff]  ;;  %v3287_v44 = vld [vmem:[#allocation2 + $0xb0] sm:$0xff] }
 0x2c7   : > { %v3286_v11 = vld [vmem:[#allocation2 + $0xa8] sm:$0xff] }
 0x2cd   : > { %14308 = vmatmul.mubr.msk.bf16.gmra.mrb[136].mxu0 %vm1465_vm0, %v17206_v26  ;;  %14552 = vmatmul.mubr.msk.bf16.vlgmr.msra.gmra.mrb[28].mxu1 %vm1465_vm0, %v17371_v53  ;;  %v17406_v26 = vpack.c.bf16 %v5123_v1, %v5122_v56  ;;  %v16421_v1 = vld [vmem:[%s18863_s2 + $0xd8] sm:$0xff]  }
 0x2ce   : > { %14584 = vmatpush3.bf16.msra.mxu1 %v16416_v59  ;;  %14311 = vmatprep.mubr.msk.bf16.mxu0 %vm1465_vm0, %v17216_v32  ;;  %v5124_v32 = vld [vmem:[#allocation2 + $0xd9] sm:$0xff]  ;;  %v5136_v59 = vld [vmem:[#allocation2 + $0x169] sm:$0xff] }
 0x2cf   : > { %14555 = vmatprep.mubr.msk.bf16.mxu1 %vm1465_vm0, %v17380_v63  ;;  %14585 = vmatprep.subr.bf16.mxu1 %v16417_v54  ;;  %v17451_v35 = vpack.c.bf16 %v5137_v6, %v5136_v59  ;;  %v3297_v59 = vld [vmem:[#allocation2 + $0x128] sm:$0xff]  ;;  %v5432_v6 = vld [vmem:[#allocation2 + $0xf2] sm:$0xff] }
 0x2d2   : > { %14586 = vmatpush3.bf16.msra.mxu1 %v16417_v54  ;;  %v17468_v54 = vpack.c.bf16 %v3281_v28, %v3280_v58  ;;  %v17541_v58 = vpack.c.bf16 %v5433_v20, %v5432_v6  ;;  %v5434_v28 = vld [vmem:[#allocation2 + $0x10a] sm:$0xff]  ;;  %v5447_v6 = vld [vmem:[#allocation2 + $0x1a2] sm:$0xff] }
 0x2d3   : > { %14619 = vmatprep.subr.bf16.mxu1 %v17389_v0 }
 0x2d5   : > { %14312 = vmatmul.mubr.msk.bf16.gmra.mrb[140].mxu0 %vm1465_vm0, %v17218_v33  ;;  %14556 = vmatmul.mubr.msk.bf16.gmra.mrb[0].mxu1 %vm1465_vm0, %v17391_v48  ;;  %v5125_v33 = vld [vmem:[#allocation2 + $0xe1] sm:$0xff] }
 0x2d6   : > { %14315 = vmatprep.mubr.msk.bf16.mxu0 %vm1465_vm0, %v17228_v41  ;;  %14559 = vmatprep.mubr.msk.bf16.mxu1 %vm1465_vm0, %v17394_v51  ;;  %v5126_v41 = vld [vmem:[#allocation2 + $0xf1] sm:$0xff]  ;;  %v17416_v21 = vpack.c.bf16 %v5125_v33, %v5124_v32  ;;  %v17490_v32 = vpack.c.bf16 %v3287_v44, %v3286_v11  ;;  %v3288_v33 = vld [vmem:[#allocation2 + $0xc0] sm:$0xff]  ;;  %v17551_v11 = vpack.c.bf16 %v3301_v29, %v3300_v25 }
 0x2d7   : > { %v17418_v31 = vpack.c.bf16 %v5127_v61, %v5126_v41  ;;  %v3289_v41 = vld [vmem:[#allocation2 + $0xc8] sm:$0xff]  ;;  %v3290_v61 = vld [vmem:[#allocation2 + $0xd8] sm:$0xff]  ;;  %v17553_v44 = vpack.c.bf16 %v5435_v24, %v5434_v28 }
 0x2d8   : > { %v5726_v24 = vld [vmem:[#allocation2 + $0x63] sm:$0xff]  ;;  %v5727_v25 = vld [vmem:[#allocation2 + $0x6b] sm:$0xff] }
 0x2dd   : > { %14316 = vmatmul.mubr.msk.bf16.gmra.mrb[144].mxu0 %vm1465_vm0, %v17230_v49  ;;  %14560 = vmatmul.mubr.msk.bf16.gmra.mrb[4].mxu1 %vm1465_vm0, %v17404_v10  ;;  %v5128_v49 = vld [vmem:[#allocation2 + $0x109] sm:$0xff] }
 0x2de   : > { %14319 = vmatprep.mubr.msk.bf16.mxu0 %vm1465_vm0, %v17240_v4  ;;  %14563 = vmatprep.mubr.msk.bf16.mxu1 %vm1465_vm0, %v17406_v26  ;;  %v5129_v4 = vld [vmem:[#allocation2 + $0x111] sm:$0xff] }
 0x2df   : > { %v17428_v8 = vpack.c.bf16 %v5129_v4, %v5128_v49  ;;  %v3291_v49 = vld [vmem:[#allocation2 + $0xe0] sm:$0xff]  ;;  %v5427_v4 = vld [vmem:[#allocation2 + $0xb2] sm:$0xff] }
 0x2e5   : > { %14320 = vmatmul.mubr.msk.bf16.gmra.mrb[148].mxu0 %vm1465_vm0, %v17242_v9  ;;  %14564 = vmatmul.mubr.msk.bf16.gmra.mrb[8].mxu1 %vm1465_vm0, %v17416_v21  ;;  %v3274_v9 = vld [vmem:[#allocation2 + $0x18] sm:$0xff] }
 0x2e6   : > { %14323 = vmatprep.mubr.msk.bf16.mxu0 %vm1465_vm0, %v17252_v27  ;;  %14567 = vmatprep.mubr.msk.bf16.mxu1 %vm1465_vm0, %v17418_v31  ;;  %v3275_v27 = vld [vmem:[#allocation2 + $0x20] sm:$0xff] }
 0x2e7   : > { %v3306_v12 = vpack.c.bf16 %v3275_v27, %v3274_v9  ;;  %v5428_v9 = vld [vmem:[#allocation2 + $0xc2] sm:$0xff] }
 0x2e8   : > { %v3294_v27 = vld [vmem:[#allocation2 + $0x108] sm:$0xff] }
 0x2ed   : > { %14324 = vmatmul.mubr.msk.bf16.gmra.mrb[152].mxu0 %vm1465_vm0, %v17254_v36  ;;  %14568 = vmatmul.mubr.msk.bf16.gmra.mrb[12].mxu1 %vm1465_vm0, %v17428_v8  ;;  %v3276_v36 = vld [vmem:[#allocation2 + $0x30] sm:$0xff] }
 0x2ee   : > { %14327 = vmatprep.mubr.msk.bf16.mxu0 %vm1465_vm0, %v17263_v18  ;;  %14571 = vmatprep.mubr.msk.bf16.mxu1 %vm1465_vm0, %v17430_v40  ;;  %v3277_v18 = vld [vmem:[#allocation2 + $0x38] sm:$0xff] }
 0x2ef   : > { %v3307_v34 = vpack.c.bf16 %v3277_v18, %v3276_v36  ;;  %v5431_v36 = vld [vmem:[#allocation2 + $0xe2] sm:$0xff] }
 0x2f0   : > { %v3296_v18 = vld [vmem:[#allocation2 + $0x120] sm:$0xff] }
 0x2f1   : > { %v17535_v22 = vpack.c.bf16 %v3297_v59, %v3296_v18 }
 0x2f5   : > { %14328 = vmatmul.mubr.msk.bf16.gmra.mrb[156].mxu0 %vm1465_vm0, %v17265_v2  ;;  %14572 = vmatmul.mubr.msk.bf16.gmra.mrb[16].mxu1 %vm1465_vm0, %v17440_v14  ;;  %v17453_v2 = vpack.c.bf16 %v3279_v19, %v3278_v7  ;;  %v3298_v7 = vld [vmem:[#allocation2 + $0x138] sm:$0xff]  ;;  %v3299_v19 = vld [vmem:[#allocation2 + $0x140] sm:$0xff] }
 0x2f6   : > { %14575 = vmatprep.mubr.msk.bf16.mxu1 %vm1465_vm0, %v17442_v5  ;;  %14335 = vmatprep.mubr.msk.bf16.mxu0 %vm1465_vm0, %v3306_v12  ;;  %v17523_v12 = vpack.c.bf16 %v3295_v55, %v3294_v27  ;;  %v5442_v55 = vld [vmem:[#allocation2 + $0x16a] sm:$0xff] }
 0x2fd   : > { %14336 = vmatmul.mubr.msk.bf16.vlgmr.msra.gmra.mrb[128].mxu0 %vm1465_vm0, %v3307_v34  ;;  %14576 = vmatmul.mubr.msk.bf16.gmra.mrb[20].mxu1 %vm1465_vm0, %v17451_v35 }
 0x2fe   : > { %14339 = vmatprep.mubr.msk.bf16.mxu0 %vm1465_vm0, %v17453_v2  ;;  %14579 = vmatprep.mubr.msk.bf16.mxu1 %vm1465_vm0, %v17455_v37 }
 0x2ff   : > { %14368 = vmatpush3.bf16.msra.mxu0 %v17359_v38  ;;  %v3284_v38 = vld [vmem:[#allocation2 + $0x90] sm:$0xff] }
 0x300   : > { %14369 = vmatprep.subr.bf16.mxu0 %v16423_v57  ;;  %v17485_v56 = vpack.c.bf16 %v3285_v45, %v3284_v38  ;;  %v3303_v38 = vld [vmem:[#allocation2 + $0x170] sm:$0xff] }
 0x301   : > { %v5437_v45 = vld [vmem:[#allocation2 + $0x12a] sm:$0xff] }
 0x303   : > { %14370 = vmatpush3.bf16.msra.mxu0 %v16423_v57  ;;  %v17539_v57 = vpack.c.bf16 %v3299_v19, %v3298_v7  ;;  %v16498_v7 = vld [vmem:[%s18863_s2 + $0x78] sm:$0xff]  }
 0x304   : > { %14403 = vmatprep.subr.bf16.mxu0 %v17475_v17  ;;  %v5722_v19 = vld [vmem:[#allocation2 + $0x33] sm:$0xff] }
 0x305   : > { %14340 = vmatmul.mubr.msk.bf16.gmra.mrb[132].mxu0 %vm1465_vm0, %v17468_v54  ;;  %14580 = vmatmul.mubr.msk.bf16.gmra.mrb[24].mxu1 %vm1465_vm0, %v5157_v52  ;;  %v3302_v52 = vld [vmem:[#allocation2 + $0x168] sm:$0xff] }
 0x306   : > { %14343 = vmatprep.mubr.msk.bf16.mxu0 %vm1465_vm0, %v17470_v16  ;;  %14587 = vmatprep.mubr.msk.bf16.mxu1 %vm1465_vm0, %v17144_v46  ;;  %v17504_v46 = vld [vmem:[%s18863_s2 + $0xe0] sm:$0xff]  }
 0x30d   : > { %14344 = vmatmul.mubr.msk.bf16.gmra.mrb[136].mxu0 %vm1465_vm0, %v17485_v56  ;;  %14588 = vmatmul.mubr.msk.bf16.vlgmr.msra.gmra.mrb[28].mxu1 %vm1465_vm0, %v17166_v13  ;;  %v17506_v13 = vpack.c.bf16 %v3289_v41, %v3288_v33  ;;  %v17557_v33 = vpack.c.bf16 %v5437_v45, %v5436_v30  ;;  %v3580_v41 = vld [vmem:[#allocation2 + $0x19] sm:$0xff]  ;;  %v16425_v30 = vld [vmem:[%s18863_s2 + $0xe8] sm:$0xff]  }
 0x30e   : > { %14620 = vmatpush3.bf16.msra.mxu1 %v17389_v0  ;;  %14347 = vmatprep.mubr.msk.bf16.mxu0 %vm1465_vm0, %v17490_v32  ;;  %v17509_v0 = vpack.c.bf16 %v3291_v49, %v3290_v61  ;;  %v3581_v61 = vld [vmem:[#allocation2 + $0x21] sm:$0xff] }
 0x30f   : > { %14591 = vmatprep.mubr.msk.bf16.mxu1 %vm1465_vm0, %v17168_v15  ;;  %14621 = vmatprep.subr.bf16.mxu1 %v16421_v1  ;;  %v5426_v15 = vld [vmem:[#allocation2 + $0xaa] sm:$0xff]  ;;  %v5438_v49 = vld [vmem:[#allocation2 + $0x13a] sm:$0xff]  ;;  %v3612_v42 = vpack.c.bf16 %v3581_v61, %v3580_v41 }
 0x310   : > { %v17521_v47 = vpack.c.bf16 %v5427_v4, %v5426_v15  ;;  %v5439_v15 = vld [vmem:[#allocation2 + $0x142] sm:$0xff]  ;;  %v5440_v4 = vld [vmem:[#allocation2 + $0x152] sm:$0xff] }
 0x311   : > { %v17569_v27 = vpack.c.bf16 %v5441_v62, %v5440_v4  ;;  %v5731_v45 = vld [vmem:[#allocation2 + $0x9b] sm:$0xff]  ;;  %v5733_v61 = vld [vmem:[#allocation2 + $0xb3] sm:$0xff] }
 0x312   : > { %14622 = vmatpush3.bf16.msra.mxu1 %v16421_v1  ;;  %v17555_v1 = vpack.c.bf16 %v3303_v38, %v3302_v52  ;;  %v5729_v52 = vld [vmem:[#allocation2 + $0x83] sm:$0xff]  ;;  %v5730_v38 = vld [vmem:[#allocation2 + $0x93] sm:$0xff] }
 0x313   : > { %14655 = vmatprep.subr.bf16.mxu1 %v17504_v46 }
 0x315   : > { %14348 = vmatmul.mubr.msk.bf16.gmra.mrb[140].mxu0 %vm1465_vm0, %v17506_v13  ;;  %14592 = vmatmul.mubr.msk.bf16.gmra.mrb[0].mxu1 %vm1465_vm0, %v17178_v43  ;;  %v17525_v43 = vpack.c.bf16 %v5429_v39, %v5428_v9  ;;  %v17567_v9 = vpack.c.bf16 %v5439_v15, %v5438_v49  ;;  %v5443_v39 = vld [vmem:[#allocation2 + $0x172] sm:$0xff]  ;;  %v5734_v49 = vld [vmem:[#allocation2 + $0xc3] sm:$0xff] }
 0x316   : > { %14351 = vmatprep.mubr.msk.bf16.mxu0 %vm1465_vm0, %v17509_v0  ;;  %14595 = vmatprep.mubr.msk.bf16.mxu1 %vm1465_vm0, %v17185_v50  ;;  %v5430_v50 = vld [vmem:[#allocation2 + $0xda] sm:$0xff]  ;;  %v17578_v18 = vpack.c.bf16 %v5443_v39, %v5442_v55  ;;  %v5735_v15 = vld [vmem:[#allocation2 + $0xcb] sm:$0xff] }
 0x317   : > { %v17537_v34 = vpack.c.bf16 %v5431_v36, %v5430_v50  ;;  %v5444_v50 = vld [vmem:[#allocation2 + $0x182] sm:$0xff]  ;;  %v5445_v36 = vld [vmem:[#allocation2 + $0x18a] sm:$0xff]  ;;  %v17639_v62 = vpack.c.bf16 %v5735_v15, %v5734_v49  ;;  %v6028_v15 = vld [vmem:[#allocation2 + $0x34] sm:$0xff] }
 0x318   : > { %v17580_v59 = vpack.c.bf16 %v5445_v36, %v5444_v50  ;;  %v5739_v55 = vld [vmem:[#allocation2 + $0xfb] sm:$0xff]  ;;  %v5742_v36 = vld [vmem:[#allocation2 + $0x123] sm:$0xff] }
 0x319   : > { %v5753_v49 = vld [vmem:[#allocation2 + $0x1a3] sm:$0xff] }
 0x31d   : > { %14352 = vmatmul.mubr.msk.bf16.gmra.mrb[144].mxu0 %vm1465_vm0, %v17519_v3  ;;  %14596 = vmatmul.mubr.msk.bf16.gmra.mrb[4].mxu1 %vm1465_vm0, %v17521_v47 }
 0x31e   : > { %14355 = vmatprep.mubr.msk.bf16.mxu0 %vm1465_vm0, %v17523_v12  ;;  %14599 = vmatprep.mubr.msk.bf16.mxu1 %vm1465_vm0, %v17525_v43 }
 0x325   : > { %14356 = vmatmul.mubr.msk.bf16.gmra.mrb[148].mxu0 %vm1465_vm0, %v17535_v22  ;;  %14600 = vmatmul.mubr.msk.bf16.gmra.mrb[8].mxu1 %vm1465_vm0, %v17537_v34 }
 0x326   : > { %14359 = vmatprep.mubr.msk.bf16.mxu0 %vm1465_vm0, %v17539_v57  ;;  %14603 = vmatprep.mubr.msk.bf16.mxu1 %vm1465_vm0, %v17541_v58 }
 0x32d   : > { %14360 = vmatmul.mubr.msk.bf16.gmra.mrb[152].mxu0 %vm1465_vm0, %v17551_v11  ;;  %14604 = vmatmul.mubr.msk.bf16.gmra.mrb[12].mxu1 %vm1465_vm0, %v17553_v44 }
 0x32e   : > { %14363 = vmatprep.mubr.msk.bf16.mxu0 %vm1465_vm0, %v17555_v1  ;;  %14607 = vmatprep.mubr.msk.bf16.mxu1 %vm1465_vm0, %v17557_v33 }
 0x335   : > { %14364 = vmatmul.mubr.msk.bf16.gmra.mrb[156].mxu0 %vm1465_vm0, %v17343_v23  ;;  %14608 = vmatmul.mubr.msk.bf16.gmra.mrb[16].mxu1 %vm1465_vm0, %v17567_v9  ;;  %v5446_v23 = vld [vmem:[#allocation2 + $0x19a] sm:$0xff] }
 0x336   : > { %14611 = vmatprep.mubr.msk.bf16.mxu1 %vm1465_vm0, %v17569_v27  ;;  %14371 = vmatprep.mubr.msk.bf16.mxu0 %vm1465_vm0, %v3612_v42  ;;  %v17594_v20 = vpack.c.bf16 %v5447_v6, %v5446_v23  ;;  %v5738_v42 = vld [vmem:[#allocation2 + $0xf3] sm:$0xff]  ;;  %v5743_v23 = vld [vmem:[#allocation2 + $0x12b] sm:$0xff] }
 0x337   : > { %v17651_v50 = vpack.c.bf16 %v5739_v55, %v5738_v42  ;;  %v6030_v55 = vld [vmem:[#allocation2 + $0x4c] sm:$0xff] }
 0x33d   : > { %14372 = vmatmul.mubr.msk.bf16.vlgmr.msra.gmra.mrb[128].mxu0 %vm1465_vm0, %v17361_v60  ;;  %14612 = vmatmul.mubr.msk.bf16.gmra.mrb[20].mxu1 %vm1465_vm0, %v17578_v18  ;;  %v5723_v60 = vld [vmem:[#allocation2 + $0x3b] sm:$0xff] }
 0x33e   : > { %14375 = vmatprep.mubr.msk.bf16.mxu0 %vm1465_vm0, %v17371_v53  ;;  %14615 = vmatprep.mubr.msk.bf16.mxu1 %vm1465_vm0, %v17580_v59  ;;  %v5754_v28 = vpack.c.bf16 %v5723_v60, %v5722_v19  ;;  %v5724_v53 = vld [vmem:[#allocation2 + $0x4b] sm:$0xff]  ;;  %v5744_v19 = vld [vmem:[#allocation2 + $0x13b] sm:$0xff]  ;;  %v5745_v60 = vld [vmem:[#allocation2 + $0x143] sm:$0xff] }
 0x33f   : > { %14404 = vmatpush3.bf16.msra.mxu0 %v17475_v17  ;;  %v5725_v17 = vld [vmem:[#allocation2 + $0x53] sm:$0xff] }
 0x340   : > { %14405 = vmatprep.subr.bf16.mxu0 %v16498_v7  ;;  %v17603_v29 = vpack.c.bf16 %v5725_v17, %v5724_v53  ;;  %v5747_v53 = vld [vmem:[#allocation2 + $0x15b] sm:$0xff] }
 0x343   : > { %14406 = vmatpush3.bf16.msra.mxu0 %v16498_v7  ;;  %v17663_v7 = vpack.c.bf16 %v5743_v23, %v5742_v36  ;;  %v6033_v36 = vld [vmem:[#allocation2 + $0x6c] sm:$0xff] }
 0x345   : > { %14376 = vmatmul.mubr.msk.bf16.gmra.mrb[132].mxu0 %vm1465_vm0, %v17380_v63  ;;  %14616 = vmatmul.mubr.msk.bf16.gmra.mrb[24].mxu1 %vm1465_vm0, %v17594_v20  ;;  %v17612_v63 = vpack.c.bf16 %v5727_v25, %v5726_v24  ;;  %v17673_v24 = vpack.c.bf16 %v5745_v60, %v5744_v19  ;;  %v16428_v19 = vld [vmem:[%s18863_s2 + $0x100] sm:$0xff]  }
 0x346   : > { %14379 = vmatprep.mubr.msk.bf16.mxu0 %vm1465_vm0, %v17391_v48  ;;  %14623 = vmatprep.mubr.msk.bf16.mxu1 %vm1465_vm0, %v5754_v28  ;;  %v17622_v48 = vld [vmem:[%s18863_s2 + $0xf0] sm:$0xff]   ;;  %v6034_v60 = vld [vmem:[#allocation2 + $0x7c] sm:$0xff] }
 0x347   : > { %v5746_v28 = vld [vmem:[#allocation2 + $0x153] sm:$0xff] }
 0x348   : > { %v17675_v25 = vpack.c.bf16 %v5747_v53, %v5746_v28  ;;  %v6035_v28 = vld [vmem:[#allocation2 + $0x84] sm:$0xff]  ;;  %v6036_v53 = vld [vmem:[#allocation2 + $0x94] sm:$0xff] }
 0x34d   : > { %14380 = vmatmul.mubr.msk.bf16.gmra.mrb[136].mxu0 %vm1465_vm0, %v17394_v51  ;;  %14624 = vmatmul.mubr.msk.bf16.vlgmr.msra.gmra.mrb[28].mxu1 %vm1465_vm0, %v17603_v29  ;;  %v5728_v51 = vld [vmem:[#allocation2 + $0x7b] sm:$0xff] }
 0x34e   : > { %14656 = vmatpush3.bf16.msra.mxu1 %v17504_v46  ;;  %14383 = vmatprep.mubr.msk.bf16.mxu0 %vm1465_vm0, %v17404_v10  ;;  %v17624_v41 = vpack.c.bf16 %v5729_v52, %v5728_v51  ;;  %v17627_v46 = vpack.c.bf16 %v5731_v45, %v5730_v38  ;;  %v5732_v10 = vld [vmem:[#allocation2 + $0xab] sm:$0xff]  ;;  %v5749_v51 = vld [vmem:[#allocation2 + $0x173] sm:$0xff]  ;;  %v5750_v52 = vld [vmem:[#allocation2 + $0x183] sm:$0xff] }
 0x34f   : > { %14627 = vmatprep.mubr.msk.bf16.mxu1 %vm1465_vm0, %v17612_v63  ;;  %14657 = vmatprep.subr.bf16.mxu1 %v16425_v30  ;;  %v17637_v4 = vpack.c.bf16 %v5733_v61, %v5732_v10  ;;  %v5751_v38 = vld [vmem:[#allocation2 + $0x18b] sm:$0xff] }
 0x350   : > { %v17686_v61 = vpack.c.bf16 %v5751_v38, %v5750_v52  ;;  %v6041_v52 = vld [vmem:[#allocation2 + $0xcc] sm:$0xff] }
 0x352   : > { %14658 = vmatpush3.bf16.msra.mxu1 %v16425_v30  ;;  %v5748_v30 = vld [vmem:[#allocation2 + $0x16b] sm:$0xff] }
 0x353   : > { %14691 = vmatprep.subr.bf16.mxu1 %v17622_v48  ;;  %v17684_v10 = vpack.c.bf16 %v5749_v51, %v5748_v30  ;;  %v6039_v30 = vld [vmem:[#allocation2 + $0xb4] sm:$0xff]  ;;  %v6040_v51 = vld [vmem:[#allocation2 + $0xc4] sm:$0xff] }
 0x355   : > { %14384 = vmatmul.mubr.msk.bf16.gmra.mrb[140].mxu0 %vm1465_vm0, %v17406_v26  ;;  %14628 = vmatmul.mubr.msk.bf16.gmra.mrb[0].mxu1 %vm1465_vm0, %v17624_v41  ;;  %v5736_v26 = vld [vmem:[#allocation2 + $0xdb] sm:$0xff] }
 0x356   : > { %14387 = vmatprep.mubr.msk.bf16.mxu0 %vm1465_vm0, %v17416_v21  ;;  %14631 = vmatprep.mubr.msk.bf16.mxu1 %vm1465_vm0, %v17627_v46  ;;  %v5737_v21 = vld [vmem:[#allocation2 + $0xe3] sm:$0xff] }
 0x357   : > { %v17649_v39 = vpack.c.bf16 %v5737_v21, %v5736_v26  ;;  %v6029_v26 = vld [vmem:[#allocation2 + $0x3c] sm:$0xff] }
 0x358   : > { %v6060_v42 = vpack.c.bf16 %v6029_v26, %v6028_v15  ;;  %v6044_v15 = vld [vmem:[#allocation2 + $0xf4] sm:$0xff]  ;;  %v6045_v26 = vld [vmem:[#allocation2 + $0xfc] sm:$0xff] }
 0x35d   : > { %14388 = vmatmul.mubr.msk.bf16.gmra.mrb[144].mxu0 %vm1465_vm0, %v17418_v31  ;;  %14632 = vmatmul.mubr.msk.bf16.gmra.mrb[4].mxu1 %vm1465_vm0, %v17637_v4  ;;  %v5740_v31 = vld [vmem:[#allocation2 + $0x10b] sm:$0xff] }
 0x35e   : > { %14391 = vmatprep.mubr.msk.bf16.mxu0 %vm1465_vm0, %v17428_v8  ;;  %14635 = vmatprep.mubr.msk.bf16.mxu1 %vm1465_vm0, %v17639_v62  ;;  %v5741_v8 = vld [vmem:[#allocation2 + $0x113] sm:$0xff] }
 0x35f   : > { %v17661_v6 = vpack.c.bf16 %v5741_v8, %v5740_v31  ;;  %v6031_v31 = vld [vmem:[#allocation2 + $0x54] sm:$0xff]  ;;  %v6032_v8 = vld [vmem:[#allocation2 + $0x64] sm:$0xff] }
 0x360   : > { %v17698_v23 = vpack.c.bf16 %v6031_v31, %v6030_v55  ;;  %v17731_v55 = vpack.c.bf16 %v6045_v26, %v6044_v15  ;;  %v6046_v31 = vld [vmem:[#allocation2 + $0x10c] sm:$0xff]  ;;  %v6056_v15 = vld [vmem:[#allocation2 + $0x184] sm:$0xff] }
 0x361   : > { %v6057_v26 = vld [vmem:[#allocation2 + $0x18c] sm:$0xff] }
 0x365   : > { %14392 = vmatmul.mubr.msk.bf16.gmra.mrb[148].mxu0 %vm1465_vm0, %v17430_v40  ;;  %14636 = vmatmul.mubr.msk.bf16.gmra.mrb[8].mxu1 %vm1465_vm0, %v17649_v39  ;;  %v3886_v40 = vld [vmem:[#allocation2 + $0x1a] sm:$0xff] }
 0x366   : > { %14395 = vmatprep.mubr.msk.bf16.mxu0 %vm1465_vm0, %v17440_v14  ;;  %14639 = vmatprep.mubr.msk.bf16.mxu1 %vm1465_vm0, %v17651_v50  ;;  %v3887_v14 = vld [vmem:[#allocation2 + $0x22] sm:$0xff] }
 0x367   : > { %v3918_v17 = vpack.c.bf16 %v3887_v14, %v3886_v40  ;;  %v16427_v40 = vld [vmem:[%s18863_s2 + $0xf8] sm:$0xff]   ;;  %v17703_v14 = vpack.c.bf16 %v6033_v36, %v6032_v8  ;;  %v6048_v36 = vld [vmem:[#allocation2 + $0x124] sm:$0xff] }
 0x368   : > { %v6047_v8 = vld [vmem:[#allocation2 + $0x114] sm:$0xff] }
 0x36d   : > { %14396 = vmatmul.mubr.msk.bf16.gmra.mrb[152].mxu0 %vm1465_vm0, %v17442_v5  ;;  %14640 = vmatmul.mubr.msk.bf16.gmra.mrb[12].mxu1 %vm1465_vm0, %v17661_v6  ;;  %v3888_v5 = vld [vmem:[#allocation2 + $0x32] sm:$0xff] }
 0x36e   : > { %14399 = vmatprep.mubr.msk.bf16.mxu0 %vm1465_vm0, %v17451_v35  ;;  %14643 = vmatprep.mubr.msk.bf16.mxu1 %vm1465_vm0, %v17663_v7  ;;  %v3889_v35 = vld [vmem:[#allocation2 + $0x3a] sm:$0xff] }
 0x36f   : > { %v3919_v45 = vpack.c.bf16 %v3889_v35, %v3888_v5  ;;  %v17713_v5 = vpack.c.bf16 %v6035_v28, %v6034_v60  ;;  %v17737_v60 = vpack.c.bf16 %v6047_v8, %v6046_v31  ;;  %v17755_v8 = vpack.c.bf16 %v6057_v26, %v6056_v15  ;;  %v16431_v15 = vld [vmem:[%s18863_s2 + $0x118] sm:$0xff]  }
 0x375   : > { %14400 = vmatmul.mubr.msk.bf16.gmra.mrb[156].mxu0 %vm1465_vm0, %v17455_v37  ;;  %14644 = vmatmul.mubr.msk.bf16.gmra.mrb[16].mxu1 %vm1465_vm0, %v17673_v24  ;;  %v5752_v37 = vld [vmem:[#allocation2 + $0x19b] sm:$0xff] }
 0x376   : > { %14647 = vmatprep.mubr.msk.bf16.mxu1 %vm1465_vm0, %v17675_v25  ;;  %14407 = vmatprep.mubr.msk.bf16.mxu0 %vm1465_vm0, %v3918_v17  ;;  %v17693_v21 = vpack.c.bf16 %v5753_v49, %v5752_v37  ;;  %v6037_v17 = vld [vmem:[#allocation2 + $0x9c] sm:$0xff]  ;;  %v6043_v49 = vld [vmem:[#allocation2 + $0xe4] sm:$0xff] }
 0x377   : > { %v17715_v35 = vpack.c.bf16 %v6037_v17, %v6036_v53  ;;  %v6042_v37 = vld [vmem:[#allocation2 + $0xdc] sm:$0xff]  ;;  %v6051_v17 = vld [vmem:[#allocation2 + $0x144] sm:$0xff] }
 0x378   : > { %v6050_v53 = vld [vmem:[#allocation2 + $0x13c] sm:$0xff] }
 0x37d   : > { %14408 = vmatmul.mubr.msk.bf16.vlgmr.msra.gmra.mrb[128].mxu0 %vm1465_vm0, %v3919_v45  ;;  %14648 = vmatmul.mubr.msk.bf16.gmra.mrb[20].mxu1 %vm1465_vm0, %v17684_v10  ;;  %v17723_v45 = vpack.c.bf16 %v6041_v52, %v6040_v51  ;;  %v17745_v51 = vpack.c.bf16 %v6051_v17, %v6050_v53  ;;  %v16429_v17 = vld [vmem:[%s18863_s2 + $0x108] sm:$0xff]  }
 0x37e   : > { %14651 = vmatprep.mubr.msk.bf16.mxu1 %vm1465_vm0, %v17686_v61 }
 0x385   : > { %14652 = vmatmul.mubr.msk.bf16.gmra.mrb[24].mxu1 %vm1465_vm0, %v17693_v21 }
 0x386   : > { %14659 = vmatprep.mubr.msk.bf16.mxu1 %vm1465_vm0, %v6060_v42  ;;  %v17729_v42 = vpack.c.bf16 %v6043_v49, %v6042_v37  ;;  %v6054_v37 = vld [vmem:[#allocation2 + $0x16c] sm:$0xff]  ;;  %v6055_v49 = vld [vmem:[#allocation2 + $0x174] sm:$0xff] }
 0x387   : > { %v17753_v31 = vpack.c.bf16 %v6055_v49, %v6054_v37  ;;  %v6646_v37 = vld [vmem:[#allocation2 + $0x81] sm:$0xff] }
 0x38d   : > { %14660 = vmatmul.mubr.msk.bf16.vlgmr.msra.gmra.mrb[28].mxu1 %vm1465_vm0, %v17698_v23 }
 0x38e   : > { %14692 = vmatpush3.bf16.msra.mxu1 %v17622_v48  ;;  %14663 = vmatprep.mubr.msk.bf16.mxu1 %vm1465_vm0, %v17703_v14  ;;  %v6038_v48 = vld [vmem:[#allocation2 + $0xac] sm:$0xff] }
 0x38f   : > { %14693 = vmatprep.subr.bf16.mxu1 %v16427_v40  ;;  %v17721_v38 = vpack.c.bf16 %v6039_v30, %v6038_v48  ;;  %v6052_v48 = vld [vmem:[#allocation2 + $0x154] sm:$0xff]  ;;  %v6053_v30 = vld [vmem:[#allocation2 + $0x15c] sm:$0xff] }
 0x390   : > { %v17747_v52 = vpack.c.bf16 %v6053_v30, %v6052_v48  ;;  %v16430_v48 = vld [vmem:[%s18863_s2 + $0x110] sm:$0xff]   ;;  %v6645_v30 = vld [vmem:[#allocation2 + $0x79] sm:$0xff] }
 0x391   : > { %v17815_v26 = vpack.c.bf16 %v6646_v37, %v6645_v30 }
 0x392   : > { %14694 = vmatpush3.bf16.msra.mxu1 %v16427_v40  ;;  %v6049_v40 = vld [vmem:[#allocation2 + $0x12c] sm:$0xff] }
 0x393   : > { %14727 = vmatprep.subr.bf16.mxu1 %v16428_v19  ;;  %v17739_v28 = vpack.c.bf16 %v6049_v40, %v6048_v36  ;;  %v6058_v36 = vld [vmem:[#allocation2 + $0x19c] sm:$0xff]  ;;  %v6059_v40 = vld [vmem:[#allocation2 + $0x1a4] sm:$0xff] }
 0x394   : > { %v17761_v53 = vpack.c.bf16 %v6059_v40, %v6058_v36  ;;  %v17824_v36 = vld [vmem:[%s18863_s2 + $0x120] sm:$0xff]   ;;  %v6647_v40 = vld [vmem:[#allocation2 + $0x91] sm:$0xff] }
 0x395   : > { %14664 = vmatmul.mubr.msk.bf16.gmra.mrb[0].mxu1 %vm1465_vm0, %v17713_v5 }
 0x396   : > { %14667 = vmatprep.mubr.msk.bf16.mxu1 %vm1465_vm0, %v17715_v35 }
 0x39d   : > { %14668 = vmatmul.mubr.msk.bf16.gmra.mrb[4].mxu1 %vm1465_vm0, %v17721_v38 }
 0x39e   : > { %14671 = vmatprep.mubr.msk.bf16.mxu1 %vm1465_vm0, %v17723_v45 }
 0x3a5   : > { %14672 = vmatmul.mubr.msk.bf16.gmra.mrb[8].mxu1 %vm1465_vm0, %v17729_v42 }
 0x3a6   : > { %14675 = vmatprep.mubr.msk.bf16.mxu1 %vm1465_vm0, %v17731_v55 }
 0x3ad   : > { %14676 = vmatmul.mubr.msk.bf16.gmra.mrb[12].mxu1 %vm1465_vm0, %v17737_v60 }
 0x3ae   : > { %14679 = vmatprep.mubr.msk.bf16.mxu1 %vm1465_vm0, %v17739_v28 }
 0x3b5   : > { %14680 = vmatmul.mubr.msk.bf16.gmra.mrb[16].mxu1 %vm1465_vm0, %v17745_v51 }
 0x3b6   : > { %14683 = vmatprep.mubr.msk.bf16.mxu1 %vm1465_vm0, %v17747_v52 }
 0x3bd   : > { %14684 = vmatmul.mubr.msk.bf16.gmra.mrb[20].mxu1 %vm1465_vm0, %v17753_v31 }
 0x3be   : > { %14687 = vmatprep.mubr.msk.bf16.mxu1 %vm1465_vm0, %v17755_v8 }
 0x3c5   : > { %14688 = vmatmul.mubr.msk.bf16.gmra.mrb[24].mxu1 %vm1465_vm0, %v17761_v53 }
 0x3c6   : > { %14695 = vmatprep.mubr.msk.bf16.mxu1 %vm1465_vm0, %v17453_v2  ;;  %v6361_v2 = vld [vmem:[#allocation2 + $0x180] sm:$0xff] }
 0x3cd   : > { %14696 = vmatmul.mubr.msk.bf16.vlgmr.msra.gmra.mrb[28].mxu1 %vm1465_vm0, %v17468_v54  ;;  %v6362_v54 = vld [vmem:[#allocation2 + $0x188] sm:$0xff] }
 0x3ce   : > { %14728 = vmatpush3.bf16.msra.mxu1 %v16428_v19  ;;  %14699 = vmatprep.mubr.msk.bf16.mxu1 %vm1465_vm0, %v17470_v16  ;;  %v6363_v16 = vld [vmem:[#allocation2 + $0x198] sm:$0xff]  ;;  %v6644_v19 = vld [vmem:[#allocation2 + $0x69] sm:$0xff] }
 0x3cf   : > { %14729 = vmatprep.subr.bf16.mxu1 %v16429_v17 }
 0x3d2   : > { %14730 = vmatpush3.bf16.msra.mxu1 %v16429_v17  ;;  %v6648_v17 = vld [vmem:[#allocation2 + $0x99] sm:$0xff] }
 0x3d3   : > { %14763 = vmatprep.subr.bf16.mxu1 %v16430_v48 }
 0x3d5   : > { %14700 = vmatmul.mubr.msk.bf16.gmra.mrb[0].mxu1 %vm1465_vm0, %v17485_v56  ;;  %v6364_v56 = vld [vmem:[#allocation2 + $0x1a0] sm:$0xff] }
 0x3d6   : > { %14703 = vmatprep.mubr.msk.bf16.mxu1 %vm1465_vm0, %v17490_v32  ;;  %v17797_v32 = vpack.c.bf16 %v6362_v54, %v6361_v2  ;;  %v6649_v2 = vld [vmem:[#allocation2 + $0xa9] sm:$0xff]  ;;  %v6650_v54 = vld [vmem:[#allocation2 + $0xb1] sm:$0xff] }
 0x3dd   : > { %14704 = vmatmul.mubr.msk.bf16.gmra.mrb[4].mxu1 %vm1465_vm0, %v17506_v13  ;;  %v17799_v13 = vpack.c.bf16 %v6364_v56, %v6363_v16  ;;  %v17826_v16 = vpack.c.bf16 %v6648_v17, %v6647_v40  ;;  %v17829_v56 = vpack.c.bf16 %v6650_v54, %v6649_v2  ;;  %v6655_v40 = vld [vmem:[#allocation2 + $0xf1] sm:$0xff]  ;;  %v6656_v17 = vld [vmem:[#allocation2 + $0xf9] sm:$0xff]  ;;  %v6657_v54 = vld [vmem:[#allocation2 + $0x109] sm:$0xff] }
 0x3de   : > { %14707 = vmatprep.mubr.msk.bf16.mxu1 %vm1465_vm0, %v17509_v0  ;;  %v6365_v0 = vld [vmem:[#allocation2 + $0x1b0] sm:$0xff] }
 0x3e5   : > { %14708 = vmatmul.mubr.msk.bf16.gmra.mrb[8].mxu1 %vm1465_vm0, %v17519_v3  ;;  %v6366_v3 = vld [vmem:[#allocation2 + $0x1b8] sm:$0xff] }
 0x3e6   : > { %14711 = vmatprep.mubr.msk.bf16.mxu1 %vm1465_vm0, %v17523_v12  ;;  %v17805_v12 = vpack.c.bf16 %v6366_v3, %v6365_v0  ;;  %v6651_v0 = vld [vmem:[#allocation2 + $0xc1] sm:$0xff]  ;;  %v6652_v3 = vld [vmem:[#allocation2 + $0xc9] sm:$0xff] }
 0x3e7   : > { %v17843_v30 = vpack.c.bf16 %v6652_v3, %v6651_v0  ;;  %v17859_v3 = vpack.c.bf16 %v6656_v17, %v6655_v40 }
 0x3e9   : > { %18887 = vst [vmem:[#allocation16_spill] sm:$0xff] %v17859_v3 }
 0x3ed   : > { %14712 = vmatmul.mubr.msk.bf16.gmra.mrb[12].mxu1 %vm1465_vm0, %v17535_v22  ;;  %v6641_v22 = vld [vmem:[#allocation2 + $0x49] sm:$0xff] }
 0x3ee   : > { %14715 = vmatprep.mubr.msk.bf16.mxu1 %vm1465_vm0, %v17539_v57  ;;  %v6642_v57 = vld [vmem:[#allocation2 + $0x51] sm:$0xff] }
 0x3f5   : > { %14716 = vmatmul.mubr.msk.bf16.gmra.mrb[16].mxu1 %vm1465_vm0, %v17551_v11  ;;  %v6673_v11 = vpack.c.bf16 %v6642_v57, %v6641_v22  ;;  %v6653_v57 = vld [vmem:[#allocation2 + $0xd9] sm:$0xff] }
 0x3f6   : > { %14719 = vmatprep.mubr.msk.bf16.mxu1 %vm1465_vm0, %v17555_v1  ;;  %v6643_v1 = vld [vmem:[#allocation2 + $0x61] sm:$0xff] }
 0x3f7   : > { %v17810_v49 = vpack.c.bf16 %v6644_v19, %v6643_v1 }
 0x3fd   : > { %14720 = vmatmul.mubr.msk.bf16.gmra.mrb[20].mxu1 %vm1465_vm0, %v17797_v32 }
 0x3fe   : > { %14723 = vmatprep.mubr.msk.bf16.mxu1 %vm1465_vm0, %v17799_v13 }
 0x405   : > { %14724 = vmatmul.mubr.msk.bf16.gmra.mrb[24].mxu1 %vm1465_vm0, %v17805_v12 }
 0x406   : > { %14731 = vmatprep.mubr.msk.bf16.mxu1 %vm1465_vm0, %v6673_v11  ;;  %v6654_v11 = vld [vmem:[#allocation2 + $0xe1] sm:$0xff] }
 0x407   : > { %v17845_v37 = vpack.c.bf16 %v6654_v11, %v6653_v57 }
 0x409   : > { %18882 = vst [vmem:[#allocation11_spill] sm:$0xff] %v17845_v37 }
 0x40d   : > { %14732 = vmatmul.mubr.msk.bf16.vlgmr.msra.gmra.mrb[28].mxu1 %vm1465_vm0, %v17810_v49 }
 0x40e   : > { %14764 = vmatpush3.bf16.msra.mxu1 %v16430_v48  ;;  %14735 = vmatprep.mubr.msk.bf16.mxu1 %vm1465_vm0, %v17815_v26 }
 0x40f   : > { %14765 = vmatprep.subr.bf16.mxu1 %v16431_v15 }
 0x412   : > { %14766 = vmatpush3.bf16.msra.mxu1 %v16431_v15 }
 0x413   : > { %14799 = vmatprep.subr.bf16.mxu1 %v17824_v36 }
 0x415   : > { %14736 = vmatmul.mubr.msk.bf16.gmra.mrb[0].mxu1 %vm1465_vm0, %v17826_v16 }
 0x416   : > { %14739 = vmatprep.mubr.msk.bf16.mxu1 %vm1465_vm0, %v17829_v56 }
 0x418   : > { %v17835_v48 = vpop.f32.mrb[132].mxu0 }
 0x419   : > { %18878 = vst [vmem:[#allocation7_spill] sm:$0xff] %v17835_v48  ;;  %v17837_v22 = vpop.f32.mrb[133].mxu0  ;;  %v6661_v48 = vld [vmem:[#allocation2 + $0x139] sm:$0xff] }
 0x41a   : > { %18879 = vst [vmem:[#allocation8_spill] sm:$0xff] %v17837_v22  ;;  %v17839_v1 = vpop.f32.mrb[134].mxu0 }
 0x41b   : > { %18880 = vst [vmem:[#allocation9_spill] sm:$0xff] %v17839_v1  ;;  %v17841_v19 = vpop.f32.mrb[135].mxu0  ;;  %v6658_v1 = vld [vmem:[#allocation2 + $0x111] sm:$0xff] }
 0x41c   : > { %18881 = vst [vmem:[#allocation10_spill] sm:$0xff] %v17841_v19  ;;  %v17861_v57 = vpack.c.bf16 %v6658_v1, %v6657_v54 }
 0x41d   : > { %14740 = vmatmul.mubr.msk.bf16.gmra.mrb[4].mxu1 %vm1465_vm0, %v17843_v30 }
 0x41e   : > { %14743 = vmatprep.mubr.msk.bf16.mxu1 %vm1465_vm0, %v17845_v37  ;;  %18888 = vst [vmem:[#allocation17_spill] sm:$0xff] %v17861_v57 }
 0x420   : > { %v17851_v15 = vpop.f32.mrb[136].mxu0 }
 0x421   : > { %18883 = vst [vmem:[#allocation12_spill] sm:$0xff] %v17851_v15  ;;  %v17853_v2 = vpop.f32.mrb[137].mxu0  ;;  %v6659_v15 = vld [vmem:[#allocation2 + $0x121] sm:$0xff] }
 0x422   : > { %18884 = vst [vmem:[#allocation13_spill] sm:$0xff] %v17853_v2  ;;  %v17855_v22 = vpop.f32.mrb[138].mxu0  ;;  %v6660_v2 = vld [vmem:[#allocation2 + $0x129] sm:$0xff] }
 0x423   : > { %18885 = vst [vmem:[#allocation14_spill] sm:$0xff] %v17855_v22  ;;  %v17857_v0 = vpop.f32.mrb[139].mxu0  ;;  %v6662_v22 = vld [vmem:[#allocation2 + $0x141] sm:$0xff]  ;;  %v17875_v1 = vpack.c.bf16 %v6660_v2, %v6659_v15 }
 0x424   : > { %18886 = vst [vmem:[#allocation15_spill] sm:$0xff] %v17857_v0  ;;  %v17877_v17 = vpack.c.bf16 %v6662_v22, %v6661_v48 }
 0x425   : > { %14744 = vmatmul.mubr.msk.bf16.gmra.mrb[8].mxu1 %vm1465_vm0, %v17859_v3  ;;  %18893 = vst [vmem:[#allocation22_spill] sm:$0xff] %v17875_v1 }
 0x426   : > { %14747 = vmatprep.mubr.msk.bf16.mxu1 %vm1465_vm0, %v17861_v57  ;;  %18894 = vst [vmem:[#allocation23_spill] sm:$0xff] %v17877_v17  ;;  %v6665_v57 = vld [vmem:[#allocation2 + $0x169] sm:$0xff] }
 0x428   : > { %v17867_v11 = vpop.f32.mrb[140].mxu0 }
 0x429   : > { %18889 = vst [vmem:[#allocation18_spill] sm:$0xff] %v17867_v11  ;;  %v17869_v19 = vpop.f32.mrb[141].mxu0  ;;  %v6663_v11 = vld [vmem:[#allocation2 + $0x151] sm:$0xff] }
 0x42a   : > { %18890 = vst [vmem:[#allocation19_spill] sm:$0xff] %v17869_v19  ;;  %v17871_v37 = vpop.f32.mrb[142].mxu0  ;;  %v6664_v19 = vld [vmem:[#allocation2 + $0x159] sm:$0xff] }
 0x42b   : > { %18891 = vst [vmem:[#allocation20_spill] sm:$0xff] %v17871_v37  ;;  %v17873_v40 = vpop.f32.mrb[143].mxu0  ;;  %v6666_v37 = vld [vmem:[#allocation2 + $0x171] sm:$0xff]  ;;  %v17891_v48 = vpack.c.bf16 %v6664_v19, %v6663_v11 }
 0x42c   : > { %18892 = vst [vmem:[#allocation21_spill] sm:$0xff] %v17873_v40  ;;  %v17893_v22 = vpack.c.bf16 %v6666_v37, %v6665_v57  ;;  %v6671_v11 = vld [vmem:[#allocation2 + $0x1b1] sm:$0xff] }
 0x42d   : > { %14748 = vmatmul.mubr.msk.bf16.gmra.mrb[12].mxu1 %vm1465_vm0, %v17875_v1  ;;  %18899 = vst [vmem:[#allocation28_spill] sm:$0xff] %v17891_v48 }
 0x42e   : > { %14751 = vmatprep.mubr.msk.bf16.mxu1 %vm1465_vm0, %v17877_v17  ;;  %18900 = vst [vmem:[#allocation29_spill] sm:$0xff] %v17893_v22  ;;  %v6669_v17 = vld [vmem:[#allocation2 + $0x199] sm:$0xff] }
 0x430   : > { %v17883_v54 = vpop.f32.mrb[144].mxu0 }
 0x431   : > { %18895 = vst [vmem:[#allocation24_spill] sm:$0xff] %v17883_v54  ;;  %v17885_v0 = vpop.f32.mrb[145].mxu0  ;;  %v6667_v54 = vld [vmem:[#allocation2 + $0x181] sm:$0xff] }
 0x432   : > { %18896 = vst [vmem:[#allocation25_spill] sm:$0xff] %v17885_v0  ;;  %v17887_v3 = vpop.f32.mrb[146].mxu0  ;;  %v6668_v0 = vld [vmem:[#allocation2 + $0x189] sm:$0xff] }
 0x433   : > { %18897 = vst [vmem:[#allocation26_spill] sm:$0xff] %v17887_v3  ;;  %v17889_v15 = vpop.f32.mrb[147].mxu0  ;;  %v6670_v3 = vld [vmem:[#allocation2 + $0x1a1] sm:$0xff]  ;;  %v17907_v37 = vpack.c.bf16 %v6668_v0, %v6667_v54 }
 0x434   : > { %18898 = vst [vmem:[#allocation27_spill] sm:$0xff] %v17889_v15  ;;  %v17909_v57 = vpack.c.bf16 %v6670_v3, %v6669_v17 }
 0x435   : > { %14752 = vmatmul.mubr.msk.bf16.gmra.mrb[16].mxu1 %vm1465_vm0, %v17891_v48  ;;  %18905 = vst [vmem:[#allocation34_spill] sm:$0xff] %v17907_v37 }
 0x436   : > { %14755 = vmatprep.mubr.msk.bf16.mxu1 %vm1465_vm0, %v17893_v22  ;;  %18906 = vst [vmem:[#allocation35_spill] sm:$0xff] %v17909_v57 }
 0x438   : > { %v17899_v2 = vpop.f32.mrb[148].mxu0 }
 0x439   : > { %18901 = vst [vmem:[#allocation30_spill] sm:$0xff] %v17899_v2  ;;  %v17901_v40 = vpop.f32.mrb[149].mxu0  ;;  %v6672_v2 = vld [vmem:[#allocation2 + $0x1b9] sm:$0xff] }
 0x43a   : > { %18902 = vst [vmem:[#allocation31_spill] sm:$0xff] %v17901_v40  ;;  %v17903_v1 = vpop.f32.mrb[150].mxu0  ;;  %v17919_v22 = vpack.c.bf16 %v6672_v2, %v6671_v11  ;;  %v6951_v2 = vld [vmem:[#allocation2 + $0x7a] sm:$0xff]  ;;  %v6952_v11 = vld [vmem:[#allocation2 + $0x82] sm:$0xff] }
 0x43b   : > { %18903 = vst [vmem:[#allocation32_spill] sm:$0xff] %v17903_v1  ;;  %v17905_v19 = vpop.f32.mrb[151].mxu0  ;;  %v6947_v1 = vld [vmem:[#allocation2 + $0x4a] sm:$0xff] }
 0x43c   : > { %18904 = vst [vmem:[#allocation33_spill] sm:$0xff] %v17905_v19  ;;  %v6948_v19 = vld [vmem:[#allocation2 + $0x52] sm:$0xff] }
 0x43d   : > { %14756 = vmatmul.mubr.msk.bf16.gmra.mrb[20].mxu1 %vm1465_vm0, %v17907_v37  ;;  %v6979_v17 = vpack.c.bf16 %v6948_v19, %v6947_v1  ;;  %v16433_v1 = vld [vmem:[%s18863_s2 + $0x128] sm:$0xff]   ;;  %v17941_v19 = vpack.c.bf16 %v6952_v11, %v6951_v2 }
 0x43e   : > { %14759 = vmatprep.mubr.msk.bf16.mxu1 %vm1465_vm0, %v17909_v57  ;;  %v6949_v57 = vld [vmem:[#allocation2 + $0x62] sm:$0xff] }
 0x440   : > { %v17915_v15 = vpop.f32.mrb[152].mxu0 }
 0x441   : > { %18907 = vst [vmem:[#allocation36_spill] sm:$0xff] %v17915_v15  ;;  %v17917_v40 = vpop.f32.mrb[153].mxu0  ;;  %v6950_v15 = vld [vmem:[#allocation2 + $0x6a] sm:$0xff] }
 0x442   : > { %18908 = vst [vmem:[#allocation37_spill] sm:$0xff] %v17917_v40  ;;  %v17921_v0 = vpop.f32.mrb[154].mxu0 }
 0x443   : > { %18909 = vst [vmem:[#allocation38_spill] sm:$0xff] %v17921_v0  ;;  %v17923_v3 = vpop.f32.mrb[155].mxu0  ;;  %v17936_v0 = vpack.c.bf16 %v6950_v15, %v6949_v57  ;;  %v16434_v15 = vld [vmem:[%s18863_s2 + $0x130] sm:$0xff]  }
 0x445   : > { %14760 = vmatmul.mubr.msk.bf16.gmra.mrb[24].mxu1 %vm1465_vm0, %v17919_v22 }
 0x446   : > { %14767 = vmatprep.mubr.msk.bf16.mxu1 %vm1465_vm0, %v6979_v17  ;;  %v6953_v17 = vld [vmem:[#allocation2 + $0x92] sm:$0xff] }
 0x448   : > { %v17928_v54 = vpop.f32.mrb[156].mxu0 }
 0x449   : > { %v17930_v37 = vpop.f32.mrb[157].mxu0 }
 0x44a   : > { %v17932_v40 = vpop.f32.mrb[158].mxu0 }
 0x44b   : > { %18910 = vst [vmem:[#allocation39_spill] sm:$0xff] %v17932_v40  ;;  %v17934_v48 = vpop.f32.mrb[159].mxu0 }
 0x44c   : > { %18911 = vst [vmem:[#allocation40_spill] sm:$0xff] %v17934_v48  ;;  %v6954_v48 = vld [vmem:[#allocation2 + $0x9a] sm:$0xff] }
 0x44d   : > { %14768 = vmatmul.mubr.msk.bf16.vlgmr.msra.gmra.mrb[28].mxu1 %vm1465_vm0, %v17936_v0 }
 0x44e   : > { %14800 = vmatpush3.bf16.msra.mxu1 %v17824_v36  ;;  %14771 = vmatprep.mubr.msk.bf16.mxu1 %vm1465_vm0, %v17941_v19  ;;  %v17959_v36 = vpack.c.bf16 %v6954_v48, %v6953_v17  ;;  %v7886_v17 = vld [vmem:[#allocation2 + $0x150] sm:$0xff] }
 0x44f   : > { %14801 = vmatprep.subr.bf16.mxu1 %v16433_v1 }
 0x450   : > { %v17951_v57 = vpop.f32.mrb[128].mxu0 }
 0x451   : > { %v17953_v40 = vpop.f32.mrb[129].mxu0 }
 0x452   : > { %v17955_v2 = vpop.f32.mrb[130].mxu0  ;;  %14802 = vmatpush3.bf16.msra.mxu1 %v16433_v1  ;;  %v7884_v1 = vld [vmem:[#allocation2 + $0x138] sm:$0xff] }
 0x453   : > { %v17957_v11 = vpop.f32.mrb[131].mxu0  ;;  %14835 = vmatprep.subr.bf16.mxu1 %v16434_v15 }
 0x455   : > { %14772 = vmatmul.mubr.msk.bf16.gmra.mrb[0].mxu1 %vm1465_vm0, %v17959_v36 }
 0x456   : > { %14775 = vmatprep.mubr.msk.bf16.mxu1 %vm1465_vm0, %v17521_v47  ;;  %v6977_v47 = vld [vmem:[#allocation2 + $0x1b2] sm:$0xff] }
 0x45d   : > { %14776 = vmatmul.mubr.msk.bf16.gmra.mrb[4].mxu1 %vm1465_vm0, %v17525_v43  ;;  %v6978_v43 = vld [vmem:[#allocation2 + $0x1ba] sm:$0xff] }
 0x45e   : > { %14779 = vmatprep.mubr.msk.bf16.mxu1 %vm1465_vm0, %v17537_v34  ;;  %v17985_v34 = vpack.c.bf16 %v6978_v43, %v6977_v47  ;;  %v7887_v47 = vld [vmem:[#allocation2 + $0x158] sm:$0xff] }
 0x465   : > { %14780 = vmatmul.mubr.msk.bf16.gmra.mrb[8].mxu1 %vm1465_vm0, %v17541_v58  ;;  %v16435_v58 = vld [vmem:[%s18863_s2 + $0x138] sm:$0xff]  }
 0x466   : > { %14783 = vmatprep.mubr.msk.bf16.mxu1 %vm1465_vm0, %v17553_v44  ;;  %v16436_v44 = vld [vmem:[%s18863_s2 + $0x140] sm:$0xff]  }
 0x46d   : > { %14784 = vmatmul.mubr.msk.bf16.gmra.mrb[12].mxu1 %vm1465_vm0, %v17557_v33  ;;  %v7283_v33 = vld [vmem:[#allocation2 + $0x1b3] sm:$0xff] }
 0x46e   : > { %14787 = vmatprep.mubr.msk.bf16.mxu1 %vm1465_vm0, %v17567_v9  ;;  %v7284_v9 = vld [vmem:[#allocation2 + $0x1bb] sm:$0xff] }
 0x475   : > { %14788 = vmatmul.mubr.msk.bf16.gmra.mrb[16].mxu1 %vm1465_vm0, %v17569_v27  ;;  %v18025_v27 = vpack.c.bf16 %v7284_v9, %v7283_v33  ;;  %v7889_v33 = vld [vmem:[#allocation2 + $0x170] sm:$0xff] }
 0x476   : > { %14791 = vmatprep.mubr.msk.bf16.mxu1 %vm1465_vm0, %v17578_v18  ;;  %v16437_v18 = vld [vmem:[%s18863_s2 + $0x148] sm:$0xff]  }
 0x47d   : > { %14792 = vmatmul.mubr.msk.bf16.gmra.mrb[20].mxu1 %vm1465_vm0, %v17580_v59  ;;  %v16438_v59 = vld [vmem:[%s18863_s2 + $0x150] sm:$0xff]  }
 0x47e   : > { %14795 = vmatprep.mubr.msk.bf16.mxu1 %vm1465_vm0, %v17594_v20  ;;  %v7589_v20 = vld [vmem:[#allocation2 + $0x1b4] sm:$0xff] }
 0x485   : > { %14796 = vmatmul.mubr.msk.bf16.gmra.mrb[24].mxu1 %vm1465_vm0, %v17985_v34 }
 0x486   : > { %14803 = vmatprep.mubr.msk.bf16.mxu1 %vm1465_vm0, %v17603_v29  ;;  %v7590_v29 = vld [vmem:[#allocation2 + $0x1bc] sm:$0xff] }
 0x48d   : > { %14804 = vmatmul.mubr.msk.bf16.vlgmr.msra.gmra.mrb[28].mxu1 %vm1465_vm0, %v17612_v63  ;;  %v18065_v63 = vpack.c.bf16 %v7590_v29, %v7589_v20  ;;  %v16441_v29 = vld [vmem:[%s18863_s2 + $0x168] sm:$0xff]  }
 0x48e   : > { %14836 = vmatpush3.bf16.msra.mxu1 %v16434_v15  ;;  %14807 = vmatprep.mubr.msk.bf16.mxu1 %vm1465_vm0, %v17624_v41  ;;  %v7866_v41 = vld [vmem:[#allocation2 + $0x60] sm:$0xff] }
 0x48f   : > { %14837 = vmatprep.subr.bf16.mxu1 %v16435_v58  ;;  %v7885_v15 = vld [vmem:[#allocation2 + $0x140] sm:$0xff] }
 0x490   : > { %v7907_v43 = vpack.c.bf16 %v7885_v15, %v7884_v1  ;;  %v8502_v1 = vld [vmem:[#allocation2 + $0x182] sm:$0xff]  ;;  %v8503_v15 = vld [vmem:[#allocation2 + $0x18a] sm:$0xff] }
 0x492   : > { %14838 = vmatpush3.bf16.msra.mxu1 %v16435_v58  ;;  %v7908_v58 = vpack.c.bf16 %v7887_v47, %v7886_v17  ;;  %v8522_v47 = vpack.c.bf16 %v8503_v15, %v8502_v1  ;;  %v9090_v15 = vld [vmem:[#allocation2 + $0x64] sm:$0xff] }
 0x493   : > { %14871 = vmatprep.subr.bf16.mxu1 %v16436_v44 }
 0x495   : > { %14808 = vmatmul.mubr.msk.bf16.gmra.mrb[0].mxu1 %vm1465_vm0, %v17627_v46  ;;  %v7867_v46 = vld [vmem:[#allocation2 + $0x68] sm:$0xff] }
 0x496   : > { %14811 = vmatprep.mubr.msk.bf16.mxu1 %vm1465_vm0, %v17637_v4  ;;  %v7898_v4 = vpack.c.bf16 %v7867_v46, %v7866_v41  ;;  %v18917_v41 = vld [vmem:[#allocation28_spill] sm:$0xff]  ;;  %v18920_v46 = vld [vmem:[#allocation35_spill] sm:$0xff] }
 0x49d   : > { %14812 = vmatmul.mubr.msk.bf16.gmra.mrb[4].mxu1 %vm1465_vm0, %v17639_v62  ;;  %v7868_v62 = vld [vmem:[#allocation2 + $0x78] sm:$0xff] }
 0x49e   : > { %14815 = vmatprep.mubr.msk.bf16.mxu1 %vm1465_vm0, %v17649_v39  ;;  %v7869_v39 = vld [vmem:[#allocation2 + $0x80] sm:$0xff] }
 0x4a5   : > { %14816 = vmatmul.mubr.msk.bf16.gmra.mrb[8].mxu1 %vm1465_vm0, %v17651_v50  ;;  %v7870_v50 = vld [vmem:[#allocation2 + $0x90] sm:$0xff] }
 0x4a6   : > { %14819 = vmatprep.mubr.msk.bf16.mxu1 %vm1465_vm0, %v17661_v6  ;;  %v7871_v6 = vld [vmem:[#allocation2 + $0x98] sm:$0xff] }
 0x4ad   : > { %14820 = vmatmul.mubr.msk.bf16.gmra.mrb[12].mxu1 %vm1465_vm0, %v17663_v7  ;;  %v7899_v7 = vpack.c.bf16 %v7869_v39, %v7868_v62  ;;  %v8203_v62 = vld [vmem:[#allocation2 + $0x1d1] sm:$0xff] }
 0x4ae   : > { %14823 = vmatprep.mubr.msk.bf16.mxu1 %vm1465_vm0, %v17673_v24  ;;  %v16439_v24 = vld [vmem:[%s18863_s2 + $0x158] sm:$0xff]  }
 0x4b5   : > { %14824 = vmatmul.mubr.msk.bf16.gmra.mrb[16].mxu1 %vm1465_vm0, %v17675_v25  ;;  %v7900_v25 = vpack.c.bf16 %v7871_v6, %v7870_v50  ;;  %v16443_v50 = vld [vmem:[%s18863_s2 + $0x178] sm:$0xff]   ;;  %v8484_v6 = vld [vmem:[#allocation2 + $0xaa] sm:$0xff] }
 0x4b6   : > { %14827 = vmatprep.mubr.msk.bf16.mxu1 %vm1465_vm0, %v17684_v10  ;;  %v16440_v10 = vld [vmem:[%s18863_s2 + $0x160] sm:$0xff]  }
 0x4bd   : > { %14828 = vmatmul.mubr.msk.bf16.gmra.mrb[20].mxu1 %vm1465_vm0, %v17686_v61  ;;  %v7872_v61 = vld [vmem:[#allocation2 + $0xa8] sm:$0xff] }
 0x4be   : > { %14831 = vmatprep.mubr.msk.bf16.mxu1 %vm1465_vm0, %v17693_v21  ;;  %v7873_v21 = vld [vmem:[#allocation2 + $0xb0] sm:$0xff] }
 0x4c5   : > { %14832 = vmatmul.mubr.msk.bf16.gmra.mrb[24].mxu1 %vm1465_vm0, %v18025_v27 }
 0x4c6   : > { %14839 = vmatprep.mubr.msk.bf16.mxu1 %vm1465_vm0, %v17698_v23  ;;  %v7874_v23 = vld [vmem:[#allocation2 + $0xc0] sm:$0xff] }
 0x4cd   : > { %14840 = vmatmul.mubr.msk.bf16.vlgmr.msra.gmra.mrb[28].mxu1 %vm1465_vm0, %v17703_v14  ;;  %v7875_v14 = vld [vmem:[#allocation2 + $0xc8] sm:$0xff] }
 0x4ce   : > { %14872 = vmatpush3.bf16.msra.mxu1 %v16436_v44  ;;  %14843 = vmatprep.mubr.msk.bf16.mxu1 %vm1465_vm0, %v17713_v5  ;;  %v7901_v5 = vpack.c.bf16 %v7873_v21, %v7872_v61  ;;  %v7888_v44 = vld [vmem:[#allocation2 + $0x168] sm:$0xff]  ;;  %v8490_v61 = vld [vmem:[#allocation2 + $0xf2] sm:$0xff]  ;;  %v8491_v21 = vld [vmem:[#allocation2 + $0xfa] sm:$0xff] }
 0x4cf   : > { %14873 = vmatprep.subr.bf16.mxu1 %v16437_v18  ;;  %v7909_v9 = vpack.c.bf16 %v7889_v33, %v7888_v44  ;;  %v8508_v33 = vld [vmem:[#allocation2 + $0x1ca] sm:$0xff] }
 0x4d2   : > { %14874 = vmatpush3.bf16.msra.mxu1 %v16437_v18  ;;  %v7896_v18 = vld [vmem:[#allocation2 + $0x1c8] sm:$0xff] }
 0x4d3   : > { %14907 = vmatprep.subr.bf16.mxu1 %v16438_v59 }
 0x4d5   : > { %14844 = vmatmul.mubr.msk.bf16.gmra.mrb[0].mxu1 %vm1465_vm0, %v17715_v35  ;;  %v7902_v35 = vpack.c.bf16 %v7875_v14, %v7874_v23  ;;  %v8516_v14 = vpack.c.bf16 %v8491_v21, %v8490_v61  ;;  %v8802_v21 = vld [vmem:[#allocation2 + $0x13b] sm:$0xff] }
 0x4d6   : > { %14847 = vmatprep.mubr.msk.bf16.mxu1 %vm1465_vm0, %v17721_v38  ;;  %v7876_v38 = vld [vmem:[#allocation2 + $0xd8] sm:$0xff] }
 0x4dd   : > { %14848 = vmatmul.mubr.msk.bf16.gmra.mrb[4].mxu1 %vm1465_vm0, %v17723_v45  ;;  %v7877_v45 = vld [vmem:[#allocation2 + $0xe0] sm:$0xff] }
 0x4de   : > { %14851 = vmatprep.mubr.msk.bf16.mxu1 %vm1465_vm0, %v17729_v42  ;;  %v7878_v42 = vld [vmem:[#allocation2 + $0xf0] sm:$0xff] }
 0x4e5   : > { %14852 = vmatmul.mubr.msk.bf16.gmra.mrb[8].mxu1 %vm1465_vm0, %v17731_v55  ;;  %v7879_v55 = vld [vmem:[#allocation2 + $0xf8] sm:$0xff] }
 0x4e6   : > { %14855 = vmatprep.mubr.msk.bf16.mxu1 %vm1465_vm0, %v17737_v60  ;;  %v7903_v60 = vpack.c.bf16 %v7877_v45, %v7876_v38  ;;  %v8494_v38 = vld [vmem:[#allocation2 + $0x122] sm:$0xff]  ;;  %v8495_v45 = vld [vmem:[#allocation2 + $0x12a] sm:$0xff] }
 0x4ed   : > { %14856 = vmatmul.mubr.msk.bf16.gmra.mrb[12].mxu1 %vm1465_vm0, %v17739_v28  ;;  %v7904_v28 = vpack.c.bf16 %v7879_v55, %v7878_v42  ;;  %v8518_v55 = vpack.c.bf16 %v8495_v45, %v8494_v38  ;;  %v8806_v45 = vld [vmem:[#allocation2 + $0x16b] sm:$0xff] }
 0x4ee   : > { %14859 = vmatprep.mubr.msk.bf16.mxu1 %vm1465_vm0, %v17745_v51  ;;  %v7880_v51 = vld [vmem:[#allocation2 + $0x108] sm:$0xff] }
 0x4f5   : > { %14860 = vmatmul.mubr.msk.bf16.gmra.mrb[16].mxu1 %vm1465_vm0, %v17747_v52  ;;  %v7881_v52 = vld [vmem:[#allocation2 + $0x110] sm:$0xff] }
 0x4f6   : > { %14863 = vmatprep.mubr.msk.bf16.mxu1 %vm1465_vm0, %v17753_v31  ;;  %v7882_v31 = vld [vmem:[#allocation2 + $0x120] sm:$0xff] }
 0x4fd   : > { %14864 = vmatmul.mubr.msk.bf16.gmra.mrb[20].mxu1 %vm1465_vm0, %v17755_v8  ;;  %v7883_v8 = vld [vmem:[#allocation2 + $0x128] sm:$0xff] }
 0x4fe   : > { %14867 = vmatprep.mubr.msk.bf16.mxu1 %vm1465_vm0, %v17761_v53  ;;  %v7905_v53 = vpack.c.bf16 %v7881_v52, %v7880_v51  ;;  %v7906_v48 = vpack.c.bf16 %v7883_v8, %v7882_v31  ;;  %v8498_v51 = vld [vmem:[#allocation2 + $0x152] sm:$0xff]  ;;  %v8499_v52 = vld [vmem:[#allocation2 + $0x15a] sm:$0xff] }
 0x4ff   : > { %v8520_v8 = vpack.c.bf16 %v8499_v52, %v8498_v51  ;;  %v8810_v52 = vld [vmem:[#allocation2 + $0x19b] sm:$0xff] }
 0x505   : > { %14868 = vmatmul.mubr.msk.bf16.gmra.mrb[24].mxu1 %vm1465_vm0, %v18065_v63 }
 0x506   : > { %14875 = vmatprep.mubr.msk.bf16.mxu1 %vm1465_vm0, %v7898_v4  ;;  %v8202_v4 = vld [vmem:[#allocation2 + $0x1c9] sm:$0xff] }
 0x507   : > { %v8219_v39 = vpack.c.bf16 %v8203_v62, %v8202_v4 }
 0x50d   : > { %14876 = vmatmul.mubr.msk.bf16.vlgmr.msra.gmra.mrb[28].mxu1 %vm1465_vm0, %v7899_v7  ;;  %v8485_v7 = vld [vmem:[#allocation2 + $0xb2] sm:$0xff] }
 0x50e   : > { %14908 = vmatpush3.bf16.msra.mxu1 %v16438_v59  ;;  %14879 = vmatprep.mubr.msk.bf16.mxu1 %vm1465_vm0, %v7900_v25  ;;  %v7897_v59 = vld [vmem:[#allocation2 + $0x1d0] sm:$0xff]  ;;  %v8513_v25 = vpack.c.bf16 %v8485_v7, %v8484_v6  ;;  %v8797_v7 = vld [vmem:[#allocation2 + $0xfb] sm:$0xff] }
 0x50f   : > { %14909 = vmatprep.subr.bf16.mxu1 %v16439_v24  ;;  %v7913_v20 = vpack.c.bf16 %v7897_v59, %v7896_v18  ;;  %v8784_v59 = vld [vmem:[#allocation2 + $0x63] sm:$0xff]  ;;  %v8796_v6 = vld [vmem:[#allocation2 + $0xf3] sm:$0xff] }
 0x512   : > { %14910 = vmatpush3.bf16.msra.mxu1 %v16439_v24  ;;  %v8487_v24 = vld [vmem:[#allocation2 + $0xca] sm:$0xff] }
 0x513   : > { %14943 = vmatprep.subr.bf16.mxu1 %v16440_v10 }
 0x515   : > { %14880 = vmatmul.mubr.msk.bf16.gmra.mrb[0].mxu1 %vm1465_vm0, %v7901_v5  ;;  %v8492_v5 = vld [vmem:[#allocation2 + $0x10a] sm:$0xff] }
 0x516   : > { %14883 = vmatprep.mubr.msk.bf16.mxu1 %vm1465_vm0, %v7902_v35  ;;  %v8493_v35 = vld [vmem:[#allocation2 + $0x112] sm:$0xff] }
 0x517   : > { %v8517_v42 = vpack.c.bf16 %v8493_v35, %v8492_v5  ;;  %v8805_v5 = vld [vmem:[#allocation2 + $0x15b] sm:$0xff] }
 0x51d   : > { %14884 = vmatmul.mubr.msk.bf16.gmra.mrb[4].mxu1 %vm1465_vm0, %v7903_v60  ;;  %v8496_v60 = vld [vmem:[#allocation2 + $0x13a] sm:$0xff] }
 0x51e   : > { %14887 = vmatprep.mubr.msk.bf16.mxu1 %vm1465_vm0, %v7904_v28  ;;  %v8497_v28 = vld [vmem:[#allocation2 + $0x142] sm:$0xff] }
 0x51f   : > { %v8519_v31 = vpack.c.bf16 %v8497_v28, %v8496_v60  ;;  %v8809_v60 = vld [vmem:[#allocation2 + $0x18b] sm:$0xff] }
 0x525   : > { %14888 = vmatmul.mubr.msk.bf16.gmra.mrb[8].mxu1 %vm1465_vm0, %v7905_v53  ;;  %v8500_v53 = vld [vmem:[#allocation2 + $0x16a] sm:$0xff] }
 0x526   : > { %14891 = vmatprep.mubr.msk.bf16.mxu1 %vm1465_vm0, %v7906_v48  ;;  %v8501_v48 = vld [vmem:[#allocation2 + $0x172] sm:$0xff] }
 0x527   : > { %v8521_v17 = vpack.c.bf16 %v8501_v48, %v8500_v53  ;;  %v8814_v53 = vld [vmem:[#allocation2 + $0x1cb] sm:$0xff]  ;;  %v8815_v48 = vld [vmem:[#allocation2 + $0x1d3] sm:$0xff] }
 0x528   : > { %v8831_v1 = vpack.c.bf16 %v8815_v48, %v8814_v53 }
 0x52d   : > { %14892 = vmatmul.mubr.msk.bf16.gmra.mrb[12].mxu1 %vm1465_vm0, %v7907_v43  ;;  %v8504_v43 = vld [vmem:[#allocation2 + $0x19a] sm:$0xff] }
 0x52e   : > { %14895 = vmatprep.mubr.msk.bf16.mxu1 %vm1465_vm0, %v7908_v58  ;;  %v8505_v58 = vld [vmem:[#allocation2 + $0x1a2] sm:$0xff] }
 0x52f   : > { %v8523_v44 = vpack.c.bf16 %v8505_v58, %v8504_v43  ;;  %v9092_v43 = vld [vmem:[#allocation2 + $0x7c] sm:$0xff]  ;;  %v9093_v58 = vld [vmem:[#allocation2 + $0x84] sm:$0xff] }
 0x535   : > { %14896 = vmatmul.mubr.msk.bf16.gmra.mrb[16].mxu1 %vm1465_vm0, %v7909_v9  ;;  %v8509_v9 = vld [vmem:[#allocation2 + $0x1d2] sm:$0xff] }
 0x536   : > { %14899 = vmatprep.mubr.msk.bf16.mxu1 %vm1465_vm0, %v17797_v32  ;;  %v16442_v32 = vld [vmem:[%s18863_s2 + $0x170] sm:$0xff]   ;;  %v8525_v18 = vpack.c.bf16 %v8509_v9, %v8508_v33  ;;  %v9095_v33 = vld [vmem:[#allocation2 + $0x9c] sm:$0xff]  ;;  %v9123_v9 = vpack.c.bf16 %v9093_v58, %v9092_v43 }
 0x53d   : > { %14900 = vmatmul.mubr.msk.bf16.gmra.mrb[20].mxu1 %vm1465_vm0, %v17799_v13  ;;  %v18912_v13 = vld [vmem:[#allocation11_spill] sm:$0xff] }
 0x53e   : > { %14903 = vmatprep.mubr.msk.bf16.mxu1 %vm1465_vm0, %v17805_v12  ;;  %v18913_v12 = vld [vmem:[#allocation16_spill] sm:$0xff] }
 0x545   : > { %14904 = vmatmul.mubr.msk.bf16.gmra.mrb[24].mxu1 %vm1465_vm0, %v7913_v20  ;;  %v8785_v20 = vld [vmem:[#allocation2 + $0x6b] sm:$0xff] }
 0x546   : > { %14911 = vmatprep.mubr.msk.bf16.mxu1 %vm1465_vm0, %v17810_v49  ;;  %v18914_v49 = vld [vmem:[#allocation17_spill] sm:$0xff] }
 0x54d   : > { %14912 = vmatmul.mubr.msk.bf16.vlgmr.msra.gmra.mrb[28].mxu1 %vm1465_vm0, %v17815_v26  ;;  %v18915_v26 = vld [vmem:[#allocation22_spill] sm:$0xff] }
 0x54e   : > { %14944 = vmatpush3.bf16.msra.mxu1 %v16440_v10  ;;  %14915 = vmatprep.mubr.msk.bf16.mxu1 %vm1465_vm0, %v17826_v16  ;;  %v18916_v16 = vld [vmem:[#allocation23_spill] sm:$0xff] }
 0x54f   : > { %14945 = vmatprep.subr.bf16.mxu1 %v16441_v29 }
 0x552   : > { %14946 = vmatpush3.bf16.msra.mxu1 %v16441_v29  ;;  %v8816_v29 = vpack.c.bf16 %v8785_v20, %v8784_v59  ;;  %v9097_v59 = vld [vmem:[#allocation2 + $0xb4] sm:$0xff]  ;;  %v9098_v20 = vld [vmem:[#allocation2 + $0xc4] sm:$0xff] }
 0x553   : > { %14979 = vmatprep.subr.bf16.mxu1 %v16442_v32 }
 0x555   : > { %14916 = vmatmul.mubr.msk.bf16.gmra.mrb[0].mxu1 %vm1465_vm0, %v17829_v56  ;;  %v18918_v56 = vld [vmem:[#allocation29_spill] sm:$0xff] }
 0x556   : > { %14919 = vmatprep.mubr.msk.bf16.mxu1 %vm1465_vm0, %v17843_v30  ;;  %v18919_v30 = vld [vmem:[#allocation34_spill] sm:$0xff] }
 0x55d   : > { %14920 = vmatmul.mubr.msk.bf16.gmra.mrb[4].mxu1 %vm1465_vm0, %v18912_v13  ;;  %v8787_v13 = vld [vmem:[#allocation2 + $0x83] sm:$0xff] }
 0x55e   : > { %14923 = vmatprep.mubr.msk.bf16.mxu1 %vm1465_vm0, %v18913_v12  ;;  %v8788_v12 = vld [vmem:[#allocation2 + $0x93] sm:$0xff] }
 0x565   : > { %14924 = vmatmul.mubr.msk.bf16.gmra.mrb[8].mxu1 %vm1465_vm0, %v18914_v49  ;;  %v8789_v49 = vld [vmem:[#allocation2 + $0x9b] sm:$0xff] }
 0x566   : > { %14927 = vmatprep.mubr.msk.bf16.mxu1 %vm1465_vm0, %v18915_v26 }
 0x56d   : > { %14928 = vmatmul.mubr.msk.bf16.gmra.mrb[12].mxu1 %vm1465_vm0, %v18916_v16  ;;  %v16445_v16 = vld [vmem:[%s18863_s2 + $0x188] sm:$0xff]  }
 0x56e   : > { %14931 = vmatprep.mubr.msk.bf16.mxu1 %vm1465_vm0, %v18917_v41  ;;  %v8790_v41 = vld [vmem:[#allocation2 + $0xab] sm:$0xff] }
 0x575   : > { %14932 = vmatmul.mubr.msk.bf16.gmra.mrb[16].mxu1 %vm1465_vm0, %v18918_v56  ;;  %v8791_v56 = vld [vmem:[#allocation2 + $0xb3] sm:$0xff] }
 0x576   : > { %14935 = vmatprep.mubr.msk.bf16.mxu1 %vm1465_vm0, %v18919_v30  ;;  %v8792_v30 = vld [vmem:[#allocation2 + $0xc3] sm:$0xff]  ;;  %v8819_v4 = vpack.c.bf16 %v8791_v56, %v8790_v41  ;;  %v9104_v56 = vld [vmem:[#allocation2 + $0x10c] sm:$0xff] }
 0x57d   : > { %14936 = vmatmul.mubr.msk.bf16.gmra.mrb[20].mxu1 %vm1465_vm0, %v18920_v46  ;;  %v8793_v46 = vld [vmem:[#allocation2 + $0xcb] sm:$0xff] }
 0x57e   : > { %14939 = vmatprep.mubr.msk.bf16.mxu1 %vm1465_vm0, %v17919_v22  ;;  %v18143_v22 = vld [vmem:[%s18863_s2 + $0x180] sm:$0xff]   ;;  %v8820_v62 = vpack.c.bf16 %v8793_v46, %v8792_v30  ;;  %v9105_v30 = vld [vmem:[#allocation2 + $0x114] sm:$0xff] }
 0x57f   : > { %v9106_v46 = vld [vmem:[#allocation2 + $0x124] sm:$0xff] }
 0x585   : > { %14940 = vmatmul.mubr.msk.bf16.gmra.mrb[24].mxu1 %vm1465_vm0, %v8219_v39  ;;  %v8794_v39 = vld [vmem:[#allocation2 + $0xdb] sm:$0xff] }
 0x586   : > { %14947 = vmatprep.mubr.msk.bf16.mxu1 %vm1465_vm0, %v17936_v0  ;;  %v8486_v0 = vld [vmem:[#allocation2 + $0xc2] sm:$0xff] }
 0x587   : > { %v8514_v10 = vpack.c.bf16 %v8487_v24, %v8486_v0  ;;  %v8798_v24 = vld [vmem:[#allocation2 + $0x10b] sm:$0xff] }
 0x58d   : > { %14948 = vmatmul.mubr.msk.bf16.vlgmr.msra.gmra.mrb[28].mxu1 %vm1465_vm0, %v17941_v19  ;;  %v8488_v19 = vld [vmem:[#allocation2 + $0xda] sm:$0xff] }
 0x58e   : > { %14980 = vmatpush3.bf16.msra.mxu1 %v16442_v32  ;;  %14951 = vmatprep.mubr.msk.bf16.mxu1 %vm1465_vm0, %v17959_v36  ;;  %v8489_v36 = vld [vmem:[#allocation2 + $0xe2] sm:$0xff] }
 0x58f   : > { %14981 = vmatprep.subr.bf16.mxu1 %v16443_v50  ;;  %v8515_v23 = vpack.c.bf16 %v8489_v36, %v8488_v19  ;;  %v8786_v32 = vld [vmem:[#allocation2 + $0x7b] sm:$0xff]  ;;  %v8801_v19 = vld [vmem:[#allocation2 + $0x12b] sm:$0xff] }
 0x590   : > { %v8817_v26 = vpack.c.bf16 %v8787_v13, %v8786_v32 }
 0x592   : > { %14982 = vmatpush3.bf16.msra.mxu1 %v16443_v50  ;;  %v8795_v50 = vld [vmem:[#allocation2 + $0xe3] sm:$0xff] }
 0x593   : > { %15015 = vmatprep.subr.bf16.mxu1 %v18143_v22  ;;  %v8821_v0 = vpack.c.bf16 %v8795_v50, %v8794_v39  ;;  %v9108_v50 = vld [vmem:[#allocation2 + $0x13c] sm:$0xff] }
 0x595   : > { %14952 = vmatmul.mubr.msk.bf16.gmra.mrb[0].mxu1 %vm1465_vm0, %v8513_v25  ;;  %v8799_v25 = vld [vmem:[#allocation2 + $0x113] sm:$0xff] }
 0x596   : > { %14955 = vmatprep.mubr.msk.bf16.mxu1 %vm1465_vm0, %v8514_v10  ;;  %v8800_v10 = vld [vmem:[#allocation2 + $0x123] sm:$0xff]  ;;  %v8823_v36 = vpack.c.bf16 %v8799_v25, %v8798_v24  ;;  %v9112_v25 = vld [vmem:[#allocation2 + $0x16c] sm:$0xff] }
 0x597   : > { %v8824_v61 = vpack.c.bf16 %v8801_v19, %v8800_v10  ;;  %v9113_v10 = vld [vmem:[#allocation2 + $0x174] sm:$0xff]  ;;  %v9114_v19 = vld [vmem:[#allocation2 + $0x184] sm:$0xff] }
 0x59d   : > { %14956 = vmatmul.mubr.msk.bf16.gmra.mrb[4].mxu1 %vm1465_vm0, %v8515_v23  ;;  %v8803_v23 = vld [vmem:[#allocation2 + $0x143] sm:$0xff] }
 0x59e   : > { %14959 = vmatprep.mubr.msk.bf16.mxu1 %vm1465_vm0, %v8516_v14  ;;  %v8804_v14 = vld [vmem:[#allocation2 + $0x153] sm:$0xff]  ;;  %v8825_v35 = vpack.c.bf16 %v8803_v23, %v8802_v21  ;;  %v9116_v23 = vld [vmem:[#allocation2 + $0x19c] sm:$0xff] }
 0x59f   : > { %v8826_v38 = vpack.c.bf16 %v8805_v5, %v8804_v14  ;;  %v9117_v14 = vld [vmem:[#allocation2 + $0x1a4] sm:$0xff] }
 0x5a0   : > { %v9135_v5 = vpack.c.bf16 %v9117_v14, %v9116_v23 }
 0x5a5   : > { %14960 = vmatmul.mubr.msk.bf16.gmra.mrb[8].mxu1 %vm1465_vm0, %v8517_v42  ;;  %v8807_v42 = vld [vmem:[#allocation2 + $0x173] sm:$0xff] }
 0x5a6   : > { %14963 = vmatprep.mubr.msk.bf16.mxu1 %vm1465_vm0, %v8518_v55  ;;  %v8808_v55 = vld [vmem:[#allocation2 + $0x183] sm:$0xff]  ;;  %v8827_v28 = vpack.c.bf16 %v8807_v42, %v8806_v45  ;;  %v16446_v42 = vld [vmem:[%s18864_s3 + $0x10] sm:$0xff]  }
 0x5a7   : > { %v8828_v51 = vpack.c.bf16 %v8809_v60, %v8808_v55  ;;  %15051 = vmatprep.subr.bf16.mxu0 %v16446_v42  ;;  %v16447_v55 = vld [vmem:[%s18864_s3 + $0x18] sm:$0xff]   ;;  %v9532_v60 = vld [vmem:[#allocation3 + $0x1] sm:$0xff] }
 0x5a8   : > { %15052 = vmatpush3.bf16.msra.mxu0 %v16446_v42  ;;  %v18244_v42 = vld [vmem:[#allocation3 + $0x14] sm:$0xff] }
 0x5a9   : > { %15053 = vmatprep.subr.bf16.mxu0 %v16447_v55 }
 0x5ac   : > { %15054 = vmatpush3.bf16.msra.mxu0 %v16447_v55  ;;  %v18931_v55 = vld [vmem:[#allocation20_spill] sm:$0xff] }
 0x5ad   : > { %14964 = vmatmul.mubr.msk.bf16.gmra.mrb[12].mxu1 %vm1465_vm0, %v8519_v31  ;;  %v8811_v31 = vld [vmem:[#allocation2 + $0x1a3] sm:$0xff] }
 0x5ae   : > { %14967 = vmatprep.mubr.msk.bf16.mxu1 %vm1465_vm0, %v8520_v8  ;;  %v8829_v8 = vpack.c.bf16 %v8811_v31, %v8810_v52 }
 0x5b5   : > { %14968 = vmatmul.mubr.msk.bf16.gmra.mrb[16].mxu1 %vm1465_vm0, %v8521_v17  ;;  %v9091_v17 = vld [vmem:[#allocation2 + $0x6c] sm:$0xff] }
 0x5b6   : > { %14971 = vmatprep.mubr.msk.bf16.mxu1 %vm1465_vm0, %v8522_v47  ;;  %v9122_v47 = vpack.c.bf16 %v9091_v17, %v9090_v15 }
 0x5bd   : > { %14972 = vmatmul.mubr.msk.bf16.gmra.mrb[20].mxu1 %vm1465_vm0, %v8523_v44  ;;  %v9094_v44 = vld [vmem:[#allocation2 + $0x94] sm:$0xff] }
 0x5be   : > { %14975 = vmatprep.mubr.msk.bf16.mxu1 %vm1465_vm0, %v17985_v34  ;;  %v8818_v34 = vpack.c.bf16 %v8789_v49, %v8788_v12  ;;  %v9100_v12 = vld [vmem:[#allocation2 + $0xdc] sm:$0xff]  ;;  %v9101_v49 = vld [vmem:[#allocation2 + $0xe4] sm:$0xff] }
 0x5c5   : > { %14976 = vmatmul.mubr.msk.bf16.gmra.mrb[24].mxu1 %vm1465_vm0, %v8525_v18  ;;  %v9124_v18 = vpack.c.bf16 %v9095_v33, %v9094_v44  ;;  %v18921_v44 = vld [vmem:[#allocation7_spill] sm:$0xff] }
 0x5c6   : > { %14983 = vmatprep.mubr.msk.bf16.mxu1 %vm1465_vm0, %v8816_v29  ;;  %v9099_v29 = vld [vmem:[#allocation2 + $0xcc] sm:$0xff] }
 0x5c7   : > { %v9126_v13 = vpack.c.bf16 %v9099_v29, %v9098_v20  ;;  %v18924_v29 = vld [vmem:[#allocation10_spill] sm:$0xff] }
 0x5cd   : > { %14984 = vmatmul.mubr.msk.bf16.vlgmr.msra.gmra.mrb[28].mxu1 %vm1465_vm0, %v8817_v26  ;;  %v9102_v26 = vld [vmem:[#allocation2 + $0xf4] sm:$0xff] }
 0x5ce   : > { %15016 = vmatpush3.bf16.msra.mxu1 %v18143_v22  ;;  %14987 = vmatprep.mubr.msk.bf16.mxu1 %vm1465_vm0, %v8818_v34  ;;  %v8822_v22 = vpack.c.bf16 %v8797_v7, %v8796_v6  ;;  %v9127_v34 = vpack.c.bf16 %v9101_v49, %v9100_v12  ;;  %v9109_v6 = vld [vmem:[#allocation2 + $0x144] sm:$0xff]  ;;  %v9110_v7 = vld [vmem:[#allocation2 + $0x154] sm:$0xff]  ;;  %v18228_v49 = vld [vmem:[%s18866_s5] ss:$0 sm:$0xff] }
 0x5cf   : > { %15017 = vmatprep.subr.bf16.mxu1 %v16445_v16 }
 0x5d2   : > { %15018 = vmatpush3.bf16.msra.mxu1 %v16445_v16  ;;  %v9103_v16 = vld [vmem:[#allocation2 + $0xfc] sm:$0xff] }
 0x5d3   : > { %v9128_v41 = vpack.c.bf16 %v9103_v16, %v9102_v26 }
 0x5d5   : > { %14988 = vmatmul.mubr.msk.bf16.gmra.mrb[0].mxu1 %vm1465_vm0, %v8819_v4  ;;  %v9107_v4 = vld [vmem:[#allocation2 + $0x12c] sm:$0xff] }
 0x5d6   : > { %14991 = vmatprep.mubr.msk.bf16.mxu1 %vm1465_vm0, %v8820_v62  ;;  %v9129_v62 = vpack.c.bf16 %v9105_v30, %v9104_v56  ;;  %v9130_v39 = vpack.c.bf16 %v9107_v4, %v9106_v46  ;;  %v18926_v46 = vld [vmem:[#allocation13_spill] sm:$0xff] }
 0x5dd   : > { %14992 = vmatmul.mubr.msk.bf16.gmra.mrb[4].mxu1 %vm1465_vm0, %v8821_v0  ;;  %v9111_v0 = vld [vmem:[#allocation2 + $0x15c] sm:$0xff] }
 0x5de   : > { %14995 = vmatprep.mubr.msk.bf16.mxu1 %vm1465_vm0, %v8822_v22  ;;  %v9131_v22 = vpack.c.bf16 %v9109_v6, %v9108_v50  ;;  %v9132_v24 = vpack.c.bf16 %v9111_v0, %v9110_v7  ;;  %v18928_v0 = vld [vmem:[#allocation15_spill] sm:$0xff] }
 0x5e5   : > { %14996 = vmatmul.mubr.msk.bf16.gmra.mrb[8].mxu1 %vm1465_vm0, %v8823_v36  ;;  %v9115_v36 = vld [vmem:[#allocation2 + $0x18c] sm:$0xff] }
 0x5e6   : > { %14999 = vmatprep.mubr.msk.bf16.mxu1 %vm1465_vm0, %v8824_v61  ;;  %v9133_v61 = vpack.c.bf16 %v9113_v10, %v9112_v25  ;;  %v9134_v21 = vpack.c.bf16 %v9115_v36, %v9114_v19 }
 0x5ed   : > { %15000 = vmatmul.mubr.msk.bf16.gmra.mrb[12].mxu1 %vm1465_vm0, %v8825_v35  ;;  %v9120_v35 = vld [vmem:[#allocation2 + $0x1cc] sm:$0xff] }
 0x5ee   : > { %15003 = vmatprep.mubr.msk.bf16.mxu1 %vm1465_vm0, %v8826_v38  ;;  %v9121_v38 = vld [vmem:[#allocation2 + $0x1d4] sm:$0xff] }
 0x5ef   : > { %v9137_v45 = vpack.c.bf16 %v9121_v38, %v9120_v35 }
 0x5f5   : > { %15004 = vmatmul.mubr.msk.bf16.gmra.mrb[16].mxu1 %vm1465_vm0, %v8827_v28  ;;  %v18204_v28 = vld [vmem:[#allocation3 + $0x11] sm:$0xff] }
 0x5f6   : > { %15007 = vmatprep.mubr.msk.bf16.mxu1 %vm1465_vm0, %v8828_v51  ;;  %v18211_v51 = vld [vmem:[%s18864_s3] sm:$0xff]  }
 0x5f7   : > { %15063 = vmatprep.subr.bf16.mxu0 %v18211_v51 }
 0x5fd   : > { %15008 = vmatmul.mubr.msk.bf16.gmra.mrb[20].mxu1 %vm1465_vm0, %v8829_v8 }
 0x5fe   : > { %15011 = vmatprep.mubr.msk.bf16.mxu1 %vm1465_vm0, %v18025_v27  ;;  %v9096_v27 = vld [vmem:[#allocation2 + $0xac] sm:$0xff] }
 0x5ff   : > { %v9125_v32 = vpack.c.bf16 %v9097_v59, %v9096_v27 }
 0x605   : > { %15012 = vmatmul.mubr.msk.bf16.gmra.mrb[24].mxu1 %vm1465_vm0, %v8831_v1 }
 0x606   : > { %15019 = vmatprep.mubr.msk.bf16.mxu1 %vm1465_vm0, %v9122_v47 }
 0x60d   : > { %15020 = vmatmul.mubr.msk.bf16.vlgmr.msra.gmra.mrb[28].mxu1 %vm1465_vm0, %v9123_v9 }
 0x60e   : > { %15023 = vmatprep.mubr.msk.bf16.mxu1 %vm1465_vm0, %v9124_v18 }
 0x615   : > { %15024 = vmatmul.mubr.msk.bf16.gmra.mrb[0].mxu1 %vm1465_vm0, %v9125_v32 }
 0x616   : > { %15027 = vmatprep.mubr.msk.bf16.mxu1 %vm1465_vm0, %v9126_v13 }
 0x61d   : > { %15028 = vmatmul.mubr.msk.bf16.gmra.mrb[4].mxu1 %vm1465_vm0, %v9127_v34  ;;  %v18925_v34 = vld [vmem:[#allocation12_spill] sm:$0xff] }
 0x61e   : > { %15031 = vmatprep.mubr.msk.bf16.mxu1 %vm1465_vm0, %v9128_v41 }
 0x625   : > { %15032 = vmatmul.mubr.msk.bf16.gmra.mrb[8].mxu1 %vm1465_vm0, %v9129_v62 }
 0x626   : > { %15035 = vmatprep.mubr.msk.bf16.mxu1 %vm1465_vm0, %v9130_v39  ;;  %v18927_v39 = vld [vmem:[#allocation14_spill] sm:$0xff] }
 0x62d   : > { %15036 = vmatmul.mubr.msk.bf16.gmra.mrb[12].mxu1 %vm1465_vm0, %v9131_v22 }
 0x62e   : > { %15039 = vmatprep.mubr.msk.bf16.mxu1 %vm1465_vm0, %v9132_v24 }
 0x635   : > { %15040 = vmatmul.mubr.msk.bf16.gmra.mrb[16].mxu1 %vm1465_vm0, %v9133_v61  ;;  %v18929_v61 = vld [vmem:[#allocation18_spill] sm:$0xff] }
 0x636   : > { %15043 = vmatprep.mubr.msk.bf16.mxu1 %vm1465_vm0, %v9134_v21 }
 0x63d   : > { %15044 = vmatmul.mubr.msk.bf16.gmra.mrb[20].mxu1 %vm1465_vm0, %v9135_v5  ;;  %v18930_v5 = vld [vmem:[#allocation19_spill] sm:$0xff] }
 0x63e   : > { %15047 = vmatprep.mubr.msk.bf16.mxu1 %vm1465_vm0, %v18065_v63  ;;  %v9540_v63 = vpack.c.bf16 %v18204_v28, %v9532_v60 }
 0x640   : > { %15055 = vmatprep.mubr.msk.bf16.mxu0 %vm1465_vm0, %v9540_v63 }
 0x645   : > { %15048 = vmatmul.mubr.msk.bf16.gmra.mrb[24].mxu1 %vm1465_vm0, %v9137_v45  ;;  %v18242_v45 = vld [vmem:[#allocation3 + $0x13] sm:$0xff] }
 0x6e0   : > { %v15021_v52 = vpop.f32.mrb[28].mxu1 }
 0x6e1   : > { %v15355_v31 = vadd.f32 %v15021_v52, %v17951_v57  ;;  %v9237_v8 = vpop.f32.mrb[29].mxu1  ;;  %v18922_v57 = vld [vmem:[#allocation8_spill] sm:$0xff] }
 0x6e2   : > { %v15356_v53 = vadd.f32 %v9237_v8, %v17953_v40  ;;  %v15022_v48 = vpop.f32.mrb[30].mxu1  ;;  %v18923_v40 = vld [vmem:[#allocation9_spill] sm:$0xff] }
 0x6e3   : > { %v15357_v1 = vadd.f32 %v15022_v48, %v17955_v2  ;;  %v9240_v15 = vpop.f32.mrb[31].mxu1 }
 0x6e4   : > { %v9396_v17 = vmax.f32 %v15356_v53, %v15355_v31  ;;  %v15358_v47 = vadd.f32 %v9240_v15, %v17957_v11  ;;  %v18932_v31 = vld [vmem:[#allocation21_spill] sm:$0xff] }
 0x6e6   : > { %9412 = vst.msk [vmem:[#allocation5] sm:$0xff] %vm1465_vm0, %v9396_v17  ;;  %v9397_v43 = vmax.f32 %v15358_v47, %v15357_v1 }
 0x6e8   : > { %9413 = vst.msk [vmem:[#allocation5 + $0x8] sm:$0xff] %vm1465_vm0, %v9397_v43  ;;  %v15025_v58 = vpop.f32.mrb[0].mxu1 }
 0x6e9   : > { %v15359_v33 = vadd.f32 %v15025_v58, %v18921_v44  ;;  %v9253_v9 = vpop.f32.mrb[1].mxu1 }
 0x6ea   : > { %v15360_v18 = vadd.f32 %v9253_v9, %v18922_v57  ;;  %v15026_v27 = vpop.f32.mrb[2].mxu1 }
 0x6eb   : > { %v15361_v59 = vadd.f32 %v15026_v27, %v18923_v40  ;;  %v9256_v20 = vpop.f32.mrb[3].mxu1  ;;  %v18934_v27 = vld [vmem:[#allocation25_spill] sm:$0xff] }
 0x6ec   : > { %v9398_v2 = vmax.f32 %v15360_v18, %v15359_v33  ;;  %v15362_v32 = vadd.f32 %v9256_v20, %v18924_v29  ;;  %v18933_v33 = vld [vmem:[#allocation24_spill] sm:$0xff]  ;;  %v18935_v20 = vld [vmem:[#allocation26_spill] sm:$0xff] }
 0x6ee   : > { %9414 = vst.msk [vmem:[#allocation5 + $0x10] sm:$0xff] %vm1465_vm0, %v9398_v2  ;;  %v9399_v11 = vmax.f32 %v15362_v32, %v15361_v59 }
 0x6ef   : > { %v9428_v13 = vld [vmem:[#allocation5] ss:$2 sm:$0xff]  ;;  %v9444_v12 = vld [vmem:[#allocation5 + $0x1] ss:$2 sm:$0xff] }
 0x6f0   : > { %v9459_v26 = vmax.f32 %v9428_v13, %v9444_v12  ;;  %9415 = vst.msk [vmem:[#allocation5 + $0x18] sm:$0xff] %vm1465_vm0, %v9399_v11  ;;  %v15029_v16 = vpop.f32.mrb[4].mxu1  ;;  %v18936_v12 = vld [vmem:[#allocation27_spill] sm:$0xff] }
 0x6f1   : > { %v15363_v41 = vadd.f32 %v15029_v16, %v18925_v34  ;;  %v9269_v56 = vpop.f32.mrb[5].mxu1  ;;  %v16449_v34 = vld [vmem:[%s18864_s3 + $0x8] sm:$0xff]  }
 0x6f2   : > { %v9474_v30 = vadd.f32 %v18228_v49, %v9459_v26  ;;  %v15364_v4 = vadd.f32 %v9269_v56, %v18926_v46  ;;  %v15030_v62 = vpop.f32.mrb[6].mxu1 }
 0x6f3   : > { %v15365_v50 = vadd.f32 %v15030_v62, %v18927_v39  ;;  %v9272_v6 = vpop.f32.mrb[7].mxu1  ;;  %v18281_v62 = vld [vmem:[%s18864_s3 + $0x20] sm:$0xff]   ;;  %v18937_v39 = vld [vmem:[#allocation30_spill] sm:$0xff] }
 0x6f4   : > { %9508 = vst.msk [vmem:[#allocation3 + $0x22] sm:$0xff] %vm1465_vm0, %v9474_v30  ;;  %v9400_v7 = vmax.f32 %v15364_v4, %v15363_v41  ;;  %v15366_v22 = vadd.f32 %v9272_v6, %v18928_v0  ;;  %v18938_v0 = vld [vmem:[#allocation31_spill] sm:$0xff] }
 0x6f6   : > { %9416 = vst.msk [vmem:[#allocation5 + $0x20] sm:$0xff] %vm1465_vm0, %v9400_v7  ;;  %v9401_v24 = vmax.f32 %v15366_v22, %v15365_v50 }
 0x6f7   : > { %v9430_v25 = vld [vmem:[#allocation5 + $0x10] ss:$2 sm:$0xff]  ;;  %v9446_v10 = vld [vmem:[#allocation5 + $0x11] ss:$2 sm:$0xff] }
 0x6f8   : > { %v9460_v19 = vmax.f32 %v9430_v25, %v9446_v10  ;;  %9417 = vst.msk [vmem:[#allocation5 + $0x28] sm:$0xff] %vm1465_vm0, %v9401_v24  ;;  %v15033_v36 = vpop.f32.mrb[8].mxu1 }
 0x6f9   : > { %v15367_v21 = vadd.f32 %v15033_v36, %v18929_v61  ;;  %v9285_v23 = vpop.f32.mrb[9].mxu1 }
 0x6fa   : > { %v9475_v14 = vadd.f32 %v18228_v49, %v9460_v19  ;;  %v15368_v35 = vadd.f32 %v9285_v23, %v18930_v5  ;;  %v15034_v38 = vpop.f32.mrb[10].mxu1 }
 0x6fb   : > { %v15369_v60 = vadd.f32 %v15034_v38, %v18931_v55  ;;  %v9288_v63 = vpop.f32.mrb[11].mxu1  ;;  %v18249_v53 = vld [vmem:[#allocation3 + $0x23] sm:$0xff] }
 0x6fc   : > { %9509 = vst.msk [vmem:[#allocation3 + $0x32] sm:$0xff] %vm1465_vm0, %v9475_v14  ;;  %v9402_v52 = vmax.f32 %v15368_v35, %v15367_v21  ;;  %v15370_v8 = vadd.f32 %v9288_v63, %v18932_v31  ;;  %v18251_v48 = vld [vmem:[#allocation3 + $0x24] sm:$0xff]  ;;  %v10420_v1 = vpack.c.bf16 %v18249_v53, %v18242_v45  ;;  %v18940_v14 = vld [vmem:[#allocation33_spill] sm:$0xff] }
 0x6fd   : > { %v10534_v15 = vpack.c.bf16 %v18251_v48, %v18244_v42  ;;  %v18263_v32 = vld [vmem:[#allocation3 + $0x21] sm:$0xff] }
 0x6fe   : > { %9418 = vst.msk [vmem:[#allocation5 + $0x30] sm:$0xff] %vm1465_vm0, %v9402_v52  ;;  %v9403_v17 = vmax.f32 %v15370_v8, %v15369_v60 }
 0x6ff   : > { %v9432_v47 = vld [vmem:[#allocation5 + $0x20] ss:$2 sm:$0xff]  ;;  %v9448_v43 = vld [vmem:[#allocation5 + $0x21] ss:$2 sm:$0xff] }
 0x700   : > { %v9461_v58 = vmax.f32 %v9432_v47, %v9448_v43  ;;  %9419 = vst.msk [vmem:[#allocation5 + $0x38] sm:$0xff] %vm1465_vm0, %v9403_v17  ;;  %v15037_v44 = vpop.f32.mrb[12].mxu1 }
 0x701   : > { %v15371_v9 = vadd.f32 %v15037_v44, %v18933_v33  ;;  %v9301_v57 = vpop.f32.mrb[13].mxu1  ;;  %v18941_v44 = vld [vmem:[#allocation36_spill] sm:$0xff] }
 0x702   : > { %v9476_v18 = vadd.f32 %v18228_v49, %v9461_v58  ;;  %v15372_v40 = vadd.f32 %v9301_v57, %v18934_v27  ;;  %v15038_v59 = vpop.f32.mrb[14].mxu1 }
 0x703   : > { %v15373_v2 = vadd.f32 %v15038_v59, %v18935_v20  ;;  %v9304_v29 = vpop.f32.mrb[15].mxu1  ;;  %v9535_v11 = vld [vmem:[#allocation3 + $0x31] sm:$0xff] }
 0x704   : > { %9510 = vst.msk [vmem:[#allocation3 + $0x42] sm:$0xff] %vm1465_vm0, %v9476_v18  ;;  %v9404_v13 = vmax.f32 %v15372_v40, %v15371_v9  ;;  %v15374_v26 = vadd.f32 %v9304_v29, %v18936_v12  ;;  %v18268_v16 = vpack.c.bf16 %v9535_v11, %v18263_v32  ;;  %v18286_v25 = vld [vmem:[#allocation3 + $0x32] sm:$0xff] }
 0x705   : > { %v18291_v21 = vld [vmem:[#allocation3 + $0x33] sm:$0xff] }
 0x706   : > { %9420 = vst.msk [vmem:[#allocation5 + $0x40] sm:$0xff] %vm1465_vm0, %v9404_v13  ;;  %v9405_v41 = vmax.f32 %v15374_v26, %v15373_v2  ;;  %15056 = vmatmul.mubr.msk.bf16.vlgmr.msra.gmra.mrb[160].mxu0 %vm1465_vm0, %v18268_v16  ;;  %v18298_v38 = vld [vmem:[#allocation3 + $0x34] sm:$0xff] }
 0x707   : > { %v9434_v56 = vld [vmem:[#allocation5 + $0x30] ss:$2 sm:$0xff]  ;;  %v9450_v30 = vld [vmem:[#allocation5 + $0x31] ss:$2 sm:$0xff]  ;;  %15064 = vmatpush3.bf16.msra.mxu0 %v18211_v51  ;;  %v18939_v51 = vld [vmem:[#allocation32_spill] sm:$0xff] }
 0x708   : > { %v9462_v46 = vmax.f32 %v9434_v56, %v9450_v30  ;;  %9421 = vst.msk [vmem:[#allocation5 + $0x48] sm:$0xff] %vm1465_vm0, %v9405_v41  ;;  %v15041_v4 = vpop.f32.mrb[16].mxu1  ;;  %15065 = vmatprep.subr.bf16.mxu0 %v16449_v34  ;;  %v18942_v18 = vld [vmem:[#allocation37_spill] sm:$0xff]  ;;  %v18943_v59 = vld [vmem:[#allocation38_spill] sm:$0xff] }
 0x709   : > { %v15375_v50 = vadd.f32 %v15041_v4, %v18937_v39  ;;  %v9317_v6 = vpop.f32.mrb[17].mxu1 }
 0x70a   : > { %v9477_v7 = vadd.f32 %v18228_v49, %v9462_v46  ;;  %v15376_v22 = vadd.f32 %v9317_v6, %v18938_v0  ;;  %v15042_v24 = vpop.f32.mrb[18].mxu1 }
 0x70b   : > { %v15377_v10 = vadd.f32 %v15042_v24, %v18939_v51  ;;  %v9320_v19 = vpop.f32.mrb[19].mxu1  ;;  %v9536_v36 = vld [vmem:[#allocation3 + $0x41] sm:$0xff]  ;;  %15066 = vmatpush3.bf16.msra.mxu0 %v16449_v34 }
 0x70c   : > { %v18289_v61 = vld [vmem:[#allocation3 + $0x42] sm:$0xff]  ;;  %9511 = vst.msk [vmem:[#allocation3 + $0x52] sm:$0xff] %vm1465_vm0, %v9477_v7  ;;  %v9406_v23 = vmax.f32 %v15376_v22, %v15375_v50  ;;  %v15378_v5 = vadd.f32 %v9320_v19, %v18940_v14  ;;  %15075 = vmatprep.subr.bf16.mxu0 %v18281_v62  ;;  %v18302_v60 = vpack.c.bf16 %v9536_v36, %v9535_v11 }
 0x70d   : > { %v18296_v35 = vld [vmem:[#allocation3 + $0x43] sm:$0xff]  ;;  %v18306_v63 = vpack.c.bf16 %v18289_v61, %v18286_v25 }
 0x70e   : > { %v18300_v55 = vld [vmem:[#allocation3 + $0x44] sm:$0xff]  ;;  %v18310_v52 = vpack.c.bf16 %v18296_v35, %v18291_v21  ;;  %9422 = vst.msk [vmem:[#allocation5 + $0x50] sm:$0xff] %vm1465_vm0, %v9406_v23  ;;  %v9407_v8 = vmax.f32 %v15378_v5, %v15377_v10 }
 0x70f   : > { %v18314_v31 = vpack.c.bf16 %v18300_v55, %v18298_v38  ;;  %v9436_v17 = vld [vmem:[#allocation5 + $0x40] ss:$2 sm:$0xff]  ;;  %v9452_v47 = vld [vmem:[#allocation5 + $0x41] ss:$2 sm:$0xff] }
 0x710   : > { %v9463_v43 = vmax.f32 %v9436_v17, %v9452_v47  ;;  %9423 = vst.msk [vmem:[#allocation5 + $0x58] sm:$0xff] %vm1465_vm0, %v9407_v8  ;;  %v15045_v58 = vpop.f32.mrb[20].mxu1  ;;  %v18944_v7 = vld [vmem:[#allocation39_spill] sm:$0xff] }
 0x711   : > { %v15379_v33 = vadd.f32 %v15045_v58, %v18941_v44  ;;  %v9333_v9 = vpop.f32.mrb[21].mxu1 }
 0x712   : > { %v9478_v57 = vadd.f32 %v18228_v49, %v9463_v43  ;;  %v15380_v27 = vadd.f32 %v9333_v9, %v18942_v18  ;;  %v15046_v40 = vpop.f32.mrb[22].mxu1  ;;  %v9516_v9 = vld [vmem:[#allocation3] sm:$0xff]  ;;  %v18362_v18 = vld [vmem:[#allocation3 + $0x10] sm:$0xff] }
 0x713   : > { %v15381_v20 = vadd.f32 %v15046_v40, %v18943_v59  ;;  %v9336_v2 = vpop.f32.mrb[23].mxu1  ;;  %v9537_v29 = vld [vmem:[#allocation3 + $0x51] sm:$0xff]  ;;  %v9524_v40 = vpack.c.bf16 %v18362_v18, %v9516_v9 }
 0x714   : > { %9512 = vst.msk [vmem:[#allocation3 + $0x62] sm:$0xff] %vm1465_vm0, %v9478_v57  ;;  %v9408_v11 = vmax.f32 %v15380_v27, %v15379_v33  ;;  %v15382_v13 = vadd.f32 %v9336_v2, %v17923_v3  ;;  %v18324_v12 = vpack.c.bf16 %v9537_v29, %v9536_v36  ;;  %v9732_v6 = vld [vmem:[#allocation3 + $0x52] sm:$0xff]  ;;  %v18945_v36 = vld [vmem:[#allocation40_spill] sm:$0xff] }
 0x715   : > { %v18336_v10 = vld [vmem:[#allocation3 + $0x53] sm:$0xff] }
 0x716   : > { %9424 = vst.msk [vmem:[#allocation5 + $0x60] sm:$0xff] %vm1465_vm0, %v9408_v11  ;;  %v9409_v26 = vmax.f32 %v15382_v13, %v15381_v20  ;;  %15059 = vmatprep.mubr.msk.bf16.mxu0 %vm1465_vm0, %v18324_v12  ;;  %v18342_v14 = vld [vmem:[#allocation3 + $0x54] sm:$0xff] }
 0x717   : > { %v9438_v34 = vld [vmem:[#allocation5 + $0x50] ss:$2 sm:$0xff]  ;;  %v9454_v41 = vld [vmem:[#allocation5 + $0x51] ss:$2 sm:$0xff] }
 0x718   : > { %v9464_v56 = vmax.f32 %v9438_v34, %v9454_v41  ;;  %9425 = vst.msk [vmem:[#allocation5 + $0x68] sm:$0xff] %vm1465_vm0, %v9409_v26  ;;  %v15049_v30 = vpop.f32.mrb[24].mxu1  ;;  %v18374_v11 = vld [vmem:[#allocation3 + $0x30] sm:$0xff]  ;;  %v18379_v34 = vld [vmem:[#allocation3 + $0x20] sm:$0xff] }
 0x719   : > { %v15383_v46 = vadd.f32 %v15049_v30, %v17928_v54  ;;  %v9349_v4 = vpop.f32.mrb[25].mxu1  ;;  %v18377_v26 = vld [vmem:[#allocation3 + $0x50] sm:$0xff]  ;;  %v18384_v41 = vpack.c.bf16 %v18374_v11, %v18379_v34  ;;  %v16451_v30 = vld [vmem:[%s18864_s3 + $0x28] sm:$0xff]  }
 0x71a   : > { %v9479_v39 = vadd.f32 %v18228_v49, %v9464_v56  ;;  %v15384_v3 = vadd.f32 %v9349_v4, %v17930_v37  ;;  %v15050_v50 = vpop.f32.mrb[26].mxu1  ;;  %v18386_v56 = vld [vmem:[#allocation3 + $0x40] sm:$0xff]  ;;  %v16452_v4 = vld [vmem:[%s18864_s3 + $0x30] sm:$0xff]  }
 0x71b   : > { %v15385_v0 = vadd.f32 %v15050_v50, %v18944_v7  ;;  %v9352_v22 = vpop.f32.mrb[27].mxu1  ;;  %v9538_v24 = vld [vmem:[#allocation3 + $0x61] sm:$0xff] }
 0x71c   : > { %v18334_v51 = vld [vmem:[#allocation3 + $0x62] sm:$0xff]  ;;  %9513 = vst.msk [vmem:[#allocation3 + $0x72] sm:$0xff] %vm1465_vm0, %v9479_v39  ;;  %v9410_v19 = vmax.f32 %v15384_v3, %v15383_v46  ;;  %v15386_v54 = vadd.f32 %v9352_v22, %v18945_v36  ;;  %v18346_v5 = vpack.c.bf16 %v9538_v24, %v9537_v29  ;;  %v18393_v46 = vpack.c.bf16 %v18377_v26, %v18386_v56  ;;  %v18405_v3 = vld [vmem:[#allocation3 + $0x12] sm:$0xff] }
 0x71d   : > { %v18340_v23 = vld [vmem:[#allocation3 + $0x63] sm:$0xff]  ;;  %v18349_v8 = vpack.c.bf16 %v18334_v51, %v9732_v6 }
 0x71e   : > { %v18344_v37 = vld [vmem:[#allocation3 + $0x64] sm:$0xff]  ;;  %v18353_v17 = vpack.c.bf16 %v18340_v23, %v18336_v10  ;;  %9426 = vst.msk [vmem:[#allocation5 + $0x70] sm:$0xff] %vm1465_vm0, %v9410_v19  ;;  %v9411_v43 = vmax.f32 %v15386_v54, %v15385_v0  ;;  %v18424_v19 = vpack.c.bf16 %v9732_v6, %v18289_v61  ;;  %v18445_v6 = vpack.c.bf16 %v18291_v21, %v18249_v53  ;;  %v16456_v21 = vld [vmem:[%s18864_s3 + $0x50] sm:$0xff]  }
 0x71f   : > { %v18357_v47 = vpack.c.bf16 %v18344_v37, %v18342_v14  ;;  %v9440_v58 = vld [vmem:[#allocation5 + $0x60] ss:$2 sm:$0xff]  ;;  %v9456_v44 = vld [vmem:[#allocation5 + $0x61] ss:$2 sm:$0xff] }
 0x720   : > { %v9465_v33 = vmax.f32 %v9440_v58, %v9456_v44  ;;  %9427 = vst.msk [vmem:[#allocation5 + $0x78] sm:$0xff] %vm1465_vm0, %v9411_v43  ;;  %v9522_v50 = vld [vmem:[#allocation3 + $0x60] sm:$0xff]  ;;  %v16455_v58 = vld [vmem:[%s18864_s3 + $0x48] sm:$0xff]   ;;  %v18452_v44 = vpack.c.bf16 %v18336_v10, %v18296_v35  ;;  %v18473_v10 = vpack.c.bf16 %v18298_v38, %v18251_v48  ;;  %v16469_v48 = vld [vmem:[%s18864_s3 + $0xb8] sm:$0xff]  }
 0x721   : > { %v9841_v36 = vld [vmem:[#allocation3 + $0x3] sm:$0xff] }
 0x722   : > { %v9480_v57 = vadd.f32 %v18228_v49, %v9465_v33  ;;  %v9849_v43 = vpack.c.bf16 %v18242_v45, %v9841_v36  ;;  %v16458_v38 = vld [vmem:[%s18864_s3 + $0x60] sm:$0xff]   ;;  %v16467_v53 = vld [vmem:[%s18864_s3 + $0xa8] sm:$0xff]   ;;  %v16472_v36 = vld [vmem:[%s18864_s3 + $0xd0] sm:$0xff]  }
 0x723   : > { %v18364_v27 = vld [vmem:[#allocation3 + $0x71] sm:$0xff] }
 0x724   : > { %9514 = vst.msk [vmem:[#allocation3 + $0x82] sm:$0xff] %vm1465_vm0, %v9480_v57  ;;  %v18369_v59 = vpack.c.bf16 %v18364_v27, %v9538_v24  ;;  %v18403_v39 = vld [vmem:[#allocation3 + $0x70] sm:$0xff]  ;;  %v16453_v24 = vld [vmem:[%s18864_s3 + $0x38] sm:$0xff]  }
 0x725   : > { %v18409_v0 = vpack.c.bf16 %v18403_v39, %v9522_v50  ;;  %v18433_v54 = vld [vmem:[#allocation3 + $0x72] sm:$0xff] }
 0x726   : > { %15060 = vmatmul.mubr.msk.bf16.gmra.mrb[164].mxu0 %vm1465_vm0, %v18369_v59  ;;  %v18438_v61 = vpack.c.bf16 %v18433_v54, %v18334_v51  ;;  %v9955_v51 = vld [vmem:[#allocation3 + $0x4] sm:$0xff]  ;;  %v18461_v33 = vld [vmem:[#allocation3 + $0x73] sm:$0xff] }
 0x727   : > { %v9442_v20 = vld [vmem:[#allocation5 + $0x70] ss:$2 sm:$0xff]  ;;  %v9458_v2 = vld [vmem:[#allocation5 + $0x71] ss:$2 sm:$0xff]  ;;  %15067 = vmatprep.mubr.msk.bf16.mxu0 %vm1465_vm0, %v9524_v40  ;;  %v9963_v9 = vpack.c.bf16 %v18244_v42, %v9955_v51  ;;  %v18466_v35 = vpack.c.bf16 %v18461_v33, %v18340_v23  ;;  %v18480_v40 = vpack.c.bf16 %v18342_v14, %v18300_v55  ;;  %v10078_v55 = vpack.c.bf16 %v18379_v34, %v18362_v18 }
 0x728   : > { %v9466_v29 = vmax.f32 %v9442_v20, %v9458_v2  ;;  %v16457_v57 = vld [vmem:[%s18864_s3 + $0x58] sm:$0xff]   ;;  %v18502_v14 = vpack.c.bf16 %v18386_v56, %v18374_v11  ;;  %v16459_v2 = vld [vmem:[%s18864_s3 + $0x68] sm:$0xff]   ;;  %v16460_v18 = vld [vmem:[%s18864_s3 + $0x70] sm:$0xff]  }
 0x729   : > { %v18489_v23 = vld [vmem:[#allocation3 + $0x74] sm:$0xff] }
 0x72a   : > { %v9481_v13 = vadd.f32 %v18228_v49, %v9466_v29  ;;  %v9727_v49 = vld [vmem:[#allocation3 + $0x2] sm:$0xff]  ;;  %v18493_v20 = vpack.c.bf16 %v18489_v23, %v18344_v37  ;;  %v18508_v37 = vpack.c.bf16 %v9522_v50, %v18377_v26  ;;  %v16461_v26 = vld [vmem:[%s18864_s3 + $0x78] sm:$0xff]  }
 0x72b   : > { %v9735_v7 = vpack.c.bf16 %v18405_v3, %v9727_v49  ;;  %v18517_v29 = vld [vmem:[#allocation3 + $0x80] sm:$0xff] }
 0x72c   : > { %9515 = vst.msk [vmem:[#allocation3 + $0x92] sm:$0xff] %vm1465_vm0, %v9481_v13  ;;  %v18521_v11 = vpack.c.bf16 %v18517_v29, %v18403_v39  ;;  %v10192_v13 = vpack.c.bf16 %v18263_v32, %v18204_v28  ;;  %v16462_v28 = vld [vmem:[%s18864_s3 + $0x80] sm:$0xff]   ;;  %v16465_v39 = vld [vmem:[%s18864_s3 + $0x98] sm:$0xff]  }
 0x72d   : > { %v18538_v32 = vld [vmem:[#allocation3 + $0x81] sm:$0xff] }
 0x72e   : > { %15068 = vmatmul.mubr.msk.bf16.vlgmr.msra.gmra.mrb[160].mxu0 %vm1465_vm0, %v18384_v41  ;;  %v18542_v34 = vpack.c.bf16 %v18538_v32, %v18364_v27  ;;  %v16464_v27 = vld [vmem:[%s18864_s3 + $0x90] sm:$0xff]   ;;  %v10305_v49 = vld [vmem:[#allocation3 + $0x82] sm:$0xff] }
 0x72f   : > { %15076 = vmatpush3.bf16.msra.mxu0 %v18281_v62  ;;  %15071 = vmatprep.mubr.msk.bf16.mxu0 %vm1465_vm0, %v18393_v46  ;;  %v18414_v62 = vld [vmem:[#allocation3 + $0x22] sm:$0xff] }
 0x730   : > { %15077 = vmatprep.subr.bf16.mxu0 %v16451_v30  ;;  %v18418_v22 = vpack.c.bf16 %v18286_v25, %v18414_v62  ;;  %v16454_v25 = vld [vmem:[%s18864_s3 + $0x40] sm:$0xff]   ;;  %v10306_v56 = vpack.c.bf16 %v18414_v62, %v18405_v3 }
 0x731   : > { %v16466_v3 = vld [vmem:[%s18864_s3 + $0xa0] sm:$0xff]  }
 0x732   : > { %v10419_v50 = vld [vmem:[#allocation3 + $0x83] sm:$0xff] }
 0x733   : > { %15078 = vmatpush3.bf16.msra.mxu0 %v16451_v30  ;;  %v16463_v30 = vld [vmem:[%s18864_s3 + $0x88] sm:$0xff]   ;;  %v18579_v45 = vpack.c.bf16 %v10419_v50, %v18461_v33  ;;  %v18614_v62 = vld [vmem:[#allocation3 + $0x90] sm:$0xff]  ;;  %v16478_v33 = vld [vmem:[%s18864_s3 + $0x100] sm:$0xff]  }
 0x734   : > { %15087 = vmatprep.subr.bf16.mxu0 %v16452_v4  ;;  %v18673_v51 = vld [vmem:[#allocation3 + $0x93] sm:$0xff] }
 0x736   : > { %15072 = vmatmul.mubr.msk.bf16.gmra.mrb[164].mxu0 %vm1465_vm0, %v18409_v0 }
 0x737   : > { %15079 = vmatprep.mubr.msk.bf16.mxu0 %vm1465_vm0, %v9735_v7  ;;  %v10533_v7 = vld [vmem:[#allocation3 + $0x84] sm:$0xff] }
 0x738   : > { %v18598_v42 = vpack.c.bf16 %v10533_v7, %v18489_v23  ;;  %v18711_v23 = vld [vmem:[#allocation3 + $0xa0] sm:$0xff] }
 0x73e   : > { %15080 = vmatmul.mubr.msk.bf16.vlgmr.msra.gmra.mrb[160].mxu0 %vm1465_vm0, %v18418_v22 }
 0x73f   : > { %15088 = vmatpush3.bf16.msra.mxu0 %v16452_v4  ;;  %15083 = vmatprep.mubr.msk.bf16.mxu0 %vm1465_vm0, %v18424_v19  ;;  %v18560_v4 = vpack.c.bf16 %v10305_v49, %v18433_v54  ;;  %v18654_v54 = vld [vmem:[#allocation3 + $0x92] sm:$0xff] }
 0x740   : > { %15089 = vmatprep.subr.bf16.mxu0 %v16453_v24 }
 0x743   : > { %15090 = vmatpush3.bf16.msra.mxu0 %v16453_v24  ;;  %v16471_v24 = vld [vmem:[%s18864_s3 + $0xc8] sm:$0xff]  }
 0x744   : > { %15099 = vmatprep.subr.bf16.mxu0 %v16454_v25 }
 0x746   : > { %15084 = vmatmul.mubr.msk.bf16.gmra.mrb[164].mxu0 %vm1465_vm0, %v18438_v61 }
 0x747   : > { %15091 = vmatprep.mubr.msk.bf16.mxu0 %vm1465_vm0, %v9849_v43  ;;  %v16475_v43 = vld [vmem:[%s18864_s3 + $0xe8] sm:$0xff]  }
 0x74e   : > { %15092 = vmatmul.mubr.msk.bf16.vlgmr.msra.gmra.mrb[160].mxu0 %vm1465_vm0, %v18445_v6 }
 0x74f   : > { %15100 = vmatpush3.bf16.msra.mxu0 %v16454_v25  ;;  %15095 = vmatprep.mubr.msk.bf16.mxu0 %vm1465_vm0, %v18452_v44  ;;  %v18634_v25 = vld [vmem:[#allocation3 + $0x91] sm:$0xff] }
 0x750   : > { %15101 = vmatprep.subr.bf16.mxu0 %v16455_v58 }
 0x753   : > { %15102 = vmatpush3.bf16.msra.mxu0 %v16455_v58  ;;  %v16476_v58 = vld [vmem:[%s18864_s3 + $0xf0] sm:$0xff]  }
 0x754   : > { %15111 = vmatprep.subr.bf16.mxu0 %v16456_v21 }
 0x756   : > { %15096 = vmatmul.mubr.msk.bf16.gmra.mrb[164].mxu0 %vm1465_vm0, %v18466_v35 }
 0x757   : > { %15103 = vmatprep.mubr.msk.bf16.mxu0 %vm1465_vm0, %v9963_v9  ;;  %v18692_v9 = vld [vmem:[#allocation3 + $0x94] sm:$0xff] }
 0x75e   : > { %15104 = vmatmul.mubr.msk.bf16.vlgmr.msra.gmra.mrb[160].mxu0 %vm1465_vm0, %v18473_v10 }
 0x75f   : > { %15112 = vmatpush3.bf16.msra.mxu0 %v16456_v21  ;;  %15107 = vmatprep.mubr.msk.bf16.mxu0 %vm1465_vm0, %v18480_v40  ;;  %v16477_v21 = vld [vmem:[%s18864_s3 + $0xf8] sm:$0xff]  }
 0x760   : > { %15113 = vmatprep.subr.bf16.mxu0 %v16457_v57 }
 0x763   : > { %15114 = vmatpush3.bf16.msra.mxu0 %v16457_v57  ;;  %v16479_v57 = vld [vmem:[%s18864_s3 + $0x108] sm:$0xff]  }
 0x764   : > { %15123 = vmatprep.subr.bf16.mxu0 %v16458_v38 }
 0x766   : > { %15108 = vmatmul.mubr.msk.bf16.gmra.mrb[164].mxu0 %vm1465_vm0, %v18493_v20 }
 0x767   : > { %15115 = vmatprep.mubr.msk.bf16.mxu0 %vm1465_vm0, %v10078_v55  ;;  %v11222_v55 = vpack.c.bf16 %v18711_v23, %v18614_v62 }
 0x76e   : > { %15116 = vmatmul.mubr.msk.bf16.vlgmr.msra.gmra.mrb[160].mxu0 %vm1465_vm0, %v18502_v14 }
 0x76f   : > { %15124 = vmatpush3.bf16.msra.mxu0 %v16458_v38  ;;  %15119 = vmatprep.mubr.msk.bf16.mxu0 %vm1465_vm0, %v18508_v37  ;;  %v16480_v38 = vld [vmem:[%s18864_s3 + $0x110] sm:$0xff]  }
 0x770   : > { %15125 = vmatprep.subr.bf16.mxu0 %v16459_v2 }
 0x773   : > { %15126 = vmatpush3.bf16.msra.mxu0 %v16459_v2  ;;  %v16482_v2 = vld [vmem:[%s18864_s3 + $0x120] sm:$0xff]  }
 0x774   : > { %15135 = vmatprep.subr.bf16.mxu0 %v16460_v18 }
 0x776   : > { %15120 = vmatmul.mubr.msk.bf16.gmra.mrb[164].mxu0 %vm1465_vm0, %v18521_v11 }
 0x777   : > { %15127 = vmatprep.mubr.msk.bf16.mxu0 %vm1465_vm0, %v10192_v13  ;;  %v18762_v13 = vld [vmem:[#allocation3 + $0xa3] sm:$0xff] }
 0x77e   : > { %15128 = vmatmul.mubr.msk.bf16.vlgmr.msra.gmra.mrb[160].mxu0 %vm1465_vm0, %v18302_v60 }
 0x77f   : > { %15136 = vmatpush3.bf16.msra.mxu0 %v16460_v18  ;;  %15131 = vmatprep.mubr.msk.bf16.mxu0 %vm1465_vm0, %v18346_v5  ;;  %v16484_v18 = vld [vmem:[%s18864_s3 + $0x130] sm:$0xff]  }
 0x780   : > { %15137 = vmatprep.subr.bf16.mxu0 %v16461_v26 }
 0x783   : > { %15138 = vmatpush3.bf16.msra.mxu0 %v16461_v26  ;;  %v16488_v26 = vld [vmem:[%s18864_s3 + $0x150] sm:$0xff]  }
 0x784   : > { %15147 = vmatprep.subr.bf16.mxu0 %v16462_v28 }
 0x786   : > { %15132 = vmatmul.mubr.msk.bf16.gmra.mrb[164].mxu0 %vm1465_vm0, %v18542_v34 }
 0x787   : > { %15139 = vmatprep.mubr.msk.bf16.mxu0 %vm1465_vm0, %v10306_v56 }
 0x78e   : > { %15140 = vmatmul.mubr.msk.bf16.vlgmr.msra.gmra.mrb[160].mxu0 %vm1465_vm0, %v18306_v63 }
 0x78f   : > { %15148 = vmatpush3.bf16.msra.mxu0 %v16462_v28  ;;  %15143 = vmatprep.mubr.msk.bf16.mxu0 %vm1465_vm0, %v18349_v8  ;;  %v18779_v28 = vld [vmem:[#allocation3 + $0xa4] sm:$0xff] }
 0x790   : > { %15149 = vmatprep.subr.bf16.mxu0 %v16463_v30 }
 0x793   : > { %15150 = vmatpush3.bf16.msra.mxu0 %v16463_v30  ;;  %v11896_v30 = vld [vmem:[#allocation3 + $0x41] sm:$0xff] }
 0x794   : > { %15159 = vmatprep.subr.bf16.mxu0 %v16464_v27 }
 0x796   : > { %15144 = vmatmul.mubr.msk.bf16.gmra.mrb[164].mxu0 %vm1465_vm0, %v18560_v4 }
 0x797   : > { %15151 = vmatprep.mubr.msk.bf16.mxu0 %vm1465_vm0, %v10420_v1  ;;  %v16468_v1 = vld [vmem:[%s18864_s3 + $0xb0] sm:$0xff]  }
 0x79e   : > { %15152 = vmatmul.mubr.msk.bf16.vlgmr.msra.gmra.mrb[160].mxu0 %vm1465_vm0, %v18310_v52 }
 0x79f   : > { %15160 = vmatpush3.bf16.msra.mxu0 %v16464_v27  ;;  %15155 = vmatprep.mubr.msk.bf16.mxu0 %vm1465_vm0, %v18353_v17 }
 0x7a0   : > { %15161 = vmatprep.subr.bf16.mxu0 %v16465_v39 }
 0x7a3   : > { %15162 = vmatpush3.bf16.msra.mxu0 %v16465_v39  ;;  %v16491_v39 = vld [vmem:[%s18864_s3 + $0x168] sm:$0xff]  }
 0x7a4   : > { %15171 = vmatprep.subr.bf16.mxu0 %v16466_v3 }
 0x7a6   : > { %15156 = vmatmul.mubr.msk.bf16.gmra.mrb[164].mxu0 %vm1465_vm0, %v18579_v45 }
 0x7a7   : > { %15163 = vmatprep.mubr.msk.bf16.mxu0 %vm1465_vm0, %v10534_v15  ;;  %v16470_v15 = vld [vmem:[%s18864_s3 + $0xc0] sm:$0xff]  }
 0x7ae   : > { %15164 = vmatmul.mubr.msk.bf16.vlgmr.msra.gmra.mrb[160].mxu0 %vm1465_vm0, %v18314_v31 }
 0x7af   : > { %15172 = vmatpush3.bf16.msra.mxu0 %v16466_v3  ;;  %15167 = vmatprep.mubr.msk.bf16.mxu0 %vm1465_vm0, %v18357_v47  ;;  %v11903_v3 = vld [vmem:[#allocation3 + $0xb1] sm:$0xff] }
 0x7b0   : > { %15173 = vmatprep.subr.bf16.mxu0 %v16467_v53 }
 0x7b3   : > { %15174 = vmatpush3.bf16.msra.mxu0 %v16467_v53  ;;  %v16493_v53 = vld [vmem:[%s18864_s3 + $0x178] sm:$0xff]  }
 0x7b4   : > { %15183 = vmatprep.subr.bf16.mxu0 %v16468_v1 }
 0x7b6   : > { %15168 = vmatmul.mubr.msk.bf16.gmra.mrb[164].mxu0 %vm1465_vm0, %v18598_v42 }
 0x7b7   : > { %15175 = vmatprep.mubr.msk.bf16.mxu0 %vm1465_vm0, %v18384_v41  ;;  %v18618_v41 = vpack.c.bf16 %v18614_v62, %v18517_v29  ;;  %v18745_v29 = vld [vmem:[#allocation3 + $0xa2] sm:$0xff] }
 0x7be   : > { %15176 = vmatmul.mubr.msk.bf16.vlgmr.msra.gmra.mrb[160].mxu0 %vm1465_vm0, %v18393_v46 }
 0x7bf   : > { %15184 = vmatpush3.bf16.msra.mxu0 %v16468_v1  ;;  %15179 = vmatprep.mubr.msk.bf16.mxu0 %vm1465_vm0, %v18409_v0  ;;  %v12017_v1 = vld [vmem:[#allocation3 + $0xb2] sm:$0xff] }
 0x7c0   : > { %15185 = vmatprep.subr.bf16.mxu0 %v16469_v48 }
 0x7c3   : > { %15186 = vmatpush3.bf16.msra.mxu0 %v16469_v48 }
 0x7c4   : > { %15195 = vmatprep.subr.bf16.mxu0 %v16470_v15 }
 0x7c6   : > { %15180 = vmatmul.mubr.msk.bf16.gmra.mrb[164].mxu0 %vm1465_vm0, %v18618_v41 }
 0x7c7   : > { %15187 = vmatprep.mubr.msk.bf16.mxu0 %vm1465_vm0, %v18268_v16  ;;  %v18638_v16 = vpack.c.bf16 %v18634_v25, %v18538_v32  ;;  %v11789_v32 = vld [vmem:[#allocation3 + $0xb0] sm:$0xff] }
 0x7c8   : > { %v11793_v56 = vpack.c.bf16 %v11789_v32, %v18711_v23 }
 0x7ce   : > { %15188 = vmatmul.mubr.msk.bf16.vlgmr.msra.gmra.mrb[160].mxu0 %vm1465_vm0, %v18324_v12  ;;  %v16473_v12 = vld [vmem:[%s18864_s3 + $0xd8] sm:$0xff]  }
 0x7cf   : > { %15196 = vmatpush3.bf16.msra.mxu0 %v16470_v15  ;;  %15191 = vmatprep.mubr.msk.bf16.mxu0 %vm1465_vm0, %v18369_v59  ;;  %v16474_v59 = vld [vmem:[%s18864_s3 + $0xe0] sm:$0xff]  }
 0x7d0   : > { %15197 = vmatprep.subr.bf16.mxu0 %v16471_v24 }
 0x7d3   : > { %15198 = vmatpush3.bf16.msra.mxu0 %v16471_v24 }
 0x7d4   : > { %15207 = vmatprep.subr.bf16.mxu0 %v16472_v36 }
 0x7d6   : > { %15192 = vmatmul.mubr.msk.bf16.gmra.mrb[164].mxu0 %vm1465_vm0, %v18638_v16 }
 0x7d7   : > { %15199 = vmatprep.mubr.msk.bf16.mxu0 %vm1465_vm0, %v18418_v22  ;;  %v18657_v22 = vpack.c.bf16 %v18654_v54, %v10305_v49  ;;  %v11898_v49 = vld [vmem:[#allocation3 + $0x61] sm:$0xff] }
 0x7de   : > { %15200 = vmatmul.mubr.msk.bf16.vlgmr.msra.gmra.mrb[160].mxu0 %vm1465_vm0, %v18424_v19 }
 0x7df   : > { %15208 = vmatpush3.bf16.msra.mxu0 %v16472_v36  ;;  %15203 = vmatprep.mubr.msk.bf16.mxu0 %vm1465_vm0, %v18438_v61 }
 0x7e0   : > { %15209 = vmatprep.subr.bf16.mxu0 %v16473_v12 }
 0x7e3   : > { %15210 = vmatpush3.bf16.msra.mxu0 %v16473_v12  ;;  %v13330_v12 = vld [vmem:[%s18867_s6] ss:$0 sm:$0xff] }
 0x7e4   : > { %15219 = vmatprep.subr.bf16.mxu0 %v16474_v59 }
 0x7e6   : > { %15204 = vmatmul.mubr.msk.bf16.gmra.mrb[164].mxu0 %vm1465_vm0, %v18657_v22 }
 0x7e7   : > { %15211 = vmatprep.mubr.msk.bf16.mxu0 %vm1465_vm0, %v18445_v6  ;;  %v18676_v6 = vpack.c.bf16 %v18673_v51, %v10419_v50  ;;  %v16492_v50 = vld [vmem:[%s18864_s3 + $0x170] sm:$0xff]  }
 0x7ee   : > { %15212 = vmatmul.mubr.msk.bf16.vlgmr.msra.gmra.mrb[160].mxu0 %vm1465_vm0, %v18452_v44 }
 0x7ef   : > { %15220 = vmatpush3.bf16.msra.mxu0 %v16474_v59  ;;  %15215 = vmatprep.mubr.msk.bf16.mxu0 %vm1465_vm0, %v18466_v35 }
 0x7f0   : > { %15221 = vmatprep.subr.bf16.mxu0 %v16475_v43 }
 0x7f3   : > { %15222 = vmatpush3.bf16.msra.mxu0 %v16475_v43 }
 0x7f4   : > { %15231 = vmatprep.subr.bf16.mxu0 %v16476_v58 }
 0x7f6   : > { %15216 = vmatmul.mubr.msk.bf16.gmra.mrb[164].mxu0 %vm1465_vm0, %v18676_v6 }
 0x7f7   : > { %15223 = vmatprep.mubr.msk.bf16.mxu0 %vm1465_vm0, %v18473_v10  ;;  %v18695_v10 = vpack.c.bf16 %v18692_v9, %v10533_v7  ;;  %v16494_v7 = vld [vmem:[%s18864_s3 + $0x180] sm:$0xff]  }
 0x7fe   : > { %15224 = vmatmul.mubr.msk.bf16.vlgmr.msra.gmra.mrb[160].mxu0 %vm1465_vm0, %v18480_v40 }
 0x7ff   : > { %15232 = vmatpush3.bf16.msra.mxu0 %v16476_v58  ;;  %15227 = vmatprep.mubr.msk.bf16.mxu0 %vm1465_vm0, %v18493_v20 }
 0x800   : > { %15233 = vmatprep.subr.bf16.mxu0 %v16477_v21 }
 0x803   : > { %15234 = vmatpush3.bf16.msra.mxu0 %v16477_v21 }
 0x804   : > { %15243 = vmatprep.subr.bf16.mxu0 %v16478_v33 }
 0x806   : > { %15228 = vmatmul.mubr.msk.bf16.gmra.mrb[164].mxu0 %vm1465_vm0, %v18695_v10 }
 0x807   : > { %15235 = vmatprep.mubr.msk.bf16.mxu0 %vm1465_vm0, %v18502_v14  ;;  %v16481_v14 = vld [vmem:[%s18864_s3 + $0x118] sm:$0xff]  }
 0x80e   : > { %15236 = vmatmul.mubr.msk.bf16.vlgmr.msra.gmra.mrb[160].mxu0 %vm1465_vm0, %v18508_v37  ;;  %v18728_v37 = vld [vmem:[#allocation3 + $0xa1] sm:$0xff] }
 0x80f   : > { %15244 = vmatpush3.bf16.msra.mxu0 %v16478_v33  ;;  %15239 = vmatprep.mubr.msk.bf16.mxu0 %vm1465_vm0, %v18521_v11  ;;  %v16486_v11 = vld [vmem:[%s18864_s3 + $0x140] sm:$0xff]  }
 0x810   : > { %15245 = vmatprep.subr.bf16.mxu0 %v16479_v57 }
 0x813   : > { %15246 = vmatpush3.bf16.msra.mxu0 %v16479_v57 }
 0x814   : > { %15255 = vmatprep.subr.bf16.mxu0 %v16480_v38 }
 0x816   : > { %15240 = vmatmul.mubr.msk.bf16.gmra.mrb[164].mxu0 %vm1465_vm0, %v11222_v55 }
 0x817   : > { %15247 = vmatprep.mubr.msk.bf16.mxu0 %vm1465_vm0, %v18302_v60  ;;  %v11336_v60 = vpack.c.bf16 %v18728_v37, %v18634_v25 }
 0x81e   : > { %15248 = vmatmul.mubr.msk.bf16.vlgmr.msra.gmra.mrb[160].mxu0 %vm1465_vm0, %v18346_v5  ;;  %v16483_v5 = vld [vmem:[%s18864_s3 + $0x128] sm:$0xff]  }
 0x81f   : > { %15256 = vmatpush3.bf16.msra.mxu0 %v16480_v38  ;;  %15251 = vmatprep.mubr.msk.bf16.mxu0 %vm1465_vm0, %v18542_v34  ;;  %v16490_v34 = vld [vmem:[%s18864_s3 + $0x160] sm:$0xff]  }
 0x820   : > { %15257 = vmatprep.subr.bf16.mxu0 %v16481_v14 }
 0x823   : > { %15258 = vmatpush3.bf16.msra.mxu0 %v16481_v14 }
 0x824   : > { %15267 = vmatprep.subr.bf16.mxu0 %v16482_v2 }
 0x826   : > { %15252 = vmatmul.mubr.msk.bf16.gmra.mrb[164].mxu0 %vm1465_vm0, %v11336_v60 }
 0x827   : > { %15259 = vmatprep.mubr.msk.bf16.mxu0 %vm1465_vm0, %v18306_v63  ;;  %v11450_v63 = vpack.c.bf16 %v18745_v29, %v18654_v54 }
 0x82e   : > { %15260 = vmatmul.mubr.msk.bf16.vlgmr.msra.gmra.mrb[160].mxu0 %vm1465_vm0, %v18349_v8  ;;  %v16485_v8 = vld [vmem:[%s18864_s3 + $0x138] sm:$0xff]  }
 0x82f   : > { %15268 = vmatpush3.bf16.msra.mxu0 %v16482_v2  ;;  %15263 = vmatprep.mubr.msk.bf16.mxu0 %vm1465_vm0, %v18560_v4 }
 0x830   : > { %15269 = vmatprep.subr.bf16.mxu0 %v16483_v5 }
 0x833   : > { %15270 = vmatpush3.bf16.msra.mxu0 %v16483_v5 }
 0x834   : > { %15279 = vmatprep.subr.bf16.mxu0 %v16484_v18 }
 0x836   : > { %15264 = vmatmul.mubr.msk.bf16.gmra.mrb[164].mxu0 %vm1465_vm0, %v11450_v63 }
 0x837   : > { %15271 = vmatprep.mubr.msk.bf16.mxu0 %vm1465_vm0, %v18310_v52  ;;  %v11564_v52 = vpack.c.bf16 %v18762_v13, %v18673_v51 }
 0x83e   : > { %15272 = vmatmul.mubr.msk.bf16.vlgmr.msra.gmra.mrb[160].mxu0 %vm1465_vm0, %v18353_v17  ;;  %v16487_v17 = vld [vmem:[%s18864_s3 + $0x148] sm:$0xff]  }
 0x83f   : > { %15280 = vmatpush3.bf16.msra.mxu0 %v16484_v18  ;;  %15275 = vmatprep.mubr.msk.bf16.mxu0 %vm1465_vm0, %v18579_v45  ;;  %v11907_v45 = vpack.c.bf16 %v11903_v3, %v18728_v37 }
 0x840   : > { %15281 = vmatprep.subr.bf16.mxu0 %v16485_v8 }
 0x843   : > { %15282 = vmatpush3.bf16.msra.mxu0 %v16485_v8 }
 0x844   : > { %15291 = vmatprep.subr.bf16.mxu0 %v16486_v11 }
 0x846   : > { %15276 = vmatmul.mubr.msk.bf16.gmra.mrb[164].mxu0 %vm1465_vm0, %v11564_v52 }
 0x847   : > { %15283 = vmatprep.mubr.msk.bf16.mxu0 %vm1465_vm0, %v18314_v31  ;;  %v11678_v31 = vpack.c.bf16 %v18779_v28, %v18692_v9 }
 0x84e   : > { %15284 = vmatmul.mubr.msk.bf16.vlgmr.msra.gmra.mrb[160].mxu0 %vm1465_vm0, %v18357_v47  ;;  %v16489_v47 = vld [vmem:[%s18864_s3 + $0x158] sm:$0xff]  }
 0x84f   : > { %15292 = vmatpush3.bf16.msra.mxu0 %v16486_v11  ;;  %15287 = vmatprep.mubr.msk.bf16.mxu0 %vm1465_vm0, %v18598_v42  ;;  %v12021_v42 = vpack.c.bf16 %v12017_v1, %v18745_v29 }
 0x850   : > { %15293 = vmatprep.subr.bf16.mxu0 %v16487_v17 }
 0x853   : > { %15294 = vmatpush3.bf16.msra.mxu0 %v16487_v17 }
 0x854   : > { %15303 = vmatprep.subr.bf16.mxu0 %v16488_v26 }
 0x856   : > { %15288 = vmatmul.mubr.msk.bf16.gmra.mrb[164].mxu0 %vm1465_vm0, %v11678_v31 }
 0x857   : > { %15295 = vmatprep.mubr.msk.bf16.mxu0 %vm1465_vm0, %v18393_v46  ;;  %v11897_v46 = vld [vmem:[#allocation3 + $0x51] sm:$0xff] }
 0x858   : > { %v11904_v27 = vpack.c.bf16 %v11897_v46, %v11896_v30 }
 0x85e   : > { %15296 = vmatmul.mubr.msk.bf16.vlgmr.msra.gmra.mrb[160].mxu0 %vm1465_vm0, %v18409_v0  ;;  %v11899_v0 = vld [vmem:[#allocation3 + $0x71] sm:$0xff] }
 0x85f   : > { %15304 = vmatpush3.bf16.msra.mxu0 %v16488_v26  ;;  %15299 = vmatprep.mubr.msk.bf16.mxu0 %vm1465_vm0, %v18618_v41  ;;  %v11905_v4 = vpack.c.bf16 %v11899_v0, %v11898_v49 }
 0x860   : > { %15305 = vmatprep.subr.bf16.mxu0 %v16489_v47 }
 0x863   : > { %15306 = vmatpush3.bf16.msra.mxu0 %v16489_v47 }
 0x864   : > { %15315 = vmatprep.subr.bf16.mxu0 %v16490_v34 }
 0x866   : > { %15300 = vmatmul.mubr.msk.bf16.gmra.mrb[164].mxu0 %vm1465_vm0, %v11793_v56 }
 0x867   : > { %15307 = vmatprep.mubr.msk.bf16.mxu0 %vm1465_vm0, %v11904_v27 }
 0x86e   : > { %15308 = vmatmul.mubr.msk.bf16.vlgmr.msra.gmra.mrb[160].mxu0 %vm1465_vm0, %v11905_v4 }
 0x86f   : > { %15316 = vmatpush3.bf16.msra.mxu0 %v16490_v34  ;;  %15311 = vmatprep.mubr.msk.bf16.mxu0 %vm1465_vm0, %v18638_v16 }
 0x870   : > { %15317 = vmatprep.subr.bf16.mxu0 %v16491_v39 }
 0x873   : > { %15318 = vmatpush3.bf16.msra.mxu0 %v16491_v39 }
 0x874   : > { %15327 = vmatprep.subr.bf16.mxu0 %v16492_v50 }
 0x876   : > { %15312 = vmatmul.mubr.msk.bf16.gmra.mrb[164].mxu0 %vm1465_vm0, %v11907_v45 }
 0x877   : > { %15319 = vmatprep.mubr.msk.bf16.mxu0 %vm1465_vm0, %v18424_v19  ;;  %v16495_v19 = vld [vmem:[%s18864_s3 + $0x188] sm:$0xff]  }
 0x87e   : > { %15320 = vmatmul.mubr.msk.bf16.vlgmr.msra.gmra.mrb[160].mxu0 %vm1465_vm0, %v18438_v61  ;;  %v12131_v61 = vld [vmem:[#allocation3 + $0xb3] sm:$0xff] }
 0x87f   : > { %15328 = vmatpush3.bf16.msra.mxu0 %v16492_v50  ;;  %15323 = vmatprep.mubr.msk.bf16.mxu0 %vm1465_vm0, %v18657_v22  ;;  %v12135_v48 = vpack.c.bf16 %v12131_v61, %v18762_v13 }
 0x880   : > { %15329 = vmatprep.subr.bf16.mxu0 %v16493_v53 }
 0x883   : > { %15330 = vmatpush3.bf16.msra.mxu0 %v16493_v53 }
 0x884   : > { %15339 = vmatprep.subr.bf16.mxu0 %v16494_v7 }
 0x886   : > { %15324 = vmatmul.mubr.msk.bf16.gmra.mrb[164].mxu0 %vm1465_vm0, %v12021_v42 }
 0x887   : > { %15331 = vmatprep.mubr.msk.bf16.mxu0 %vm1465_vm0, %v18452_v44  ;;  %v12245_v44 = vld [vmem:[#allocation3 + $0xb4] sm:$0xff] }
 0x88e   : > { %15332 = vmatmul.mubr.msk.bf16.vlgmr.msra.gmra.mrb[160].mxu0 %vm1465_vm0, %v18466_v35  ;;  %v12249_v35 = vpack.c.bf16 %v12245_v44, %v18779_v28 }
 0x88f   : > { %15340 = vmatpush3.bf16.msra.mxu0 %v16494_v7  ;;  %15335 = vmatprep.mubr.msk.bf16.mxu0 %vm1465_vm0, %v18676_v6 }
 0x890   : > { %15341 = vmatprep.subr.bf16.mxu0 %v16495_v19 }
 0x893   : > { %15342 = vmatpush3.bf16.msra.mxu0 %v16495_v19 }
 0x896   : > { %15336 = vmatmul.mubr.msk.bf16.gmra.mrb[164].mxu0 %vm1465_vm0, %v12135_v48 }
 0x897   : > { %15343 = vmatprep.mubr.msk.bf16.mxu0 %vm1465_vm0, %v18480_v40 }
 0x89e   : > { %15344 = vmatmul.mubr.msk.bf16.vlgmr.msra.gmra.mrb[160].mxu0 %vm1465_vm0, %v18493_v20 }
 0x89f   : > { %15347 = vmatprep.mubr.msk.bf16.mxu0 %vm1465_vm0, %v18695_v10 }
 0x8a6   : > { %15348 = vmatmul.mubr.msk.bf16.gmra.mrb[164].mxu0 %vm1465_vm0, %v12249_v35 }
 0x971   : > { %v15345_v15 = vpop.f32.mrb[160].mxu0 }
 0x972   : > { %v12313_v62 = vpop.f32.mrb[161].mxu0 }
 0x973   : > { %v15346_v41 = vpop.f32.mrb[162].mxu0 }
 0x974   : > { %v12353_v24 = vmax.f32 %v15345_v15, %v15346_v41  ;;  %v12316_v36 = vpop.f32.mrb[163].mxu0 }
 0x975   : > { %v12352_v25 = vmax.f32 %v12313_v62, %v12316_v36 }
 0x976   : > { %12358 = vst.msk [vmem:[#allocation6 + $0x8] sm:$0xff] %vm12356_vm3, %v12353_v24 }
 0x977   : > { %12357 = vst.msk [vmem:[#allocation6] sm:$0xff] %vm12356_vm3, %v12352_v25 }
 0x979   : > { %v15349_v40 = vpop.f32.mrb[164].mxu0 }
 0x97a   : > { %v12329_v20 = vpop.f32.mrb[165].mxu0 }
 0x97b   : > { %v15350_v16 = vpop.f32.mrb[166].mxu0 }
 0x97c   : > { %v12355_v59 = vmax.f32 %v15349_v40, %v15350_v16  ;;  %v12332_v54 = vpop.f32.mrb[167].mxu0 }
 0x97d   : > { %v12363_v22 = vld [vmem:[#allocation6 + $0x8] ss:$2 sm:$0xf]  ;;  %v12371_v43 = vld [vmem:[#allocation6 + $0x9] ss:$2 sm:$0xf]  ;;  %v12354_v58 = vmax.f32 %v12329_v20, %v12332_v54 }
 0x97e   : > { %v12377_v51 = vmax.f32 %v12363_v22, %v12371_v43  ;;  %v12361_v6 = vld [vmem:[#allocation6] ss:$2 sm:$0xf]  ;;  %v12369_v21 = vld [vmem:[#allocation6 + $0x1] ss:$2 sm:$0xf] }
 0x97f   : > { %12360 = vst.msk [vmem:[#allocation6 + $0x18] sm:$0xff] %vm12356_vm3, %v12355_v59  ;;  %v12376_v33 = vmax.f32 %v12361_v6, %v12369_v21  ;;  %12359 = vst.msk [vmem:[#allocation6 + $0x10] sm:$0xff] %vm12356_vm3, %v12354_v58 }
 0x980   : > { %v12388_v9 = vadd.f32 %v13330_v12, %v12377_v51 }
 0x981   : > { %v12387_v10 = vadd.f32 %v13330_v12, %v12376_v33 }
 0x982   : > { %v12392_v57 = vpack.c.bf16 %v12388_v9, %v12388_v9 }
 0x983   : > { %v12391_v38 = vpack.c.bf16 %v12387_v10, %v12387_v10 }
 0x984   : > { %12397 = vst.msk [vmem:[%s278_s29 + $0x2] sm:$0x3] %vm12395_vm4, %v12392_v57 }
 0x985   : > { %12396 = vst.msk [vmem:[%s278_s29] sm:$0x3] %vm12395_vm4, %v12391_v38 }
 0x986   : > { %v12367_v23 = vld [vmem:[#allocation6 + $0x18] ss:$2 sm:$0xf]  ;;  %v12375_v55 = vld [vmem:[#allocation6 + $0x19] ss:$2 sm:$0xf] }
 0x987   : > { %v12379_v14 = vmax.f32 %v12367_v23, %v12375_v55  ;;  %v12365_v2 = vld [vmem:[#allocation6 + $0x10] ss:$2 sm:$0xf]  ;;  %v12373_v37 = vld [vmem:[#allocation6 + $0x11] ss:$2 sm:$0xf] }
 0x988   : > { %v12378_v60 = vmax.f32 %v12365_v2, %v12373_v37 }
 0x989   : > { %v12390_v5 = vadd.f32 %v13330_v12, %v12379_v14 }
 0x98a   : > { %v12389_v18 = vadd.f32 %v13330_v12, %v12378_v60 }
 0x98b   : > { %v12394_v29 = vpack.c.bf16 %v12390_v5, %v12390_v5 }
 0x98c   : > { %v12393_v63 = vpack.c.bf16 %v12389_v18, %v12389_v18 }
 0x98d   : > { %12399 = vst.msk [vmem:[%s278_s29 + $0x6] sm:$0x3] %vm12395_vm4, %v12394_v29 }
 0x98e   : > { %12398 = vst.msk [vmem:[%s278_s29 + $0x4] sm:$0x3] %vm12395_vm4, %v12393_v63 }
 0x98f PF: > { %s17_s24 = sadd.s32 1, %s16505_s24  }
 0x990   : > { %p14_p4 = scmp.ge.s32.totalorder %s17_s24, 4  }
 0x992   :  { %16 = sbr.rel (!%p14_p4) target bundleno = 1 (0x1), region = 221 }

</bundles_post_ra>
